<compile_context>
chip_gen: v7x
topology: tpu7x:2x2x1
jax: 0.10.0
libtpu: 0.0.40
codegen_flags: <defaults>
</compile_context>

<pallas_src>
import functools

import numpy as np
import jax
import jax.numpy as jnp
from jax import lax
from jax.experimental import pallas as pl
from jax.experimental.pallas import tpu as pltpu

# ----------------------------- configuration --------------------------------
IMG = 16                     # image_encoder.img_size (square)
PATCH = 4                    # ViT patch size
HF = IMG // PATCH            # feature grid side (4)
NUM_TOKENS = HF * HF         # 16 image tokens
E = 32                       # embedding dim
VIT_HEADS = 2
DEC_HEADS = 2
NUM_MASK_TOKENS = 4
N_TOK = 1 + NUM_MASK_TOKENS  # iou token + mask tokens (no sparse prompts)
T_PAD = 8                    # decoder tokens padded to a sublane multiple
C_UP = 8                     # channels of the upscaled image embedding
U1, U2, U3 = 8, 16, 32       # UNetEncoder channel widths
MASK_THRESHOLD = 0.0
LN_EPS = 1e-6                # TODO(synk): torch LayerNorm default eps is 1e-5
OUT_ROWS = 24                # K1 lane-dense output slab rows

_PARALLEL = pltpu.CompilerParams(dimension_semantics=("parallel",))


# ----------------------------- spec helpers ----------------------------------
def _bspec(shape):
    """Per-batch block: leading dim indexed by grid, rest full."""
    nd = len(shape)
    return pl.BlockSpec((1,) + tuple(shape[1:]),
                        lambda b, nd=nd: (b,) + (0,) * (nd - 1))


def _cspec(shape):
    """Batch-independent (constant) operand: full-array block."""
    nd = len(shape)
    return pl.BlockSpec(tuple(shape), lambda b, nd=nd: (0,) * nd)


# ----------------------------- in-kernel helpers -----------------------------
def _mm(a, b):
    """MXU matmul: bf16 operands, f32 accumulation."""
    return jnp.dot(a.astype(jnp.bfloat16), b.astype(jnp.bfloat16),
                   preferred_element_type=jnp.float32)


def _mm_t(a, b):
    """a (M,K) x b (N,K) -> (M,N): contract dim 1 of both (no in-kernel .T)."""
    return lax.dot_general(a.astype(jnp.bfloat16), b.astype(jnp.bfloat16),
                           (((1,), (1,)), ((), ())),
                           preferred_element_type=jnp.float32)


def _ln(x, g, b, eps=LN_EPS):
    mu = jnp.mean(x, axis=-1, keepdims=True)
    var = jnp.mean((x - mu) ** 2, axis=-1, keepdims=True)
    return (x - mu) * lax.rsqrt(var + eps) * g + b


def _mha(q, k, v, o_w, num_heads, valid_keys=None):
    """Multi-head attention.  Head outputs are concatenated on lanes and a
    single projection matmul is applied.  Optional key-padding mask (the mask
    is built once and reused by every head)."""
    tq, e = q.shape
    tk = k.shape[0]
    d = e // num_heads
    scale = 1.0 / (d ** 0.5)
    mask = None
    if valid_keys is not None:
        kidx = lax.broadcasted_iota(jnp.int32, (tq, tk), 1)
        mask = kidx < valid_keys
    heads = []
    for h in range(num_heads):
        sl = slice(h * d, (h + 1) * d)
        s = _mm_t(q[:, sl], k[:, sl]) * scale              # (Tq, Tk) f32
        if mask is not None:
            s = jnp.where(mask, s, -1e30)
        s = s - jnp.max(s, axis=-1, keepdims=True)
        p = jnp.exp(s)
        p = p * pl.reciprocal(jnp.sum(p, axis=-1, keepdims=True), approx=True)
        heads.append(_mm(p, v[:, sl]))                     # (Tq, d)
    return _mm(jnp.concatenate(heads, axis=1), o_w)        # one projection


def _view(ref, layout, name):
    """Static window of a packed slab ref."""
    off, r, c = layout[name]
    return ref[off:off + r, 0:c]


# ----------------------------- Pallas kernels --------------------------------
def _k1_kernel(patches_ref, wb_ref, wf_ref, out_ref, *, wb_l, wf_l):
    """Fused ImageEncoderViT + MaskDecoder token path for one image."""
    W = lambda n: _view(wb_ref, wb_l, n)        # bf16 matmul weights
    F = lambda n: _view(wf_ref, wf_l, n)        # f32 biases / LN / tokens / PE

    g, be = F("ln_g"), F("ln_b")                # (7, E) LN params (ViT + dec)

    # ---------------- ImageEncoderViT ----------------
    x = patches_ref[0]                                           # (16, 48)
    tok = _mm(x, W("patch_w")) + F("patch_b") + F("vit_pos")     # (16, E)
    h = _ln(tok, g[0:1], be[0:1])
    qkv = _mm(h, W("qkv_w")) + F("qkv_b")                        # (16, 3E)
    a = _mha(qkv[:, :E], qkv[:, E:2 * E], qkv[:, 2 * E:], W("proj_w"), VIT_HEADS)
    tok = tok + a + F("proj_b")
    h = _ln(tok, g[1:2], be[1:2])
    # TODO(synk): jax.nn.gelu uses the tanh approximation (PyTorch default erf)
    m = jax.nn.gelu(_mm(h, W("fc1_w")) + F("fc1_b"))
    tok = tok + _mm(m, W("fc2_w")) + F("fc2_b")
    tok = _mm(tok, W("neck_w")) + F("neck_b")                    # neck linear
    src = _ln(tok, g[2:3], be[2:3])                              # (16, E)

    # ---------------- MaskDecoder token path ----------------
    src = src + F("no_mask")                    # dense "no prompt" embedding
    pos = F("dec_pe")
    dtok = F("tok0")                            # (T_PAD, E) padded tokens

    # merged projections of (src + pos): [c1_k | c1_v | c2_q]
    kvq = _mm(src + pos, W("srcpos_w")) + F("srcpos_b")          # (16, 3E)

    # 1) token self-attention (keys masked to the N_TOK valid rows)
    qkv = _mm(dtok, W("sa_qkv_w")) + F("sa_qkv_b")
    a = _mha(qkv[:, :E], qkv[:, E:2 * E], qkv[:, 2 * E:], W("sa_o_w"),
             DEC_HEADS, valid_keys=N_TOK) + F("sa_o_b")
    dtok = _ln(dtok + a, g[3:4], be[3:4])

    # 2) cross attention: tokens -> image
    q = _mm(dtok, W("c1_q_w")) + F("c1_q_b")
    a = _mha(q, kvq[:, :E], kvq[:, E:2 * E], W("c1_o_w"), DEC_HEADS) + F("c1_o_b")
    dtok = _ln(dtok + a, g[4:5], be[4:5])

    # 3) token MLP
    m = jax.nn.gelu(_mm(dtok, W("mlp1_w")) + F("mlp1_b"))
    dtok = _ln(dtok + _mm(m, W("mlp2_w")) + F("mlp2_b"), g[5:6], be[5:6])

    # 4) cross attention: image -> tokens
    kv = _mm(dtok, W("c2_kv_w")) + F("c2_kv_b")
    a = _mha(kvq[:, 2 * E:], kv[:, :E], kv[:, E:], W("c2_o_w"),
             DEC_HEADS, valid_keys=N_TOK) + F("c2_o_b")
    src = _ln(src + a, g[6:7], be[6:7])

    iou_tok = dtok[0:1, :]
    mt0 = dtok[1:2, :]                          # first mask token (ac_token)

    # IoU head
    h1 = jnp.maximum(_mm(iou_tok, W("iou1_w")) + F("iou1_b"), 0.0)
    iou = _mm(h1, W("iou2_w")) + F("iou2_b")                     # (1, 4)

    # upscaling projection (pixel shuffle done in glue), lane dense (16, 128)
    up = jax.nn.gelu(_mm(src, W("up_w")) + F("up_b"))

    # hyper-network (ac_token + cnn_token, with cnn_token == ac_token)
    hh = jax.nn.gelu(_mm(mt0 + mt0, W("hyp1_w")) + F("hyp1_b"))
    hyp = _mm(hh, W("hyp2_w")) + F("hyp2_b")                     # (1, C_UP)

    # single lane-dense output slab: rows 0..15 = up, row 16 = [iou | hyp | 0]
    extra = jnp.concatenate(
        [iou, hyp, jnp.zeros((1, 128 - NUM_MASK_TOKENS - C_UP), jnp.float32)],
        axis=1)
    pad = jnp.zeros((OUT_ROWS - NUM_TOKENS - 1, 128), jnp.float32)
    out_ref[0] = jnp.concatenate([up, extra, pad], axis=0)


def _k2_kernel(cols1_ref, ups_ref, hyp_ref, ra_ref, rb_ref, rc_ref, cw_ref,
               cb_ref, out_ref, *, ra_l, rb_l, rc_l, cw_l, cb_l):
    """Fused UNetEncoder + MaskDecoder2 mask head for one image.
    Pool / im2col / upsample of in-kernel activations are 0/1 routing matmuls."""
    RA = lambda n: _view(ra_ref, ra_l, n)
    RB = lambda n: _view(rb_ref, rb_l, n)
    RC = lambda n: _view(rc_ref, rc_l, n)
    CW = lambda n: _view(cw_ref, cw_l, n)
    CB = lambda n: _view(cb_ref, cb_l, n)
    relu = lambda x: jnp.maximum(x, 0.0)

    # ---------------- UNetEncoder ----------------
    cols1 = cols1_ref[0]                                   # (32, 256) rows>=27 zero
    f = relu(_mm(CW("w1"), cols1) + CB("b1"))              # (U1, 256)  "first"

    # maxpool 16x16 -> 8x8 (exact: each routing column selects one element)
    p1 = [_mm(f, RB("p1_%d" % d)) for d in range(4)]
    fp = functools.reduce(jnp.maximum, p1)                 # (U1, 64)

    # conv2: in-kernel im2col via routing matmuls, then one conv matmul
    cols2 = jnp.concatenate([_mm(fp, RB("g8_%d" % t)) for t in range(9)], axis=0)
    e = relu(_mm(CW("w2"), cols2) + CB("b2"))              # (U2, 64)   "early"

    # maxpool 8x8 -> 4x4
    p2 = [_mm(e, RC("p2_%d" % d)) for d in range(4)]
    ep = functools.reduce(jnp.maximum, p2)                 # (U2, 16)

    # conv3
    cols3 = jnp.concatenate([_mm(ep, RC("g4_%d" % t)) for t in range(9)], axis=0)
    c = relu(_mm(CW("w3"), cols3) + CB("b3"))              # (U3, 16)   "cnn"

    # nearest-neighbour x2 / x4 upsampling as matmuls
    e_up = _mm(e, RA("s2"))                                # (U2, 256)
    c_up = _mm(c, RA("s4"))                                # (U3, 256)

    # ---------------- MaskDecoder2 mask head ----------------
    xcat = jnp.concatenate([ups_ref[0], f], axis=0)        # (C_UP + U1, 256)
    colsf = jnp.concatenate([_mm(xcat, RA("g16_%d" % t)) for t in range(9)],
                            axis=0)                        # (144, 256)
    x = relu(_mm(CW("wf"), colsf) + CB("bf"))              # (C_UP, 256)
    x = relu(x + _mm(CW("ew"), e_up) + CB("eb") + _mm(CW("uw"), c_up) + CB("ub"))
    out_ref[0] = _mm(hyp_ref[0], x)                        # (1, 256)


# ----------------------------- packing / routing helpers ---------------------
def _pack_slab(entries, width, row_align, dtype):
    """Pack a list of (name, 2-D array) into one lane-padded slab.
    Returns (slab, layout) with layout[name] = (row_offset, rows, cols)."""
    parts, layout, off = [], {}, 0
    for name, a in entries:
        a = jnp.asarray(a, jnp.float32)
        r, cdim = a.shape
        assert cdim <= width, (name, a.shape, width)
        a = jnp.pad(a, ((0, (-r) % row_align), (0, width - cdim)))
        layout[name] = (off, r, cdim)
        off += a.shape[0]
        parts.append(a)
    return jnp.concatenate(parts, axis=0).astype(dtype), layout


def _conv_gather_mats(h, w):
    """Nine (h*w, h*w) 0/1 matrices: x @ G_t gathers the 3x3 tap t of a zero-
    padded conv (tap order = kernel position, row-major)."""
    ii, jj = np.meshgrid(np.arange(h), np.arange(w), indexing="ij")
    mats = []
    for di in (-1, 0, 1):
        for dj in (-1, 0, 1):
            g = np.zeros((h * w, h * w), np.float32)
            si, sj = ii + di, jj + dj
            ok = (si >= 0) & (si < h) & (sj >= 0) & (sj < w)
            g[(si * w + sj)[ok], (ii * w + jj)[ok]] = 1.0
            mats.append(g)
    return mats


def _pool_mats(h, w):
    """Four (h*w, (h//2)*(w//2)) 0/1 matrices; max over the 4 gathers = 2x2 pool."""
    ho, wo = h // 2, w // 2
    ii, jj = np.meshgrid(np.arange(ho), np.arange(wo), indexing="ij")
    mats = []
    for a in (0, 1):
        for b in (0, 1):
            m = np.zeros((h * w, ho * wo), np.float32)
            m[((2 * ii + a) * w + (2 * jj + b)).ravel(),
              (ii * wo + jj).ravel()] = 1.0
            mats.append(m)
    return mats


def _upsample_mat(h, w, s):
    """(h*w, h*s*w*s) 0/1 matrix implementing nearest-neighbour x s upsampling."""
    ii, jj = np.meshgrid(np.arange(h * s), np.arange(w * s), indexing="ij")
    m = np.zeros((h * w, h * s * w * s), np.float32)
    m[((ii // s) * w + (jj // s)).ravel(), (ii * (w * s) + jj).ravel()] = 1.0
    return m


# ----------------------------- XLA glue ---------------------------------------
def _im2col_from_padded(xp, k, ho, wo):
    B, C = xp.shape[:2]
    cols = jnp.stack([xp[:, :, i:i + ho, j:j + wo]
                      for i in range(k) for j in range(k)], axis=2)
    return cols.reshape(B, C * k * k, ho * wo)


def im2col3x3(x):
    B, C, H, W = x.shape
    xp = jnp.pad(x, ((0, 0), (0, 0), (1, 1), (1, 1)))
    return _im2col_from_padded(xp, 3, H, W)


def vit_patches(images):
    B = images.shape[0]
    x = images.reshape(B, 3, HF, PATCH, HF, PATCH)
    x = x.transpose(0, 2, 4, 1, 3, 5)                 # (B, HF, HF, C, P, P)
    return x.reshape(B, NUM_TOKENS, 3 * PATCH * PATCH)


def pixel_shuffle_up(up_tok):
    B = up_tok.shape[0]
    x = up_tok.reshape(B, HF, HF, C_UP, PATCH, PATCH)
    x = x.transpose(0, 3, 1, 4, 2, 5)
    return x.reshape(B, C_UP, IMG, IMG)


def get_dense_pe_tokens(p):
    ys = (jnp.arange(HF, dtype=jnp.float32) + 0.5) / HF
    xs = (jnp.arange(HF, dtype=jnp.float32) + 0.5) / HF
    grid = jnp.stack(jnp.meshgrid(ys, xs, indexing="ij"), axis=-1)
    coords = 2.0 * grid - 1.0
    proj = coords @ p["pe_gaussian"]
    pe = jnp.concatenate([jnp.sin(2 * jnp.pi * proj),
                          jnp.cos(2 * jnp.pi * proj)], axis=-1)
    return pe.reshape(HF * HF, E)


# ----------------------------- model builder ----------------------------------
def make_forward(p):
    """Packs parameters into a few lane-dense slabs and returns a jitted
    forward(images) -> (masks, iou_pred, origin_masks)."""
    catl = lambda *a: jnp.concatenate(a, axis=1)
    r1 = lambda a: a.reshape(1, -1)
    catb = lambda *a: jnp.concatenate([x.reshape(-1) for x in a]).reshape(1, -1)

    # ------------- K1 packed operands (bf16 weights + f32 params) -----------
    wb_entries = [
        ("patch_w", p["patch_w"]),
        ("qkv_w", p["qkv_w"]),
        ("proj_w", p["attn_proj_w"]),
        ("fc1_w", p["fc1_w"]),
        ("fc2_w", p["fc2_w"]),
        ("neck_w", p["neck_w"]),
        ("sa_qkv_w", catl(p["sa_q_w"], p["sa_k_w"], p["sa_v_w"])),
        ("sa_o_w", p["sa_o_w"]),
        ("c1_q_w", p["c1_q_w"]),
        ("srcpos_w", catl(p["c1_k_w"], p["c1_v_w"], p["c2_q_w"])),
        ("c1_o_w", p["c1_o_w"]),
        ("mlp1_w", p["dmlp1_w"]),
        ("mlp2_w", p["dmlp2_w"]),
        ("c2_kv_w", catl(p["c2_k_w"], p["c2_v_w"])),
        ("c2_o_w", p["c2_o_w"]),
        ("iou1_w", p["iou1_w"]),
        ("iou2_w", p["iou2_w"]),
        ("up_w", p["up_w"]),
        ("hyp1_w", p["hyp1_w"]),
        ("hyp2_w", p["hyp2_w"]),
    ]
    wb, wb_l = _pack_slab(wb_entries, 128, 16, jnp.bfloat16)

    tok0 = jnp.concatenate([p["iou_token"], p["mask_tokens"],
                            jnp.zeros((T_PAD - N_TOK, E), jnp.float32)], axis=0)
    wf_entries = [
        ("patch_b", r1(p["patch_b"])),
        ("vit_pos", p["pos_embed"]),
        ("qkv_b", r1(p["qkv_b"])),
        ("proj_b", r1(p["attn_proj_b"])),
        ("fc1_b", r1(p["fc1_b"])),
        ("fc2_b", r1(p["fc2_b"])),
        ("neck_b", r1(p["neck_b"])),
        ("ln_g", jnp.stack([p["ln1_g"], p["ln2_g"], p["neck_ln_g"],
                            p["dln0_g"], p["dln1_g"], p["dln2_g"], p["dln3_g"]])),
        ("ln_b", jnp.stack([p["ln1_b"], p["ln2_b"], p["neck_ln_b"],
                            p["dln0_b"], p["dln1_b"], p["dln2_b"], p["dln3_b"]])),
        ("no_mask", r1(p["no_mask_embed"])),
        ("dec_pe", get_dense_pe_tokens(p)),
        ("tok0", tok0),
        ("sa_qkv_b", catb(p["sa_q_b"], p["sa_k_b"], p["sa_v_b"])),
        ("sa_o_b", r1(p["sa_o_b"])),
        ("c1_q_b", r1(p["c1_q_b"])),
        ("srcpos_b", catb(p["c1_k_b"], p["c1_v_b"], p["c2_q_b"])),
        ("c1_o_b", r1(p["c1_o_b"])),
        ("mlp1_b", r1(p["dmlp1_b"])),
        ("mlp2_b", r1(p["dmlp2_b"])),
        ("c2_kv_b", catb(p["c2_k_b"], p["c2_v_b"])),
        ("c2_o_b", r1(p["c2_o_b"])),
        ("iou1_b", r1(p["iou1_b"])),
        ("iou2_b", r1(p["iou2_b"])),
        ("up_b", r1(p["up_b"])),
        ("hyp1_b", r1(p["hyp1_b"])),
        ("hyp2_b", r1(p["hyp2_b"])),
    ]
    wf, wf_l = _pack_slab(wf_entries, 128, 8, jnp.float32)

    # ------------- K2 packed operands (routing + conv weights) --------------
    g16 = _conv_gather_mats(IMG, IMG)
    g8 = _conv_gather_mats(IMG // 2, IMG // 2)
    g4 = _conv_gather_mats(HF, HF)
    p16 = _pool_mats(IMG, IMG)
    p8 = _pool_mats(IMG // 2, IMG // 2)
    ra, ra_l = _pack_slab([("g16_%d" % t, g16[t]) for t in range(9)]
                          + [("s2", _upsample_mat(IMG // 2, IMG // 2, 2)),
                             ("s4", _upsample_mat(HF, HF, 4))],
                          IMG * IMG, 16, jnp.bfloat16)
    rb, rb_l = _pack_slab([("p1_%d" % d, p16[d]) for d in range(4)]
                          + [("g8_%d" % t, g8[t]) for t in range(9)],
                          (IMG // 2) ** 2, 16, jnp.bfloat16)
    rc, rc_l = _pack_slab([("p2_%d" % d, p8[d]) for d in range(4)]
                          + [("g4_%d" % t, g4[t]) for t in range(9)],
                          HF * HF, 16, jnp.bfloat16)

    # conv weights re-laid out tap-major to match the in-kernel im2col order
    tapcat = lambda w: jnp.concatenate(
        [w[:, :, ki, kj] for ki in range(3) for kj in range(3)], axis=1)
    cw_entries = [
        ("w1", jnp.pad(p["u1_w"].reshape(U1, 27), ((0, 0), (0, 5)))),  # c-major
        ("w2", tapcat(p["u2_w"])),                                     # (16, 72)
        ("w3", tapcat(p["u3_w"])),                                     # (32, 144)
        ("wf", tapcat(p["fuse_w"])),                                   # (8, 144)
        ("ew", p["e_w"].reshape(C_UP, U2)),
        ("uw", p["u_w"].reshape(C_UP, U3)),
    ]
    cw, cw_l = _pack_slab(cw_entries, 256, 16, jnp.bfloat16)
    cb_entries = [
        ("b1", p["u1_b"].reshape(U1, 1)),
        ("b2", p["u2_b"].reshape(U2, 1)),
        ("b3", p["u3_b"].reshape(U3, 1)),
        ("bf", p["fuse_b"].reshape(C_UP, 1)),
        ("eb", p["e_b"].reshape(C_UP, 1)),
        ("ub", p["u_b"].reshape(C_UP, 1)),
    ]
    cb, cb_l = _pack_slab(cb_entries, 1, 8, jnp.float32)

    k1 = functools.partial(_k1_kernel, wb_l=wb_l, wf_l=wf_l)
    k2 = functools.partial(_k2_kernel, ra_l=ra_l, rb_l=rb_l, rc_l=rc_l,
                           cw_l=cw_l, cb_l=cb_l)

    @jax.jit
    def forward_core(images, wb, wf, ra, rb, rc, cw, cb):
        B = images.shape[0]

        # ---- K1: fused ImageEncoderViT + MaskDecoder token path ------------
        patches = vit_patches(images)                              # (B, 16, 48)
        slab = pl.pallas_call(
            k1,
            grid=(B,),
            in_specs=[_bspec(patches.shape), _cspec(wb.shape), _cspec(wf.shape)],
            out_specs=_bspec((B, OUT_ROWS, 128)),
            out_shape=jax.ShapeDtypeStruct((B, OUT_ROWS, 128), jnp.float32),
            compiler_params=_PARALLEL,
        )(patches, wb, wf)

        up_tok = slab[:, :NUM_TOKENS, :]                           # (B, 16, 128)
        iou_pred = slab[:, NUM_TOKENS, :NUM_MASK_TOKENS].reshape(
            B, 1, NUM_MASK_TOKENS)
        hyper = slab[:, NUM_TOKENS:NUM_TOKENS + 1,
                     NUM_MASK_TOKENS:NUM_MASK_TOKENS + C_UP]       # (B, 1, 8)
        upscaled = pixel_shuffle_up(up_tok).reshape(B, C_UP, IMG * IMG)

        # ---- K2: fused UNetEncoder + MaskDecoder2 mask head ----------------
        cols1 = im2col3x3(images)                                  # (B, 27, 256)
        cols1 = jnp.pad(cols1, ((0, 0), (0, 32 - 27), (0, 0)))     # (B, 32, 256)
        mask_flat = pl.pallas_call(
            k2,
            grid=(B,),
            in_specs=[_bspec(cols1.shape), _bspec(upscaled.shape),
                      _bspec(hyper.shape), _cspec(ra.shape), _cspec(rb.shape),
                      _cspec(rc.shape), _cspec(cw.shape), _cspec(cb.shape)],
            out_specs=_bspec((B, 1, IMG * IMG)),
            out_shape=jax.ShapeDtypeStruct((B, 1, IMG * IMG), jnp.float32),
            compiler_params=_PARALLEL,
        )(cols1, upscaled, hyper, ra, rb, rc, cw, cb)

        origin_masks = mask_flat.reshape(B, 1, 1, IMG, IMG)
        masks = origin_masks > MASK_THRESHOLD      # threshold in plain JAX
        return masks, iou_pred, origin_masks

    return lambda images: forward_core(images, wb, wf, ra, rb, rc, cw, cb)


# ----------------------------- Sam_Twostage.forward ---------------------------
def sam_twostage_forward(forward_fn, params, batched_input, prompt_signal=False):
    """Normalize + zero-pad each image (torch preprocess), run the two fused
    kernels, and repack the per-image output dicts."""
    mean = params["pixel_mean"].reshape(3, 1, 1)
    std = params["pixel_std"].reshape(3, 1, 1)
    imgs = []
    for rec in batched_input:
        x = (rec["image"].astype(jnp.float32) - mean) / std
        canvas = jnp.zeros((3, IMG, IMG), jnp.float32)
        canvas = lax.dynamic_update_slice(canvas, x, (0, 0, 0))
        imgs.append(canvas)
    images = jnp.stack(imgs, axis=0)

    masks, iou_pred, origin = forward_fn(images)

    outputs = []
    for b in range(len(batched_input)):
        outputs.append({"masks": masks[b],
                        "iou_predictions": iou_pred[b],
                        "origin_masks": origin[b]})
    return outputs


# ----------------------------- parameter init --------------------------------
def init_params(key):
    keys = iter(jax.random.split(key, 64))

    def nrm(shape, scale=0.02):
        return scale * jax.random.normal(next(keys), shape, dtype=jnp.float32)

    z = lambda s: jnp.zeros(s, jnp.float32)
    o = lambda s: jnp.ones(s, jnp.float32)

    p = {
        "pixel_mean": jnp.array([123.675, 116.28, 103.53], jnp.float32),
        "pixel_std": jnp.array([58.395, 57.12, 57.375], jnp.float32),
        # UNetEncoder(3)
        "u1_w": nrm((U1, 3, 3, 3)), "u1_b": z((U1,)),
        "u2_w": nrm((U2, U1, 3, 3)), "u2_b": z((U2,)),
        "u3_w": nrm((U3, U2, 3, 3)), "u3_b": z((U3,)),
        # ImageEncoderViT
        "patch_w": nrm((3 * PATCH * PATCH, E)), "patch_b": z((E,)),
        "pos_embed": nrm((NUM_TOKENS, E)),
        "ln1_g": o((E,)), "ln1_b": z((E,)),
        "qkv_w": nrm((E, 3 * E)), "qkv_b": z((3 * E,)),
        "attn_proj_w": nrm((E, E)), "attn_proj_b": z((E,)),
        "ln2_g": o((E,)), "ln2_b": z((E,)),
        "fc1_w": nrm((E, 2 * E)), "fc1_b": z((2 * E,)),
        "fc2_w": nrm((2 * E, E)), "fc2_b": z((E,)),
        "neck_w": nrm((E, E)), "neck_b": z((E,)),
        "neck_ln_g": o((E,)), "neck_ln_b": z((E,)),
        # PromptEncoder
        "no_mask_embed": nrm((E,)),
        "pe_gaussian": nrm((2, E // 2), scale=1.0),
        # MaskDecoder (two-way-transformer style, 1 layer)
        "iou_token": nrm((1, E)), "mask_tokens": nrm((NUM_MASK_TOKENS, E)),
        "sa_q_w": nrm((E, E)), "sa_q_b": z((E,)),
        "sa_k_w": nrm((E, E)), "sa_k_b": z((E,)),
        "sa_v_w": nrm((E, E)), "sa_v_b": z((E,)),
        "sa_o_w": nrm((E, E)), "sa_o_b": z((E,)),
        "dln0_g": o((E,)), "dln0_b": z((E,)),
        "c1_q_w": nrm((E, E)), "c1_q_b": z((E,)),
        "c1_k_w": nrm((E, E)), "c1_k_b": z((E,)),
        "c1_v_w": nrm((E, E)), "c1_v_b": z((E,)),
        "c1_o_w": nrm((E, E)), "c1_o_b": z((E,)),
        "dln1_g": o((E,)), "dln1_b": z((E,)),
        "dmlp1_w": nrm((E, 2 * E)), "dmlp1_b": z((2 * E,)),
        "dmlp2_w": nrm((2 * E, E)), "dmlp2_b": z((E,)),
        "dln2_g": o((E,)), "dln2_b": z((E,)),
        "c2_q_w": nrm((E, E)), "c2_q_b": z((E,)),
        "c2_k_w": nrm((E, E)), "c2_k_b": z((E,)),
        "c2_v_w": nrm((E, E)), "c2_v_b": z((E,)),
        "c2_o_w": nrm((E, E)), "c2_o_b": z((E,)),
        "dln3_g": o((E,)), "dln3_b": z((E,)),
        "iou1_w": nrm((E, E)), "iou1_b": z((E,)),
        "iou2_w": nrm((E, NUM_MASK_TOKENS)), "iou2_b": z((NUM_MASK_TOKENS,)),
        "up_w": nrm((E, C_UP * PATCH * PATCH)), "up_b": z((C_UP * PATCH * PATCH,)),
        # MaskDecoder2 (CNN-fusion head)
        "fuse_w": nrm((C_UP, C_UP + U1, 3, 3)), "fuse_b": z((C_UP,)),
        "e_w": nrm((C_UP, U2, 1, 1)), "e_b": z((C_UP,)),
        "u_w": nrm((C_UP, U3, 1, 1)), "u_b": z((C_UP,)),
        "hyp1_w": nrm((E, E)), "hyp1_b": z((E,)),
        "hyp2_w": nrm((E, C_UP)), "hyp2_b": z((C_UP,)),
    }
    return p


# ----------------------------------- main -------------------------------------
if __name__ == "__main__":
    key = jax.random.PRNGKey(0)
    pkey, ka, kb = jax.random.split(key, 3)
    params = init_params(pkey)
    forward = make_forward(params)

    batched_input = [
        {"image": 255.0 * jax.random.uniform(ka, (3, 14, 12), jnp.float32),
         "original_size": (14, 12)},
        {"image": 255.0 * jax.random.uniform(kb, (3, 16, 16), jnp.float32),
         "original_size": (16, 16)},
    ]

    outputs = sam_twostage_forward(forward, params, batched_input,
                                   prompt_signal=False)
    for out in outputs:
        for v in out.values():
            jax.block_until_ready(v)

    assert outputs[0]["masks"].shape == (1, 1, IMG, IMG)
    assert outputs[0]["masks"].dtype == jnp.bool_
    assert outputs[0]["iou_predictions"].shape == (1, NUM_MASK_TOKENS)
    assert outputs[0]["origin_masks"].shape == (1, 1, IMG, IMG)
    assert all(bool(jnp.all(jnp.isfinite(o["origin_masks"]))) for o in outputs)
    print("KERNEL_OK")
</pallas_src>

<mosaic_0001>
module attributes {stable_mosaic.version = 11 : i64} {
  func.func @_k1_kernel(%arg0: i32, %arg1: memref<1x16x48xf32, #tpu.memory_space<vmem>>, %arg2: memref<720x128xbf16, #tpu.memory_space<vmem>>, %arg3: memref<224x128xf32, #tpu.memory_space<vmem>>, %arg4: memref<1x24x128xf32, #tpu.memory_space<vmem>>) attributes {dimension_semantics = [#tpu.dimension_semantics<parallel>], iteration_bounds = array<i64: 2>, scalar_prefetch = 0 : i64, scratch_operands = 0 : i64, tpu.core_type = #tpu.core_type<tc>, window_params = [{transform_indices = @transform_0, window_bounds = array<i64: 1, 16, 48>}, {pipeline_mode = #tpu.pipeline_mode<synchronous>, transform_indices = @transform_1, window_bounds = array<i64: 720, 128>}, {pipeline_mode = #tpu.pipeline_mode<synchronous>, transform_indices = @transform_2, window_bounds = array<i64: 224, 128>}, {transform_indices = @transform_3, window_bounds = array<i64: 1, 24, 128>}]} {
    %c64 = arith.constant 64 : index
    %c0 = arith.constant 0 : index
    %0 = vector.load %arg3[%c64, %c0] : memref<224x128xf32, #tpu.memory_space<vmem>>, vector<7x32xf32>
    %c72 = arith.constant 72 : index
    %c0_0 = arith.constant 0 : index
    %1 = vector.load %arg3[%c72, %c0_0] : memref<224x128xf32, #tpu.memory_space<vmem>>, vector<7x32xf32>
    %c0_1 = arith.constant 0 : index
    %c0_2 = arith.constant 0 : index
    %c0_3 = arith.constant 0 : index
    %2 = vector.load %arg1[%c0_1, %c0_2, %c0_3] : memref<1x16x48xf32, #tpu.memory_space<vmem>>, vector<1x16x48xf32>
    %3 = vector.shape_cast %2 : vector<1x16x48xf32> to vector<16x48xf32>
    %c0_4 = arith.constant 0 : index
    %c0_5 = arith.constant 0 : index
    %4 = vector.load %arg2[%c0_4, %c0_5] : memref<720x128xbf16, #tpu.memory_space<vmem>>, vector<48x32xbf16>
    %5 = arith.truncf %3 : vector<16x48xf32> to vector<16x48xbf16>
    %cst = arith.constant dense<0.000000e+00> : vector<16x32xf32>
    %6 = tpu.matmul %5, %4, %cst {dimension_numbers = #tpu.dot_dimension_numbers<[1], [0], [0], [1], [0, 0, 1, 1], [], []>} : vector<16x48xbf16>, vector<48x32xbf16>, vector<16x32xf32> -> vector<16x32xf32>
    %c0_6 = arith.constant 0 : index
    %c0_7 = arith.constant 0 : index
    %7 = vector.load %arg3[%c0_6, %c0_7] : memref<224x128xf32, #tpu.memory_space<vmem>>, vector<1x32xf32>
    %8 = vector.broadcast %7 : vector<1x32xf32> to vector<16x32xf32>
    %9 = arith.addf %6, %8 : vector<16x32xf32>
    %c8 = arith.constant 8 : index
    %c0_8 = arith.constant 0 : index
    %10 = vector.load %arg3[%c8, %c0_8] : memref<224x128xf32, #tpu.memory_space<vmem>>, vector<16x32xf32>
    %11 = arith.addf %9, %10 : vector<16x32xf32>
    %12 = vector.extract_strided_slice %0 {offsets = [0, 0], sizes = [1, 32], strides = [1, 1]} : vector<7x32xf32> to vector<1x32xf32>
    %13 = vector.extract_strided_slice %1 {offsets = [0, 0], sizes = [1, 32], strides = [1, 1]} : vector<7x32xf32> to vector<1x32xf32>
    %cst_9 = arith.constant dense<0.000000e+00> : vector<16xf32>
    %14 = vector.multi_reduction <add>, %11, %cst_9 [1] : vector<16x32xf32> to vector<16xf32>
    %15 = vector.shape_cast %14 : vector<16xf32> to vector<16x1xf32>
    %cst_10 = arith.constant 3.200000e+01 : f32
    %16 = vector.broadcast %cst_10 : f32 to vector<16x1xf32>
    %17 = arith.divf %15, %16 : vector<16x1xf32>
    %18 = vector.broadcast %17 : vector<16x1xf32> to vector<16x32xf32>
    %19 = arith.subf %11, %18 : vector<16x32xf32>
    %20 = arith.mulf %19, %19 : vector<16x32xf32>
    %cst_11 = arith.constant dense<0.000000e+00> : vector<16xf32>
    %21 = vector.multi_reduction <add>, %20, %cst_11 [1] : vector<16x32xf32> to vector<16xf32>
    %22 = vector.shape_cast %21 : vector<16xf32> to vector<16x1xf32>
    %cst_12 = arith.constant 3.200000e+01 : f32
    %23 = vector.broadcast %cst_12 : f32 to vector<16x1xf32>
    %24 = arith.divf %22, %23 : vector<16x1xf32>
    %25 = vector.broadcast %17 : vector<16x1xf32> to vector<16x32xf32>
    %26 = arith.subf %11, %25 : vector<16x32xf32>
    %cst_13 = arith.constant 9.99999997E-7 : f32
    %27 = vector.broadcast %cst_13 : f32 to vector<16x1xf32>
    %28 = arith.addf %24, %27 : vector<16x1xf32>
    %29 = math.rsqrt %28 : vector<16x1xf32>
    %30 = vector.broadcast %29 : vector<16x1xf32> to vector<16x32xf32>
    %31 = arith.mulf %26, %30 : vector<16x32xf32>
    %32 = vector.broadcast %12 : vector<1x32xf32> to vector<16x32xf32>
    %33 = arith.mulf %31, %32 : vector<16x32xf32>
    %34 = vector.broadcast %13 : vector<1x32xf32> to vector<16x32xf32>
    %35 = arith.addf %33, %34 : vector<16x32xf32>
    %c48 = arith.constant 48 : index
    %c0_14 = arith.constant 0 : index
    %36 = vector.load %arg2[%c48, %c0_14] : memref<720x128xbf16, #tpu.memory_space<vmem>>, vector<32x96xbf16>
    %37 = arith.truncf %35 : vector<16x32xf32> to vector<16x32xbf16>
    %cst_15 = arith.constant dense<0.000000e+00> : vector<16x96xf32>
    %38 = tpu.matmul %37, %36, %cst_15 {dimension_numbers = #tpu.dot_dimension_numbers<[1], [0], [0], [1], [0, 0, 1, 1], [], []>} : vector<16x32xbf16>, vector<32x96xbf16>, vector<16x96xf32> -> vector<16x96xf32>
    %c24 = arith.constant 24 : index
    %c0_16 = arith.constant 0 : index
    %39 = vector.load %arg3[%c24, %c0_16] : memref<224x128xf32, #tpu.memory_space<vmem>>, vector<1x96xf32>
    %40 = vector.broadcast %39 : vector<1x96xf32> to vector<16x96xf32>
    %41 = arith.addf %38, %40 : vector<16x96xf32>
    %42 = vector.extract_strided_slice %41 {offsets = [0, 0], sizes = [16, 32], strides = [1, 1]} : vector<16x96xf32> to vector<16x32xf32>
    %43 = vector.extract_strided_slice %41 {offsets = [0, 32], sizes = [16, 32], strides = [1, 1]} : vector<16x96xf32> to vector<16x32xf32>
    %44 = vector.extract_strided_slice %41 {offsets = [0, 64], sizes = [16, 32], strides = [1, 1]} : vector<16x96xf32> to vector<16x32xf32>
    %c80 = arith.constant 80 : index
    %c0_17 = arith.constant 0 : index
    %45 = vector.load %arg2[%c80, %c0_17] : memref<720x128xbf16, #tpu.memory_space<vmem>>, vector<32x32xbf16>
    %46 = vector.extract_strided_slice %42 {offsets = [0, 0], sizes = [16, 16], strides = [1, 1]} : vector<16x32xf32> to vector<16x16xf32>
    %47 = vector.extract_strided_slice %43 {offsets = [0, 0], sizes = [16, 16], strides = [1, 1]} : vector<16x32xf32> to vector<16x16xf32>
    %48 = arith.truncf %46 : vector<16x16xf32> to vector<16x16xbf16>
    %49 = arith.truncf %47 : vector<16x16xf32> to vector<16x16xbf16>
    %cst_18 = arith.constant dense<0.000000e+00> : vector<16x16xf32>
    %50 = tpu.matmul %48, %49, %cst_18 {dimension_numbers = #tpu.dot_dimension_numbers<[1], [1], [0], [0], [0, 0, 1, 0], [], []>} : vector<16x16xbf16>, vector<16x16xbf16>, vector<16x16xf32> -> vector<16x16xf32>
    %cst_19 = arith.constant 2.500000e-01 : f32
    %51 = vector.broadcast %cst_19 : f32 to vector<16x16xf32>
    %52 = arith.mulf %50, %51 : vector<16x16xf32>
    %cst_20 = arith.constant dense<0xFF800000> : vector<16xf32>
    %53 = vector.multi_reduction <maximumf>, %52, %cst_20 [1] : vector<16x16xf32> to vector<16xf32>
    %54 = vector.shape_cast %53 : vector<16xf32> to vector<16x1xf32>
    %55 = vector.broadcast %54 : vector<16x1xf32> to vector<16x16xf32>
    %56 = arith.subf %52, %55 : vector<16x16xf32>
    %57 = math.exp %56 : vector<16x16xf32>
    %cst_21 = arith.constant dense<0.000000e+00> : vector<16xf32>
    %58 = vector.multi_reduction <add>, %57, %cst_21 [1] : vector<16x16xf32> to vector<16xf32>
    %59 = vector.shape_cast %58 : vector<16xf32> to vector<16x1xf32>
    %60 = tpu.reciprocal %59 {approx = true} : vector<16x1xf32> -> vector<16x1xf32>
    %61 = vector.broadcast %60 : vector<16x1xf32> to vector<16x16xf32>
    %62 = arith.mulf %57, %61 : vector<16x16xf32>
    %63 = vector.extract_strided_slice %44 {offsets = [0, 0], sizes = [16, 16], strides = [1, 1]} : vector<16x32xf32> to vector<16x16xf32>
    %64 = arith.truncf %62 : vector<16x16xf32> to vector<16x16xbf16>
    %65 = arith.truncf %63 : vector<16x16xf32> to vector<16x16xbf16>
    %cst_22 = arith.constant dense<0.000000e+00> : vector<16x16xf32>
    %66 = tpu.matmul %64, %65, %cst_22 {dimension_numbers = #tpu.dot_dimension_numbers<[1], [0], [0], [1], [0, 0, 1, 1], [], []>} : vector<16x16xbf16>, vector<16x16xbf16>, vector<16x16xf32> -> vector<16x16xf32>
    %67 = vector.extract_strided_slice %42 {offsets = [0, 16], sizes = [16, 16], strides = [1, 1]} : vector<16x32xf32> to vector<16x16xf32>
    %68 = vector.extract_strided_slice %43 {offsets = [0, 16], sizes = [16, 16], strides = [1, 1]} : vector<16x32xf32> to vector<16x16xf32>
    %69 = arith.truncf %67 : vector<16x16xf32> to vector<16x16xbf16>
    %70 = arith.truncf %68 : vector<16x16xf32> to vector<16x16xbf16>
    %cst_23 = arith.constant dense<0.000000e+00> : vector<16x16xf32>
    %71 = tpu.matmul %69, %70, %cst_23 {dimension_numbers = #tpu.dot_dimension_numbers<[1], [1], [0], [0], [0, 0, 1, 0], [], []>} : vector<16x16xbf16>, vector<16x16xbf16>, vector<16x16xf32> -> vector<16x16xf32>
    %cst_24 = arith.constant 2.500000e-01 : f32
    %72 = vector.broadcast %cst_24 : f32 to vector<16x16xf32>
    %73 = arith.mulf %71, %72 : vector<16x16xf32>
    %cst_25 = arith.constant dense<0xFF800000> : vector<16xf32>
    %74 = vector.multi_reduction <maximumf>, %73, %cst_25 [1] : vector<16x16xf32> to vector<16xf32>
    %75 = vector.shape_cast %74 : vector<16xf32> to vector<16x1xf32>
    %76 = vector.broadcast %75 : vector<16x1xf32> to vector<16x16xf32>
    %77 = arith.subf %73, %76 : vector<16x16xf32>
    %78 = math.exp %77 : vector<16x16xf32>
    %cst_26 = arith.constant dense<0.000000e+00> : vector<16xf32>
    %79 = vector.multi_reduction <add>, %78, %cst_26 [1] : vector<16x16xf32> to vector<16xf32>
    %80 = vector.shape_cast %79 : vector<16xf32> to vector<16x1xf32>
    %81 = tpu.reciprocal %80 {approx = true} : vector<16x1xf32> -> vector<16x1xf32>
    %82 = vector.broadcast %81 : vector<16x1xf32> to vector<16x16xf32>
    %83 = arith.mulf %78, %82 : vector<16x16xf32>
    %84 = vector.extract_strided_slice %44 {offsets = [0, 16], sizes = [16, 16], strides = [1, 1]} : vector<16x32xf32> to vector<16x16xf32>
    %85 = arith.truncf %83 : vector<16x16xf32> to vector<16x16xbf16>
    %86 = arith.truncf %84 : vector<16x16xf32> to vector<16x16xbf16>
    %cst_27 = arith.constant dense<0.000000e+00> : vector<16x16xf32>
    %87 = tpu.matmul %85, %86, %cst_27 {dimension_numbers = #tpu.dot_dimension_numbers<[1], [0], [0], [1], [0, 0, 1, 1], [], []>} : vector<16x16xbf16>, vector<16x16xbf16>, vector<16x16xf32> -> vector<16x16xf32>
    %88 = tpu.concatenate %66, %87 in 1 : vector<16x16xf32>, vector<16x16xf32> -> vector<16x32xf32>
    %89 = arith.truncf %88 : vector<16x32xf32> to vector<16x32xbf16>
    %cst_28 = arith.constant dense<0.000000e+00> : vector<16x32xf32>
    %90 = tpu.matmul %89, %45, %cst_28 {dimension_numbers = #tpu.dot_dimension_numbers<[1], [0], [0], [1], [0, 0, 1, 1], [], []>} : vector<16x32xbf16>, vector<32x32xbf16>, vector<16x32xf32> -> vector<16x32xf32>
    %91 = arith.addf %11, %90 : vector<16x32xf32>
    %c32 = arith.constant 32 : index
    %c0_29 = arith.constant 0 : index
    %92 = vector.load %arg3[%c32, %c0_29] : memref<224x128xf32, #tpu.memory_space<vmem>>, vector<1x32xf32>
    %93 = vector.broadcast %92 : vector<1x32xf32> to vector<16x32xf32>
    %94 = arith.addf %91, %93 : vector<16x32xf32>
    %95 = vector.extract_strided_slice %0 {offsets = [1, 0], sizes = [1, 32], strides = [1, 1]} : vector<7x32xf32> to vector<1x32xf32>
    %96 = vector.extract_strided_slice %1 {offsets = [1, 0], sizes = [1, 32], strides = [1, 1]} : vector<7x32xf32> to vector<1x32xf32>
    %cst_30 = arith.constant dense<0.000000e+00> : vector<16xf32>
    %97 = vector.multi_reduction <add>, %94, %cst_30 [1] : vector<16x32xf32> to vector<16xf32>
    %98 = vector.shape_cast %97 : vector<16xf32> to vector<16x1xf32>
    %cst_31 = arith.constant 3.200000e+01 : f32
    %99 = vector.broadcast %cst_31 : f32 to vector<16x1xf32>
    %100 = arith.divf %98, %99 : vector<16x1xf32>
    %101 = vector.broadcast %100 : vector<16x1xf32> to vector<16x32xf32>
    %102 = arith.subf %94, %101 : vector<16x32xf32>
    %103 = arith.mulf %102, %102 : vector<16x32xf32>
    %cst_32 = arith.constant dense<0.000000e+00> : vector<16xf32>
    %104 = vector.multi_reduction <add>, %103, %cst_32 [1] : vector<16x32xf32> to vector<16xf32>
    %105 = vector.shape_cast %104 : vector<16xf32> to vector<16x1xf32>
    %cst_33 = arith.constant 3.200000e+01 : f32
    %106 = vector.broadcast %cst_33 : f32 to vector<16x1xf32>
    %107 = arith.divf %105, %106 : vector<16x1xf32>
    %108 = vector.broadcast %100 : vector<16x1xf32> to vector<16x32xf32>
    %109 = arith.subf %94, %108 : vector<16x32xf32>
    %cst_34 = arith.constant 9.99999997E-7 : f32
    %110 = vector.broadcast %cst_34 : f32 to vector<16x1xf32>
    %111 = arith.addf %107, %110 : vector<16x1xf32>
    %112 = math.rsqrt %111 : vector<16x1xf32>
    %113 = vector.broadcast %112 : vector<16x1xf32> to vector<16x32xf32>
    %114 = arith.mulf %109, %113 : vector<16x32xf32>
    %115 = vector.broadcast %95 : vector<1x32xf32> to vector<16x32xf32>
    %116 = arith.mulf %114, %115 : vector<16x32xf32>
    %117 = vector.broadcast %96 : vector<1x32xf32> to vector<16x32xf32>
    %118 = arith.addf %116, %117 : vector<16x32xf32>
    %c112 = arith.constant 112 : index
    %c0_35 = arith.constant 0 : index
    %119 = vector.load %arg2[%c112, %c0_35] : memref<720x128xbf16, #tpu.memory_space<vmem>>, vector<32x64xbf16>
    %120 = arith.truncf %118 : vector<16x32xf32> to vector<16x32xbf16>
    %cst_36 = arith.constant dense<0.000000e+00> : vector<16x64xf32>
    %121 = tpu.matmul %120, %119, %cst_36 {dimension_numbers = #tpu.dot_dimension_numbers<[1], [0], [0], [1], [0, 0, 1, 1], [], []>} : vector<16x32xbf16>, vector<32x64xbf16>, vector<16x64xf32> -> vector<16x64xf32>
    %c40 = arith.constant 40 : index
    %c0_37 = arith.constant 0 : index
    %122 = vector.load %arg3[%c40, %c0_37] : memref<224x128xf32, #tpu.memory_space<vmem>>, vector<1x64xf32>
    %123 = vector.broadcast %122 : vector<1x64xf32> to vector<16x64xf32>
    %124 = arith.addf %121, %123 : vector<16x64xf32>
    %125 = arith.mulf %124, %124 : vector<16x64xf32>
    %126 = arith.mulf %124, %125 : vector<16x64xf32>
    %cst_38 = arith.constant 4.471500e-02 : f32
    %127 = vector.broadcast %cst_38 : f32 to vector<16x64xf32>
    %128 = arith.mulf %127, %126 : vector<16x64xf32>
    %129 = arith.addf %124, %128 : vector<16x64xf32>
    %cst_39 = arith.constant 0.797884583 : f32
    %130 = vector.broadcast %cst_39 : f32 to vector<16x64xf32>
    %131 = arith.mulf %130, %129 : vector<16x64xf32>
    %132 = math.tanh %131 : vector<16x64xf32>
    %cst_40 = arith.constant 1.000000e+00 : f32
    %133 = vector.broadcast %cst_40 : f32 to vector<16x64xf32>
    %134 = arith.addf %133, %132 : vector<16x64xf32>
    %cst_41 = arith.constant 5.000000e-01 : f32
    %135 = vector.broadcast %cst_41 : f32 to vector<16x64xf32>
    %136 = arith.mulf %135, %134 : vector<16x64xf32>
    %137 = arith.mulf %124, %136 : vector<16x64xf32>
    %c144 = arith.constant 144 : index
    %c0_42 = arith.constant 0 : index
    %138 = vector.load %arg2[%c144, %c0_42] : memref<720x128xbf16, #tpu.memory_space<vmem>>, vector<64x32xbf16>
    %139 = arith.truncf %137 : vector<16x64xf32> to vector<16x64xbf16>
    %cst_43 = arith.constant dense<0.000000e+00> : vector<16x32xf32>
    %140 = tpu.matmul %139, %138, %cst_43 {dimension_numbers = #tpu.dot_dimension_numbers<[1], [0], [0], [1], [0, 0, 1, 1], [], []>} : vector<16x64xbf16>, vector<64x32xbf16>, vector<16x32xf32> -> vector<16x32xf32>
    %141 = arith.addf %94, %140 : vector<16x32xf32>
    %c48_44 = arith.constant 48 : index
    %c0_45 = arith.constant 0 : index
    %142 = vector.load %arg3[%c48_44, %c0_45] : memref<224x128xf32, #tpu.memory_space<vmem>>, vector<1x32xf32>
    %143 = vector.broadcast %142 : vector<1x32xf32> to vector<16x32xf32>
    %144 = arith.addf %141, %143 : vector<16x32xf32>
    %c208 = arith.constant 208 : index
    %c0_46 = arith.constant 0 : index
    %145 = vector.load %arg2[%c208, %c0_46] : memref<720x128xbf16, #tpu.memory_space<vmem>>, vector<32x32xbf16>
    %146 = arith.truncf %144 : vector<16x32xf32> to vector<16x32xbf16>
    %cst_47 = arith.constant dense<0.000000e+00> : vector<16x32xf32>
    %147 = tpu.matmul %146, %145, %cst_47 {dimension_numbers = #tpu.dot_dimension_numbers<[1], [0], [0], [1], [0, 0, 1, 1], [], []>} : vector<16x32xbf16>, vector<32x32xbf16>, vector<16x32xf32> -> vector<16x32xf32>
    %c56 = arith.constant 56 : index
    %c0_48 = arith.constant 0 : index
    %148 = vector.load %arg3[%c56, %c0_48] : memref<224x128xf32, #tpu.memory_space<vmem>>, vector<1x32xf32>
    %149 = vector.broadcast %148 : vector<1x32xf32> to vector<16x32xf32>
    %150 = arith.addf %147, %149 : vector<16x32xf32>
    %151 = vector.extract_strided_slice %0 {offsets = [2, 0], sizes = [1, 32], strides = [1, 1]} : vector<7x32xf32> to vector<1x32xf32>
    %152 = vector.extract_strided_slice %1 {offsets = [2, 0], sizes = [1, 32], strides = [1, 1]} : vector<7x32xf32> to vector<1x32xf32>
    %cst_49 = arith.constant dense<0.000000e+00> : vector<16xf32>
    %153 = vector.multi_reduction <add>, %150, %cst_49 [1] : vector<16x32xf32> to vector<16xf32>
    %154 = vector.shape_cast %153 : vector<16xf32> to vector<16x1xf32>
    %cst_50 = arith.constant 3.200000e+01 : f32
    %155 = vector.broadcast %cst_50 : f32 to vector<16x1xf32>
    %156 = arith.divf %154, %155 : vector<16x1xf32>
    %157 = vector.broadcast %156 : vector<16x1xf32> to vector<16x32xf32>
    %158 = arith.subf %150, %157 : vector<16x32xf32>
    %159 = arith.mulf %158, %158 : vector<16x32xf32>
    %cst_51 = arith.constant dense<0.000000e+00> : vector<16xf32>
    %160 = vector.multi_reduction <add>, %159, %cst_51 [1] : vector<16x32xf32> to vector<16xf32>
    %161 = vector.shape_cast %160 : vector<16xf32> to vector<16x1xf32>
    %cst_52 = arith.constant 3.200000e+01 : f32
    %162 = vector.broadcast %cst_52 : f32 to vector<16x1xf32>
    %163 = arith.divf %161, %162 : vector<16x1xf32>
    %164 = vector.broadcast %156 : vector<16x1xf32> to vector<16x32xf32>
    %165 = arith.subf %150, %164 : vector<16x32xf32>
    %cst_53 = arith.constant 9.99999997E-7 : f32
    %166 = vector.broadcast %cst_53 : f32 to vector<16x1xf32>
    %167 = arith.addf %163, %166 : vector<16x1xf32>
    %168 = math.rsqrt %167 : vector<16x1xf32>
    %169 = vector.broadcast %168 : vector<16x1xf32> to vector<16x32xf32>
    %170 = arith.mulf %165, %169 : vector<16x32xf32>
    %171 = vector.broadcast %151 : vector<1x32xf32> to vector<16x32xf32>
    %172 = arith.mulf %170, %171 : vector<16x32xf32>
    %173 = vector.broadcast %152 : vector<1x32xf32> to vector<16x32xf32>
    %174 = arith.addf %172, %173 : vector<16x32xf32>
    %c80_54 = arith.constant 80 : index
    %c0_55 = arith.constant 0 : index
    %175 = vector.load %arg3[%c80_54, %c0_55] : memref<224x128xf32, #tpu.memory_space<vmem>>, vector<1x32xf32>
    %176 = vector.broadcast %175 : vector<1x32xf32> to vector<16x32xf32>
    %177 = arith.addf %174, %176 : vector<16x32xf32>
    %c88 = arith.constant 88 : index
    %c0_56 = arith.constant 0 : index
    %178 = vector.load %arg3[%c88, %c0_56] : memref<224x128xf32, #tpu.memory_space<vmem>>, vector<16x32xf32>
    %c104 = arith.constant 104 : index
    %c0_57 = arith.constant 0 : index
    %179 = vector.load %arg3[%c104, %c0_57] : memref<224x128xf32, #tpu.memory_space<vmem>>, vector<8x32xf32>
    %180 = arith.addf %177, %178 : vector<16x32xf32>
    %c336 = arith.constant 336 : index
    %c0_58 = arith.constant 0 : index
    %181 = vector.load %arg2[%c336, %c0_58] : memref<720x128xbf16, #tpu.memory_space<vmem>>, vector<32x96xbf16>
    %182 = arith.truncf %180 : vector<16x32xf32> to vector<16x32xbf16>
    %cst_59 = arith.constant dense<0.000000e+00> : vector<16x96xf32>
    %183 = tpu.matmul %182, %181, %cst_59 {dimension_numbers = #tpu.dot_dimension_numbers<[1], [0], [0], [1], [0, 0, 1, 1], [], []>} : vector<16x32xbf16>, vector<32x96xbf16>, vector<16x96xf32> -> vector<16x96xf32>
    %c136 = arith.constant 136 : index
    %c0_60 = arith.constant 0 : index
    %184 = vector.load %arg3[%c136, %c0_60] : memref<224x128xf32, #tpu.memory_space<vmem>>, vector<1x96xf32>
    %185 = vector.broadcast %184 : vector<1x96xf32> to vector<16x96xf32>
    %186 = arith.addf %183, %185 : vector<16x96xf32>
    %c240 = arith.constant 240 : index
    %c0_61 = arith.constant 0 : index
    %187 = vector.load %arg2[%c240, %c0_61] : memref<720x128xbf16, #tpu.memory_space<vmem>>, vector<32x96xbf16>
    %188 = arith.truncf %179 : vector<8x32xf32> to vector<8x32xbf16>
    %cst_62 = arith.constant dense<0.000000e+00> : vector<8x96xf32>
    %189 = tpu.matmul %188, %187, %cst_62 {dimension_numbers = #tpu.dot_dimension_numbers<[1], [0], [0], [1], [0, 0, 1, 1], [], []>} : vector<8x32xbf16>, vector<32x96xbf16>, vector<8x96xf32> -> vector<8x96xf32>
    %c112_63 = arith.constant 112 : index
    %c0_64 = arith.constant 0 : index
    %190 = vector.load %arg3[%c112_63, %c0_64] : memref<224x128xf32, #tpu.memory_space<vmem>>, vector<1x96xf32>
    %191 = vector.broadcast %190 : vector<1x96xf32> to vector<8x96xf32>
    %192 = arith.addf %189, %191 : vector<8x96xf32>
    %193 = vector.extract_strided_slice %192 {offsets = [0, 0], sizes = [8, 32], strides = [1, 1]} : vector<8x96xf32> to vector<8x32xf32>
    %194 = vector.extract_strided_slice %192 {offsets = [0, 32], sizes = [8, 32], strides = [1, 1]} : vector<8x96xf32> to vector<8x32xf32>
    %195 = vector.extract_strided_slice %192 {offsets = [0, 64], sizes = [8, 32], strides = [1, 1]} : vector<8x96xf32> to vector<8x32xf32>
    %c272 = arith.constant 272 : index
    %c0_65 = arith.constant 0 : index
    %196 = vector.load %arg2[%c272, %c0_65] : memref<720x128xbf16, #tpu.memory_space<vmem>>, vector<32x32xbf16>
    %197 = tpu.iota {dimensions = array<i32: 1>} : vector<8x8xi32>
    %c5_i32 = arith.constant 5 : i32
    %198 = vector.broadcast %c5_i32 : i32 to vector<8x8xi32>
    %199 = arith.cmpi slt, %197, %198 : vector<8x8xi32>
    %200 = vector.extract_strided_slice %193 {offsets = [0, 0], sizes = [8, 16], strides = [1, 1]} : vector<8x32xf32> to vector<8x16xf32>
    %201 = vector.extract_strided_slice %194 {offsets = [0, 0], sizes = [8, 16], strides = [1, 1]} : vector<8x32xf32> to vector<8x16xf32>
    %202 = arith.truncf %200 : vector<8x16xf32> to vector<8x16xbf16>
    %203 = arith.truncf %201 : vector<8x16xf32> to vector<8x16xbf16>
    %cst_66 = arith.constant dense<0.000000e+00> : vector<8x8xf32>
    %204 = tpu.matmul %202, %203, %cst_66 {dimension_numbers = #tpu.dot_dimension_numbers<[1], [1], [0], [0], [0, 0, 1, 0], [], []>} : vector<8x16xbf16>, vector<8x16xbf16>, vector<8x8xf32> -> vector<8x8xf32>
    %cst_67 = arith.constant 2.500000e-01 : f32
    %205 = vector.broadcast %cst_67 : f32 to vector<8x8xf32>
    %206 = arith.mulf %204, %205 : vector<8x8xf32>
    %cst_68 = arith.constant -1.000000e+30 : f32
    %207 = vector.broadcast %cst_68 : f32 to vector<8x8xf32>
    %208 = arith.select %199, %206, %207 : vector<8x8xi1>, vector<8x8xf32>
    %cst_69 = arith.constant dense<0xFF800000> : vector<8xf32>
    %209 = vector.multi_reduction <maximumf>, %208, %cst_69 [1] : vector<8x8xf32> to vector<8xf32>
    %210 = vector.shape_cast %209 : vector<8xf32> to vector<8x1xf32>
    %211 = vector.broadcast %210 : vector<8x1xf32> to vector<8x8xf32>
    %212 = arith.subf %208, %211 : vector<8x8xf32>
    %213 = math.exp %212 : vector<8x8xf32>
    %cst_70 = arith.constant dense<0.000000e+00> : vector<8xf32>
    %214 = vector.multi_reduction <add>, %213, %cst_70 [1] : vector<8x8xf32> to vector<8xf32>
    %215 = vector.shape_cast %214 : vector<8xf32> to vector<8x1xf32>
    %216 = tpu.reciprocal %215 {approx = true} : vector<8x1xf32> -> vector<8x1xf32>
    %217 = vector.broadcast %216 : vector<8x1xf32> to vector<8x8xf32>
    %218 = arith.mulf %213, %217 : vector<8x8xf32>
    %219 = vector.extract_strided_slice %195 {offsets = [0, 0], sizes = [8, 16], strides = [1, 1]} : vector<8x32xf32> to vector<8x16xf32>
    %220 = arith.truncf %218 : vector<8x8xf32> to vector<8x8xbf16>
    %221 = arith.truncf %219 : vector<8x16xf32> to vector<8x16xbf16>
    %cst_71 = arith.constant dense<0.000000e+00> : vector<8x16xf32>
    %222 = tpu.matmul %220, %221, %cst_71 {dimension_numbers = #tpu.dot_dimension_numbers<[1], [0], [0], [1], [0, 0, 1, 1], [], []>} : vector<8x8xbf16>, vector<8x16xbf16>, vector<8x16xf32> -> vector<8x16xf32>
    %223 = vector.extract_strided_slice %193 {offsets = [0, 16], sizes = [8, 16], strides = [1, 1]} : vector<8x32xf32> to vector<8x16xf32>
    %224 = vector.extract_strided_slice %194 {offsets = [0, 16], sizes = [8, 16], strides = [1, 1]} : vector<8x32xf32> to vector<8x16xf32>
    %225 = arith.truncf %223 : vector<8x16xf32> to vector<8x16xbf16>
    %226 = arith.truncf %224 : vector<8x16xf32> to vector<8x16xbf16>
    %cst_72 = arith.constant dense<0.000000e+00> : vector<8x8xf32>
    %227 = tpu.matmul %225, %226, %cst_72 {dimension_numbers = #tpu.dot_dimension_numbers<[1], [1], [0], [0], [0, 0, 1, 0], [], []>} : vector<8x16xbf16>, vector<8x16xbf16>, vector<8x8xf32> -> vector<8x8xf32>
    %cst_73 = arith.constant 2.500000e-01 : f32
    %228 = vector.broadcast %cst_73 : f32 to vector<8x8xf32>
    %229 = arith.mulf %227, %228 : vector<8x8xf32>
    %cst_74 = arith.constant -1.000000e+30 : f32
    %230 = vector.broadcast %cst_74 : f32 to vector<8x8xf32>
    %231 = arith.select %199, %229, %230 : vector<8x8xi1>, vector<8x8xf32>
    %cst_75 = arith.constant dense<0xFF800000> : vector<8xf32>
    %232 = vector.multi_reduction <maximumf>, %231, %cst_75 [1] : vector<8x8xf32> to vector<8xf32>
    %233 = vector.shape_cast %232 : vector<8xf32> to vector<8x1xf32>
    %234 = vector.broadcast %233 : vector<8x1xf32> to vector<8x8xf32>
    %235 = arith.subf %231, %234 : vector<8x8xf32>
    %236 = math.exp %235 : vector<8x8xf32>
    %cst_76 = arith.constant dense<0.000000e+00> : vector<8xf32>
    %237 = vector.multi_reduction <add>, %236, %cst_76 [1] : vector<8x8xf32> to vector<8xf32>
    %238 = vector.shape_cast %237 : vector<8xf32> to vector<8x1xf32>
    %239 = tpu.reciprocal %238 {approx = true} : vector<8x1xf32> -> vector<8x1xf32>
    %240 = vector.broadcast %239 : vector<8x1xf32> to vector<8x8xf32>
    %241 = arith.mulf %236, %240 : vector<8x8xf32>
    %242 = vector.extract_strided_slice %195 {offsets = [0, 16], sizes = [8, 16], strides = [1, 1]} : vector<8x32xf32> to vector<8x16xf32>
    %243 = arith.truncf %241 : vector<8x8xf32> to vector<8x8xbf16>
    %244 = arith.truncf %242 : vector<8x16xf32> to vector<8x16xbf16>
    %cst_77 = arith.constant dense<0.000000e+00> : vector<8x16xf32>
    %245 = tpu.matmul %243, %244, %cst_77 {dimension_numbers = #tpu.dot_dimension_numbers<[1], [0], [0], [1], [0, 0, 1, 1], [], []>} : vector<8x8xbf16>, vector<8x16xbf16>, vector<8x16xf32> -> vector<8x16xf32>
    %246 = tpu.concatenate %222, %245 in 1 : vector<8x16xf32>, vector<8x16xf32> -> vector<8x32xf32>
    %247 = arith.truncf %246 : vector<8x32xf32> to vector<8x32xbf16>
    %cst_78 = arith.constant dense<0.000000e+00> : vector<8x32xf32>
    %248 = tpu.matmul %247, %196, %cst_78 {dimension_numbers = #tpu.dot_dimension_numbers<[1], [0], [0], [1], [0, 0, 1, 1], [], []>} : vector<8x32xbf16>, vector<32x32xbf16>, vector<8x32xf32> -> vector<8x32xf32>
    %c120 = arith.constant 120 : index
    %c0_79 = arith.constant 0 : index
    %249 = vector.load %arg3[%c120, %c0_79] : memref<224x128xf32, #tpu.memory_space<vmem>>, vector<1x32xf32>
    %250 = vector.broadcast %249 : vector<1x32xf32> to vector<8x32xf32>
    %251 = arith.addf %248, %250 : vector<8x32xf32>
    %252 = arith.addf %179, %251 : vector<8x32xf32>
    %253 = vector.extract_strided_slice %0 {offsets = [3, 0], sizes = [1, 32], strides = [1, 1]} : vector<7x32xf32> to vector<1x32xf32>
    %254 = vector.extract_strided_slice %1 {offsets = [3, 0], sizes = [1, 32], strides = [1, 1]} : vector<7x32xf32> to vector<1x32xf32>
    %cst_80 = arith.constant dense<0.000000e+00> : vector<8xf32>
    %255 = vector.multi_reduction <add>, %252, %cst_80 [1] : vector<8x32xf32> to vector<8xf32>
    %256 = vector.shape_cast %255 : vector<8xf32> to vector<8x1xf32>
    %cst_81 = arith.constant 3.200000e+01 : f32
    %257 = vector.broadcast %cst_81 : f32 to vector<8x1xf32>
    %258 = arith.divf %256, %257 : vector<8x1xf32>
    %259 = vector.broadcast %258 : vector<8x1xf32> to vector<8x32xf32>
    %260 = arith.subf %252, %259 : vector<8x32xf32>
    %261 = arith.mulf %260, %260 : vector<8x32xf32>
    %cst_82 = arith.constant dense<0.000000e+00> : vector<8xf32>
    %262 = vector.multi_reduction <add>, %261, %cst_82 [1] : vector<8x32xf32> to vector<8xf32>
    %263 = vector.shape_cast %262 : vector<8xf32> to vector<8x1xf32>
    %cst_83 = arith.constant 3.200000e+01 : f32
    %264 = vector.broadcast %cst_83 : f32 to vector<8x1xf32>
    %265 = arith.divf %263, %264 : vector<8x1xf32>
    %266 = vector.broadcast %258 : vector<8x1xf32> to vector<8x32xf32>
    %267 = arith.subf %252, %266 : vector<8x32xf32>
    %cst_84 = arith.constant 9.99999997E-7 : f32
    %268 = vector.broadcast %cst_84 : f32 to vector<8x1xf32>
    %269 = arith.addf %265, %268 : vector<8x1xf32>
    %270 = math.rsqrt %269 : vector<8x1xf32>
    %271 = vector.broadcast %270 : vector<8x1xf32> to vector<8x32xf32>
    %272 = arith.mulf %267, %271 : vector<8x32xf32>
    %273 = vector.broadcast %253 : vector<1x32xf32> to vector<8x32xf32>
    %274 = arith.mulf %272, %273 : vector<8x32xf32>
    %275 = vector.broadcast %254 : vector<1x32xf32> to vector<8x32xf32>
    %276 = arith.addf %274, %275 : vector<8x32xf32>
    %c304 = arith.constant 304 : index
    %c0_85 = arith.constant 0 : index
    %277 = vector.load %arg2[%c304, %c0_85] : memref<720x128xbf16, #tpu.memory_space<vmem>>, vector<32x32xbf16>
    %278 = arith.truncf %276 : vector<8x32xf32> to vector<8x32xbf16>
    %cst_86 = arith.constant dense<0.000000e+00> : vector<8x32xf32>
    %279 = tpu.matmul %278, %277, %cst_86 {dimension_numbers = #tpu.dot_dimension_numbers<[1], [0], [0], [1], [0, 0, 1, 1], [], []>} : vector<8x32xbf16>, vector<32x32xbf16>, vector<8x32xf32> -> vector<8x32xf32>
    %c128 = arith.constant 128 : index
    %c0_87 = arith.constant 0 : index
    %280 = vector.load %arg3[%c128, %c0_87] : memref<224x128xf32, #tpu.memory_space<vmem>>, vector<1x32xf32>
    %281 = vector.broadcast %280 : vector<1x32xf32> to vector<8x32xf32>
    %282 = arith.addf %279, %281 : vector<8x32xf32>
    %283 = vector.extract_strided_slice %186 {offsets = [0, 0], sizes = [16, 32], strides = [1, 1]} : vector<16x96xf32> to vector<16x32xf32>
    %284 = vector.extract_strided_slice %186 {offsets = [0, 32], sizes = [16, 32], strides = [1, 1]} : vector<16x96xf32> to vector<16x32xf32>
    %c368 = arith.constant 368 : index
    %c0_88 = arith.constant 0 : index
    %285 = vector.load %arg2[%c368, %c0_88] : memref<720x128xbf16, #tpu.memory_space<vmem>>, vector<32x32xbf16>
    %286 = vector.extract_strided_slice %282 {offsets = [0, 0], sizes = [8, 16], strides = [1, 1]} : vector<8x32xf32> to vector<8x16xf32>
    %287 = vector.extract_strided_slice %283 {offsets = [0, 0], sizes = [16, 16], strides = [1, 1]} : vector<16x32xf32> to vector<16x16xf32>
    %288 = arith.truncf %286 : vector<8x16xf32> to vector<8x16xbf16>
    %289 = arith.truncf %287 : vector<16x16xf32> to vector<16x16xbf16>
    %cst_89 = arith.constant dense<0.000000e+00> : vector<8x16xf32>
    %290 = tpu.matmul %288, %289, %cst_89 {dimension_numbers = #tpu.dot_dimension_numbers<[1], [1], [0], [0], [0, 0, 1, 0], [], []>} : vector<8x16xbf16>, vector<16x16xbf16>, vector<8x16xf32> -> vector<8x16xf32>
    %cst_90 = arith.constant 2.500000e-01 : f32
    %291 = vector.broadcast %cst_90 : f32 to vector<8x16xf32>
    %292 = arith.mulf %290, %291 : vector<8x16xf32>
    %cst_91 = arith.constant dense<0xFF800000> : vector<8xf32>
    %293 = vector.multi_reduction <maximumf>, %292, %cst_91 [1] : vector<8x16xf32> to vector<8xf32>
    %294 = vector.shape_cast %293 : vector<8xf32> to vector<8x1xf32>
    %295 = vector.broadcast %294 : vector<8x1xf32> to vector<8x16xf32>
    %296 = arith.subf %292, %295 : vector<8x16xf32>
    %297 = math.exp %296 : vector<8x16xf32>
    %cst_92 = arith.constant dense<0.000000e+00> : vector<8xf32>
    %298 = vector.multi_reduction <add>, %297, %cst_92 [1] : vector<8x16xf32> to vector<8xf32>
    %299 = vector.shape_cast %298 : vector<8xf32> to vector<8x1xf32>
    %300 = tpu.reciprocal %299 {approx = true} : vector<8x1xf32> -> vector<8x1xf32>
    %301 = vector.broadcast %300 : vector<8x1xf32> to vector<8x16xf32>
    %302 = arith.mulf %297, %301 : vector<8x16xf32>
    %303 = vector.extract_strided_slice %284 {offsets = [0, 0], sizes = [16, 16], strides = [1, 1]} : vector<16x32xf32> to vector<16x16xf32>
    %304 = arith.truncf %302 : vector<8x16xf32> to vector<8x16xbf16>
    %305 = arith.truncf %303 : vector<16x16xf32> to vector<16x16xbf16>
    %cst_93 = arith.constant dense<0.000000e+00> : vector<8x16xf32>
    %306 = tpu.matmul %304, %305, %cst_93 {dimension_numbers = #tpu.dot_dimension_numbers<[1], [0], [0], [1], [0, 0, 1, 1], [], []>} : vector<8x16xbf16>, vector<16x16xbf16>, vector<8x16xf32> -> vector<8x16xf32>
    %307 = vector.extract_strided_slice %282 {offsets = [0, 16], sizes = [8, 16], strides = [1, 1]} : vector<8x32xf32> to vector<8x16xf32>
    %308 = vector.extract_strided_slice %283 {offsets = [0, 16], sizes = [16, 16], strides = [1, 1]} : vector<16x32xf32> to vector<16x16xf32>
    %309 = arith.truncf %307 : vector<8x16xf32> to vector<8x16xbf16>
    %310 = arith.truncf %308 : vector<16x16xf32> to vector<16x16xbf16>
    %cst_94 = arith.constant dense<0.000000e+00> : vector<8x16xf32>
    %311 = tpu.matmul %309, %310, %cst_94 {dimension_numbers = #tpu.dot_dimension_numbers<[1], [1], [0], [0], [0, 0, 1, 0], [], []>} : vector<8x16xbf16>, vector<16x16xbf16>, vector<8x16xf32> -> vector<8x16xf32>
    %cst_95 = arith.constant 2.500000e-01 : f32
    %312 = vector.broadcast %cst_95 : f32 to vector<8x16xf32>
    %313 = arith.mulf %311, %312 : vector<8x16xf32>
    %cst_96 = arith.constant dense<0xFF800000> : vector<8xf32>
    %314 = vector.multi_reduction <maximumf>, %313, %cst_96 [1] : vector<8x16xf32> to vector<8xf32>
    %315 = vector.shape_cast %314 : vector<8xf32> to vector<8x1xf32>
    %316 = vector.broadcast %315 : vector<8x1xf32> to vector<8x16xf32>
    %317 = arith.subf %313, %316 : vector<8x16xf32>
    %318 = math.exp %317 : vector<8x16xf32>
    %cst_97 = arith.constant dense<0.000000e+00> : vector<8xf32>
    %319 = vector.multi_reduction <add>, %318, %cst_97 [1] : vector<8x16xf32> to vector<8xf32>
    %320 = vector.shape_cast %319 : vector<8xf32> to vector<8x1xf32>
    %321 = tpu.reciprocal %320 {approx = true} : vector<8x1xf32> -> vector<8x1xf32>
    %322 = vector.broadcast %321 : vector<8x1xf32> to vector<8x16xf32>
    %323 = arith.mulf %318, %322 : vector<8x16xf32>
    %324 = vector.extract_strided_slice %284 {offsets = [0, 16], sizes = [16, 16], strides = [1, 1]} : vector<16x32xf32> to vector<16x16xf32>
    %325 = arith.truncf %323 : vector<8x16xf32> to vector<8x16xbf16>
    %326 = arith.truncf %324 : vector<16x16xf32> to vector<16x16xbf16>
    %cst_98 = arith.constant dense<0.000000e+00> : vector<8x16xf32>
    %327 = tpu.matmul %325, %326, %cst_98 {dimension_numbers = #tpu.dot_dimension_numbers<[1], [0], [0], [1], [0, 0, 1, 1], [], []>} : vector<8x16xbf16>, vector<16x16xbf16>, vector<8x16xf32> -> vector<8x16xf32>
    %328 = tpu.concatenate %306, %327 in 1 : vector<8x16xf32>, vector<8x16xf32> -> vector<8x32xf32>
    %329 = arith.truncf %328 : vector<8x32xf32> to vector<8x32xbf16>
    %cst_99 = arith.constant dense<0.000000e+00> : vector<8x32xf32>
    %330 = tpu.matmul %329, %285, %cst_99 {dimension_numbers = #tpu.dot_dimension_numbers<[1], [0], [0], [1], [0, 0, 1, 1], [], []>} : vector<8x32xbf16>, vector<32x32xbf16>, vector<8x32xf32> -> vector<8x32xf32>
    %c144_100 = arith.constant 144 : index
    %c0_101 = arith.constant 0 : index
    %331 = vector.load %arg3[%c144_100, %c0_101] : memref<224x128xf32, #tpu.memory_space<vmem>>, vector<1x32xf32>
    %332 = vector.broadcast %331 : vector<1x32xf32> to vector<8x32xf32>
    %333 = arith.addf %330, %332 : vector<8x32xf32>
    %334 = arith.addf %276, %333 : vector<8x32xf32>
    %335 = vector.extract_strided_slice %0 {offsets = [4, 0], sizes = [1, 32], strides = [1, 1]} : vector<7x32xf32> to vector<1x32xf32>
    %336 = vector.extract_strided_slice %1 {offsets = [4, 0], sizes = [1, 32], strides = [1, 1]} : vector<7x32xf32> to vector<1x32xf32>
    %cst_102 = arith.constant dense<0.000000e+00> : vector<8xf32>
    %337 = vector.multi_reduction <add>, %334, %cst_102 [1] : vector<8x32xf32> to vector<8xf32>
    %338 = vector.shape_cast %337 : vector<8xf32> to vector<8x1xf32>
    %cst_103 = arith.constant 3.200000e+01 : f32
    %339 = vector.broadcast %cst_103 : f32 to vector<8x1xf32>
    %340 = arith.divf %338, %339 : vector<8x1xf32>
    %341 = vector.broadcast %340 : vector<8x1xf32> to vector<8x32xf32>
    %342 = arith.subf %334, %341 : vector<8x32xf32>
    %343 = arith.mulf %342, %342 : vector<8x32xf32>
    %cst_104 = arith.constant dense<0.000000e+00> : vector<8xf32>
    %344 = vector.multi_reduction <add>, %343, %cst_104 [1] : vector<8x32xf32> to vector<8xf32>
    %345 = vector.shape_cast %344 : vector<8xf32> to vector<8x1xf32>
    %cst_105 = arith.constant 3.200000e+01 : f32
    %346 = vector.broadcast %cst_105 : f32 to vector<8x1xf32>
    %347 = arith.divf %345, %346 : vector<8x1xf32>
    %348 = vector.broadcast %340 : vector<8x1xf32> to vector<8x32xf32>
    %349 = arith.subf %334, %348 : vector<8x32xf32>
    %cst_106 = arith.constant 9.99999997E-7 : f32
    %350 = vector.broadcast %cst_106 : f32 to vector<8x1xf32>
    %351 = arith.addf %347, %350 : vector<8x1xf32>
    %352 = math.rsqrt %351 : vector<8x1xf32>
    %353 = vector.broadcast %352 : vector<8x1xf32> to vector<8x32xf32>
    %354 = arith.mulf %349, %353 : vector<8x32xf32>
    %355 = vector.broadcast %335 : vector<1x32xf32> to vector<8x32xf32>
    %356 = arith.mulf %354, %355 : vector<8x32xf32>
    %357 = vector.broadcast %336 : vector<1x32xf32> to vector<8x32xf32>
    %358 = arith.addf %356, %357 : vector<8x32xf32>
    %c400 = arith.constant 400 : index
    %c0_107 = arith.constant 0 : index
    %359 = vector.load %arg2[%c400, %c0_107] : memref<720x128xbf16, #tpu.memory_space<vmem>>, vector<32x64xbf16>
    %360 = arith.truncf %358 : vector<8x32xf32> to vector<8x32xbf16>
    %cst_108 = arith.constant dense<0.000000e+00> : vector<8x64xf32>
    %361 = tpu.matmul %360, %359, %cst_108 {dimension_numbers = #tpu.dot_dimension_numbers<[1], [0], [0], [1], [0, 0, 1, 1], [], []>} : vector<8x32xbf16>, vector<32x64xbf16>, vector<8x64xf32> -> vector<8x64xf32>
    %c152 = arith.constant 152 : index
    %c0_109 = arith.constant 0 : index
    %362 = vector.load %arg3[%c152, %c0_109] : memref<224x128xf32, #tpu.memory_space<vmem>>, vector<1x64xf32>
    %363 = vector.broadcast %362 : vector<1x64xf32> to vector<8x64xf32>
    %364 = arith.addf %361, %363 : vector<8x64xf32>
    %365 = arith.mulf %364, %364 : vector<8x64xf32>
    %366 = arith.mulf %364, %365 : vector<8x64xf32>
    %cst_110 = arith.constant 4.471500e-02 : f32
    %367 = vector.broadcast %cst_110 : f32 to vector<8x64xf32>
    %368 = arith.mulf %367, %366 : vector<8x64xf32>
    %369 = arith.addf %364, %368 : vector<8x64xf32>
    %cst_111 = arith.constant 0.797884583 : f32
    %370 = vector.broadcast %cst_111 : f32 to vector<8x64xf32>
    %371 = arith.mulf %370, %369 : vector<8x64xf32>
    %372 = math.tanh %371 : vector<8x64xf32>
    %cst_112 = arith.constant 1.000000e+00 : f32
    %373 = vector.broadcast %cst_112 : f32 to vector<8x64xf32>
    %374 = arith.addf %373, %372 : vector<8x64xf32>
    %cst_113 = arith.constant 5.000000e-01 : f32
    %375 = vector.broadcast %cst_113 : f32 to vector<8x64xf32>
    %376 = arith.mulf %375, %374 : vector<8x64xf32>
    %377 = arith.mulf %364, %376 : vector<8x64xf32>
    %c432 = arith.constant 432 : index
    %c0_114 = arith.constant 0 : index
    %378 = vector.load %arg2[%c432, %c0_114] : memref<720x128xbf16, #tpu.memory_space<vmem>>, vector<64x32xbf16>
    %379 = arith.truncf %377 : vector<8x64xf32> to vector<8x64xbf16>
    %cst_115 = arith.constant dense<0.000000e+00> : vector<8x32xf32>
    %380 = tpu.matmul %379, %378, %cst_115 {dimension_numbers = #tpu.dot_dimension_numbers<[1], [0], [0], [1], [0, 0, 1, 1], [], []>} : vector<8x64xbf16>, vector<64x32xbf16>, vector<8x32xf32> -> vector<8x32xf32>
    %381 = arith.addf %358, %380 : vector<8x32xf32>
    %c160 = arith.constant 160 : index
    %c0_116 = arith.constant 0 : index
    %382 = vector.load %arg3[%c160, %c0_116] : memref<224x128xf32, #tpu.memory_space<vmem>>, vector<1x32xf32>
    %383 = vector.broadcast %382 : vector<1x32xf32> to vector<8x32xf32>
    %384 = arith.addf %381, %383 : vector<8x32xf32>
    %385 = vector.extract_strided_slice %0 {offsets = [5, 0], sizes = [1, 32], strides = [1, 1]} : vector<7x32xf32> to vector<1x32xf32>
    %386 = vector.extract_strided_slice %1 {offsets = [5, 0], sizes = [1, 32], strides = [1, 1]} : vector<7x32xf32> to vector<1x32xf32>
    %cst_117 = arith.constant dense<0.000000e+00> : vector<8xf32>
    %387 = vector.multi_reduction <add>, %384, %cst_117 [1] : vector<8x32xf32> to vector<8xf32>
    %388 = vector.shape_cast %387 : vector<8xf32> to vector<8x1xf32>
    %cst_118 = arith.constant 3.200000e+01 : f32
    %389 = vector.broadcast %cst_118 : f32 to vector<8x1xf32>
    %390 = arith.divf %388, %389 : vector<8x1xf32>
    %391 = vector.broadcast %390 : vector<8x1xf32> to vector<8x32xf32>
    %392 = arith.subf %384, %391 : vector<8x32xf32>
    %393 = arith.mulf %392, %392 : vector<8x32xf32>
    %cst_119 = arith.constant dense<0.000000e+00> : vector<8xf32>
    %394 = vector.multi_reduction <add>, %393, %cst_119 [1] : vector<8x32xf32> to vector<8xf32>
    %395 = vector.shape_cast %394 : vector<8xf32> to vector<8x1xf32>
    %cst_120 = arith.constant 3.200000e+01 : f32
    %396 = vector.broadcast %cst_120 : f32 to vector<8x1xf32>
    %397 = arith.divf %395, %396 : vector<8x1xf32>
    %398 = vector.broadcast %390 : vector<8x1xf32> to vector<8x32xf32>
    %399 = arith.subf %384, %398 : vector<8x32xf32>
    %cst_121 = arith.constant 9.99999997E-7 : f32
    %400 = vector.broadcast %cst_121 : f32 to vector<8x1xf32>
    %401 = arith.addf %397, %400 : vector<8x1xf32>
    %402 = math.rsqrt %401 : vector<8x1xf32>
    %403 = vector.broadcast %402 : vector<8x1xf32> to vector<8x32xf32>
    %404 = arith.mulf %399, %403 : vector<8x32xf32>
    %405 = vector.broadcast %385 : vector<1x32xf32> to vector<8x32xf32>
    %406 = arith.mulf %404, %405 : vector<8x32xf32>
    %407 = vector.broadcast %386 : vector<1x32xf32> to vector<8x32xf32>
    %408 = arith.addf %406, %407 : vector<8x32xf32>
    %c496 = arith.constant 496 : index
    %c0_122 = arith.constant 0 : index
    %409 = vector.load %arg2[%c496, %c0_122] : memref<720x128xbf16, #tpu.memory_space<vmem>>, vector<32x64xbf16>
    %410 = arith.truncf %408 : vector<8x32xf32> to vector<8x32xbf16>
    %cst_123 = arith.constant dense<0.000000e+00> : vector<8x64xf32>
    %411 = tpu.matmul %410, %409, %cst_123 {dimension_numbers = #tpu.dot_dimension_numbers<[1], [0], [0], [1], [0, 0, 1, 1], [], []>} : vector<8x32xbf16>, vector<32x64xbf16>, vector<8x64xf32> -> vector<8x64xf32>
    %c168 = arith.constant 168 : index
    %c0_124 = arith.constant 0 : index
    %412 = vector.load %arg3[%c168, %c0_124] : memref<224x128xf32, #tpu.memory_space<vmem>>, vector<1x64xf32>
    %413 = vector.broadcast %412 : vector<1x64xf32> to vector<8x64xf32>
    %414 = arith.addf %411, %413 : vector<8x64xf32>
    %415 = vector.extract_strided_slice %186 {offsets = [0, 64], sizes = [16, 32], strides = [1, 1]} : vector<16x96xf32> to vector<16x32xf32>
    %416 = vector.extract_strided_slice %414 {offsets = [0, 0], sizes = [8, 32], strides = [1, 1]} : vector<8x64xf32> to vector<8x32xf32>
    %417 = vector.extract_strided_slice %414 {offsets = [0, 32], sizes = [8, 32], strides = [1, 1]} : vector<8x64xf32> to vector<8x32xf32>
    %c528 = arith.constant 528 : index
    %c0_125 = arith.constant 0 : index
    %418 = vector.load %arg2[%c528, %c0_125] : memref<720x128xbf16, #tpu.memory_space<vmem>>, vector<32x32xbf16>
    %419 = tpu.iota {dimensions = array<i32: 1>} : vector<16x8xi32>
    %c5_i32_126 = arith.constant 5 : i32
    %420 = vector.broadcast %c5_i32_126 : i32 to vector<16x8xi32>
    %421 = arith.cmpi slt, %419, %420 : vector<16x8xi32>
    %422 = vector.extract_strided_slice %415 {offsets = [0, 0], sizes = [16, 16], strides = [1, 1]} : vector<16x32xf32> to vector<16x16xf32>
    %423 = vector.extract_strided_slice %416 {offsets = [0, 0], sizes = [8, 16], strides = [1, 1]} : vector<8x32xf32> to vector<8x16xf32>
    %424 = arith.truncf %422 : vector<16x16xf32> to vector<16x16xbf16>
    %425 = arith.truncf %423 : vector<8x16xf32> to vector<8x16xbf16>
    %cst_127 = arith.constant dense<0.000000e+00> : vector<16x8xf32>
    %426 = tpu.matmul %424, %425, %cst_127 {dimension_numbers = #tpu.dot_dimension_numbers<[1], [1], [0], [0], [0, 0, 1, 0], [], []>} : vector<16x16xbf16>, vector<8x16xbf16>, vector<16x8xf32> -> vector<16x8xf32>
    %cst_128 = arith.constant 2.500000e-01 : f32
    %427 = vector.broadcast %cst_128 : f32 to vector<16x8xf32>
    %428 = arith.mulf %426, %427 : vector<16x8xf32>
    %cst_129 = arith.constant -1.000000e+30 : f32
    %429 = vector.broadcast %cst_129 : f32 to vector<16x8xf32>
    %430 = arith.select %421, %428, %429 : vector<16x8xi1>, vector<16x8xf32>
    %cst_130 = arith.constant dense<0xFF800000> : vector<16xf32>
    %431 = vector.multi_reduction <maximumf>, %430, %cst_130 [1] : vector<16x8xf32> to vector<16xf32>
    %432 = vector.shape_cast %431 : vector<16xf32> to vector<16x1xf32>
    %433 = vector.broadcast %432 : vector<16x1xf32> to vector<16x8xf32>
    %434 = arith.subf %430, %433 : vector<16x8xf32>
    %435 = math.exp %434 : vector<16x8xf32>
    %cst_131 = arith.constant dense<0.000000e+00> : vector<16xf32>
    %436 = vector.multi_reduction <add>, %435, %cst_131 [1] : vector<16x8xf32> to vector<16xf32>
    %437 = vector.shape_cast %436 : vector<16xf32> to vector<16x1xf32>
    %438 = tpu.reciprocal %437 {approx = true} : vector<16x1xf32> -> vector<16x1xf32>
    %439 = vector.broadcast %438 : vector<16x1xf32> to vector<16x8xf32>
    %440 = arith.mulf %435, %439 : vector<16x8xf32>
    %441 = vector.extract_strided_slice %417 {offsets = [0, 0], sizes = [8, 16], strides = [1, 1]} : vector<8x32xf32> to vector<8x16xf32>
    %442 = arith.truncf %440 : vector<16x8xf32> to vector<16x8xbf16>
    %443 = arith.truncf %441 : vector<8x16xf32> to vector<8x16xbf16>
    %cst_132 = arith.constant dense<0.000000e+00> : vector<16x16xf32>
    %444 = tpu.matmul %442, %443, %cst_132 {dimension_numbers = #tpu.dot_dimension_numbers<[1], [0], [0], [1], [0, 0, 1, 1], [], []>} : vector<16x8xbf16>, vector<8x16xbf16>, vector<16x16xf32> -> vector<16x16xf32>
    %445 = vector.extract_strided_slice %415 {offsets = [0, 16], sizes = [16, 16], strides = [1, 1]} : vector<16x32xf32> to vector<16x16xf32>
    %446 = vector.extract_strided_slice %416 {offsets = [0, 16], sizes = [8, 16], strides = [1, 1]} : vector<8x32xf32> to vector<8x16xf32>
    %447 = arith.truncf %445 : vector<16x16xf32> to vector<16x16xbf16>
    %448 = arith.truncf %446 : vector<8x16xf32> to vector<8x16xbf16>
    %cst_133 = arith.constant dense<0.000000e+00> : vector<16x8xf32>
    %449 = tpu.matmul %447, %448, %cst_133 {dimension_numbers = #tpu.dot_dimension_numbers<[1], [1], [0], [0], [0, 0, 1, 0], [], []>} : vector<16x16xbf16>, vector<8x16xbf16>, vector<16x8xf32> -> vector<16x8xf32>
    %cst_134 = arith.constant 2.500000e-01 : f32
    %450 = vector.broadcast %cst_134 : f32 to vector<16x8xf32>
    %451 = arith.mulf %449, %450 : vector<16x8xf32>
    %cst_135 = arith.constant -1.000000e+30 : f32
    %452 = vector.broadcast %cst_135 : f32 to vector<16x8xf32>
    %453 = arith.select %421, %451, %452 : vector<16x8xi1>, vector<16x8xf32>
    %cst_136 = arith.constant dense<0xFF800000> : vector<16xf32>
    %454 = vector.multi_reduction <maximumf>, %453, %cst_136 [1] : vector<16x8xf32> to vector<16xf32>
    %455 = vector.shape_cast %454 : vector<16xf32> to vector<16x1xf32>
    %456 = vector.broadcast %455 : vector<16x1xf32> to vector<16x8xf32>
    %457 = arith.subf %453, %456 : vector<16x8xf32>
    %458 = math.exp %457 : vector<16x8xf32>
    %cst_137 = arith.constant dense<0.000000e+00> : vector<16xf32>
    %459 = vector.multi_reduction <add>, %458, %cst_137 [1] : vector<16x8xf32> to vector<16xf32>
    %460 = vector.shape_cast %459 : vector<16xf32> to vector<16x1xf32>
    %461 = tpu.reciprocal %460 {approx = true} : vector<16x1xf32> -> vector<16x1xf32>
    %462 = vector.broadcast %461 : vector<16x1xf32> to vector<16x8xf32>
    %463 = arith.mulf %458, %462 : vector<16x8xf32>
    %464 = vector.extract_strided_slice %417 {offsets = [0, 16], sizes = [8, 16], strides = [1, 1]} : vector<8x32xf32> to vector<8x16xf32>
    %465 = arith.truncf %463 : vector<16x8xf32> to vector<16x8xbf16>
    %466 = arith.truncf %464 : vector<8x16xf32> to vector<8x16xbf16>
    %cst_138 = arith.constant dense<0.000000e+00> : vector<16x16xf32>
    %467 = tpu.matmul %465, %466, %cst_138 {dimension_numbers = #tpu.dot_dimension_numbers<[1], [0], [0], [1], [0, 0, 1, 1], [], []>} : vector<16x8xbf16>, vector<8x16xbf16>, vector<16x16xf32> -> vector<16x16xf32>
    %468 = tpu.concatenate %444, %467 in 1 : vector<16x16xf32>, vector<16x16xf32> -> vector<16x32xf32>
    %469 = arith.truncf %468 : vector<16x32xf32> to vector<16x32xbf16>
    %cst_139 = arith.constant dense<0.000000e+00> : vector<16x32xf32>
    %470 = tpu.matmul %469, %418, %cst_139 {dimension_numbers = #tpu.dot_dimension_numbers<[1], [0], [0], [1], [0, 0, 1, 1], [], []>} : vector<16x32xbf16>, vector<32x32xbf16>, vector<16x32xf32> -> vector<16x32xf32>
    %c176 = arith.constant 176 : index
    %c0_140 = arith.constant 0 : index
    %471 = vector.load %arg3[%c176, %c0_140] : memref<224x128xf32, #tpu.memory_space<vmem>>, vector<1x32xf32>
    %472 = vector.broadcast %471 : vector<1x32xf32> to vector<16x32xf32>
    %473 = arith.addf %470, %472 : vector<16x32xf32>
    %474 = arith.addf %177, %473 : vector<16x32xf32>
    %475 = vector.extract_strided_slice %0 {offsets = [6, 0], sizes = [1, 32], strides = [1, 1]} : vector<7x32xf32> to vector<1x32xf32>
    %476 = vector.extract_strided_slice %1 {offsets = [6, 0], sizes = [1, 32], strides = [1, 1]} : vector<7x32xf32> to vector<1x32xf32>
    %cst_141 = arith.constant dense<0.000000e+00> : vector<16xf32>
    %477 = vector.multi_reduction <add>, %474, %cst_141 [1] : vector<16x32xf32> to vector<16xf32>
    %478 = vector.shape_cast %477 : vector<16xf32> to vector<16x1xf32>
    %cst_142 = arith.constant 3.200000e+01 : f32
    %479 = vector.broadcast %cst_142 : f32 to vector<16x1xf32>
    %480 = arith.divf %478, %479 : vector<16x1xf32>
    %481 = vector.broadcast %480 : vector<16x1xf32> to vector<16x32xf32>
    %482 = arith.subf %474, %481 : vector<16x32xf32>
    %483 = arith.mulf %482, %482 : vector<16x32xf32>
    %cst_143 = arith.constant dense<0.000000e+00> : vector<16xf32>
    %484 = vector.multi_reduction <add>, %483, %cst_143 [1] : vector<16x32xf32> to vector<16xf32>
    %485 = vector.shape_cast %484 : vector<16xf32> to vector<16x1xf32>
    %cst_144 = arith.constant 3.200000e+01 : f32
    %486 = vector.broadcast %cst_144 : f32 to vector<16x1xf32>
    %487 = arith.divf %485, %486 : vector<16x1xf32>
    %488 = vector.broadcast %480 : vector<16x1xf32> to vector<16x32xf32>
    %489 = arith.subf %474, %488 : vector<16x32xf32>
    %cst_145 = arith.constant 9.99999997E-7 : f32
    %490 = vector.broadcast %cst_145 : f32 to vector<16x1xf32>
    %491 = arith.addf %487, %490 : vector<16x1xf32>
    %492 = math.rsqrt %491 : vector<16x1xf32>
    %493 = vector.broadcast %492 : vector<16x1xf32> to vector<16x32xf32>
    %494 = arith.mulf %489, %493 : vector<16x32xf32>
    %495 = vector.broadcast %475 : vector<1x32xf32> to vector<16x32xf32>
    %496 = arith.mulf %494, %495 : vector<16x32xf32>
    %497 = vector.broadcast %476 : vector<1x32xf32> to vector<16x32xf32>
    %498 = arith.addf %496, %497 : vector<16x32xf32>
    %499 = vector.extract_strided_slice %408 {offsets = [0, 0], sizes = [1, 32], strides = [1, 1]} : vector<8x32xf32> to vector<1x32xf32>
    %500 = vector.extract_strided_slice %408 {offsets = [1, 0], sizes = [1, 32], strides = [1, 1]} : vector<8x32xf32> to vector<1x32xf32>
    %c560 = arith.constant 560 : index
    %c0_146 = arith.constant 0 : index
    %501 = vector.load %arg2[%c560, %c0_146] : memref<720x128xbf16, #tpu.memory_space<vmem>>, vector<32x32xbf16>
    %502 = arith.truncf %499 : vector<1x32xf32> to vector<1x32xbf16>
    %cst_147 = arith.constant dense<0.000000e+00> : vector<1x32xf32>
    %503 = tpu.matmul %502, %501, %cst_147 {dimension_numbers = #tpu.dot_dimension_numbers<[1], [0], [0], [1], [0, 0, 1, 1], [], []>} : vector<1x32xbf16>, vector<32x32xbf16>, vector<1x32xf32> -> vector<1x32xf32>
    %c184 = arith.constant 184 : index
    %c0_148 = arith.constant 0 : index
    %504 = vector.load %arg3[%c184, %c0_148] : memref<224x128xf32, #tpu.memory_space<vmem>>, vector<1x32xf32>
    %505 = arith.addf %503, %504 : vector<1x32xf32>
    %cst_149 = arith.constant 0.000000e+00 : f32
    %506 = vector.broadcast %cst_149 : f32 to vector<1x32xf32>
    %507 = arith.maximumf %505, %506 : vector<1x32xf32>
    %c592 = arith.constant 592 : index
    %c0_150 = arith.constant 0 : index
    %508 = vector.load %arg2[%c592, %c0_150] : memref<720x128xbf16, #tpu.memory_space<vmem>>, vector<32x4xbf16>
    %509 = arith.truncf %507 : vector<1x32xf32> to vector<1x32xbf16>
    %cst_151 = arith.constant dense<0.000000e+00> : vector<1x4xf32>
    %510 = tpu.matmul %509, %508, %cst_151 {dimension_numbers = #tpu.dot_dimension_numbers<[1], [0], [0], [1], [0, 0, 1, 1], [], []>} : vector<1x32xbf16>, vector<32x4xbf16>, vector<1x4xf32> -> vector<1x4xf32>
    %c192 = arith.constant 192 : index
    %c0_152 = arith.constant 0 : index
    %511 = vector.load %arg3[%c192, %c0_152] : memref<224x128xf32, #tpu.memory_space<vmem>>, vector<1x4xf32>
    %512 = arith.addf %510, %511 : vector<1x4xf32>
    %c624 = arith.constant 624 : index
    %c0_153 = arith.constant 0 : index
    %513 = vector.load %arg2[%c624, %c0_153] : memref<720x128xbf16, #tpu.memory_space<vmem>>, vector<32x128xbf16>
    %514 = arith.truncf %498 : vector<16x32xf32> to vector<16x32xbf16>
    %cst_154 = arith.constant dense<0.000000e+00> : vector<16x128xf32>
    %515 = tpu.matmul %514, %513, %cst_154 {dimension_numbers = #tpu.dot_dimension_numbers<[1], [0], [0], [1], [0, 0, 1, 1], [], []>} : vector<16x32xbf16>, vector<32x128xbf16>, vector<16x128xf32> -> vector<16x128xf32>
    %c200 = arith.constant 200 : index
    %c0_155 = arith.constant 0 : index
    %516 = vector.load %arg3[%c200, %c0_155] : memref<224x128xf32, #tpu.memory_space<vmem>>, vector<1x128xf32>
    %517 = vector.broadcast %516 : vector<1x128xf32> to vector<16x128xf32>
    %518 = arith.addf %515, %517 : vector<16x128xf32>
    %519 = arith.mulf %518, %518 : vector<16x128xf32>
    %520 = arith.mulf %518, %519 : vector<16x128xf32>
    %cst_156 = arith.constant 4.471500e-02 : f32
    %521 = vector.broadcast %cst_156 : f32 to vector<16x128xf32>
    %522 = arith.mulf %521, %520 : vector<16x128xf32>
    %523 = arith.addf %518, %522 : vector<16x128xf32>
    %cst_157 = arith.constant 0.797884583 : f32
    %524 = vector.broadcast %cst_157 : f32 to vector<16x128xf32>
    %525 = arith.mulf %524, %523 : vector<16x128xf32>
    %526 = math.tanh %525 : vector<16x128xf32>
    %cst_158 = arith.constant 1.000000e+00 : f32
    %527 = vector.broadcast %cst_158 : f32 to vector<16x128xf32>
    %528 = arith.addf %527, %526 : vector<16x128xf32>
    %cst_159 = arith.constant 5.000000e-01 : f32
    %529 = vector.broadcast %cst_159 : f32 to vector<16x128xf32>
    %530 = arith.mulf %529, %528 : vector<16x128xf32>
    %531 = arith.mulf %518, %530 : vector<16x128xf32>
    %532 = arith.addf %500, %500 : vector<1x32xf32>
    %c656 = arith.constant 656 : index
    %c0_160 = arith.constant 0 : index
    %533 = vector.load %arg2[%c656, %c0_160] : memref<720x128xbf16, #tpu.memory_space<vmem>>, vector<32x32xbf16>
    %534 = arith.truncf %532 : vector<1x32xf32> to vector<1x32xbf16>
    %cst_161 = arith.constant dense<0.000000e+00> : vector<1x32xf32>
    %535 = tpu.matmul %534, %533, %cst_161 {dimension_numbers = #tpu.dot_dimension_numbers<[1], [0], [0], [1], [0, 0, 1, 1], [], []>} : vector<1x32xbf16>, vector<32x32xbf16>, vector<1x32xf32> -> vector<1x32xf32>
    %c208_162 = arith.constant 208 : index
    %c0_163 = arith.constant 0 : index
    %536 = vector.load %arg3[%c208_162, %c0_163] : memref<224x128xf32, #tpu.memory_space<vmem>>, vector<1x32xf32>
    %537 = arith.addf %535, %536 : vector<1x32xf32>
    %538 = arith.mulf %537, %537 : vector<1x32xf32>
    %539 = arith.mulf %537, %538 : vector<1x32xf32>
    %cst_164 = arith.constant 4.471500e-02 : f32
    %540 = vector.broadcast %cst_164 : f32 to vector<1x32xf32>
    %541 = arith.mulf %540, %539 : vector<1x32xf32>
    %542 = arith.addf %537, %541 : vector<1x32xf32>
    %cst_165 = arith.constant 0.797884583 : f32
    %543 = vector.broadcast %cst_165 : f32 to vector<1x32xf32>
    %544 = arith.mulf %543, %542 : vector<1x32xf32>
    %545 = math.tanh %544 : vector<1x32xf32>
    %cst_166 = arith.constant 1.000000e+00 : f32
    %546 = vector.broadcast %cst_166 : f32 to vector<1x32xf32>
    %547 = arith.addf %546, %545 : vector<1x32xf32>
    %cst_167 = arith.constant 5.000000e-01 : f32
    %548 = vector.broadcast %cst_167 : f32 to vector<1x32xf32>
    %549 = arith.mulf %548, %547 : vector<1x32xf32>
    %550 = arith.mulf %537, %549 : vector<1x32xf32>
    %c688 = arith.constant 688 : index
    %c0_168 = arith.constant 0 : index
    %551 = vector.load %arg2[%c688, %c0_168] : memref<720x128xbf16, #tpu.memory_space<vmem>>, vector<32x8xbf16>
    %552 = arith.truncf %550 : vector<1x32xf32> to vector<1x32xbf16>
    %cst_169 = arith.constant dense<0.000000e+00> : vector<1x8xf32>
    %553 = tpu.matmul %552, %551, %cst_169 {dimension_numbers = #tpu.dot_dimension_numbers<[1], [0], [0], [1], [0, 0, 1, 1], [], []>} : vector<1x32xbf16>, vector<32x8xbf16>, vector<1x8xf32> -> vector<1x8xf32>
    %c216 = arith.constant 216 : index
    %c0_170 = arith.constant 0 : index
    %554 = vector.load %arg3[%c216, %c0_170] : memref<224x128xf32, #tpu.memory_space<vmem>>, vector<1x8xf32>
    %555 = arith.addf %553, %554 : vector<1x8xf32>
    %cst_171 = arith.constant 0.000000e+00 : f32
    %556 = vector.broadcast %cst_171 : f32 to vector<1x116xf32>
    %557 = tpu.concatenate %512, %555, %556 in 1 : vector<1x4xf32>, vector<1x8xf32>, vector<1x116xf32> -> vector<1x128xf32>
    %cst_172 = arith.constant 0.000000e+00 : f32
    %558 = vector.broadcast %cst_172 : f32 to vector<7x128xf32>
    %559 = tpu.concatenate %531, %557, %558 in 0 : vector<16x128xf32>, vector<1x128xf32>, vector<7x128xf32> -> vector<24x128xf32>
    %c0_173 = arith.constant 0 : index
    %c0_174 = arith.constant 0 : index
    %c0_175 = arith.constant 0 : index
    %560 = vector.load %arg4[%c0_173, %c0_174, %c0_175] : memref<1x24x128xf32, #tpu.memory_space<vmem>>, vector<1x24x128xf32>
    %561 = vector.shape_cast %560 : vector<1x24x128xf32> to vector<24x128xf32>
    %562 = vector.shape_cast %559 : vector<24x128xf32> to vector<1x24x128xf32>
    tpu.vector_store %arg4[%c0_173, %c0_174, %c0_175], %562 {strides = array<i32>} : memref<1x24x128xf32, #tpu.memory_space<vmem>>, vector<1x24x128xf32>,
    return
  }
  func.func @transform_0(%arg0: i32) -> (i32, i32, i32) {
    %c0_i32 = arith.constant 0 : i32
    %c0_i32_0 = arith.constant 0 : i32
    %c0_i32_1 = arith.constant 0 : i32
    return %arg0, %c0_i32, %c0_i32_0 : i32, i32, i32
  }
  func.func @transform_1(%arg0: i32) -> (i32, i32) {
    %c0_i32 = arith.constant 0 : i32
    %c0_i32_0 = arith.constant 0 : i32
    %c0_i32_1 = arith.constant 0 : i32
    return %c0_i32, %c0_i32_0 : i32, i32
  }
  func.func @transform_2(%arg0: i32) -> (i32, i32) {
    %c0_i32 = arith.constant 0 : i32
    %c0_i32_0 = arith.constant 0 : i32
    %c0_i32_1 = arith.constant 0 : i32
    return %c0_i32, %c0_i32_0 : i32, i32
  }
  func.func @transform_3(%arg0: i32) -> (i32, i32, i32) {
    %c0_i32 = arith.constant 0 : i32
    %c0_i32_0 = arith.constant 0 : i32
    %c0_i32_1 = arith.constant 0 : i32
    return %arg0, %c0_i32, %c0_i32_0 : i32, i32, i32
  }
}

module attributes {stable_mosaic.version = 11 : i64} {
  func.func @_k2_kernel(%arg0: i32, %arg1: memref<1x32x256xf32, #tpu.memory_space<vmem>>, %arg2: memref<1x8x256xf32, #tpu.memory_space<vmem>>, %arg3: memref<1x1x8xf32, #tpu.memory_space<vmem>>, %arg4: memref<2384x256xbf16, #tpu.memory_space<vmem>>, %arg5: memref<1600x64xbf16, #tpu.memory_space<vmem>>, %arg6: memref<400x16xbf16, #tpu.memory_space<vmem>>, %arg7: memref<112x256xbf16, #tpu.memory_space<vmem>>, %arg8: memref<80x1xf32, #tpu.memory_space<vmem>>, %arg9: memref<1x1x256xf32, #tpu.memory_space<vmem>>) attributes {dimension_semantics = [#tpu.dimension_semantics<parallel>], iteration_bounds = array<i64: 2>, scalar_prefetch = 0 : i64, scratch_operands = 0 : i64, tpu.core_type = #tpu.core_type<tc>, window_params = [{transform_indices = @transform_0, window_bounds = array<i64: 1, 32, 256>}, {transform_indices = @transform_1, window_bounds = array<i64: 1, 8, 256>}, {transform_indices = @transform_2, window_bounds = array<i64: 1, 1, 8>}, {pipeline_mode = #tpu.pipeline_mode<synchronous>, transform_indices = @transform_3, window_bounds = array<i64: 2384, 256>}, {pipeline_mode = #tpu.pipeline_mode<synchronous>, transform_indices = @transform_4, window_bounds = array<i64: 1600, 64>}, {pipeline_mode = #tpu.pipeline_mode<synchronous>, transform_indices = @transform_5, window_bounds = array<i64: 400, 16>}, {pipeline_mode = #tpu.pipeline_mode<synchronous>, transform_indices = @transform_6, window_bounds = array<i64: 112, 256>}, {pipeline_mode = #tpu.pipeline_mode<synchronous>, transform_indices = @transform_7, window_bounds = array<i64: 80, 1>}, {transform_indices = @transform_8, window_bounds = array<i64: 1, 1, 256>}]} {
    %c0 = arith.constant 0 : index
    %c0_0 = arith.constant 0 : index
    %c0_1 = arith.constant 0 : index
    %0 = vector.load %arg1[%c0, %c0_0, %c0_1] : memref<1x32x256xf32, #tpu.memory_space<vmem>>, vector<1x32x256xf32>
    %1 = vector.shape_cast %0 : vector<1x32x256xf32> to vector<32x256xf32>
    %c0_2 = arith.constant 0 : index
    %c0_3 = arith.constant 0 : index
    %2 = vector.load %arg7[%c0_2, %c0_3] : memref<112x256xbf16, #tpu.memory_space<vmem>>, vector<8x32xbf16>
    %3 = arith.truncf %1 : vector<32x256xf32> to vector<32x256xbf16>
    %cst = arith.constant dense<0.000000e+00> : vector<8x256xf32>
    %4 = tpu.matmul %2, %3, %cst {dimension_numbers = #tpu.dot_dimension_numbers<[1], [0], [0], [1], [0, 0, 1, 1], [], []>} : vector<8x32xbf16>, vector<32x256xbf16>, vector<8x256xf32> -> vector<8x256xf32>
    %c0_4 = arith.constant 0 : index
    %c0_5 = arith.constant 0 : index
    %5 = vector.load %arg8[%c0_4, %c0_5] : memref<80x1xf32, #tpu.memory_space<vmem>>, vector<8x1xf32>
    %6 = vector.broadcast %5 : vector<8x1xf32> to vector<8x256xf32>
    %7 = arith.addf %4, %6 : vector<8x256xf32>
    %cst_6 = arith.constant 0.000000e+00 : f32
    %8 = vector.broadcast %cst_6 : f32 to vector<8x256xf32>
    %9 = arith.maximumf %7, %8 : vector<8x256xf32>
    %c0_7 = arith.constant 0 : index
    %c0_8 = arith.constant 0 : index
    %10 = vector.load %arg5[%c0_7, %c0_8] : memref<1600x64xbf16, #tpu.memory_space<vmem>>, vector<256x64xbf16>
    %11 = arith.truncf %9 : vector<8x256xf32> to vector<8x256xbf16>
    %cst_9 = arith.constant dense<0.000000e+00> : vector<8x64xf32>
    %12 = tpu.matmul %11, %10, %cst_9 {dimension_numbers = #tpu.dot_dimension_numbers<[1], [0], [0], [1], [0, 0, 1, 1], [], []>} : vector<8x256xbf16>, vector<256x64xbf16>, vector<8x64xf32> -> vector<8x64xf32>
    %c256 = arith.constant 256 : index
    %c0_10 = arith.constant 0 : index
    %13 = vector.load %arg5[%c256, %c0_10] : memref<1600x64xbf16, #tpu.memory_space<vmem>>, vector<256x64xbf16>
    %14 = arith.truncf %9 : vector<8x256xf32> to vector<8x256xbf16>
    %cst_11 = arith.constant dense<0.000000e+00> : vector<8x64xf32>
    %15 = tpu.matmul %14, %13, %cst_11 {dimension_numbers = #tpu.dot_dimension_numbers<[1], [0], [0], [1], [0, 0, 1, 1], [], []>} : vector<8x256xbf16>, vector<256x64xbf16>, vector<8x64xf32> -> vector<8x64xf32>
    %c512 = arith.constant 512 : index
    %c0_12 = arith.constant 0 : index
    %16 = vector.load %arg5[%c512, %c0_12] : memref<1600x64xbf16, #tpu.memory_space<vmem>>, vector<256x64xbf16>
    %17 = arith.truncf %9 : vector<8x256xf32> to vector<8x256xbf16>
    %cst_13 = arith.constant dense<0.000000e+00> : vector<8x64xf32>
    %18 = tpu.matmul %17, %16, %cst_13 {dimension_numbers = #tpu.dot_dimension_numbers<[1], [0], [0], [1], [0, 0, 1, 1], [], []>} : vector<8x256xbf16>, vector<256x64xbf16>, vector<8x64xf32> -> vector<8x64xf32>
    %c768 = arith.constant 768 : index
    %c0_14 = arith.constant 0 : index
    %19 = vector.load %arg5[%c768, %c0_14] : memref<1600x64xbf16, #tpu.memory_space<vmem>>, vector<256x64xbf16>
    %20 = arith.truncf %9 : vector<8x256xf32> to vector<8x256xbf16>
    %cst_15 = arith.constant dense<0.000000e+00> : vector<8x64xf32>
    %21 = tpu.matmul %20, %19, %cst_15 {dimension_numbers = #tpu.dot_dimension_numbers<[1], [0], [0], [1], [0, 0, 1, 1], [], []>} : vector<8x256xbf16>, vector<256x64xbf16>, vector<8x64xf32> -> vector<8x64xf32>
    %22 = arith.maximumf %12, %15 : vector<8x64xf32>
    %23 = arith.maximumf %22, %18 : vector<8x64xf32>
    %24 = arith.maximumf %23, %21 : vector<8x64xf32>
    %c1024 = arith.constant 1024 : index
    %c0_16 = arith.constant 0 : index
    %25 = vector.load %arg5[%c1024, %c0_16] : memref<1600x64xbf16, #tpu.memory_space<vmem>>, vector<64x64xbf16>
    %26 = arith.truncf %24 : vector<8x64xf32> to vector<8x64xbf16>
    %cst_17 = arith.constant dense<0.000000e+00> : vector<8x64xf32>
    %27 = tpu.matmul %26, %25, %cst_17 {dimension_numbers = #tpu.dot_dimension_numbers<[1], [0], [0], [1], [0, 0, 1, 1], [], []>} : vector<8x64xbf16>, vector<64x64xbf16>, vector<8x64xf32> -> vector<8x64xf32>
    %c1088 = arith.constant 1088 : index
    %c0_18 = arith.constant 0 : index
    %28 = vector.load %arg5[%c1088, %c0_18] : memref<1600x64xbf16, #tpu.memory_space<vmem>>, vector<64x64xbf16>
    %29 = arith.truncf %24 : vector<8x64xf32> to vector<8x64xbf16>
    %cst_19 = arith.constant dense<0.000000e+00> : vector<8x64xf32>
    %30 = tpu.matmul %29, %28, %cst_19 {dimension_numbers = #tpu.dot_dimension_numbers<[1], [0], [0], [1], [0, 0, 1, 1], [], []>} : vector<8x64xbf16>, vector<64x64xbf16>, vector<8x64xf32> -> vector<8x64xf32>
    %c1152 = arith.constant 1152 : index
    %c0_20 = arith.constant 0 : index
    %31 = vector.load %arg5[%c1152, %c0_20] : memref<1600x64xbf16, #tpu.memory_space<vmem>>, vector<64x64xbf16>
    %32 = arith.truncf %24 : vector<8x64xf32> to vector<8x64xbf16>
    %cst_21 = arith.constant dense<0.000000e+00> : vector<8x64xf32>
    %33 = tpu.matmul %32, %31, %cst_21 {dimension_numbers = #tpu.dot_dimension_numbers<[1], [0], [0], [1], [0, 0, 1, 1], [], []>} : vector<8x64xbf16>, vector<64x64xbf16>, vector<8x64xf32> -> vector<8x64xf32>
    %c1216 = arith.constant 1216 : index
    %c0_22 = arith.constant 0 : index
    %34 = vector.load %arg5[%c1216, %c0_22] : memref<1600x64xbf16, #tpu.memory_space<vmem>>, vector<64x64xbf16>
    %35 = arith.truncf %24 : vector<8x64xf32> to vector<8x64xbf16>
    %cst_23 = arith.constant dense<0.000000e+00> : vector<8x64xf32>
    %36 = tpu.matmul %35, %34, %cst_23 {dimension_numbers = #tpu.dot_dimension_numbers<[1], [0], [0], [1], [0, 0, 1, 1], [], []>} : vector<8x64xbf16>, vector<64x64xbf16>, vector<8x64xf32> -> vector<8x64xf32>
    %c1280 = arith.constant 1280 : index
    %c0_24 = arith.constant 0 : index
    %37 = vector.load %arg5[%c1280, %c0_24] : memref<1600x64xbf16, #tpu.memory_space<vmem>>, vector<64x64xbf16>
    %38 = arith.truncf %24 : vector<8x64xf32> to vector<8x64xbf16>
    %cst_25 = arith.constant dense<0.000000e+00> : vector<8x64xf32>
    %39 = tpu.matmul %38, %37, %cst_25 {dimension_numbers = #tpu.dot_dimension_numbers<[1], [0], [0], [1], [0, 0, 1, 1], [], []>} : vector<8x64xbf16>, vector<64x64xbf16>, vector<8x64xf32> -> vector<8x64xf32>
    %c1344 = arith.constant 1344 : index
    %c0_26 = arith.constant 0 : index
    %40 = vector.load %arg5[%c1344, %c0_26] : memref<1600x64xbf16, #tpu.memory_space<vmem>>, vector<64x64xbf16>
    %41 = arith.truncf %24 : vector<8x64xf32> to vector<8x64xbf16>
    %cst_27 = arith.constant dense<0.000000e+00> : vector<8x64xf32>
    %42 = tpu.matmul %41, %40, %cst_27 {dimension_numbers = #tpu.dot_dimension_numbers<[1], [0], [0], [1], [0, 0, 1, 1], [], []>} : vector<8x64xbf16>, vector<64x64xbf16>, vector<8x64xf32> -> vector<8x64xf32>
    %c1408 = arith.constant 1408 : index
    %c0_28 = arith.constant 0 : index
    %43 = vector.load %arg5[%c1408, %c0_28] : memref<1600x64xbf16, #tpu.memory_space<vmem>>, vector<64x64xbf16>
    %44 = arith.truncf %24 : vector<8x64xf32> to vector<8x64xbf16>
    %cst_29 = arith.constant dense<0.000000e+00> : vector<8x64xf32>
    %45 = tpu.matmul %44, %43, %cst_29 {dimension_numbers = #tpu.dot_dimension_numbers<[1], [0], [0], [1], [0, 0, 1, 1], [], []>} : vector<8x64xbf16>, vector<64x64xbf16>, vector<8x64xf32> -> vector<8x64xf32>
    %c1472 = arith.constant 1472 : index
    %c0_30 = arith.constant 0 : index
    %46 = vector.load %arg5[%c1472, %c0_30] : memref<1600x64xbf16, #tpu.memory_space<vmem>>, vector<64x64xbf16>
    %47 = arith.truncf %24 : vector<8x64xf32> to vector<8x64xbf16>
    %cst_31 = arith.constant dense<0.000000e+00> : vector<8x64xf32>
    %48 = tpu.matmul %47, %46, %cst_31 {dimension_numbers = #tpu.dot_dimension_numbers<[1], [0], [0], [1], [0, 0, 1, 1], [], []>} : vector<8x64xbf16>, vector<64x64xbf16>, vector<8x64xf32> -> vector<8x64xf32>
    %c1536 = arith.constant 1536 : index
    %c0_32 = arith.constant 0 : index
    %49 = vector.load %arg5[%c1536, %c0_32] : memref<1600x64xbf16, #tpu.memory_space<vmem>>, vector<64x64xbf16>
    %50 = arith.truncf %24 : vector<8x64xf32> to vector<8x64xbf16>
    %cst_33 = arith.constant dense<0.000000e+00> : vector<8x64xf32>
    %51 = tpu.matmul %50, %49, %cst_33 {dimension_numbers = #tpu.dot_dimension_numbers<[1], [0], [0], [1], [0, 0, 1, 1], [], []>} : vector<8x64xbf16>, vector<64x64xbf16>, vector<8x64xf32> -> vector<8x64xf32>
    %52 = tpu.concatenate %27, %30, %33, %36, %39, %42, %45, %48, %51 in 0 : vector<8x64xf32>, vector<8x64xf32>, vector<8x64xf32>, vector<8x64xf32>, vector<8x64xf32>, vector<8x64xf32>, vector<8x64xf32>, vector<8x64xf32>, vector<8x64xf32> -> vector<72x64xf32>
    %c16 = arith.constant 16 : index
    %c0_34 = arith.constant 0 : index
    %53 = vector.load %arg7[%c16, %c0_34] : memref<112x256xbf16, #tpu.memory_space<vmem>>, vector<16x72xbf16>
    %54 = arith.truncf %52 : vector<72x64xf32> to vector<72x64xbf16>
    %cst_35 = arith.constant dense<0.000000e+00> : vector<16x64xf32>
    %55 = tpu.matmul %53, %54, %cst_35 {dimension_numbers = #tpu.dot_dimension_numbers<[1], [0], [0], [1], [0, 0, 1, 1], [], []>} : vector<16x72xbf16>, vector<72x64xbf16>, vector<16x64xf32> -> vector<16x64xf32>
    %c8 = arith.constant 8 : index
    %c0_36 = arith.constant 0 : index
    %56 = vector.load %arg8[%c8, %c0_36] : memref<80x1xf32, #tpu.memory_space<vmem>>, vector<16x1xf32>
    %57 = vector.broadcast %56 : vector<16x1xf32> to vector<16x64xf32>
    %58 = arith.addf %55, %57 : vector<16x64xf32>
    %cst_37 = arith.constant 0.000000e+00 : f32
    %59 = vector.broadcast %cst_37 : f32 to vector<16x64xf32>
    %60 = arith.maximumf %58, %59 : vector<16x64xf32>
    %c0_38 = arith.constant 0 : index
    %c0_39 = arith.constant 0 : index
    %61 = vector.load %arg6[%c0_38, %c0_39] : memref<400x16xbf16, #tpu.memory_space<vmem>>, vector<64x16xbf16>
    %62 = arith.truncf %60 : vector<16x64xf32> to vector<16x64xbf16>
    %cst_40 = arith.constant dense<0.000000e+00> : vector<16x16xf32>
    %63 = tpu.matmul %62, %61, %cst_40 {dimension_numbers = #tpu.dot_dimension_numbers<[1], [0], [0], [1], [0, 0, 1, 1], [], []>} : vector<16x64xbf16>, vector<64x16xbf16>, vector<16x16xf32> -> vector<16x16xf32>
    %c64 = arith.constant 64 : index
    %c0_41 = arith.constant 0 : index
    %64 = vector.load %arg6[%c64, %c0_41] : memref<400x16xbf16, #tpu.memory_space<vmem>>, vector<64x16xbf16>
    %65 = arith.truncf %60 : vector<16x64xf32> to vector<16x64xbf16>
    %cst_42 = arith.constant dense<0.000000e+00> : vector<16x16xf32>
    %66 = tpu.matmul %65, %64, %cst_42 {dimension_numbers = #tpu.dot_dimension_numbers<[1], [0], [0], [1], [0, 0, 1, 1], [], []>} : vector<16x64xbf16>, vector<64x16xbf16>, vector<16x16xf32> -> vector<16x16xf32>
    %c128 = arith.constant 128 : index
    %c0_43 = arith.constant 0 : index
    %67 = vector.load %arg6[%c128, %c0_43] : memref<400x16xbf16, #tpu.memory_space<vmem>>, vector<64x16xbf16>
    %68 = arith.truncf %60 : vector<16x64xf32> to vector<16x64xbf16>
    %cst_44 = arith.constant dense<0.000000e+00> : vector<16x16xf32>
    %69 = tpu.matmul %68, %67, %cst_44 {dimension_numbers = #tpu.dot_dimension_numbers<[1], [0], [0], [1], [0, 0, 1, 1], [], []>} : vector<16x64xbf16>, vector<64x16xbf16>, vector<16x16xf32> -> vector<16x16xf32>
    %c192 = arith.constant 192 : index
    %c0_45 = arith.constant 0 : index
    %70 = vector.load %arg6[%c192, %c0_45] : memref<400x16xbf16, #tpu.memory_space<vmem>>, vector<64x16xbf16>
    %71 = arith.truncf %60 : vector<16x64xf32> to vector<16x64xbf16>
    %cst_46 = arith.constant dense<0.000000e+00> : vector<16x16xf32>
    %72 = tpu.matmul %71, %70, %cst_46 {dimension_numbers = #tpu.dot_dimension_numbers<[1], [0], [0], [1], [0, 0, 1, 1], [], []>} : vector<16x64xbf16>, vector<64x16xbf16>, vector<16x16xf32> -> vector<16x16xf32>
    %73 = arith.maximumf %63, %66 : vector<16x16xf32>
    %74 = arith.maximumf %73, %69 : vector<16x16xf32>
    %75 = arith.maximumf %74, %72 : vector<16x16xf32>
    %c256_47 = arith.constant 256 : index
    %c0_48 = arith.constant 0 : index
    %76 = vector.load %arg6[%c256_47, %c0_48] : memref<400x16xbf16, #tpu.memory_space<vmem>>, vector<16x16xbf16>
    %77 = arith.truncf %75 : vector<16x16xf32> to vector<16x16xbf16>
    %cst_49 = arith.constant dense<0.000000e+00> : vector<16x16xf32>
    %78 = tpu.matmul %77, %76, %cst_49 {dimension_numbers = #tpu.dot_dimension_numbers<[1], [0], [0], [1], [0, 0, 1, 1], [], []>} : vector<16x16xbf16>, vector<16x16xbf16>, vector<16x16xf32> -> vector<16x16xf32>
    %c272 = arith.constant 272 : index
    %c0_50 = arith.constant 0 : index
    %79 = vector.load %arg6[%c272, %c0_50] : memref<400x16xbf16, #tpu.memory_space<vmem>>, vector<16x16xbf16>
    %80 = arith.truncf %75 : vector<16x16xf32> to vector<16x16xbf16>
    %cst_51 = arith.constant dense<0.000000e+00> : vector<16x16xf32>
    %81 = tpu.matmul %80, %79, %cst_51 {dimension_numbers = #tpu.dot_dimension_numbers<[1], [0], [0], [1], [0, 0, 1, 1], [], []>} : vector<16x16xbf16>, vector<16x16xbf16>, vector<16x16xf32> -> vector<16x16xf32>
    %c288 = arith.constant 288 : index
    %c0_52 = arith.constant 0 : index
    %82 = vector.load %arg6[%c288, %c0_52] : memref<400x16xbf16, #tpu.memory_space<vmem>>, vector<16x16xbf16>
    %83 = arith.truncf %75 : vector<16x16xf32> to vector<16x16xbf16>
    %cst_53 = arith.constant dense<0.000000e+00> : vector<16x16xf32>
    %84 = tpu.matmul %83, %82, %cst_53 {dimension_numbers = #tpu.dot_dimension_numbers<[1], [0], [0], [1], [0, 0, 1, 1], [], []>} : vector<16x16xbf16>, vector<16x16xbf16>, vector<16x16xf32> -> vector<16x16xf32>
    %c304 = arith.constant 304 : index
    %c0_54 = arith.constant 0 : index
    %85 = vector.load %arg6[%c304, %c0_54] : memref<400x16xbf16, #tpu.memory_space<vmem>>, vector<16x16xbf16>
    %86 = arith.truncf %75 : vector<16x16xf32> to vector<16x16xbf16>
    %cst_55 = arith.constant dense<0.000000e+00> : vector<16x16xf32>
    %87 = tpu.matmul %86, %85, %cst_55 {dimension_numbers = #tpu.dot_dimension_numbers<[1], [0], [0], [1], [0, 0, 1, 1], [], []>} : vector<16x16xbf16>, vector<16x16xbf16>, vector<16x16xf32> -> vector<16x16xf32>
    %c320 = arith.constant 320 : index
    %c0_56 = arith.constant 0 : index
    %88 = vector.load %arg6[%c320, %c0_56] : memref<400x16xbf16, #tpu.memory_space<vmem>>, vector<16x16xbf16>
    %89 = arith.truncf %75 : vector<16x16xf32> to vector<16x16xbf16>
    %cst_57 = arith.constant dense<0.000000e+00> : vector<16x16xf32>
    %90 = tpu.matmul %89, %88, %cst_57 {dimension_numbers = #tpu.dot_dimension_numbers<[1], [0], [0], [1], [0, 0, 1, 1], [], []>} : vector<16x16xbf16>, vector<16x16xbf16>, vector<16x16xf32> -> vector<16x16xf32>
    %c336 = arith.constant 336 : index
    %c0_58 = arith.constant 0 : index
    %91 = vector.load %arg6[%c336, %c0_58] : memref<400x16xbf16, #tpu.memory_space<vmem>>, vector<16x16xbf16>
    %92 = arith.truncf %75 : vector<16x16xf32> to vector<16x16xbf16>
    %cst_59 = arith.constant dense<0.000000e+00> : vector<16x16xf32>
    %93 = tpu.matmul %92, %91, %cst_59 {dimension_numbers = #tpu.dot_dimension_numbers<[1], [0], [0], [1], [0, 0, 1, 1], [], []>} : vector<16x16xbf16>, vector<16x16xbf16>, vector<16x16xf32> -> vector<16x16xf32>
    %c352 = arith.constant 352 : index
    %c0_60 = arith.constant 0 : index
    %94 = vector.load %arg6[%c352, %c0_60] : memref<400x16xbf16, #tpu.memory_space<vmem>>, vector<16x16xbf16>
    %95 = arith.truncf %75 : vector<16x16xf32> to vector<16x16xbf16>
    %cst_61 = arith.constant dense<0.000000e+00> : vector<16x16xf32>
    %96 = tpu.matmul %95, %94, %cst_61 {dimension_numbers = #tpu.dot_dimension_numbers<[1], [0], [0], [1], [0, 0, 1, 1], [], []>} : vector<16x16xbf16>, vector<16x16xbf16>, vector<16x16xf32> -> vector<16x16xf32>
    %c368 = arith.constant 368 : index
    %c0_62 = arith.constant 0 : index
    %97 = vector.load %arg6[%c368, %c0_62] : memref<400x16xbf16, #tpu.memory_space<vmem>>, vector<16x16xbf16>
    %98 = arith.truncf %75 : vector<16x16xf32> to vector<16x16xbf16>
    %cst_63 = arith.constant dense<0.000000e+00> : vector<16x16xf32>
    %99 = tpu.matmul %98, %97, %cst_63 {dimension_numbers = #tpu.dot_dimension_numbers<[1], [0], [0], [1], [0, 0, 1, 1], [], []>} : vector<16x16xbf16>, vector<16x16xbf16>, vector<16x16xf32> -> vector<16x16xf32>
    %c384 = arith.constant 384 : index
    %c0_64 = arith.constant 0 : index
    %100 = vector.load %arg6[%c384, %c0_64] : memref<400x16xbf16, #tpu.memory_space<vmem>>, vector<16x16xbf16>
    %101 = arith.truncf %75 : vector<16x16xf32> to vector<16x16xbf16>
    %cst_65 = arith.constant dense<0.000000e+00> : vector<16x16xf32>
    %102 = tpu.matmul %101, %100, %cst_65 {dimension_numbers = #tpu.dot_dimension_numbers<[1], [0], [0], [1], [0, 0, 1, 1], [], []>} : vector<16x16xbf16>, vector<16x16xbf16>, vector<16x16xf32> -> vector<16x16xf32>
    %103 = tpu.concatenate %78, %81, %84, %87, %90, %93, %96, %99, %102 in 0 : vector<16x16xf32>, vector<16x16xf32>, vector<16x16xf32>, vector<16x16xf32>, vector<16x16xf32>, vector<16x16xf32>, vector<16x16xf32>, vector<16x16xf32>, vector<16x16xf32> -> vector<144x16xf32>
    %c32 = arith.constant 32 : index
    %c0_66 = arith.constant 0 : index
    %104 = vector.load %arg7[%c32, %c0_66] : memref<112x256xbf16, #tpu.memory_space<vmem>>, vector<32x144xbf16>
    %105 = arith.truncf %103 : vector<144x16xf32> to vector<144x16xbf16>
    %cst_67 = arith.constant dense<0.000000e+00> : vector<32x16xf32>
    %106 = tpu.matmul %104, %105, %cst_67 {dimension_numbers = #tpu.dot_dimension_numbers<[1], [0], [0], [1], [0, 0, 1, 1], [], []>} : vector<32x144xbf16>, vector<144x16xbf16>, vector<32x16xf32> -> vector<32x16xf32>
    %c24 = arith.constant 24 : index
    %c0_68 = arith.constant 0 : index
    %107 = vector.load %arg8[%c24, %c0_68] : memref<80x1xf32, #tpu.memory_space<vmem>>, vector<32x1xf32>
    %108 = vector.broadcast %107 : vector<32x1xf32> to vector<32x16xf32>
    %109 = arith.addf %106, %108 : vector<32x16xf32>
    %cst_69 = arith.constant 0.000000e+00 : f32
    %110 = vector.broadcast %cst_69 : f32 to vector<32x16xf32>
    %111 = arith.maximumf %109, %110 : vector<32x16xf32>
    %c2304 = arith.constant 2304 : index
    %c0_70 = arith.constant 0 : index
    %112 = vector.load %arg4[%c2304, %c0_70] : memref<2384x256xbf16, #tpu.memory_space<vmem>>, vector<64x256xbf16>
    %113 = arith.truncf %60 : vector<16x64xf32> to vector<16x64xbf16>
    %cst_71 = arith.constant dense<0.000000e+00> : vector<16x256xf32>
    %114 = tpu.matmul %113, %112, %cst_71 {dimension_numbers = #tpu.dot_dimension_numbers<[1], [0], [0], [1], [0, 0, 1, 1], [], []>} : vector<16x64xbf16>, vector<64x256xbf16>, vector<16x256xf32> -> vector<16x256xf32>
    %c2368 = arith.constant 2368 : index
    %c0_72 = arith.constant 0 : index
    %115 = vector.load %arg4[%c2368, %c0_72] : memref<2384x256xbf16, #tpu.memory_space<vmem>>, vector<16x256xbf16>
    %116 = arith.truncf %111 : vector<32x16xf32> to vector<32x16xbf16>
    %cst_73 = arith.constant dense<0.000000e+00> : vector<32x256xf32>
    %117 = tpu.matmul %116, %115, %cst_73 {dimension_numbers = #tpu.dot_dimension_numbers<[1], [0], [0], [1], [0, 0, 1, 1], [], []>} : vector<32x16xbf16>, vector<16x256xbf16>, vector<32x256xf32> -> vector<32x256xf32>
    %c0_74 = arith.constant 0 : index
    %c0_75 = arith.constant 0 : index
    %c0_76 = arith.constant 0 : index
    %118 = vector.load %arg2[%c0_74, %c0_75, %c0_76] : memref<1x8x256xf32, #tpu.memory_space<vmem>>, vector<1x8x256xf32>
    %119 = vector.shape_cast %118 : vector<1x8x256xf32> to vector<8x256xf32>
    %120 = tpu.concatenate %119, %9 in 0 : vector<8x256xf32>, vector<8x256xf32> -> vector<16x256xf32>
    %c0_77 = arith.constant 0 : index
    %c0_78 = arith.constant 0 : index
    %121 = vector.load %arg4[%c0_77, %c0_78] : memref<2384x256xbf16, #tpu.memory_space<vmem>>, vector<256x256xbf16>
    %122 = arith.truncf %120 : vector<16x256xf32> to vector<16x256xbf16>
    %cst_79 = arith.constant dense<0.000000e+00> : vector<16x256xf32>
    %123 = tpu.matmul %122, %121, %cst_79 {dimension_numbers = #tpu.dot_dimension_numbers<[1], [0], [0], [1], [0, 0, 1, 1], [], []>} : vector<16x256xbf16>, vector<256x256xbf16>, vector<16x256xf32> -> vector<16x256xf32>
    %c256_80 = arith.constant 256 : index
    %c0_81 = arith.constant 0 : index
    %124 = vector.load %arg4[%c256_80, %c0_81] : memref<2384x256xbf16, #tpu.memory_space<vmem>>, vector<256x256xbf16>
    %125 = arith.truncf %120 : vector<16x256xf32> to vector<16x256xbf16>
    %cst_82 = arith.constant dense<0.000000e+00> : vector<16x256xf32>
    %126 = tpu.matmul %125, %124, %cst_82 {dimension_numbers = #tpu.dot_dimension_numbers<[1], [0], [0], [1], [0, 0, 1, 1], [], []>} : vector<16x256xbf16>, vector<256x256xbf16>, vector<16x256xf32> -> vector<16x256xf32>
    %c512_83 = arith.constant 512 : index
    %c0_84 = arith.constant 0 : index
    %127 = vector.load %arg4[%c512_83, %c0_84] : memref<2384x256xbf16, #tpu.memory_space<vmem>>, vector<256x256xbf16>
    %128 = arith.truncf %120 : vector<16x256xf32> to vector<16x256xbf16>
    %cst_85 = arith.constant dense<0.000000e+00> : vector<16x256xf32>
    %129 = tpu.matmul %128, %127, %cst_85 {dimension_numbers = #tpu.dot_dimension_numbers<[1], [0], [0], [1], [0, 0, 1, 1], [], []>} : vector<16x256xbf16>, vector<256x256xbf16>, vector<16x256xf32> -> vector<16x256xf32>
    %c768_86 = arith.constant 768 : index
    %c0_87 = arith.constant 0 : index
    %130 = vector.load %arg4[%c768_86, %c0_87] : memref<2384x256xbf16, #tpu.memory_space<vmem>>, vector<256x256xbf16>
    %131 = arith.truncf %120 : vector<16x256xf32> to vector<16x256xbf16>
    %cst_88 = arith.constant dense<0.000000e+00> : vector<16x256xf32>
    %132 = tpu.matmul %131, %130, %cst_88 {dimension_numbers = #tpu.dot_dimension_numbers<[1], [0], [0], [1], [0, 0, 1, 1], [], []>} : vector<16x256xbf16>, vector<256x256xbf16>, vector<16x256xf32> -> vector<16x256xf32>
    %c1024_89 = arith.constant 1024 : index
    %c0_90 = arith.constant 0 : index
    %133 = vector.load %arg4[%c1024_89, %c0_90] : memref<2384x256xbf16, #tpu.memory_space<vmem>>, vector<256x256xbf16>
    %134 = arith.truncf %120 : vector<16x256xf32> to vector<16x256xbf16>
    %cst_91 = arith.constant dense<0.000000e+00> : vector<16x256xf32>
    %135 = tpu.matmul %134, %133, %cst_91 {dimension_numbers = #tpu.dot_dimension_numbers<[1], [0], [0], [1], [0, 0, 1, 1], [], []>} : vector<16x256xbf16>, vector<256x256xbf16>, vector<16x256xf32> -> vector<16x256xf32>
    %c1280_92 = arith.constant 1280 : index
    %c0_93 = arith.constant 0 : index
    %136 = vector.load %arg4[%c1280_92, %c0_93] : memref<2384x256xbf16, #tpu.memory_space<vmem>>, vector<256x256xbf16>
    %137 = arith.truncf %120 : vector<16x256xf32> to vector<16x256xbf16>
    %cst_94 = arith.constant dense<0.000000e+00> : vector<16x256xf32>
    %138 = tpu.matmul %137, %136, %cst_94 {dimension_numbers = #tpu.dot_dimension_numbers<[1], [0], [0], [1], [0, 0, 1, 1], [], []>} : vector<16x256xbf16>, vector<256x256xbf16>, vector<16x256xf32> -> vector<16x256xf32>
    %c1536_95 = arith.constant 1536 : index
    %c0_96 = arith.constant 0 : index
    %139 = vector.load %arg4[%c1536_95, %c0_96] : memref<2384x256xbf16, #tpu.memory_space<vmem>>, vector<256x256xbf16>
    %140 = arith.truncf %120 : vector<16x256xf32> to vector<16x256xbf16>
    %cst_97 = arith.constant dense<0.000000e+00> : vector<16x256xf32>
    %141 = tpu.matmul %140, %139, %cst_97 {dimension_numbers = #tpu.dot_dimension_numbers<[1], [0], [0], [1], [0, 0, 1, 1], [], []>} : vector<16x256xbf16>, vector<256x256xbf16>, vector<16x256xf32> -> vector<16x256xf32>
    %c1792 = arith.constant 1792 : index
    %c0_98 = arith.constant 0 : index
    %142 = vector.load %arg4[%c1792, %c0_98] : memref<2384x256xbf16, #tpu.memory_space<vmem>>, vector<256x256xbf16>
    %143 = arith.truncf %120 : vector<16x256xf32> to vector<16x256xbf16>
    %cst_99 = arith.constant dense<0.000000e+00> : vector<16x256xf32>
    %144 = tpu.matmul %143, %142, %cst_99 {dimension_numbers = #tpu.dot_dimension_numbers<[1], [0], [0], [1], [0, 0, 1, 1], [], []>} : vector<16x256xbf16>, vector<256x256xbf16>, vector<16x256xf32> -> vector<16x256xf32>
    %c2048 = arith.constant 2048 : index
    %c0_100 = arith.constant 0 : index
    %145 = vector.load %arg4[%c2048, %c0_100] : memref<2384x256xbf16, #tpu.memory_space<vmem>>, vector<256x256xbf16>
    %146 = arith.truncf %120 : vector<16x256xf32> to vector<16x256xbf16>
    %cst_101 = arith.constant dense<0.000000e+00> : vector<16x256xf32>
    %147 = tpu.matmul %146, %145, %cst_101 {dimension_numbers = #tpu.dot_dimension_numbers<[1], [0], [0], [1], [0, 0, 1, 1], [], []>} : vector<16x256xbf16>, vector<256x256xbf16>, vector<16x256xf32> -> vector<16x256xf32>
    %148 = tpu.concatenate %123, %126, %129, %132, %135, %138, %141, %144, %147 in 0 : vector<16x256xf32>, vector<16x256xf32>, vector<16x256xf32>, vector<16x256xf32>, vector<16x256xf32>, vector<16x256xf32>, vector<16x256xf32>, vector<16x256xf32>, vector<16x256xf32> -> vector<144x256xf32>
    %c64_102 = arith.constant 64 : index
    %c0_103 = arith.constant 0 : index
    %149 = vector.load %arg7[%c64_102, %c0_103] : memref<112x256xbf16, #tpu.memory_space<vmem>>, vector<8x144xbf16>
    %150 = arith.truncf %148 : vector<144x256xf32> to vector<144x256xbf16>
    %cst_104 = arith.constant dense<0.000000e+00> : vector<8x256xf32>
    %151 = tpu.matmul %149, %150, %cst_104 {dimension_numbers = #tpu.dot_dimension_numbers<[1], [0], [0], [1], [0, 0, 1, 1], [], []>} : vector<8x144xbf16>, vector<144x256xbf16>, vector<8x256xf32> -> vector<8x256xf32>
    %c56 = arith.constant 56 : index
    %c0_105 = arith.constant 0 : index
    %152 = vector.load %arg8[%c56, %c0_105] : memref<80x1xf32, #tpu.memory_space<vmem>>, vector<8x1xf32>
    %153 = vector.broadcast %152 : vector<8x1xf32> to vector<8x256xf32>
    %154 = arith.addf %151, %153 : vector<8x256xf32>
    %cst_106 = arith.constant 0.000000e+00 : f32
    %155 = vector.broadcast %cst_106 : f32 to vector<8x256xf32>
    %156 = arith.maximumf %154, %155 : vector<8x256xf32>
    %c80 = arith.constant 80 : index
    %c0_107 = arith.constant 0 : index
    %157 = vector.load %arg7[%c80, %c0_107] : memref<112x256xbf16, #tpu.memory_space<vmem>>, vector<8x16xbf16>
    %158 = arith.truncf %114 : vector<16x256xf32> to vector<16x256xbf16>
    %cst_108 = arith.constant dense<0.000000e+00> : vector<8x256xf32>
    %159 = tpu.matmul %157, %158, %cst_108 {dimension_numbers = #tpu.dot_dimension_numbers<[1], [0], [0], [1], [0, 0, 1, 1], [], []>} : vector<8x16xbf16>, vector<16x256xbf16>, vector<8x256xf32> -> vector<8x256xf32>
    %160 = arith.addf %156, %159 : vector<8x256xf32>
    %c64_109 = arith.constant 64 : index
    %c0_110 = arith.constant 0 : index
    %161 = vector.load %arg8[%c64_109, %c0_110] : memref<80x1xf32, #tpu.memory_space<vmem>>, vector<8x1xf32>
    %162 = vector.broadcast %161 : vector<8x1xf32> to vector<8x256xf32>
    %163 = arith.addf %160, %162 : vector<8x256xf32>
    %c96 = arith.constant 96 : index
    %c0_111 = arith.constant 0 : index
    %164 = vector.load %arg7[%c96, %c0_111] : memref<112x256xbf16, #tpu.memory_space<vmem>>, vector<8x32xbf16>
    %165 = arith.truncf %117 : vector<32x256xf32> to vector<32x256xbf16>
    %cst_112 = arith.constant dense<0.000000e+00> : vector<8x256xf32>
    %166 = tpu.matmul %164, %165, %cst_112 {dimension_numbers = #tpu.dot_dimension_numbers<[1], [0], [0], [1], [0, 0, 1, 1], [], []>} : vector<8x32xbf16>, vector<32x256xbf16>, vector<8x256xf32> -> vector<8x256xf32>
    %167 = arith.addf %163, %166 : vector<8x256xf32>
    %c72 = arith.constant 72 : index
    %c0_113 = arith.constant 0 : index
    %168 = vector.load %arg8[%c72, %c0_113] : memref<80x1xf32, #tpu.memory_space<vmem>>, vector<8x1xf32>
    %169 = vector.broadcast %168 : vector<8x1xf32> to vector<8x256xf32>
    %170 = arith.addf %167, %169 : vector<8x256xf32>
    %cst_114 = arith.constant 0.000000e+00 : f32
    %171 = vector.broadcast %cst_114 : f32 to vector<8x256xf32>
    %172 = arith.maximumf %170, %171 : vector<8x256xf32>
    %c0_115 = arith.constant 0 : index
    %c0_116 = arith.constant 0 : index
    %c0_117 = arith.constant 0 : index
    %173 = vector.load %arg3[%c0_115, %c0_116, %c0_117] : memref<1x1x8xf32, #tpu.memory_space<vmem>>, vector<1x1x8xf32>
    %174 = vector.shape_cast %173 : vector<1x1x8xf32> to vector<1x8xf32>
    %175 = arith.truncf %174 : vector<1x8xf32> to vector<1x8xbf16>
    %176 = arith.truncf %172 : vector<8x256xf32> to vector<8x256xbf16>
    %cst_118 = arith.constant dense<0.000000e+00> : vector<1x256xf32>
    %177 = tpu.matmul %175, %176, %cst_118 {dimension_numbers = #tpu.dot_dimension_numbers<[1], [0], [0], [1], [0, 0, 1, 1], [], []>} : vector<1x8xbf16>, vector<8x256xbf16>, vector<1x256xf32> -> vector<1x256xf32>
    %c0_119 = arith.constant 0 : index
    %c0_120 = arith.constant 0 : index
    %c0_121 = arith.constant 0 : index
    %178 = vector.load %arg9[%c0_119, %c0_120, %c0_121] : memref<1x1x256xf32, #tpu.memory_space<vmem>>, vector<1x1x256xf32>
    %179 = vector.shape_cast %178 : vector<1x1x256xf32> to vector<1x256xf32>
    %180 = vector.shape_cast %177 : vector<1x256xf32> to vector<1x1x256xf32>
    tpu.vector_store %arg9[%c0_119, %c0_120, %c0_121], %180 {strides = array<i32>} : memref<1x1x256xf32, #tpu.memory_space<vmem>>, vector<1x1x256xf32>,
    return
  }
  func.func @transform_0(%arg0: i32) -> (i32, i32, i32) {
    %c0_i32 = arith.constant 0 : i32
    %c0_i32_0 = arith.constant 0 : i32
    %c0_i32_1 = arith.constant 0 : i32
    return %arg0, %c0_i32, %c0_i32_0 : i32, i32, i32
  }
  func.func @transform_1(%arg0: i32) -> (i32, i32, i32) {
    %c0_i32 = arith.constant 0 : i32
    %c0_i32_0 = arith.constant 0 : i32
    %c0_i32_1 = arith.constant 0 : i32
    return %arg0, %c0_i32, %c0_i32_0 : i32, i32, i32
  }
  func.func @transform_2(%arg0: i32) -> (i32, i32, i32) {
    %c0_i32 = arith.constant 0 : i32
    %c0_i32_0 = arith.constant 0 : i32
    %c0_i32_1 = arith.constant 0 : i32
    return %arg0, %c0_i32, %c0_i32_0 : i32, i32, i32
  }
  func.func @transform_3(%arg0: i32) -> (i32, i32) {
    %c0_i32 = arith.constant 0 : i32
    %c0_i32_0 = arith.constant 0 : i32
    %c0_i32_1 = arith.constant 0 : i32
    return %c0_i32, %c0_i32_0 : i32, i32
  }
  func.func @transform_4(%arg0: i32) -> (i32, i32) {
    %c0_i32 = arith.constant 0 : i32
    %c0_i32_0 = arith.constant 0 : i32
    %c0_i32_1 = arith.constant 0 : i32
    return %c0_i32, %c0_i32_0 : i32, i32
  }
  func.func @transform_5(%arg0: i32) -> (i32, i32) {
    %c0_i32 = arith.constant 0 : i32
    %c0_i32_0 = arith.constant 0 : i32
    %c0_i32_1 = arith.constant 0 : i32
    return %c0_i32, %c0_i32_0 : i32, i32
  }
  func.func @transform_6(%arg0: i32) -> (i32, i32) {
    %c0_i32 = arith.constant 0 : i32
    %c0_i32_0 = arith.constant 0 : i32
    %c0_i32_1 = arith.constant 0 : i32
    return %c0_i32, %c0_i32_0 : i32, i32
  }
  func.func @transform_7(%arg0: i32) -> (i32, i32) {
    %c0_i32 = arith.constant 0 : i32
    %c0_i32_0 = arith.constant 0 : i32
    %c0_i32_1 = arith.constant 0 : i32
    return %c0_i32, %c0_i32_0 : i32, i32
  }
  func.func @transform_8(%arg0: i32) -> (i32, i32, i32) {
    %c0_i32 = arith.constant 0 : i32
    %c0_i32_0 = arith.constant 0 : i32
    %c0_i32_1 = arith.constant 0 : i32
    return %arg0, %c0_i32, %c0_i32_0 : i32, i32, i32
  }
}

</mosaic_0001>

<bundles_post_ra>
// kernel: forward_core.2
= control target key start
LH: loop header
LB: loop body
LE: loop exit
PB: predicated region body
PF: predicated region fallthrough
CT: control target
= control target key end

     0   :  { %s3531_s12 = smov 0   ;;  %s4161_s0 = inlined_call_operand.vmem [shape: f32[2,16,48], index: 0, kind: input, shape index: {}]   ;;  %s4162_s1 = inlined_call_operand.vmem [shape: bf16[720,128], index: 1, kind: input, shape index: {}]   ;;  %s4163_s2 = inlined_call_operand.vmem [shape: f32[224,128], index: 2, kind: input, shape index: {}]   ;;  %s4164_s3 = inlined_call_operand.vmem [shape: f32[2,24,128], index: 3, kind: output, shape index: {}]  }
   0x1 LB: > { %s2865_s13 = sadd.s32 4294967295, %s3500_s12   ;;  %p2869_p0 = scmp.ge.s32.totalorder %s3500_s12, 1  ;;  %s3500_s12 = sphi %s3531_s12, %s13_s12  }
   0x2   : > { %p137_p1 = scmp.lt.s32.totalorder %s3500_s12, 3 }
   0x4   : > { %p138_p2 = pnand %p2869_p0, %p137_p1 }
   0x5   : > { %v3365_v0 = vld [vmem:[%s4162_s1] sm:$0xff] (!%p138_p2)   ;;  %v3502_v1 = vmov (!%p138_p2), 0.0   ;;  %v3366_v2 = vld [vmem:[%s4162_s1 + $0x8] sm:$0xff] (!%p138_p2)   ;;  %vm3503_vm0 = vmmov (!%p138_p2), 0   ;;  %p161_p3 = scmp.lt.s32.totalorder (!%p138_p2), %s2865_s13, 1  ;;  %v3367_v3 = vld [vmem:[%s4162_s1 + $0x10] sm:$0xff] (!%p138_p2)   ;;  %v283_v36 = vlaneseq (!%p138_p2) }
   0x6   : > { %141 = sbr.rel (%p138_p2) target bundleno = 9294 (0x244e), region = 32  ;;  %3071 = vmatprep.subr.bf16.mxu0 (!%p138_p2), %v3502_v1  ;;  %3081 = vmatprep.subr.bf16.mxu1 (!%p138_p2), %v3502_v1  ;;  %vm206_vm1 = vcmask (!%p138_p2), 392192   ;;  %v2873_v7 = vld [vmem:[%s4163_s2] ss:$0 sm:$0xff] (!%p138_p2)  ;;  %v251_v9 = vld [vmem:[%s4163_s2 + $0x8] sm:$0xff] (!%p138_p2)  ;;  %v252_v13 = vld [vmem:[%s4163_s2 + $0x10] sm:$0xff] (!%p138_p2) }
   0x7   : > { %3072 = vmatpush3.bf16.msra.mxu0 (!%p138_p2), %v3365_v0  ;;  %3077 = vmatprep.mubr.msk.bf16.mxu0 (!%p138_p2), %vm3503_vm0, %v3502_v1  ;;  %vm255_vm2 = vcmask (!%p138_p2), 261120   ;;  %v3368_v30 = vld [vmem:[%s4162_s1 + $0x18] sm:$0xff] (!%p138_p2)   ;;  %v3369_v31 = vld [vmem:[%s4162_s1 + $0x20] sm:$0xff] (!%p138_p2)   ;;  %v3595_v39 = vshrl.u32 (!%p138_p2), %v283_v36, 7  ;;  %v3607_v45 = vld [vmem:[%s4163_s2 + $0x48] sm:$0x7f] (!%p138_p2) }
   0x8   : > { %3073 = vmatprep.subr.bf16.mxu0 (!%p138_p2), %v3502_v1  ;;  %3085 = vmatprep.mubr.msk.bf16.mxu1 (!%p138_p2), %vm3503_vm0, %v3502_v1  ;;  %v3601_v41 = vld [vmem:[%s4163_s2 + $0x40] sm:$0x7f] (!%p138_p2)  ;;  %v2878_v54 = vld [vmem:[%s4163_s2 + $0x18] ss:$0 sm:$0xff] (!%p138_p2)  ;;  %s3504_s15 = smov (!%p138_p2), 80   ;;  %s3505_s16 = smov (!%p138_p2), 96  }
   0x9   : > { %3082 = vmatpush3.bf16.msra.mxu1 (!%p138_p2), %v3368_v30  ;;  %v285_v40 = vsub.s32 (!%p138_p2), 0, %v3595_v39  ;;  %s3506_s17 = smov (!%p138_p2), 112   ;;  %vm369_vm3 = vcmask (!%p138_p2), 130048   ;;  %s3507_s18 = smov (!%p138_p2), 64   ;;  %vm843_vm4 = vcmask (!%p138_p2), 523264   ;;  %vm1203_vm6 = vcmask (!%p138_p2), 64512  }
   0xa   : > { %3083 = vmatprep.subr.bf16.mxu1 (!%p138_p2), %v3502_v1  ;;  %s3508_s19 = smov (!%p138_p2), 48   ;;  %s3509_s24 = smov (!%p138_p2), 16   ;;  %vm1221_vm7 = vcmask (!%p138_p2), 1043456   ;;  %vm2801_vm8 = vcmask (!%p138_p2), 31744   ;;  %vm2803_vm9 = vcmask (!%p138_p2), 97280   ;;  %vm2805_vm10 = vcmask (!%p138_p2), 1040384  }
   0xb   : > { %3074 = vmatpush3.bf16.msra.mxu0 (!%p138_p2), %v3366_v2  ;;  %v286_v44 = vrot.slane (!%p138_p2), %v3601_v41, %v285_v40  ;;  %v292_v49 = vrot.slane (!%p138_p2), %v3607_v45, %v285_v40  ;;  %s3510_s14 = smov (!%p138_p2), 4  }
   0xc   : > { %3075 = vmatprep.subr.bf16.mxu0 (!%p138_p2), %v3502_v1 }
   0xd   : > { %s4166_s13 = smov (!%p161_p3, %s2865_s13), 1  ;;  %3084 = vmatpush3.bf16.msra.mxu1 %v3369_v31 }
   0xe   : > { %s2973_s20 = sshll.u32 %s4166_s13, 4  ;;  %3089 = vmatprep.subr.bf16.mxu1 %v3502_v1 }
   0xf   : > { %s165_s23 = scalar_lea.vmem %s4161_s0, %s2973_s20  ;;  %3076 = vmatpush3.bf16.msra.mxu0 %v3367_v3  ;;  %s3337_s20 = smul.u32 24, %s4166_s13 }
  0x10   : > { %v174_v4 = vld [vmem:[%s165_s23] sm:$0xff]  ;;  %v175_v5 = vld [vmem:[%s165_s23 + $0x8] sm:$0xff]  ;;  %3095 = vmatprep.subr.bf16.mxu0 %v3502_v1 }
  0x11   : > { %v182_v6 = vpack.c.bf16 %v175_v5, %v174_v4  ;;  %s170_s22 = scalar_lea.vmem %s4164_s3, %s3337_s20 }
  0x13   : > { %3078 = vmatmul.mubr.msk.bf16.vlgmr.msra.gmra.mrb[0].mxu0 %vm206_vm1, %v182_v6 }
  0x14   : > { %3097 = vmatprep.mubr.msk.bf16.mxu0 %vm3503_vm0, %v3502_v1 }
  0xe6   : > { %v244_v8 = vpop.f32.mrb[0].mxu0 }
  0xe7   : > { %v245_v10 = vadd.f32 %v2873_v7, %v244_v8  ;;  %v3079_v11 = vpop.f32.mrb[1].mxu0 }
  0xe8   : > { %v247_v12 = vpop.f32.mrb[2].mxu0 }
  0xe9   : > { %v3574_v14 = vadd.f32 %v251_v9, %v245_v10  ;;  %v248_v15 = vadd.f32 %v2873_v7, %v247_v12  ;;  %v3080_v16 = vpop.f32.mrb[3].mxu0 }
  0xeb   : > { %v3576_v17 = vadd.f32 %v252_v13, %v248_v15  ;;  %v256_v18 = vsel %vm255_vm2, %v3574_v14, 0.0 }
  0xec   : > { %257 = vadd.xlane.f32.xlu0 %v256_v18 }
  0xed   : > { %v259_v19 = vsel %vm255_vm2, %v3576_v17, 0.0 }
  0xf0   : > { %260 = vadd.xlane.f32.xlu0 %v259_v19 }
 0x179   : > { %v258_v20 = vpop.xlane.xlu0 %257 }
 0x17a   : > { %v263_v21 = vmul.f32 0.03125, %v258_v20 }
 0x17c   : > { %v265_v22 = vsub.f32 %v3574_v14, %v263_v21 }
 0x17d   : > { %v261_v23 = vpop.xlane.xlu0 %260 }
 0x17e   : > { %v264_v24 = vmul.f32 0.03125, %v261_v23  ;;  %v267_v25 = vmul.f32 %v265_v22, %v265_v22 }
 0x180   : > { %v266_v26 = vsub.f32 %v3576_v17, %v264_v24  ;;  %v269_v27 = vsel %vm255_vm2, %v267_v25, 0.0 }
 0x181   : > { %270 = vadd.xlane.f32.xlu1 %v269_v27 }
 0x182   : > { %v268_v28 = vmul.f32 %v266_v26, %v266_v26 }
 0x184   : > { %v272_v29 = vsel %vm255_vm2, %v268_v28, 0.0 }
 0x185   : > { %273 = vadd.xlane.f32.xlu1 %v272_v29 }
 0x20e   : > { %v271_v32 = vpop.xlane.xlu1 %270 }
 0x20f   : > { %v275_v33 = vmul.f32 0.03125, %v271_v32 }
 0x211   : > { %v277_v34 = vadd.f32 1e-06, %v275_v33 }
 0x212   : > { %v274_v35 = vpop.xlane.xlu1 %273 }
 0x213   : > { %3410 = vrsqrt.f32 %v277_v34  ;;  %v276_v37 = vmul.f32 0.03125, %v274_v35 }
 0x215   : > { %v278_v38 = vadd.f32 1e-06, %v276_v37 }
 0x217   : > { %3412 = vrsqrt.f32 %v278_v38 }
 0x21d   : > { %v3411_v42 = vpop.eup %3410 }
 0x21e   : > { %v281_v43 = vmul.f32 %v3411_v42, %v265_v22 }
 0x220   : > { %v287_v48 = vmul.f32 %v286_v44, %v281_v43 }
 0x221   : > { %v3413_v46 = vpop.eup %3412 }
 0x222   : > { %v282_v47 = vmul.f32 %v3413_v46, %v266_v26  ;;  %v293_v51 = vadd.f32 %v292_v49, %v287_v48 }
 0x224   : > { %v288_v50 = vmul.f32 %v286_v44, %v282_v47 }
 0x226   : > { %v294_v52 = vadd.f32 %v292_v49, %v288_v50 }
 0x228   : > { %v299_v53 = vpack.c.bf16 %v294_v52, %v293_v51 }
 0x22a   : > { %3086 = vmatmul.mubr.msk.bf16.vlgmr.msra.gmra.mrb[0].mxu1 %vm255_vm2, %v299_v53 }
 0x22b   : > { %3091 = vmatprep.mubr.msk.bf16.mxu1 %vm3503_vm0, %v3502_v1 }
 0x2fd   : > { %v354_v55 = vpop.f32.mrb[0].mxu1 }
 0x2fe   : > { %v3087_v56 = vpop.f32.mrb[1].mxu1  ;;  %v355_v58 = vadd.f32 %v2878_v54, %v354_v55 }
 0x2ff   : > { %v357_v57 = vpop.f32.mrb[2].mxu1 }
 0x300   : > { %v358_v59 = vadd.f32 %v2878_v54, %v357_v57  ;;  %v3088_v60 = vpop.f32.mrb[3].mxu1 }
 0x302   : > { %v3616_v61 = vpack.c.bf16 %v358_v59, %v355_v58 }
 0x304   : > { %491 = vrot.lane.b32.xlu1 %v3616_v61, %s3504_s15  ;;  %367 = vrot.lane.b32.xlu0 %v3616_v61, %s3505_s16 }
 0x308   : > { %489 = vrot.lane.b32.xlu1 %v3616_v61, %s3506_s17 }
 0x376   : > { %v368_v62 = vpop.permute.xlu0 %367  ;;  %v492_v0 = vpop.permute.xlu1 %491 }
 0x377   : > { %v374_v63 = vsel %vm369_vm3, %v368_v62, 0  ;;  %v497_v2 = vsel %vm369_vm3, %v492_v0, 0  ;;  %v3370_v62 = vld [vmem:[%s4162_s1 + $0x28] sm:$0xff]  }
 0x378   : > { %3090 = vmatpush3.bf16.xpose.msra.mxu1 %v374_v63 }
 0x379   : > { %3101 = vmatprep.subr.bf16.mxu1 %v3502_v1 }
 0x37a   : > { %v490_v3 = vpop.permute.xlu1 %489 }
 0x37f   : > { %3092 = vmatmul.mubr.msk.bf16.vlgmr.msra.gmra.mrb[4].mxu1 %vm369_vm3, %v3616_v61 }
 0x380   : > { %3102 = vmatpush3.bf16.xpose.msra.mxu1 %v497_v2  ;;  %3103 = vmatprep.mubr.msk.bf16.mxu1 %vm3503_vm0, %v3502_v1 }
 0x381   : > { %3113 = vmatprep.subr.bf16.mxu1 %v3502_v1 }
 0x387   : > { %3104 = vmatmul.mubr.msk.bf16.vlgmr.msra.gmra.mrb[8].mxu1 %vm369_vm3, %v490_v3 }
 0x388   : > { %3117 = vmatprep.mubr.msk.bf16.mxu1 %vm3503_vm0, %v3502_v1  ;;  %3114 = vmatpush3.bf16.msra.mxu1 %v3370_v62  ;;  %v3375_v62 = vld [vmem:[%s4162_s1 + $0x50] sm:$0xff]  }
 0x389   : > { %3115 = vmatprep.subr.bf16.mxu1 %v3502_v1 }
 0x452   : > { %v410_v4 = vpop.f32.mrb[4].mxu1 }
 0x453   : > { %v417_v5 = vmul.f32 0.25, %v410_v4  ;;  %v3093_v6 = vpop.f32.mrb[5].mxu1  ;;  %v3371_v4 = vld [vmem:[%s4162_s1 + $0x30] sm:$0xff]  }
 0x454   : > { %v413_v7 = vpop.f32.mrb[6].mxu1  ;;  %3116 = vmatpush3.bf16.msra.mxu1 %v3371_v4 }
 0x455   : > { %v418_v8 = vmul.f32 0.25, %v413_v7  ;;  %v3094_v9 = vpop.f32.mrb[7].mxu1  ;;  %v419_v10 = vsel %vm369_vm3, %v417_v5, -inf  ;;  %3129 = vmatprep.subr.bf16.mxu1 %v3502_v1 }
 0x456   : > { %420 = vmax.xlane.f32.xlu1 %v419_v10 }
 0x457   : > { %v422_v11 = vsel %vm369_vm3, %v418_v8, -inf }
 0x458   : > { %423 = vmax.xlane.f32.xlu0 %v422_v11 }
 0x45a   : > { %v533_v12 = vpop.f32.mrb[8].mxu1 }
 0x45b   : > { %v540_v13 = vmul.f32 0.25, %v533_v12  ;;  %v3105_v15 = vpop.f32.mrb[9].mxu1 }
 0x45c   : > { %v536_v16 = vpop.f32.mrb[10].mxu1 }
 0x45d   : > { %v541_v18 = vmul.f32 0.25, %v536_v16  ;;  %v3106_v19 = vpop.f32.mrb[11].mxu1  ;;  %v542_v20 = vsel %vm369_vm3, %v540_v13, -inf }
 0x45e   : > { %543 = vmax.xlane.f32.xlu0 %v542_v20  ;;  %v2889_v19 = vld [vmem:[%s4163_s2 + $0x20] ss:$0 sm:$0xff] }
 0x45f   : > { %v545_v21 = vsel %vm369_vm3, %v541_v18, -inf }
 0x462   : > { %546 = vmax.xlane.f32.xlu0 %v545_v21 }
 0x4e3   : > { %v421_v22 = vpop.xlane.xlu1 %420 }
 0x4e4   : > { %v425_v23 = vsub.f32 %v417_v5, %v421_v22 }
 0x4e5   : > { %v424_v24 = vpop.xlane.xlu0 %423 }
 0x4e6   : > { %v427_v25 = vmul.f32 1.442695, %v425_v23  ;;  %v426_v26 = vsub.f32 %v418_v8, %v424_v24 }
 0x4e8   : > { %3414 = vpow2.f32 %v427_v25  ;;  %v429_v27 = vmul.f32 1.442695, %v426_v26 }
 0x4ea   : > { %3416 = vpow2.f32 %v429_v27 }
 0x4eb   : > { %v544_v28 = vpop.xlane.xlu0 %543 }
 0x4ec   : > { %v548_v29 = vsub.f32 %v540_v13, %v544_v28 }
 0x4ee   : > { %v550_v30 = vmul.f32 1.442695, %v548_v29 }
 0x4ef   : > { %v547_v31 = vpop.xlane.xlu0 %546 }
 0x4f0   : > { %3418 = vpow2.f32 %v550_v30  ;;  %v549_v32 = vsub.f32 %v541_v18, %v547_v31 }
 0x4f2   : > { %v3415_v33 = vpop.eup %3414  ;;  %v552_v34 = vmul.f32 1.442695, %v549_v32 }
 0x4f3   : > { %v431_v35 = vsel %vm369_vm3, %v3415_v33, 0.0 }
 0x4f4   : > { %v3417_v37 = vpop.eup %3416  ;;  %3420 = vpow2.f32 %v552_v34  ;;  %432 = vadd.xlane.f32.xlu1 %v431_v35 }
 0x4f5   : > { %v434_v38 = vsel %vm369_vm3, %v3417_v37, 0.0 }
 0x4f6   : > { %435 = vadd.xlane.f32.xlu0 %v434_v38  ;;  %v3372_v38 = vld [vmem:[%s4162_s1 + $0x38] sm:$0xff]  }
 0x4fa   : > { %v3419_v40 = vpop.eup %3418 }
 0x4fb   : > { %v554_v42 = vsel %vm369_vm3, %v3419_v40, 0.0 }
 0x4fc   : > { %555 = vadd.xlane.f32.xlu1 %v554_v42 }
 0x4fe   : > { %v3421_v43 = vpop.eup %3420 }
 0x4ff   : > { %v557_v44 = vsel %vm369_vm3, %v3421_v43, 0.0 }
 0x500   : > { %558 = vadd.xlane.f32.xlu0 %v557_v44 }
 0x50d   : > { %442 = vrot.lane.b32.xlu1 %v3616_v61, %s3507_s18 }
 0x516   : > { %565 = vrot.lane.b32.xlu0 %v3616_v61, %s3508_s19 }
 0x581   : > { %v433_v46 = vpop.xlane.xlu1 %432 }
 0x582   : > { %3422 = vrcp.f32 %v433_v46 }
 0x583   : > { %v436_v47 = vpop.xlane.xlu0 %435 }
 0x584   : > { %3424 = vrcp.f32 %v436_v47 }
 0x589   : > { %v556_v48 = vpop.xlane.xlu1 %555 }
 0x58a   : > { %3426 = vrcp.f32 %v556_v48 }
 0x58c   : > { %v3423_v49 = vpop.eup %3422 }
 0x58d   : > { %v443_v50 = vpop.permute.xlu1 %442  ;;  %v559_v51 = vpop.xlane.xlu0 %558  ;;  %v439_v53 = vmul.f32 %v3423_v49, %v3415_v33  ;;  %v716_v49 = vsub.s32 1, %v3595_v39 }
 0x58e   : > { %v3425_v52 = vpop.eup %3424  ;;  %3428 = vrcp.f32 %v559_v51  ;;  %3096 = vmatpush3.bf16.msra.mxu0 %v443_v50 }
 0x58f   : > { %v440_v54 = vmul.f32 %v3425_v52, %v3417_v37  ;;  %3107 = vmatprep.subr.bf16.mxu0 %v3502_v1  ;;  %v717_v50 = vrot.slane %v3601_v41, %v716_v49 }
 0x591   : > { %v566_v55 = vpop.permute.xlu0 %565  ;;  %v441_v56 = vpack.c.bf16 %v440_v54, %v439_v53 }
 0x593   : > { %3098 = vmatmul.mubr.msk.bf16.vlgmr.msra.gmra.mrb[4].mxu0 %vm369_vm3, %v441_v56  ;;  %v723_v56 = vrot.slane %v3607_v45, %v716_v49 }
 0x594   : > { %3108 = vmatpush3.bf16.msra.mxu0 %v566_v55  ;;  %3109 = vmatprep.mubr.msk.bf16.mxu0 %vm3503_vm0, %v3502_v1  ;;  %v3427_v57 = vpop.eup %3426 }
 0x595   : > { %3121 = vmatprep.subr.bf16.mxu0 %v3502_v1  ;;  %v562_v59 = vmul.f32 %v3427_v57, %v3419_v40  ;;  %v3373_v40 = vld [vmem:[%s4162_s1 + $0x40] sm:$0xff]  }
 0x598   : > { %v3429_v58 = vpop.eup %3428 }
 0x599   : > { %v563_v60 = vmul.f32 %v3429_v58, %v3421_v43 }
 0x59b   : > { %v564_v61 = vpack.c.bf16 %v563_v60, %v562_v59 }
 0x59d   : > { %3110 = vmatmul.mubr.msk.bf16.vlgmr.msra.gmra.mrb[8].mxu0 %vm369_vm3, %v564_v61  ;;  %v3374_v61 = vld [vmem:[%s4162_s1 + $0x48] sm:$0xff]  }
 0x59e   : > { %3125 = vmatprep.mubr.msk.bf16.mxu0 %vm3503_vm0, %v3502_v1  ;;  %3122 = vmatpush3.bf16.msra.mxu0 %v3372_v38 }
 0x59f   : > { %3123 = vmatprep.subr.bf16.mxu0 %v3502_v1 }
 0x5a2   : > { %3124 = vmatpush3.bf16.msra.mxu0 %v3373_v40 }
 0x5a3   : > { %3141 = vmatprep.subr.bf16.mxu0 %v3502_v1 }
 0x666   : > { %v482_v63 = vpop.f32.mrb[4].mxu0 }
 0x667   : > { %v3099_v0 = vpop.f32.mrb[5].mxu0 }
 0x668   : > { %v485_v2 = vpop.f32.mrb[6].mxu0  ;;  %v3377_v0 = vld [vmem:[%s4162_s1 + $0x60] sm:$0xff]  }
 0x669   : > { %v3100_v3 = vpop.f32.mrb[7].mxu0 }
 0x670   : > { %v605_v5 = vpop.f32.mrb[8].mxu0 }
 0x671   : > { %v3111_v6 = vpop.f32.mrb[9].mxu0 }
 0x672   : > { %v608_v7 = vpop.f32.mrb[10].mxu0 }
 0x673   : > { %v3355_v8 = vpack.i.bf16 %v608_v7, %v605_v5  ;;  %v3112_v9 = vpop.f32.mrb[11].mxu0 }
 0x675   : > { %3356 = vrot.lane.b32.xlu1 %v3355_v8, %s3509_s24 }
 0x6e7   : > { %v3357_v10 = vpop.permute.xlu1 %3356 }
 0x6e8   : > { %v3359_v11 = vunpack.i.h.bf16 %v3357_v10  ;;  %v3358_v12 = vunpack.i.l.bf16 %v3357_v10 }
 0x6ea   : > { %v621_v13 = vsel %vm369_vm3, %v485_v2, %v3359_v11  ;;  %v620_v15 = vsel %vm369_vm3, %v482_v63, %v3358_v12  ;;  %v3376_v63 = vld [vmem:[%s4162_s1 + $0x58] sm:$0xff]   ;;  %v2890_v2 = vld [vmem:[%s4163_s2 + $0x28] ss:$0 sm:$0xff] }
 0x6eb   : > { %v622_v16 = vpack.c.bf16 %v621_v13, %v620_v15 }
 0x6ed   : > { %3118 = vmatmul.mubr.msk.bf16.vlgmr.msra.gmra.mrb[12].mxu1 %vm255_vm2, %v622_v16 }
 0x6ee   : > { %3137 = vmatprep.mubr.msk.bf16.mxu1 %vm3503_vm0, %v3502_v1  ;;  %3130 = vmatpush3.bf16.msra.mxu1 %v3374_v61 }
 0x6ef   : > { %3131 = vmatprep.subr.bf16.mxu1 %v3502_v1 }
 0x6f2   : > { %3132 = vmatpush3.bf16.msra.mxu1 %v3375_v62 }
 0x6f3   : > { %3133 = vmatprep.subr.bf16.mxu1 %v3502_v1 }
 0x6f6   : > { %3134 = vmatpush3.bf16.msra.mxu1 %v3376_v63 }
 0x6f7   : > { %3135 = vmatprep.subr.bf16.mxu1 %v3502_v1 }
 0x6fa   : > { %3136 = vmatpush3.bf16.msra.mxu1 %v3377_v0 }
 0x6fb   : > { %3157 = vmatprep.subr.bf16.mxu1 %v3502_v1 }
 0x7c0   : > { %v672_v18 = vpop.f32.mrb[12].mxu1 }
 0x7c1   : > { %v679_v20 = vadd.f32 %v672_v18, %v3574_v14  ;;  %v3119_v21 = vpop.f32.mrb[13].mxu1 }
 0x7c2   : > { %v675_v22 = vpop.f32.mrb[14].mxu1 }
 0x7c3   : > { %v3673_v23 = vadd.f32 %v2889_v19, %v679_v20  ;;  %v680_v24 = vadd.f32 %v675_v22, %v3576_v17  ;;  %v3120_v25 = vpop.f32.mrb[15].mxu1 }
 0x7c5   : > { %v3676_v26 = vadd.f32 %v2889_v19, %v680_v24  ;;  %v688_v27 = vsel %vm255_vm2, %v3673_v23, 0.0 }
 0x7c6   : > { %689 = vadd.xlane.f32.xlu1 %v688_v27 }
 0x7c7   : > { %v691_v28 = vsel %vm255_vm2, %v3676_v26, 0.0 }
 0x7c8   : > { %692 = vadd.xlane.f32.xlu0 %v691_v28 }
 0x853   : > { %v690_v29 = vpop.xlane.xlu1 %689 }
 0x854   : > { %v694_v30 = vmul.f32 0.03125, %v690_v29 }
 0x855   : > { %v693_v14 = vpop.xlane.xlu0 %692 }
 0x856   : > { %v696_v31 = vsub.f32 %v3673_v23, %v694_v30  ;;  %v695_v32 = vmul.f32 0.03125, %v693_v14 }
 0x858   : > { %v697_v33 = vsub.f32 %v3676_v26, %v695_v32  ;;  %v698_v17 = vmul.f32 %v696_v31, %v696_v31  ;;  %v3379_v32 = vld [vmem:[%s4162_s1 + $0x70] sm:$0xff]  }
 0x85a   : > { %v700_v34 = vsel %vm255_vm2, %v698_v17, 0.0  ;;  %v699_v35 = vmul.f32 %v697_v33, %v697_v33  ;;  %v3381_v17 = vld [vmem:[%s4162_s1 + $0x80] sm:$0xff]  }
 0x85b   : > { %701 = vadd.xlane.f32.xlu0 %v700_v34  ;;  %v3739_v34 = vld [vmem:[%s4163_s2 + $0x68] sm:$0xff] }
 0x85c   : > { %v703_v37 = vsel %vm255_vm2, %v699_v35, 0.0  ;;  %v1083_v35 = vpack.c.bf16 %v3739_v34, %v3739_v34 }
 0x85d   : > { %704 = vadd.xlane.f32.xlu1 %v703_v37 }
 0x8e8   : > { %v702_v42 = vpop.xlane.xlu0 %701 }
 0x8e9   : > { %v706_v43 = vmul.f32 0.03125, %v702_v42  ;;  %v2899_v42 = vld [vmem:[%s4163_s2 + $0x30] ss:$0 sm:$0xff] }
 0x8ea   : > { %v705_v44 = vpop.xlane.xlu1 %704 }
 0x8eb   : > { %v708_v46 = vadd.f32 1e-06, %v706_v43  ;;  %v707_v47 = vmul.f32 0.03125, %v705_v44 }
 0x8ed   : > { %3430 = vrsqrt.f32 %v708_v46  ;;  %v709_v48 = vadd.f32 1e-06, %v707_v47 }
 0x8ef   : > { %3432 = vrsqrt.f32 %v709_v48 }
 0x8f7   : > { %v3431_v51 = vpop.eup %3430 }
 0x8f8   : > { %v712_v52 = vmul.f32 %v3431_v51, %v696_v31  ;;  %v3378_v31 = vld [vmem:[%s4162_s1 + $0x68] sm:$0xff]  }
 0x8f9   : > { %v3433_v53 = vpop.eup %3432 }
 0x8fa   : > { %v718_v54 = vmul.f32 %v717_v50, %v712_v52  ;;  %v713_v55 = vmul.f32 %v3433_v53, %v697_v33  ;;  %v3380_v33 = vld [vmem:[%s4162_s1 + $0x78] sm:$0xff]  }
 0x8fc   : > { %v719_v57 = vmul.f32 %v717_v50, %v713_v55  ;;  %v724_v58 = vadd.f32 %v723_v56, %v718_v54 }
 0x8fe   : > { %v725_v59 = vadd.f32 %v723_v56, %v719_v57 }
 0x900   : > { %v730_v60 = vpack.c.bf16 %v725_v59, %v724_v58 }
 0x902   : > { %3126 = vmatmul.mubr.msk.bf16.vlgmr.msra.gmra.mrb[12].mxu0 %vm255_vm2, %v730_v60 }
 0x903   : > { %3145 = vmatprep.mubr.msk.bf16.mxu0 %vm3503_vm0, %v3502_v1  ;;  %3142 = vmatpush3.bf16.msra.mxu0 %v3378_v31 }
 0x904   : > { %3143 = vmatprep.subr.bf16.mxu0 %v3502_v1 }
 0x907   : > { %3144 = vmatpush3.bf16.msra.mxu0 %v3379_v32 }
 0x908   : > { %3149 = vmatprep.subr.bf16.mxu0 %v3502_v1 }
 0x9d5   : > { %v785_v3 = vpop.f32.mrb[12].mxu0 }
 0x9d6   : > { %v786_v4 = vadd.f32 %v2890_v2, %v785_v3  ;;  %v3127_v5 = vpop.f32.mrb[13].mxu0 }
 0x9d7   : > { %v788_v6 = vpop.f32.mrb[14].mxu0 }
 0x9d8   : > { %v792_v7 = vmul.f32 %v786_v4, %v786_v4  ;;  %v789_v8 = vadd.f32 %v2890_v2, %v788_v6  ;;  %v3128_v9 = vpop.f32.mrb[15].mxu0 }
 0x9da   : > { %v794_v10 = vmul.f32 %v792_v7, %v786_v4  ;;  %v793_v11 = vmul.f32 %v789_v8, %v789_v8 }
 0x9dc   : > { %v796_v12 = vmul.f32 0.044715, %v794_v10  ;;  %v795_v13 = vmul.f32 %v793_v11, %v789_v8  ;;  %v3382_v11 = vld [vmem:[%s4162_s1 + $0xa8] sm:$0xff]  }
 0x9de   : > { %v798_v15 = vadd.f32 %v796_v12, %v786_v4  ;;  %v797_v16 = vmul.f32 0.044715, %v795_v13  ;;  %v3383_v12 = vld [vmem:[%s4162_s1 + $0xb0] sm:$0xff]  }
 0x9e0   : > { %v800_v18 = vmul.f32 0.7978846, %v798_v15  ;;  %v799_v19 = vadd.f32 %v797_v16, %v789_v8 }
 0x9e2   : > { %3434 = vtanh.f32 %v800_v18  ;;  %v801_v20 = vmul.f32 0.7978846, %v799_v19 }
 0x9e4   : > { %3436 = vtanh.f32 %v801_v20 }
 0x9ec   : > { %v3435_v21 = vpop.eup %3434 }
 0x9ed   : > { %v804_v22 = vadd.f32 1.0, %v3435_v21  ;;  %v991_v21 = vsub.s32 2, %v3595_v39 }
 0x9ee   : > { %v3437_v24 = vpop.eup %3436 }
 0x9ef   : > { %v806_v25 = vmul.f32 0.5, %v804_v22  ;;  %v805_v27 = vadd.f32 1.0, %v3437_v24  ;;  %v992_v22 = vrot.slane %v3601_v41, %v991_v21 }
 0x9f1   : > { %v807_v28 = vmul.f32 0.5, %v805_v27  ;;  %v808_v29 = vmul.f32 %v806_v25, %v786_v4  ;;  %v998_v25 = vrot.slane %v3607_v45, %v991_v21 }
 0x9f3   : > { %v809_v30 = vmul.f32 %v807_v28, %v789_v8  ;;  %v2909_v8 = vld [vmem:[%s4163_s2 + $0x70] ss:$0 sm:$0xff] }
 0x9f5   : > { %v818_v14 = vpack.c.bf16 %v809_v30, %v808_v29 }
 0x9f7   : > { %3138 = vmatmul.mubr.msk.bf16.vlgmr.msra.gmra.mrb[16].mxu1 %vm843_vm4, %v818_v14  ;;  %v2904_v14 = vld [vmem:[%s4163_s2 + $0x50] ss:$0 sm:$0xff] }
 0x9f8   : > { %3161 = vmatprep.mubr.msk.bf16.mxu1 %vm3503_vm0, %v3502_v1  ;;  %3158 = vmatpush3.bf16.msra.mxu1 %v3380_v33 }
 0x9f9   : > { %3159 = vmatprep.subr.bf16.mxu1 %v3502_v1 }
 0x9fc   : > { %3160 = vmatpush3.bf16.msra.mxu1 %v3381_v17 }
 0x9fd   : > { %3171 = vmatprep.subr.bf16.mxu1 %v3502_v1 }
 0x9ff   : > { %3162 = vmatmul.mubr.msk.bf16.vlgmr.msra.gmra.mrb[20].mxu1 %vm255_vm2, %v1083_v35  ;;  %v1008_v35 = vld [vmem:[%s4163_s2 + $0x58] sm:$0xff] }
 0xa00   : > { %3173 = vmatprep.mubr.msk.bf16.mxu1 %vm3503_vm0, %v3502_v1 }
 0xaca   : > { %v881_v37 = vpop.f32.mrb[16].mxu1 }
 0xacb   : > { %v888_v38 = vadd.f32 %v881_v37, %v3673_v23  ;;  %v3139_v40 = vpop.f32.mrb[17].mxu1  ;;  %v2900_v23 = vld [vmem:[%s4163_s2 + $0x38] ss:$0 sm:$0xff]  ;;  %v1009_v37 = vld [vmem:[%s4163_s2 + $0x60] sm:$0xff] }
 0xacc   : > { %v884_v43 = vpop.f32.mrb[18].mxu1 }
 0xacd   : > { %v889_v44 = vadd.f32 %v884_v43, %v3676_v26  ;;  %v3140_v46 = vpop.f32.mrb[19].mxu1  ;;  %v895_v47 = vadd.f32 %v2899_v42, %v888_v38 }
 0xacf   : > { %v896_v48 = vadd.f32 %v2899_v42, %v889_v44 }
 0xad1   : > { %v901_v49 = vpack.c.bf16 %v896_v48, %v895_v47 }
 0xad2   : > { %v1138_v57 = vpop.f32.mrb[20].mxu1 }
 0xad3   : > { %3146 = vmatmul.mubr.msk.bf16.vlgmr.msra.gmra.mrb[16].mxu0 %vm255_vm2, %v901_v49  ;;  %v3163_v58 = vpop.f32.mrb[21].mxu1  ;;  %v1139_v9 = vadd.f32 %v2909_v8, %v1138_v57 }
 0xad4   : > { %3153 = vmatprep.mubr.msk.bf16.mxu0 %vm3503_vm0, %v3502_v1  ;;  %v1141_v59 = vpop.f32.mrb[22].mxu1  ;;  %3150 = vmatpush3.bf16.msra.mxu0 %v3382_v11 }
 0xad5   : > { %v3164_v60 = vpop.f32.mrb[23].mxu1  ;;  %v3766_v10 = vpack.c.bf16 %v1139_v9, %v1139_v9  ;;  %3151 = vmatprep.subr.bf16.mxu0 %v3502_v1 }
 0xad8   : > { %3152 = vmatpush3.bf16.msra.mxu0 %v3383_v12 }
 0xad9   : > { %3165 = vmatprep.subr.bf16.mxu0 %v3502_v1 }
 0xba6   : > { %v956_v50 = vpop.f32.mrb[16].mxu0 }
 0xba7   : > { %v957_v51 = vadd.f32 %v2900_v23, %v956_v50  ;;  %v3147_v52 = vpop.f32.mrb[17].mxu0 }
 0xba8   : > { %v959_v53 = vpop.f32.mrb[18].mxu0 }
 0xba9   : > { %v960_v54 = vadd.f32 %v2900_v23, %v959_v53  ;;  %v3148_v55 = vpop.f32.mrb[19].mxu0  ;;  %v963_v26 = vsel %vm255_vm2, %v957_v51, 0.0  ;;  %v2905_v23 = vld [vmem:[%s4163_s2 + $0x88] ss:$0 sm:$0xff] }
 0xbaa   : > { %964 = vadd.xlane.f32.xlu0 %v963_v26  ;;  %v3818_v26 = vand.u32 127, %v283_v36 }
 0xbab   : > { %v966_v56 = vsel %vm255_vm2, %v960_v54, 0.0 }
 0xbac   : > { %967 = vadd.xlane.f32.xlu1 %v966_v56  ;;  %vm1150_vm5 = vcmp.lt.s32.totalorder %v3818_v26, 5 }
 0xc37   : > { %v965_v61 = vpop.xlane.xlu0 %964 }
 0xc38   : > { %v969_v62 = vmul.f32 0.03125, %v965_v61 }
 0xc39   : > { %v968_v63 = vpop.xlane.xlu1 %967 }
 0xc3a   : > { %v971_v0 = vsub.f32 %v957_v51, %v969_v62  ;;  %v970_v2 = vmul.f32 0.03125, %v968_v63 }
 0xc3c   : > { %v972_v3 = vsub.f32 %v960_v54, %v970_v2  ;;  %v973_v4 = vmul.f32 %v971_v0, %v971_v0 }
 0xc3e   : > { %v975_v5 = vsel %vm255_vm2, %v973_v4, 0.0  ;;  %v974_v6 = vmul.f32 %v972_v3, %v972_v3 }
 0xc3f   : > { %976 = vadd.xlane.f32.xlu0 %v975_v5 }
 0xc40   : > { %v978_v7 = vsel %vm255_vm2, %v974_v6, 0.0 }
 0xc41   : > { %979 = vadd.xlane.f32.xlu1 %v978_v7 }
 0xc52   : > { %1267 = vrot.lane.b32.xlu1 %v3766_v10, %s3504_s15 }
 0xc55   : > { %1153 = vrot.lane.b32.xlu0 %v3766_v10, %s3505_s16 }
 0xc56   : > { %1265 = vrot.lane.b32.xlu1 %v3766_v10, %s3506_s17 }
 0xccc   : > { %v977_v13 = vpop.xlane.xlu0 %976 }
 0xccd   : > { %v981_v15 = vmul.f32 0.03125, %v977_v13 }
 0xcce   : > { %v980_v16 = vpop.xlane.xlu1 %979 }
 0xccf   : > { %v983_v18 = vadd.f32 1e-06, %v981_v15  ;;  %v982_v19 = vmul.f32 0.03125, %v980_v16 }
 0xcd0   : > { %v1154_v40 = vpop.permute.xlu0 %1153 }
 0xcd1   : > { %3438 = vrsqrt.f32 %v983_v18  ;;  %v984_v20 = vadd.f32 1e-06, %v982_v19  ;;  %v1159_v44 = vsel %vm369_vm3, %v1154_v40, 0 }
 0xcd2   : > { %v1268_v47 = vpop.permute.xlu1 %1267 }
 0xcd3   : > { %3440 = vrsqrt.f32 %v984_v20  ;;  %v1273_v48 = vsel %vm369_vm3, %v1268_v47, 0 }
 0xcd6   : > { %v1266_v49 = vpop.permute.xlu1 %1265 }
 0xcdb   : > { %v3439_v24 = vpop.eup %3438 }
 0xcdc   : > { %v987_v27 = vmul.f32 %v3439_v24, %v971_v0 }
 0xcdd   : > { %v3441_v28 = vpop.eup %3440 }
 0xcde   : > { %v993_v29 = vmul.f32 %v992_v22, %v987_v27  ;;  %v988_v30 = vmul.f32 %v3441_v28, %v972_v3 }
 0xce0   : > { %v999_v31 = vadd.f32 %v998_v25, %v993_v29  ;;  %v994_v32 = vmul.f32 %v992_v22, %v988_v30 }
 0xce2   : > { %v1000_v33 = vadd.f32 %v998_v25, %v994_v32  ;;  %v3788_v17 = vadd.f32 %v2904_v14, %v999_v31  ;;  %v3384_v32 = vld [vmem:[%s4162_s1 + $0x88] sm:$0xff]  }
 0xce4   : > { %v3796_v38 = vadd.f32 %v2904_v14, %v1000_v33  ;;  %v1011_v42 = vadd.f32 %v1008_v35, %v3788_v17  ;;  %v3385_v33 = vld [vmem:[%s4162_s1 + $0x90] sm:$0xff]  }
 0xce6   : > { %v1012_v43 = vadd.f32 %v1009_v37, %v3796_v38 }
 0xce8   : > { %v1017_v46 = vpack.c.bf16 %v1012_v43, %v1011_v42 }
 0xcea   : > { %3154 = vmatmul.mubr.msk.bf16.vlgmr.msra.gmra.mrb[20].mxu0 %vm255_vm2, %v1017_v46 }
 0xceb   : > { %3166 = vmatpush3.bf16.xpose.msra.mxu0 %v1159_v44  ;;  %3167 = vmatprep.mubr.msk.bf16.mxu0 %vm3503_vm0, %v3502_v1 }
 0xcec   : > { %3177 = vmatprep.subr.bf16.mxu0 %v3502_v1 }
 0xcf2   : > { %3168 = vmatmul.mubr.msk.bf16.vlgmr.msra.gmra.mrb[24].mxu0 %vm369_vm3, %v3766_v10 }
 0xcf3   : > { %3178 = vmatpush3.bf16.xpose.msra.mxu0 %v1273_v48  ;;  %3179 = vmatprep.mubr.msk.bf16.mxu0 %vm3503_vm0, %v3502_v1 }
 0xcf4   : > { %3189 = vmatprep.subr.bf16.mxu0 %v3502_v1 }
 0xcfa   : > { %3180 = vmatmul.mubr.msk.bf16.vlgmr.msra.gmra.mrb[28].mxu0 %vm369_vm3, %v1266_v49 }
 0xcfb   : > { %3193 = vmatprep.mubr.msk.bf16.mxu0 %vm3503_vm0, %v3502_v1  ;;  %3190 = vmatpush3.bf16.msra.mxu0 %v3384_v32 }
 0xcfc   : > { %3191 = vmatprep.subr.bf16.mxu0 %v3502_v1 }
 0xcff   : > { %3192 = vmatpush3.bf16.msra.mxu0 %v3385_v33 }
 0xd00   : > { %3205 = vmatprep.subr.bf16.mxu0 %v3502_v1 }
 0xdbd   : > { %v1072_v50 = vpop.f32.mrb[20].mxu0 }
 0xdbe   : > { %v3155_v51 = vpop.f32.mrb[21].mxu0  ;;  %v1073_v53 = vadd.f32 %v2905_v23, %v1072_v50 }
 0xdbf   : > { %v1075_v52 = vpop.f32.mrb[22].mxu0  ;;  %v2917_v51 = vld [vmem:[%s4163_s2 + $0x78] ss:$0 sm:$0xff] }
 0xdc0   : > { %v1076_v54 = vadd.f32 %v2905_v23, %v1075_v52  ;;  %v3156_v55 = vpop.f32.mrb[23].mxu0 }
 0xdc2   : > { %v3820_v56 = vpack.c.bf16 %v1076_v54, %v1073_v53 }
 0xdc4   : > { %v1542_v50 = vsel %vm369_vm3, %v3820_v56, 0 }
 0xdc5   : > { %v1195_v57 = vpop.f32.mrb[24].mxu0 }
 0xdc6   : > { %v1201_v58 = vmul.f32 0.25, %v1195_v57  ;;  %v3169_v59 = vpop.f32.mrb[25].mxu0 }
 0xdc7   : > { %v1198_v60 = vpop.f32.mrb[26].mxu0 }
 0xdc8   : > { %v3170_v61 = vpop.f32.mrb[27].mxu0  ;;  %v1202_v62 = vsel %vm1150_vm5, %v1201_v58, -1e+30 }
 0xdc9   : > { %v1204_v63 = vsel %vm1203_vm6, %v1202_v62, -inf }
 0xdca   : > { %1205 = vmax.xlane.f32.xlu1 %v1204_v63 }
 0xdcd   : > { %v1309_v0 = vpop.f32.mrb[28].mxu0 }
 0xdce   : > { %v1315_v2 = vmul.f32 0.25, %v1309_v0  ;;  %v3181_v36 = vpop.f32.mrb[29].mxu0 }
 0xdcf   : > { %v1312_v3 = vpop.f32.mrb[30].mxu0 }
 0xdd0   : > { %v3182_v4 = vpop.f32.mrb[31].mxu0  ;;  %v1316_v5 = vsel %vm1150_vm5, %v1315_v2, -1e+30  ;;  %v3386_v2 = vld [vmem:[%s4162_s1 + $0x98] sm:$0xff]  }
 0xdd1   : > { %v1317_v6 = vsel %vm1203_vm6, %v1316_v5, -inf }
 0xdd2   : > { %1318 = vmax.xlane.f32.xlu0 %v1317_v6 }
 0xddb   : > { %1216 = vrot.lane.b32.xlu1 %v3766_v10, %s3507_s18 }
 0xe57   : > { %v1206_v7 = vpop.xlane.xlu1 %1205 }
 0xe58   : > { %v1207_v8 = vsub.f32 %v1202_v62, %v1206_v7 }
 0xe5a   : > { %v1208_v9 = vmul.f32 1.442695, %v1207_v8 }
 0xe5b   : > { %v1217_v11 = vpop.permute.xlu1 %1216 }
 0xe5c   : > { %3442 = vpow2.f32 %v1208_v9  ;;  %v1223_v12 = vsel %vm1221_vm7, %v1217_v11, 0 }
 0xe5d   : > { %3172 = vmatpush3.bf16.msra.mxu1 %v1223_v12 }
 0xe5e   : > { %3183 = vmatprep.subr.bf16.mxu1 %v3502_v1 }
 0xe5f   : > { %v1319_v13 = vpop.xlane.xlu0 %1318 }
 0xe60   : > { %v1320_v15 = vsub.f32 %v1316_v5, %v1319_v13  ;;  %v1459_v5 = vsub.s32 3, %v3595_v39 }
 0xe62   : > { %v1321_v16 = vmul.f32 1.442695, %v1320_v15  ;;  %v1460_v6 = vrot.slane %v3601_v41, %v1459_v5  ;;  %v1465_v9 = vrot.slane %v3607_v45, %v1459_v5  ;;  %v2921_v15 = vld [vmem:[%s4163_s2 + $0x80] ss:$0 sm:$0xff] }
 0xe64   : > { %3444 = vpow2.f32 %v1321_v16 }
 0xe66   : > { %v3443_v18 = vpop.eup %3442 }
 0xe67   : > { %v1210_v19 = vsel %vm1203_vm6, %v3443_v18, 0.0 }
 0xe68   : > { %1211 = vadd.xlane.f32.xlu0 %v1210_v19 }
 0xe6e   : > { %v3445_v20 = vpop.eup %3444 }
 0xe6f   : > { %v1323_v21 = vsel %vm1203_vm6, %v3445_v20, 0.0 }
 0xe70   : > { %1324 = vadd.xlane.f32.xlu0 %v1323_v21 }
 0xe86   : > { %1329 = vrot.lane.b32.xlu0 %v3766_v10, %s3508_s19 }
 0xef5   : > { %v1212_v22 = vpop.xlane.xlu0 %1211 }
 0xef6   : > { %3446 = vrcp.f32 %v1212_v22 }
 0xefd   : > { %v1325_v24 = vpop.xlane.xlu0 %1324 }
 0xefe   : > { %3448 = vrcp.f32 %v1325_v24 }
 0xf00   : > { %v3447_v25 = vpop.eup %3446 }
 0xf01   : > { %v1214_v27 = vmul.f32 %v3447_v25, %v3443_v18  ;;  %v1330_v28 = vpop.permute.xlu0 %1329 }
 0xf02   : > { %v1335_v30 = vsel %vm1221_vm7, %v1330_v28, 0 }
 0xf03   : > { %v1215_v29 = vpack.c.bf16 %v1214_v27, %v1214_v27 }
 0xf05   : > { %3174 = vmatmul.mubr.msk.bf16.vlgmr.msra.gmra.mrb[24].mxu1 %vm1203_vm6, %v1215_v29 }
 0xf06   : > { %3184 = vmatpush3.bf16.msra.mxu1 %v1335_v30  ;;  %3185 = vmatprep.mubr.msk.bf16.mxu1 %vm3503_vm0, %v3502_v1 }
 0xf07   : > { %3197 = vmatprep.subr.bf16.mxu1 %v3502_v1 }
 0xf08   : > { %v3449_v14 = vpop.eup %3448 }
 0xf09   : > { %v1327_v10 = vmul.f32 %v3449_v14, %v3445_v20 }
 0xf0b   : > { %v1328_v31 = vpack.c.bf16 %v1327_v10, %v1327_v10 }
 0xf0d   : > { %3186 = vmatmul.mubr.msk.bf16.vlgmr.msra.gmra.mrb[28].mxu1 %vm1203_vm6, %v1328_v31 }
 0xf0e   : > { %3201 = vmatprep.mubr.msk.bf16.mxu1 %vm3503_vm0, %v3502_v1  ;;  %3198 = vmatpush3.bf16.msra.mxu1 %v3386_v2 }
 0xf0f   : > { %3199 = vmatprep.subr.bf16.mxu1 %v3502_v1 }
 0xfd8   : > { %v1259_v35 = vpop.f32.mrb[24].mxu1 }
 0xfd9   : > { %v3175_v37 = vpop.f32.mrb[25].mxu1 }
 0xfda   : > { %v1262_v40 = vpop.f32.mrb[26].mxu1 }
 0xfdb   : > { %v3176_v42 = vpop.f32.mrb[27].mxu1 }
 0xfe0   : > { %v1371_v43 = vpop.f32.mrb[28].mxu1 }
 0xfe1   : > { %1378 = vrot.lane.b32.xlu1 %v1371_v43, %s3509_s24  ;;  %v3187_v44 = vpop.f32.mrb[29].mxu1 }
 0xfe2   : > { %v1374_v46 = vpop.f32.mrb[30].mxu1 }
 0xfe3   : > { %v3188_v47 = vpop.f32.mrb[31].mxu1 }
0x1053   : > { %v1379_v48 = vpop.permute.xlu1 %1378 }
0x1054   : > { %v1381_v49 = vsel %vm369_vm3, %v1259_v35, %v1379_v48 }
0x1055   : > { %v1382_v23 = vpack.c.bf16 %v1381_v49, %v1381_v49 }
0x1057   : > { %3194 = vmatmul.mubr.msk.bf16.vlgmr.msra.gmra.mrb[32].mxu0 %vm255_vm2, %v1382_v23 }
0x1058   : > { %3206 = vmatpush3.bf16.xpose.msra.mxu0 %v1542_v50  ;;  %3207 = vmatprep.mubr.msk.bf16.mxu0 %vm3503_vm0, %v3502_v1 }
0x1059   : > { %3217 = vmatprep.subr.bf16.mxu0 %v3502_v1 }
0x112a   : > { %v1437_v52 = vpop.f32.mrb[32].mxu0 }
0x112b   : > { %v1438_v53 = vadd.f32 %v2917_v51, %v1437_v52  ;;  %v3195_v54 = vpop.f32.mrb[33].mxu0 }
0x112c   : > { %v1440_v55 = vpop.f32.mrb[34].mxu0 }
0x112d   : > { %v3196_v57 = vpop.f32.mrb[35].mxu0  ;;  %v1443_v58 = vadd.f32 %v1438_v53, %v3739_v34  ;;  %v3387_v34 = vld [vmem:[%s4162_s1 + $0xa0] sm:$0xff]  }
0x112e   : > { %3200 = vmatpush3.bf16.msra.mxu1 %v3387_v34 }
0x112f   : > { %v1444_v59 = vsel %vm255_vm2, %v1443_v58, 0.0  ;;  %3211 = vmatprep.subr.bf16.mxu1 %v3502_v1 }
0x1130   : > { %1445 = vadd.xlane.f32.xlu1 %v1444_v59 }
0x11bd   : > { %v1446_v60 = vpop.xlane.xlu1 %1445 }
0x11be   : > { %v1447_v61 = vmul.f32 0.03125, %v1446_v60 }
0x11c0   : > { %v1448_v62 = vsub.f32 %v1443_v58, %v1447_v61 }
0x11c2   : > { %v1449_v63 = vmul.f32 %v1448_v62, %v1448_v62 }
0x11c4   : > { %v1450_v0 = vsel %vm255_vm2, %v1449_v63, 0.0 }
0x11c5   : > { %1451 = vadd.xlane.f32.xlu0 %v1450_v0 }
0x11db   : > { %1647 = vrot.lane.b32.xlu0 %v3820_v56, %s3506_s17 }
0x1252   : > { %v1452_v36 = vpop.xlane.xlu0 %1451 }
0x1253   : > { %v1453_v3 = vmul.f32 0.03125, %v1452_v36  ;;  %v3389_v36 = vld [vmem:[%s4162_s1 + $0xc0] sm:$0xff]  }
0x1255   : > { %v1454_v4 = vadd.f32 1e-06, %v1453_v3 }
0x1256   : > { %v1648_v19 = vpop.permute.xlu0 %1647 }
0x1257   : > { %3450 = vrsqrt.f32 %v1454_v4  ;;  %v1653_v22 = vsel %vm369_vm3, %v1648_v19, 0 }
0x1261   : > { %v3451_v7 = vpop.eup %3450 }
0x1262   : > { %v1456_v8 = vmul.f32 %v3451_v7, %v1448_v62  ;;  %v3388_v62 = vld [vmem:[%s4162_s1 + $0xb8] sm:$0xff]  }
0x1264   : > { %v1461_v11 = vmul.f32 %v1460_v6, %v1456_v8 }
0x1266   : > { %v3880_v12 = vadd.f32 %v1465_v9, %v1461_v11  ;;  %v2929_v11 = vld [vmem:[%s4163_s2 + $0x90] ss:$0 sm:$0xff] }
0x1268   : > { %v1471_v13 = vpack.c.bf16 %v3880_v12, %v3880_v12 }
0x126a   : > { %3202 = vmatmul.mubr.msk.bf16.vlgmr.msra.gmra.mrb[32].mxu1 %vm255_vm2, %v1471_v13 }
0x126b   : > { %3213 = vmatprep.mubr.msk.bf16.mxu1 %vm3503_vm0, %v3502_v1 }
0x133d   : > { %v1526_v41 = vpop.f32.mrb[32].mxu1 }
0x133e   : > { %v1527_v16 = vadd.f32 %v2921_v15, %v1526_v41  ;;  %v3203_v18 = vpop.f32.mrb[33].mxu1 }
0x133f   : > { %v1529_v45 = vpop.f32.mrb[34].mxu1 }
0x1340   : > { %v1536_v20 = vpack.c.bf16 %v1527_v16, %v1527_v16  ;;  %v3204_v21 = vpop.f32.mrb[35].mxu1 }
0x1342   : > { %1645 = vrot.lane.b32.xlu1 %v1536_v20, %s3506_s17  ;;  %3208 = vmatmul.mubr.msk.bf16.vlgmr.msra.gmra.mrb[36].mxu0 %vm369_vm3, %v1536_v20 }
0x1343   : > { %3218 = vmatpush3.bf16.xpose.msra.mxu0 %v1653_v22  ;;  %3219 = vmatprep.mubr.msk.bf16.mxu0 %vm3503_vm0, %v3502_v1 }
0x1344   : > { %3229 = vmatprep.subr.bf16.mxu0 %v3502_v1 }
0x13b4   : > { %v1646_v24 = vpop.permute.xlu1 %1645 }
0x13b5   : > { %3220 = vmatmul.mubr.msk.bf16.vlgmr.msra.gmra.mrb[40].mxu0 %vm369_vm3, %v1646_v24 }
0x13b6   : > { %3233 = vmatprep.mubr.msk.bf16.mxu0 %vm3503_vm0, %v3502_v1  ;;  %3230 = vmatpush3.bf16.msra.mxu0 %v3388_v62 }
0x13b7   : > { %3231 = vmatprep.subr.bf16.mxu0 %v3502_v1 }
0x13ba   : > { %3232 = vmatpush3.bf16.msra.mxu0 %v3389_v36 }
0x13bb   : > { %3245 = vmatprep.subr.bf16.mxu0 %v3502_v1 }
0x1415   : > { %v1578_v25 = vpop.f32.mrb[36].mxu0 }
0x1416   : > { %v1584_v27 = vmul.f32 0.25, %v1578_v25  ;;  %v3209_v28 = vpop.f32.mrb[37].mxu0 }
0x1417   : > { %v1581_v29 = vpop.f32.mrb[38].mxu0 }
0x1418   : > { %v3210_v30 = vpop.f32.mrb[39].mxu0  ;;  %v1585_v14 = vsel %vm369_vm3, %v1584_v27, -inf }
0x1419   : > { %1586 = vmax.xlane.f32.xlu1 %v1585_v14  ;;  %v1836_v30 = vsub.s32 4, %v3595_v39  ;;  %v3950_v14 = vld [vmem:[%s4163_s2 + $0x40] sm:$0x7f] }
0x1488   : > { %v1689_v10 = vpop.f32.mrb[40].mxu0 }
0x1489   : > { %v1695_v31 = vmul.f32 0.25, %v1689_v10  ;;  %v3221_v32 = vpop.f32.mrb[41].mxu0  ;;  %v1837_v10 = vrot.slane %v3950_v14, %v1836_v30 }
0x148a   : > { %v1692_v33 = vpop.f32.mrb[42].mxu0 }
0x148b   : > { %v3222_v35 = vpop.f32.mrb[43].mxu0  ;;  %v1696_v37 = vsel %vm369_vm3, %v1695_v31, -inf  ;;  %v3956_v33 = vld [vmem:[%s4163_s2 + $0x48] sm:$0x7f] }
0x148c   : > { %1697 = vmax.xlane.f32.xlu0 %v1696_v37  ;;  %v1842_v35 = vrot.slane %v3956_v33, %v1836_v30 }
0x14a6   : > { %v1587_v40 = vpop.xlane.xlu1 %1586 }
0x14a7   : > { %v1588_v42 = vsub.f32 %v1584_v27, %v1587_v40  ;;  %v3391_v27 = vld [vmem:[%s4162_s1 + $0xd0] sm:$0xff]  }
0x14a9   : > { %v1589_v43 = vmul.f32 1.442695, %v1588_v42 }
0x14ab   : > { %3452 = vpow2.f32 %v1589_v43  ;;  %v3392_v43 = vld [vmem:[%s4162_s1 + $0xd8] sm:$0xff]  }
0x14b5   : > { %v3453_v44 = vpop.eup %3452 }
0x14b6   : > { %v1591_v46 = vsel %vm369_vm3, %v3453_v44, 0.0 }
0x14b7   : > { %1592 = vadd.xlane.f32.xlu0 %v1591_v46  ;;  %v3394_v46 = vld [vmem:[%s4162_s1 + $0xe8] sm:$0xff]  }
0x14cd   : > { %1598 = vrot.lane.b32.xlu0 %v3820_v56, %s3505_s16 }
0x1519   : > { %v1698_v47 = vpop.xlane.xlu0 %1697 }
0x151a   : > { %v1699_v48 = vsub.f32 %v1695_v31, %v1698_v47  ;;  %v3395_v47 = vld [vmem:[%s4162_s1 + $0xf0] sm:$0xff]  }
0x151c   : > { %v1700_v49 = vmul.f32 1.442695, %v1699_v48  ;;  %v2933_v48 = vld [vmem:[%s4163_s2 + $0x98] ss:$0 sm:$0xff] }
0x151e   : > { %3454 = vpow2.f32 %v1700_v49 }
0x1528   : > { %v3455_v23 = vpop.eup %3454 }
0x1529   : > { %v1702_v50 = vsel %vm369_vm3, %v3455_v23, 0.0 }
0x152a   : > { %1703 = vadd.xlane.f32.xlu1 %v1702_v50 }
0x153b   : > { %1708 = vrot.lane.b32.xlu1 %v3820_v56, %s3504_s15 }
0x1544   : > { %v1593_v51 = vpop.xlane.xlu0 %1592 }
0x1545   : > { %3456 = vrcp.f32 %v1593_v51 }
0x1548   : > { %v1599_v52 = vpop.permute.xlu0 %1598 }
0x1549   : > { %3212 = vmatpush3.bf16.msra.mxu1 %v1599_v52 }
0x154a   : > { %3223 = vmatprep.subr.bf16.mxu1 %v3502_v1 }
0x154f   : > { %v3457_v53 = vpop.eup %3456 }
0x1550   : > { %v1595_v54 = vmul.f32 %v3457_v53, %v3453_v44  ;;  %v3393_v44 = vld [vmem:[%s4162_s1 + $0xe0] sm:$0xff]  }
0x1552   : > { %v1596_v55 = vpack.c.bf16 %v1595_v54, %v1595_v54 }
0x1554   : > { %3214 = vmatmul.mubr.msk.bf16.vlgmr.msra.gmra.mrb[36].mxu1 %vm369_vm3, %v1596_v55 }
0x1555   : > { %3225 = vmatprep.mubr.msk.bf16.mxu1 %vm3503_vm0, %v3502_v1 }
0x15b7   : > { %v1704_v57 = vpop.xlane.xlu1 %1703 }
0x15b8   : > { %3458 = vrcp.f32 %v1704_v57 }
0x15bb   : > { %v1709_v58 = vpop.permute.xlu1 %1708 }
0x15bc   : > { %3224 = vmatpush3.bf16.msra.mxu1 %v1709_v58 }
0x15bd   : > { %3237 = vmatprep.subr.bf16.mxu1 %v3502_v1 }
0x15c2   : > { %v3459_v59 = vpop.eup %3458 }
0x15c3   : > { %v1706_v60 = vmul.f32 %v3459_v59, %v3455_v23 }
0x15c5   : > { %v1707_v61 = vpack.c.bf16 %v1706_v60, %v1706_v60 }
0x15c7   : > { %3226 = vmatmul.mubr.msk.bf16.vlgmr.msra.gmra.mrb[40].mxu1 %vm369_vm3, %v1707_v61 }
0x15c8   : > { %3241 = vmatprep.mubr.msk.bf16.mxu1 %vm3503_vm0, %v3502_v1 }
0x1627   : > { %v1638_v63 = vpop.f32.mrb[36].mxu1 }
0x1628   : > { %v3215_v0 = vpop.f32.mrb[37].mxu1 }
0x1629   : > { %v1641_v2 = vpop.f32.mrb[38].mxu1 }
0x162a   : > { %v3216_v34 = vpop.f32.mrb[39].mxu1  ;;  %v2942_v2 = vld [vmem:[%s4163_s2 + $0xa0] ss:$0 sm:$0xff] }
0x169a   : > { %v1748_v3 = vpop.f32.mrb[40].mxu1 }
0x169b   : > { %1755 = vrot.lane.b32.xlu1 %v1748_v3, %s3509_s24  ;;  %v3227_v4 = vpop.f32.mrb[41].mxu1 }
0x169c   : > { %v1751_v5 = vpop.f32.mrb[42].mxu1 }
0x169d   : > { %v3228_v6 = vpop.f32.mrb[43].mxu1 }
0x170d   : > { %v1756_v7 = vpop.permute.xlu1 %1755 }
0x170e   : > { %v1758_v8 = vsel %vm369_vm3, %v1638_v63, %v1756_v7 }
0x170f   : > { %v1759_v9 = vpack.c.bf16 %v1758_v8, %v1758_v8 }
0x1711   : > { %3234 = vmatmul.mubr.msk.bf16.vlgmr.msra.gmra.mrb[44].mxu0 %vm255_vm2, %v1759_v9 }
0x1712   : > { %3253 = vmatprep.mubr.msk.bf16.mxu0 %vm3503_vm0, %v3502_v1  ;;  %3246 = vmatpush3.bf16.msra.mxu0 %v3392_v43 }
0x1713   : > { %3247 = vmatprep.subr.bf16.mxu0 %v3502_v1 }
0x1716   : > { %3248 = vmatpush3.bf16.msra.mxu0 %v3393_v44 }
0x1717   : > { %3249 = vmatprep.subr.bf16.mxu0 %v3502_v1 }
0x171a   : > { %3250 = vmatpush3.bf16.msra.mxu0 %v3394_v46 }
0x171b   : > { %3251 = vmatprep.subr.bf16.mxu0 %v3502_v1 }
0x171e   : > { %3252 = vmatpush3.bf16.msra.mxu0 %v3395_v47 }
0x171f   : > { %3271 = vmatprep.subr.bf16.mxu0 %v3502_v1 }
0x17e4   : > { %v1814_v13 = vpop.f32.mrb[44].mxu0 }
0x17e5   : > { %v1815_v15 = vadd.f32 %v2929_v11, %v1814_v13  ;;  %v3235_v41 = vpop.f32.mrb[45].mxu0 }
0x17e6   : > { %v1817_v16 = vpop.f32.mrb[46].mxu0  ;;  %v3397_v41 = vld [vmem:[%s4162_s1 + $0x100] sm:$0xff]  }
0x17e7   : > { %v3236_v18 = vpop.f32.mrb[47].mxu0  ;;  %v1820_v19 = vadd.f32 %v1815_v15, %v3880_v12  ;;  %v3390_v12 = vld [vmem:[%s4162_s1 + $0xc8] sm:$0xff]   ;;  %v3396_v15 = vld [vmem:[%s4162_s1 + $0xf8] sm:$0xff]  }
0x17e8   : > { %3238 = vmatpush3.bf16.msra.mxu1 %v3390_v12 }
0x17e9   : > { %v1821_v45 = vsel %vm255_vm2, %v1820_v19, 0.0  ;;  %3239 = vmatprep.subr.bf16.mxu1 %v3502_v1 }
0x17ea   : > { %1822 = vadd.xlane.f32.xlu1 %v1821_v45  ;;  %v2016_v45 = vsub.s32 5, %v3595_v39 }
0x17ec   : > { %3240 = vmatpush3.bf16.msra.mxu1 %v3391_v27 }
0x17ed   : > { %3257 = vmatprep.subr.bf16.mxu1 %v3502_v1 }
0x17fb   : > { %2094 = vrot.lane.b32.xlu1 %v3820_v56, %s3507_s18 }
0x17ff   : > { %2220 = vrot.lane.b32.xlu1 %v3820_v56, %s3508_s19 }
0x1877   : > { %v1823_v20 = vpop.xlane.xlu1 %1822 }
0x1878   : > { %v1824_v21 = vmul.f32 0.03125, %v1823_v20  ;;  %v2017_v20 = vrot.slane %v3950_v14, %v2016_v45 }
0x187a   : > { %v1825_v22 = vsub.f32 %v1820_v19, %v1824_v21 }
0x187c   : > { %v1826_v24 = vmul.f32 %v1825_v22, %v1825_v22 }
0x187e   : > { %v1827_v25 = vsel %vm255_vm2, %v1826_v24, 0.0  ;;  %v2022_v24 = vrot.slane %v3956_v33, %v2016_v45 }
0x187f   : > { %1828 = vadd.xlane.f32.xlu0 %v1827_v25 }
0x190c   : > { %v1829_v56 = vpop.xlane.xlu0 %1828 }
0x190d   : > { %v1830_v28 = vmul.f32 0.03125, %v1829_v56  ;;  %v2943_v56 = vld [vmem:[%s4163_s2 + $0xa8] ss:$0 sm:$0xff] }
0x190f   : > { %v1831_v29 = vadd.f32 1e-06, %v1830_v28 }
0x1911   : > { %3460 = vrsqrt.f32 %v1831_v29 }
0x191b   : > { %v3461_v31 = vpop.eup %3460 }
0x191c   : > { %v1833_v32 = vmul.f32 %v3461_v31, %v1825_v22 }
0x191e   : > { %v1838_v37 = vmul.f32 %v1837_v10, %v1833_v32 }
0x1920   : > { %v1843_v40 = vadd.f32 %v1842_v35, %v1838_v37  ;;  %v2095_v37 = vpop.permute.xlu1 %2094 }
0x1922   : > { %v1848_v42 = vpack.c.bf16 %v1843_v40, %v1843_v40 }
0x1924   : > { %3242 = vmatmul.mubr.msk.bf16.vlgmr.msra.gmra.mrb[44].mxu1 %vm255_vm2, %v1848_v42  ;;  %v2221_v43 = vpop.permute.xlu1 %2220 }
0x1925   : > { %3261 = vmatprep.mubr.msk.bf16.mxu1 %vm3503_vm0, %v3502_v1  ;;  %3258 = vmatpush3.bf16.msra.mxu1 %v3396_v15 }
0x1926   : > { %3259 = vmatprep.subr.bf16.mxu1 %v3502_v1 }
0x1929   : > { %3260 = vmatpush3.bf16.msra.mxu1 %v3397_v41 }
0x192a   : > { %3265 = vmatprep.subr.bf16.mxu1 %v3502_v1 }
0x19f7   : > { %v1903_v49 = vpop.f32.mrb[44].mxu1 }
0x19f8   : > { %v1904_v23 = vadd.f32 %v2933_v48, %v1903_v49  ;;  %v3243_v50 = vpop.f32.mrb[45].mxu1 }
0x19f9   : > { %v1906_v51 = vpop.f32.mrb[46].mxu1 }
0x19fa   : > { %v1909_v52 = vmul.f32 %v1904_v23, %v1904_v23  ;;  %v3244_v53 = vpop.f32.mrb[47].mxu1 }
0x19fc   : > { %v1910_v54 = vmul.f32 %v1909_v52, %v1904_v23 }
0x19fe   : > { %v1911_v55 = vmul.f32 0.044715, %v1910_v54 }
0x1a00   : > { %v1912_v57 = vadd.f32 %v1911_v55, %v1904_v23 }
0x1a02   : > { %v1913_v58 = vmul.f32 0.7978846, %v1912_v57 }
0x1a04   : > { %3462 = vtanh.f32 %v1913_v58 }
0x1a0e   : > { %v3463_v59 = vpop.eup %3462 }
0x1a0f   : > { %v1915_v60 = vadd.f32 1.0, %v3463_v59 }
0x1a11   : > { %v1916_v61 = vmul.f32 0.5, %v1915_v60 }
0x1a13   : > { %v1917_v62 = vmul.f32 %v1916_v61, %v1904_v23 }
0x1a15   : > { %v1926_v63 = vpack.c.bf16 %v1917_v62, %v1917_v62 }
0x1a17   : > { %3254 = vmatmul.mubr.msk.bf16.vlgmr.msra.gmra.mrb[48].mxu0 %vm843_vm4, %v1926_v63 }
0x1a18   : > { %3273 = vmatprep.mubr.msk.bf16.mxu0 %vm3503_vm0, %v3502_v1 }
0x1aea   : > { %v1988_v0 = vpop.f32.mrb[48].mxu0 }
0x1aeb   : > { %v1994_v34 = vadd.f32 %v1988_v0, %v1843_v40  ;;  %v3255_v36 = vpop.f32.mrb[49].mxu0 }
0x1aec   : > { %v1991_v3 = vpop.f32.mrb[50].mxu0 }
0x1aed   : > { %v3256_v4 = vpop.f32.mrb[51].mxu0  ;;  %v2000_v5 = vadd.f32 %v2942_v2, %v1994_v34 }
0x1aef   : > { %v2001_v6 = vsel %vm255_vm2, %v2000_v5, 0.0 }
0x1af0   : > { %2002 = vadd.xlane.f32.xlu0 %v2001_v6 }
0x1b7d   : > { %v2003_v7 = vpop.xlane.xlu0 %2002 }
0x1b7e   : > { %v2004_v8 = vmul.f32 0.03125, %v2003_v7 }
0x1b80   : > { %v2005_v9 = vsub.f32 %v2000_v5, %v2004_v8 }
0x1b82   : > { %v2006_v11 = vmul.f32 %v2005_v9, %v2005_v9 }
0x1b84   : > { %v2007_v13 = vsel %vm255_vm2, %v2006_v11, 0.0 }
0x1b85   : > { %2008 = vadd.xlane.f32.xlu0 %v2007_v13 }
0x1c12   : > { %v2009_v16 = vpop.xlane.xlu0 %2008 }
0x1c13   : > { %v2010_v18 = vmul.f32 0.03125, %v2009_v16 }
0x1c15   : > { %v2011_v19 = vadd.f32 1e-06, %v2010_v18 }
0x1c17   : > { %3464 = vrsqrt.f32 %v2011_v19 }
0x1c21   : > { %v3465_v21 = vpop.eup %3464 }
0x1c22   : > { %v2013_v22 = vmul.f32 %v3465_v21, %v2005_v9 }
0x1c24   : > { %v2018_v25 = vmul.f32 %v2017_v20, %v2013_v22 }
0x1c26   : > { %v4000_v12 = vadd.f32 %v2022_v24, %v2018_v25 }
0x1c28   : > { %v4004_v27 = vpack.c.bf16 %v4000_v12, %v4000_v12 }
0x1c2a   : > { %3262 = vmatmul.mubr.msk.bf16.vlgmr.msra.gmra.mrb[48].mxu1 %vm255_vm2, %v4004_v27 }
0x1c2b   : > { %3267 = vmatprep.mubr.msk.bf16.mxu1 %vm3503_vm0, %v3502_v1 }
0x1cfd   : > { %v2083_v28 = vpop.f32.mrb[48].mxu1 }
0x1cfe   : > { %v2084_v29 = vadd.f32 %v2943_v56, %v2083_v28  ;;  %v3263_v30 = vpop.f32.mrb[49].mxu1 }
0x1cff   : > { %v2086_v10 = vpop.f32.mrb[50].mxu1 }
0x1d00   : > { %v4013_v31 = vpack.c.bf16 %v2084_v29, %v2084_v29  ;;  %v3264_v32 = vpop.f32.mrb[51].mxu1 }
0x1d02   : > { %2222 = vrot.lane.b32.xlu0 %v4013_v31, %s3506_s17  ;;  %v2100_v35 = vsel %vm369_vm3, %v4013_v31, 0 }
0x1d03   : > { %3266 = vmatpush3.bf16.xpose.msra.mxu1 %v2100_v35 }
0x1d04   : > { %3277 = vmatprep.subr.bf16.mxu1 %v3502_v1 }
0x1d0a   : > { %3268 = vmatmul.mubr.msk.bf16.vlgmr.msra.gmra.mrb[52].mxu1 %vm369_vm3, %v2095_v37 }
0x1d0b   : > { %3279 = vmatprep.mubr.msk.bf16.mxu1 %vm3503_vm0, %v3502_v1 }
0x1d74   : > { %v2223_v40 = vpop.permute.xlu0 %2222 }
0x1d75   : > { %v2228_v42 = vsel %vm369_vm3, %v2223_v40, 0 }
0x1d76   : > { %3278 = vmatpush3.bf16.xpose.msra.mxu1 %v2228_v42 }
0x1d77   : > { %3289 = vmatprep.subr.bf16.mxu1 %v3502_v1 }
0x1d7d   : > { %3280 = vmatmul.mubr.msk.bf16.vlgmr.msra.gmra.mrb[56].mxu1 %vm369_vm3, %v2221_v43 }
0x1d7e   : > { %3293 = vmatprep.mubr.msk.bf16.mxu1 %vm3503_vm0, %v3502_v1 }
0x1ddd   : > { %v2136_v44 = vpop.f32.mrb[52].mxu1 }
0x1dde   : > { %v2143_v46 = vmul.f32 0.25, %v2136_v44  ;;  %v3269_v47 = vpop.f32.mrb[53].mxu1 }
0x1ddf   : > { %v2139_v48 = vpop.f32.mrb[54].mxu1 }
0x1de0   : > { %v2144_v49 = vmul.f32 0.25, %v2139_v48  ;;  %v3270_v23 = vpop.f32.mrb[55].mxu1  ;;  %v2145_v50 = vsel %vm1150_vm5, %v2143_v46, -1e+30  ;;  %v3398_v46 = vld [vmem:[%s4162_s1 + $0x118] sm:$0xff]   ;;  %v3399_v48 = vld [vmem:[%s4162_s1 + $0x120] sm:$0xff]  }
0x1de1   : > { %v2147_v51 = vsel %vm1203_vm6, %v2145_v50, -inf }
0x1de2   : > { %2148 = vmax.xlane.f32.xlu1 %v2147_v51  ;;  %v2146_v52 = vsel %vm1150_vm5, %v2144_v49, -1e+30  ;;  %v3400_v49 = vld [vmem:[%s4162_s1 + $0x108] sm:$0xff]  }
0x1de3   : > { %v2150_v53 = vsel %vm1203_vm6, %v2146_v52, -inf  ;;  %3290 = vmatpush3.bf16.msra.mxu1 %v3400_v49 }
0x1de4   : > { %2151 = vmax.xlane.f32.xlu0 %v2150_v53  ;;  %3291 = vmatprep.subr.bf16.mxu1 %v3502_v1 }
0x1e50   : > { %v2264_v54 = vpop.f32.mrb[56].mxu1 }
0x1e51   : > { %v2271_v55 = vmul.f32 0.25, %v2264_v54  ;;  %v3281_v57 = vpop.f32.mrb[57].mxu1 }
0x1e52   : > { %v2267_v58 = vpop.f32.mrb[58].mxu1 }
0x1e53   : > { %v2272_v59 = vmul.f32 0.25, %v2267_v58  ;;  %v3282_v60 = vpop.f32.mrb[59].mxu1  ;;  %v2273_v61 = vsel %vm1150_vm5, %v2271_v55, -1e+30 }
0x1e54   : > { %v2275_v62 = vsel %vm1203_vm6, %v2273_v61, -inf }
0x1e55   : > { %2276 = vmax.xlane.f32.xlu0 %v2275_v62  ;;  %v2274_v63 = vsel %vm1150_vm5, %v2272_v59, -1e+30 }
0x1e56   : > { %v2278_v0 = vsel %vm1203_vm6, %v2274_v63, -inf }
0x1e57   : > { %2279 = vmax.xlane.f32.xlu1 %v2278_v0  ;;  %v2463_v0 = vld [vmem:[%s4163_s2 + $0xb8] sm:$0x1] }
0x1e6f   : > { %v2149_v2 = vpop.xlane.xlu1 %2148 }
0x1e70   : > { %v2153_v34 = vsub.f32 %v2145_v50, %v2149_v2 }
0x1e71   : > { %v2152_v36 = vpop.xlane.xlu0 %2151 }
0x1e72   : > { %v2155_v3 = vmul.f32 1.442695, %v2153_v34  ;;  %v2154_v4 = vsub.f32 %v2146_v52, %v2152_v36  ;;  %v3401_v52 = vld [vmem:[%s4162_s1 + $0x110] sm:$0xff]  }
0x1e73   : > { %3292 = vmatpush3.bf16.msra.mxu1 %v3401_v52 }
0x1e74   : > { %3466 = vpow2.f32 %v2155_v3  ;;  %v2157_v5 = vmul.f32 1.442695, %v2154_v4  ;;  %3305 = vmatprep.subr.bf16.mxu1 %v3502_v1  ;;  %v3402_v4 = vld [vmem:[%s4162_s1 + $0x128] sm:$0xff]  }
0x1e76   : > { %3468 = vpow2.f32 %v2157_v5 }
0x1e7e   : > { %v3467_v6 = vpop.eup %3466 }
0x1e7f   : > { %v2159_v7 = vsel %vm1203_vm6, %v3467_v6, 0.0 }
0x1e80   : > { %v3469_v8 = vpop.eup %3468  ;;  %2160 = vadd.xlane.f32.xlu0 %v2159_v7  ;;  %v3403_v7 = vld [vmem:[%s4162_s1 + $0x130] sm:$0xff]  }
0x1e81   : > { %v2162_v9 = vsel %vm1203_vm6, %v3469_v8, 0.0 }
0x1e82   : > { %2163 = vadd.xlane.f32.xlu1 %v2162_v9  ;;  %v3404_v9 = vld [vmem:[%s4162_s1 + $0x148] sm:$0xff]  }
0x1ee2   : > { %v2277_v26 = vpop.xlane.xlu0 %2276 }
0x1ee3   : > { %v2281_v11 = vsub.f32 %v2273_v61, %v2277_v26 }
0x1ee4   : > { %v2280_v13 = vpop.xlane.xlu1 %2279 }
0x1ee5   : > { %v2283_v15 = vmul.f32 1.442695, %v2281_v11  ;;  %v2282_v41 = vsub.f32 %v2274_v63, %v2280_v13  ;;  %v2662_v11 = vadd.f32 %v4000_v12, %v4000_v12  ;;  %v3405_v13 = vld [vmem:[%s4162_s1 + $0x150] sm:$0xff]  }
0x1ee6   : > { %v2951_v12 = vld [vmem:[%s4163_s2 + $0xb0] ss:$0 sm:$0xff] }
0x1ee7   : > { %3470 = vpow2.f32 %v2283_v15  ;;  %v2285_v16 = vmul.f32 1.442695, %v2282_v41  ;;  %v2667_v15 = vpack.c.bf16 %v2662_v11, %v2662_v11 }
0x1ee9   : > { %3472 = vpow2.f32 %v2285_v16  ;;  %v2670_v41 = vshrl.u32 %v2667_v15, 16 }
0x1ef1   : > { %v3471_v18 = vpop.eup %3470 }
0x1ef2   : > { %v2287_v19 = vsel %vm1203_vm6, %v3471_v18, 0.0 }
0x1ef3   : > { %v3473_v45 = vpop.eup %3472  ;;  %2288 = vadd.xlane.f32.xlu0 %v2287_v19 }
0x1ef4   : > { %v2290_v20 = vsel %vm1203_vm6, %v3473_v45, 0.0 }
0x1ef5   : > { %2291 = vadd.xlane.f32.xlu1 %v2290_v20 }
0x1f06   : > { %2298 = vrot.lane.b32.xlu1 %v4013_v31, %s3504_s15 }
0x1f09   : > { %2171 = vrot.lane.b32.xlu0 %v4013_v31, %s3505_s16 }
0x1f0d   : > { %v2161_v22 = vpop.xlane.xlu0 %2160 }
0x1f0f   : > { %v2164_v21 = vpop.xlane.xlu1 %2163 }
0x1f10   : > { %3474 = vrcp.f32 %v2164_v21 }
0x1f11   : > { %3476 = vrcp.f32 %v2161_v22 }
0x1f1a   : > { %v3475_v24 = vpop.eup %3474 }
0x1f1b   : > { %v3477_v56 = vpop.eup %3476  ;;  %v2168_v29 = vmul.f32 %v3475_v24, %v3469_v8 }
0x1f1c   : > { %v2167_v10 = vmul.f32 %v3477_v56, %v3467_v6 }
0x1f1e   : > { %v2169_v37 = vpack.c.bf16 %v2168_v29, %v2167_v10 }
0x1f80   : > { %v2289_v25 = vpop.xlane.xlu0 %2288 }
0x1f81   : > { %3478 = vrcp.f32 %v2289_v25 }
0x1f82   : > { %v2292_v28 = vpop.xlane.xlu1 %2291 }
0x1f83   : > { %3480 = vrcp.f32 %v2292_v28 }
0x1f84   : > { %v2172_v30 = vpop.permute.xlu0 %2171 }
0x1f85   : > { %v2177_v32 = vsel %vm1221_vm7, %v2172_v30, 0 }
0x1f86   : > { %3272 = vmatpush3.bf16.msra.mxu0 %v2177_v32  ;;  %v2299_v35 = vpop.permute.xlu1 %2298 }
0x1f87   : > { %3283 = vmatprep.subr.bf16.mxu0 %v3502_v1  ;;  %v2304_v31 = vsel %vm1221_vm7, %v2299_v35, 0 }
0x1f89   : > { %3274 = vmatmul.mubr.msk.bf16.vlgmr.msra.gmra.mrb[52].mxu0 %vm1203_vm6, %v2169_v37 }
0x1f8a   : > { %3284 = vmatpush3.bf16.msra.mxu0 %v2304_v31  ;;  %3285 = vmatprep.mubr.msk.bf16.mxu0 %vm3503_vm0, %v3502_v1 }
0x1f8b   : > { %v3479_v40 = vpop.eup %3478  ;;  %3297 = vmatprep.subr.bf16.mxu0 %v3502_v1 }
0x1f8c   : > { %v2295_v43 = vmul.f32 %v3479_v40, %v3471_v18 }
0x1f8d   : > { %v3481_v42 = vpop.eup %3480 }
0x1f8e   : > { %v2296_v44 = vmul.f32 %v3481_v42, %v3473_v45 }
0x1f90   : > { %v2297_v47 = vpack.c.bf16 %v2296_v44, %v2295_v43 }
0x1f92   : > { %3286 = vmatmul.mubr.msk.bf16.vlgmr.msra.gmra.mrb[56].mxu0 %vm1203_vm6, %v2297_v47 }
0x1f93   : > { %3298 = vmatpush3.bf16.msra.mxu0 %v3398_v46  ;;  %3301 = vmatprep.mubr.msk.bf16.mxu0 %vm3503_vm0, %v3502_v1 }
0x1f94   : > { %3299 = vmatprep.subr.bf16.mxu0 %v3502_v1 }
0x1f97   : > { %3300 = vmatpush3.bf16.msra.mxu0 %v3399_v48 }
0x1f98   : > { %3313 = vmatprep.subr.bf16.mxu0 %v3502_v1 }
0x1f9a   : > { %3302 = vmatmul.mubr.msk.bf16.vlgmr.msra.gmra.mrb[60].mxu0 %vm255_vm2, %v4004_v27 }
0x1f9b   : > { %3317 = vmatprep.mubr.msk.bf16.mxu0 %vm3503_vm0, %v3502_v1 }
0x205c   : > { %v2213_v23 = vpop.f32.mrb[52].mxu0 }
0x205d   : > { %v3275_v50 = vpop.f32.mrb[53].mxu0 }
0x205e   : > { %v2216_v51 = vpop.f32.mrb[54].mxu0  ;;  %v3407_v50 = vld [vmem:[%s4162_s1 + $0x140] sm:$0xff]  }
0x205f   : > { %v3276_v53 = vpop.f32.mrb[55].mxu0 }
0x2065   : > { %v2340_v27 = vpop.f32.mrb[56].mxu0 }
0x2066   : > { %v3287_v54 = vpop.f32.mrb[57].mxu0 }
0x2067   : > { %v2343_v55 = vpop.f32.mrb[58].mxu0 }
0x2068   : > { %v3360_v57 = vpack.i.bf16 %v2343_v55, %v2340_v27  ;;  %v3288_v58 = vpop.f32.mrb[59].mxu0 }
0x206a   : > { %3361 = vrot.lane.b32.xlu1 %v3360_v57, %s3509_s24 }
0x206d   : > { %v2510_v59 = vpop.f32.mrb[60].mxu0 }
0x206e   : > { %v3303_v60 = vpop.f32.mrb[61].mxu0  ;;  %v2511_v5 = vadd.f32 %v2510_v59, %v2463_v0  ;;  %v2449_v0 = vsub.s32 6, %v3595_v39 }
0x206f   : > { %v2513_v61 = vpop.f32.mrb[62].mxu0 }
0x2070   : > { %v3304_v62 = vpop.f32.mrb[63].mxu0  ;;  %v2516_v8 = vmax.f32 %v2511_v5, 0.0 }
0x2072   : > { %v2521_v26 = vpack.c.bf16 %v2516_v8, %v2516_v8 }
0x20dc   : > { %v3362_v63 = vpop.permute.xlu1 %3361 }
0x20dd   : > { %v3364_v2 = vunpack.i.h.bf16 %v3362_v63  ;;  %v3363_v34 = vunpack.i.l.bf16 %v3362_v63 }
0x20df   : > { %v2356_v36 = vsel %vm369_vm3, %v2216_v51, %v3364_v2  ;;  %v2355_v3 = vsel %vm369_vm3, %v2213_v23, %v3363_v34  ;;  %v3406_v23 = vld [vmem:[%s4162_s1 + $0x138] sm:$0xff]   ;;  %v2668_v51 = vld [vmem:[%s4163_s2 + $0xd0] sm:$0x1]  ;;  %v2450_v34 = vrot.slane %v3950_v14, %v2449_v0  ;;  %v3409_v14 = vld [vmem:[%s4162_s1 + $0x160] sm:$0xff]  }
0x20e0   : > { %v2357_v6 = vpack.c.bf16 %v2356_v36, %v2355_v3  ;;  %3314 = vmatpush3.bf16.msra.mxu0 %v3406_v23 }
0x20e1   : > { %3315 = vmatprep.subr.bf16.mxu0 %v3502_v1 }
0x20e2   : > { %3294 = vmatmul.mubr.msk.bf16.vlgmr.msra.gmra.mrb[60].mxu1 %vm255_vm2, %v2357_v6 }
0x20e3   : > { %3306 = vmatpush3.bf16.msra.mxu1 %v3402_v4  ;;  %3309 = vmatprep.mubr.msk.bf16.mxu1 %vm3503_vm0, %v3502_v1 }
0x20e4   : > { %3307 = vmatprep.subr.bf16.mxu1 %v3502_v1  ;;  %3316 = vmatpush3.bf16.msra.mxu0 %v3407_v50 }
0x20e5   : > { %3329 = vmatprep.subr.bf16.mxu0 %v3502_v1 }
0x20e7   : > { %3308 = vmatpush3.bf16.msra.mxu1 %v3403_v7  ;;  %v2456_v7 = vrot.slane %v3956_v33, %v2449_v0 }
0x20e8   : > { %3321 = vmatprep.subr.bf16.mxu1 %v3502_v1 }
0x20ea   : > { %3310 = vmatmul.mubr.msk.bf16.vlgmr.msra.gmra.mrb[64].mxu1 %vm255_vm2, %v2521_v26 }
0x20eb   : > { %3322 = vmatpush3.bf16.msra.mxu1 %v3404_v9  ;;  %3325 = vmatprep.mubr.msk.bf16.mxu1 %vm3503_vm0, %v3502_v1 }
0x20ec   : > { %3323 = vmatprep.subr.bf16.mxu1 %v3502_v1 }
0x20ef   : > { %3324 = vmatpush3.bf16.msra.mxu1 %v3405_v13  ;;  %v3408_v13 = vld [vmem:[%s4162_s1 + $0x158] sm:$0xff]  }
0x20f2   : > { %3326 = vmatmul.mubr.msk.bf16.vlgmr.msra.gmra.mrb[68].mxu1 %vm255_vm2, %v2670_v41 }
0x21b5   : > { %v2412_v16 = vpop.f32.mrb[60].mxu1 }
0x21b6   : > { %v2413_v18 = vadd.f32 %v2951_v12, %v2412_v16  ;;  %v3295_v19 = vpop.f32.mrb[61].mxu1 }
0x21b7   : > { %v2415_v45 = vpop.f32.mrb[62].mxu1 }
0x21b8   : > { %v2416_v20 = vadd.f32 %v2951_v12, %v2415_v45  ;;  %v3296_v21 = vpop.f32.mrb[63].mxu1  ;;  %v2419_v22 = vadd.f32 %v2413_v18, %v3788_v17  ;;  %v2961_v12 = vld [vmem:[%s4163_s2 + $0xc8] ss:$0 sm:$0xff] }
0x21ba   : > { %v2421_v24 = vsel %vm255_vm2, %v2419_v22, 0.0  ;;  %v2420_v25 = vadd.f32 %v2416_v20, %v3796_v38 }
0x21bb   : > { %2422 = vadd.xlane.f32.xlu1 %v2421_v24 }
0x21bc   : > { %v2424_v56 = vsel %vm255_vm2, %v2420_v25, 0.0 }
0x21bd   : > { %2425 = vadd.xlane.f32.xlu0 %v2424_v56  ;;  %v4115_v28 = vpop.f32.mrb[64].mxu1 }
0x21be   : > { %v3311_v29 = vpop.f32.mrb[65].mxu1 }
0x21bf   : > { %v2575_v30 = vpop.f32.mrb[66].mxu1 }
0x21c0   : > { %v3312_v10 = vpop.f32.mrb[67].mxu1 }
0x21c5   : > { %v2721_v32 = vpop.f32.mrb[68].mxu1 }
0x21c6   : > { %v3327_v35 = vpop.f32.mrb[69].mxu1  ;;  %v2722_v52 = vadd.f32 %v2721_v32, %v2668_v51  ;;  %v2522_v51 = vld [vmem:[%s4163_s2 + $0xc0] sm:$0x1] }
0x21c7   : > { %v2724_v37 = vpop.f32.mrb[70].mxu1 }
0x21c8   : > { %v3328_v31 = vpop.f32.mrb[71].mxu1  ;;  %v2727_v53 = vmul.f32 %v2722_v52, %v2722_v52 }
0x21ca   : > { %v2728_v27 = vmul.f32 %v2727_v53, %v2722_v52 }
0x21cc   : > { %v2729_v54 = vmul.f32 0.044715, %v2728_v27 }
0x21ce   : > { %v2730_v55 = vadd.f32 %v2729_v54, %v2722_v52 }
0x21d0   : > { %v2731_v60 = vmul.f32 0.7978846, %v2730_v55 }
0x2248   : > { %v2423_v40 = vpop.xlane.xlu1 %2422 }
0x2249   : > { %v2427_v42 = vmul.f32 0.03125, %v2423_v40 }
0x224a   : > { %v2426_v17 = vpop.xlane.xlu0 %2425 }
0x224b   : > { %v2429_v43 = vsub.f32 %v2419_v22, %v2427_v42  ;;  %v2428_v44 = vmul.f32 0.03125, %v2426_v17 }
0x224d   : > { %v2430_v46 = vsub.f32 %v2420_v25, %v2428_v44  ;;  %v2431_v38 = vmul.f32 %v2429_v43, %v2429_v43 }
0x224f   : > { %v2433_v47 = vsel %vm255_vm2, %v2431_v38, 0.0  ;;  %v2432_v48 = vmul.f32 %v2430_v46, %v2430_v46 }
0x2250   : > { %2434 = vadd.xlane.f32.xlu0 %v2433_v47 }
0x2251   : > { %v2436_v49 = vsel %vm255_vm2, %v2432_v48, 0.0 }
0x2254   : > { %2437 = vadd.xlane.f32.xlu0 %v2436_v49 }
0x22dd   : > { %v2435_v57 = vpop.xlane.xlu0 %2434 }
0x22de   : > { %v2439_v58 = vmul.f32 0.03125, %v2435_v57 }
0x22e0   : > { %v2441_v59 = vadd.f32 1e-06, %v2439_v58 }
0x22e1   : > { %v2438_v61 = vpop.xlane.xlu0 %2437 }
0x22e2   : > { %3482 = vrsqrt.f32 %v2441_v59  ;;  %v2440_v62 = vmul.f32 0.03125, %v2438_v61 }
0x22e3   : > { %3484 = vtanh.f32 %v2731_v60 }
0x22e4   : > { %v2442_v63 = vadd.f32 1e-06, %v2440_v62 }
0x22e6   : > { %3486 = vrsqrt.f32 %v2442_v63 }
0x22ec   : > { %v3483_v2 = vpop.eup %3482 }
0x22ed   : > { %v2445_v36 = vmul.f32 %v3483_v2, %v2429_v43  ;;  %v3485_v3 = vpop.eup %3484 }
0x22ee   : > { %v2733_v8 = vadd.f32 1.0, %v3485_v3 }
0x22ef   : > { %v2451_v5 = vmul.f32 %v2450_v34, %v2445_v36 }
0x22f0   : > { %v3487_v4 = vpop.eup %3486  ;;  %v2734_v15 = vmul.f32 0.5, %v2733_v8 }
0x22f1   : > { %v2446_v6 = vmul.f32 %v3487_v4, %v2430_v46  ;;  %v2457_v26 = vadd.f32 %v2456_v7, %v2451_v5 }
0x22f2   : > { %v2735_v33 = vmul.f32 %v2734_v15, %v2722_v52  ;;  %v2573_v52 = vadd.f32 %v4115_v28, %v2522_v51 }
0x22f3   : > { %v2452_v9 = vmul.f32 %v2450_v34, %v2446_v6 }
0x22f4   : > { %v2740_v41 = vpack.c.bf16 %v2735_v33, %v2735_v33 }
0x22f5   : > { %v2458_v11 = vadd.f32 %v2456_v7, %v2452_v9 }
0x22f7   : > { %v2582_v39 = vpack.c.bf16 %v2458_v11, %v2457_v26 }
0x22f9   : > { %3318 = vmatmul.mubr.msk.bf16.vlgmr.msra.gmra.mrb[64].mxu0 %vm255_vm2, %v2582_v39 }
0x22fa   : > { %3330 = vmatpush3.bf16.msra.mxu0 %v3408_v13  ;;  %3333 = vmatprep.mubr.msk.bf16.mxu0 %vm3503_vm0, %v3502_v1 }
0x22fb   : > { %3331 = vmatprep.subr.bf16.mxu0 %v3502_v1  ;;  %v2741_v1 = vld [vmem:[%s4163_s2 + $0xd8] sm:$0x1] }
0x22fe   : > { %3332 = vmatpush3.bf16.msra.mxu0 %v3409_v14 }
0x2301   : > { %3334 = vmatmul.mubr.msk.bf16.vlgmr.msra.gmra.mrb[68].mxu0 %vm255_vm2, %v2740_v41 }
0x23cc   : > { %v2637_v16 = vpop.f32.mrb[64].mxu0 }
0x23cd   : > { %v2638_v18 = vadd.f32 %v2961_v12, %v2637_v16  ;;  %v3319_v19 = vpop.f32.mrb[65].mxu0 }
0x23ce   : > { %v2640_v45 = vpop.f32.mrb[66].mxu0 }
0x23cf   : > { %v2644_v20 = vmul.f32 %v2638_v18, %v2638_v18  ;;  %v2641_v21 = vadd.f32 %v2961_v12, %v2640_v45  ;;  %v3320_v22 = vpop.f32.mrb[67].mxu0 }
0x23d1   : > { %v2646_v24 = vmul.f32 %v2644_v20, %v2638_v18  ;;  %v2645_v25 = vmul.f32 %v2641_v21, %v2641_v21 }
0x23d3   : > { %v2648_v56 = vmul.f32 0.044715, %v2646_v24  ;;  %v2647_v29 = vmul.f32 %v2645_v25, %v2641_v21 }
0x23d4   : > { %v2791_v30 = vpop.f32.mrb[68].mxu0 }
0x23d5   : > { %v2650_v10 = vadd.f32 %v2648_v56, %v2638_v18  ;;  %v2649_v32 = vmul.f32 0.044715, %v2647_v29  ;;  %v2792_v35 = vadd.f32 %v2791_v30, %v2741_v1  ;;  %v3335_v37 = vpop.f32.mrb[69].mxu0 }
0x23d6   : > { %v2794_v31 = vpop.f32.mrb[70].mxu0 }
0x23d7   : > { %v2652_v40 = vmul.f32 0.7978846, %v2650_v10  ;;  %v2651_v42 = vadd.f32 %v2649_v32, %v2641_v21  ;;  %2798 = vrot.lane.b32.xlu1 %v2792_v35, %s3510_s14  ;;  %v3336_v17 = vpop.f32.mrb[71].mxu0 }
0x23d9   : > { %3488 = vtanh.f32 %v2652_v40  ;;  %v2653_v43 = vmul.f32 0.7978846, %v2651_v42 }
0x23db   : > { %3490 = vtanh.f32 %v2653_v43 }
0x23e3   : > { %v3489_v44 = vpop.eup %3488 }
0x23e4   : > { %v2656_v46 = vadd.f32 1.0, %v3489_v44 }
0x23e5   : > { %v3491_v38 = vpop.eup %3490 }
0x23e6   : > { %v2658_v47 = vmul.f32 0.5, %v2656_v46  ;;  %v2657_v48 = vadd.f32 1.0, %v3491_v38 }
0x23e8   : > { %v2660_v49 = vmul.f32 %v2658_v47, %v2638_v18  ;;  %v2659_v23 = vmul.f32 0.5, %v2657_v48 }
0x23ea   : > { %v2661_v50 = vmul.f32 %v2659_v23, %v2641_v21  ;;  %2807 = vst [vmem:[%s170_s22] sm:$0xff] %v2660_v49 }
0x23ec   : > { %2808 = vst [vmem:[%s170_s22 + $0x8] sm:$0xff] %v2661_v50 }
0x2449   : > { %v2799_v53 = vpop.permute.xlu1 %2798 }
0x244a   : > { %v2802_v27 = vsel %vm2801_vm8, %v2573_v52, %v2799_v53 }
0x244b   : > { %v2804_v54 = vsel %vm2803_vm9, %v2802_v27, 0.0 }
0x244c   : > { %v2806_v55 = vsel %vm2805_vm10, %v2804_v54, 0.0 }
0x244d   : > { %2809 = vst [vmem:[%s170_s22 + $0x10] sm:$0xff] %v2806_v55 }
0x244e PF: > { %s13_s12 = sadd.s32 1, %s3500_s12  }
0x244f   : > { %p10_p4 = scmp.ge.s32.totalorder %s13_s12, 4  }
0x2451   :  { %12 = sbr.rel (!%p10_p4) target bundleno = 1 (0x1), region = 62 }

// kernel: forward_core.3
= control target key start
LH: loop header
LB: loop body
LE: loop exit
PB: predicated region body
PF: predicated region fallthrough
CT: control target
= control target key end

     0   :  { %s6833_s27 = smov 0   ;;  %s8538_s0 = inlined_call_operand.vmem [shape: f32[2,32,256], index: 0, kind: input, shape index: {}]   ;;  %s8539_s1 = inlined_call_operand.vmem [shape: f32[2,8,256], index: 1, kind: input, shape index: {}]   ;;  %s8540_s2 = inlined_call_operand.vmem [shape: f32[2,1,8], index: 2, kind: input, shape index: {}]   ;;  %s8541_s3 = inlined_call_operand.vmem [shape: bf16[2384,256], index: 3, kind: input, shape index: {}]   ;;  %s8542_s4 = inlined_call_operand.vmem [shape: bf16[1600,64], index: 4, kind: input, shape index: {}]   ;;  %s8543_s5 = inlined_call_operand.vmem [shape: bf16[400,16], index: 5, kind: input, shape index: {}]   ;;  %s8544_s6 = inlined_call_operand.vmem [shape: bf16[112,256], index: 6, kind: input, shape index: {}]   ;;  %s8545_s7 = inlined_call_operand.vmem [shape: f32[80,1], index: 7, kind: input, shape index: {}]   ;;  %s8546_s8 = inlined_call_operand.vmem [shape: f32[2,1,256], index: 8, kind: output, shape index: {}]  }
   0x1 LB: > { %s5302_s28 = sadd.s32 4294967295, %s6782_s27   ;;  %p5306_p0 = scmp.ge.s32.totalorder %s6782_s27, 1  ;;  %s6782_s27 = sphi %s6833_s27, %s18_s27  }
   0x2   : > { %p280_p1 = scmp.lt.s32.totalorder %s6782_s27, 3 }
   0x4   : > { %p281_p2 = pnand %p5306_p0, %p280_p1 }
   0x5   : > { %p321_p3 = scmp.lt.s32.totalorder (!%p281_p2), %s5302_s28, 1  ;;  %v352_v0 = vld [vmem:[%s8545_s7] sm:$0xff] (!%p281_p2)  ;;  %v6784_v1 = vmov (!%p281_p2), 0   ;;  %v1742_v2 = vld [vmem:[%s8545_s7 + $0x8] sm:$0xff] (!%p281_p2)  ;;  %v2574_v17 = vld [vmem:[%s8545_s7 + $0x30] sm:$0xff] (!%p281_p2)  ;;  %vm358_vm0 = vcmask (!%p281_p2), 261120  }
   0x6   : > { %284 = sbr.rel (%p281_p2) target bundleno = 2715 (0xa9b), region = 52  ;;  %394 = vmatprep.mubr.bf16.mxu0 (!%p281_p2), %v6784_v1  ;;  %6193 = vset.pattern.permute.xlu0 (!%p281_p2), %v6784_v1  ;;  %v6195_v3 = vld [vmem:[%s8542_s4 + $0x40] sm:$0xff] (!%p281_p2)   ;;  %v6199_v18 = vld [vmem:[%s8542_s4 + $0x48] sm:$0xff] (!%p281_p2)   ;;  %v6203_v25 = vld [vmem:[%s8542_s4 + $0x50] sm:$0xff] (!%p281_p2)   ;;  %vm6786_vm1 = vmmov (!%p281_p2), 0   ;;  %vm1115_vm2 = vcmask (!%p281_p2), 523264  }
   0x7   : > { %355 = vperm.xlu0 (!%p281_p2), %6193, %v352_v0   ;;  %6194 = vset.pattern.permute.xlu1 (!%p281_p2), %v6784_v1  ;;  %v2572_v4 = vld [vmem:[%s8545_s7 + $0x20] sm:$0xff] (!%p281_p2)  ;;  %v6201_v21 = vld [vmem:[%s8542_s4 + $0x8] sm:$0xff] (!%p281_p2)   ;;  %v6205_v27 = vld [vmem:[%s8542_s4 + $0x10] sm:$0xff] (!%p281_p2)   ;;  %vm1763_vm3 = vcmask (!%p281_p2), 1043456   ;;  %vm1759_vm4 = vcmask (!%p281_p2), 588800   ;;  %vm2121_vm5 = vcmask (!%p281_p2), 130048  }
   0x8   : > { %5780 = vmatprep.subr.bf16.mxu1 (!%p281_p2), %v6195_v3  ;;  %v6197_v5 = vld [vmem:[%s8542_s4] sm:$0xff] (!%p281_p2)   ;;  %v6200_v26 = vld [vmem:[%s8542_s4 + $0xc8] sm:$0xff] (!%p281_p2)   ;;  %v6207_v29 = vld [vmem:[%s8542_s4 + $0x58] sm:$0xff] (!%p281_p2)   ;;  %vm5154_vm6 = vcmask (!%p281_p2), 64512  }
   0x9   : > { %5781 = vmatpush3.bf16.msra.mxu1 (!%p281_p2), %v6197_v5  ;;  %v6196_v20 = vld [vmem:[%s8542_s4 + $0xc0] sm:$0xff] (!%p281_p2)   ;;  %v6202_v28 = vld [vmem:[%s8542_s4 + $0x88] sm:$0xff] (!%p281_p2)   ;;  %v6204_v30 = vld [vmem:[%s8542_s4 + $0xd0] sm:$0xff] (!%p281_p2)  }
   0xa   : > { %5782 = vmatprep.subr.bf16.mxu1 (!%p281_p2), %v6199_v18  ;;  %v347_v22 = vld [vmem:[%s8544_s6] sm:$0xf] (!%p281_p2)  ;;  %v6209_v31 = vld [vmem:[%s8542_s4 + $0x18] sm:$0xff] (!%p281_p2)   ;;  %v6206_v32 = vld [vmem:[%s8542_s4 + $0x90] sm:$0xff] (!%p281_p2)  }
   0xb   : > { %1746 = vperm.xlu0 (!%p281_p2), %6193, %v1742_v2   ;;  %v6198_v23 = vld [vmem:[%s8542_s4 + $0x80] sm:$0xff] (!%p281_p2)   ;;  %v6208_v34 = vld [vmem:[%s8542_s4 + $0xd8] sm:$0xff] (!%p281_p2)   ;;  %v6215_v37 = vld [vmem:[%s8542_s4 + $0x68] sm:$0xff] (!%p281_p2)  }
   0xc   : > { %v5081_v24 = vld [vmem:[%s8545_s7 + $0x40] sm:$0xff] (!%p281_p2)  ;;  %v6210_v36 = vld [vmem:[%s8542_s4 + $0x98] sm:$0xff] (!%p281_p2)   ;;  %v6217_v39 = vld [vmem:[%s8542_s4 + $0x28] sm:$0xff] (!%p281_p2)  }
   0xd   : > { %s8548_s28 = smov (!%p321_p3, %s5302_s28), 1  ;;  %5783 = vmatpush3.bf16.msra.mxu1 %v6201_v21  ;;  %v6211_v33 = vld [vmem:[%s8542_s4 + $0x60] sm:$0xff]   ;;  %v6216_v41 = vld [vmem:[%s8542_s4 + $0xe8] sm:$0xff]   ;;  %v6219_v43 = vld [vmem:[%s8542_s4 + $0x70] sm:$0xff]  }
   0xe   : > { %s5778_s13 = sshll.u32 %s8548_s28, 6  ;;  %5784 = vmatprep.subr.bf16.mxu1 %v6203_v25  ;;  %v6213_v35 = vld [vmem:[%s8542_s4 + $0x20] sm:$0xff]   ;;  %v6218_v42 = vld [vmem:[%s8542_s4 + $0xa8] sm:$0xff]   ;;  %v6220_v44 = vld [vmem:[%s8542_s4 + $0xf0] sm:$0xff]   ;;  %s5779_s11 = sshll.u32 %s8548_s28, 4 }
   0xf   : > { %s325_s16 = scalar_lea.vmem %s8538_s0, %s5778_s13  ;;  %2582 = vperm.xlu0 %6193, %v2572_v4   ;;  %v6212_v38 = vld [vmem:[%s8542_s4 + $0xe0] sm:$0xff]   ;;  %v6221_v45 = vld [vmem:[%s8542_s4 + $0x30] sm:$0xff]   ;;  %v6223_v47 = vld [vmem:[%s8542_s4 + $0x78] sm:$0xff]   ;;  %s333_s24 = scalar_lea.vmem %s8540_s2, %s8548_s28 }
  0x10   : > { %v340_v6 = vld [vmem:[%s325_s16 + $0x8] sm:$0xff]  ;;  %v342_v7 = vld [vmem:[%s325_s16 + $0x18] sm:$0xff]  ;;  %v339_v8 = vld [vmem:[%s325_s16] sm:$0xff]  ;;  %s5311_s25 = sshll.u32 %s8548_s28, 1 }
  0x11   : > { %v349_v9 = vpack.c.bf16 %v342_v7, %v340_v6  ;;  %v341_v10 = vld [vmem:[%s325_s16 + $0x10] sm:$0xff]  ;;  %v344_v11 = vld [vmem:[%s325_s16 + $0x28] sm:$0xff]  ;;  %v346_v12 = vld [vmem:[%s325_s16 + $0x38] sm:$0xff]  ;;  %5785 = vmatpush3.bf16.msra.mxu1 %v6205_v27  ;;  %s337_s29 = scalar_lea.vmem %s8546_s8, %s5311_s25 }
  0x12   : > { %v348_v13 = vpack.c.bf16 %v341_v10, %v339_v8  ;;  %v351_v14 = vpack.c.bf16 %v346_v12, %v344_v11  ;;  %v343_v15 = vld [vmem:[%s325_s16 + $0x20] sm:$0xff]  ;;  %v345_v16 = vld [vmem:[%s325_s16 + $0x30] sm:$0xff]  ;;  %5786 = vmatprep.subr.bf16.mxu1 %v6207_v29  ;;  %v6224_v48 = vld [vmem:[%s8542_s4 + $0xf8] sm:$0xff]   ;;  %s7500_s16 = scalar_lea.vmem %s8539_s1, %s5779_s11 }
  0x13   : > { %362 = vmatprep.subr.bf16.mxu0 %v349_v9  ;;  %v350_v19 = vpack.c.bf16 %v345_v16, %v343_v15  ;;  %2592 = vperm.xlu0 %6193, %v2574_v17   ;;  %v6214_v40 = vld [vmem:[%s8542_s4 + $0xa0] sm:$0xff]   ;;  %v6222_v46 = vld [vmem:[%s8542_s4 + $0xb0] sm:$0xff]   ;;  %v6225_v49 = vld [vmem:[%s8542_s4 + $0x38] sm:$0xff]  }
  0x14   : > { %363 = vmatpush1.bf16.msra.mxu0 %v348_v13  ;;  %v6226_v50 = vld [vmem:[%s8542_s4 + $0xb8] sm:$0xff]   ;;  %v6227_v51 = vld [vmem:[%s8542_s4 + $0x140] sm:$0xff]   ;;  %v6231_v3 = vld [vmem:[%s8542_s4 + $0x148] sm:$0xff]  }
  0x15   : > { %364 = vmatprep.subr.bf16.mxu0 %v351_v14  ;;  %5787 = vmatpush3.bf16.msra.mxu1 %v6209_v31  ;;  %v6228_v52 = vld [vmem:[%s8542_s4 + $0x1c0] sm:$0xff]   ;;  %v6232_v4 = vld [vmem:[%s8542_s4 + $0x1c8] sm:$0xff]   ;;  %v6235_v7 = vld [vmem:[%s8542_s4 + $0x150] sm:$0xff]  }
  0x16   : > { %5788 = vmatprep.subr.bf16.mxu1 %v6211_v33  ;;  %v6229_v63 = vld [vmem:[%s8542_s4 + $0x100] sm:$0xff]   ;;  %v6233_v5 = vld [vmem:[%s8542_s4 + $0x108] sm:$0xff]   ;;  %v6236_v8 = vld [vmem:[%s8542_s4 + $0x1d0] sm:$0xff]   ;;  %v6785_v33 = vmov 0.0  }
  0x17   : > { %5084 = vperm.xlu0 %6193, %v5081_v24   ;;  %v6230_v0 = vld [vmem:[%s8542_s4 + $0x180] sm:$0xff]   ;;  %v6234_v6 = vld [vmem:[%s8542_s4 + $0x188] sm:$0xff]   ;;  %v6237_v9 = vld [vmem:[%s8542_s4 + $0x110] sm:$0xff]  }
  0x18   : > { %365 = vmatpush1.bf16.msra.mxu0 %v350_v19  ;;  %v6238_v10 = vld [vmem:[%s8542_s4 + $0x190] sm:$0xff]   ;;  %v6239_v11 = vld [vmem:[%s8542_s4 + $0x158] sm:$0xff]   ;;  %v6243_v15 = vld [vmem:[%s8542_s4 + $0x160] sm:$0xff]  }
  0x19   : > { %5802 = vmatprep.subr.bf16.mxu0 %v6196_v20  ;;  %5789 = vmatpush3.bf16.msra.mxu1 %v6213_v35  ;;  %v6240_v12 = vld [vmem:[%s8542_s4 + $0x1d8] sm:$0xff]   ;;  %v6244_v16 = vld [vmem:[%s8542_s4 + $0x1e0] sm:$0xff]   ;;  %v6247_v19 = vld [vmem:[%s8542_s4 + $0x168] sm:$0xff]  }
  0x1a   : > { %5790 = vmatprep.subr.bf16.mxu1 %v6215_v37  ;;  %v6241_v13 = vld [vmem:[%s8542_s4 + $0x118] sm:$0xff]   ;;  %v6245_v17 = vld [vmem:[%s8542_s4 + $0x120] sm:$0xff]   ;;  %v6248_v20 = vld [vmem:[%s8542_s4 + $0x1e8] sm:$0xff]  }
  0x1b   : > { %5312 = vmatmul.mubr.msk.bf16.vlgmr.msra.gmra.mrb[0].mxu0 %vm358_vm0, %v347_v22  ;;  %v6242_v14 = vld [vmem:[%s8542_s4 + $0x198] sm:$0xff]   ;;  %v6246_v18 = vld [vmem:[%s8542_s4 + $0x1a0] sm:$0xff]   ;;  %v6249_v21 = vld [vmem:[%s8542_s4 + $0x128] sm:$0xff]  }
  0x1c   : > { %5803 = vmatpush3.bf16.msra.mxu0 %v6198_v23  ;;  %v6250_v22 = vld [vmem:[%s8542_s4 + $0x1a8] sm:$0xff]   ;;  %v6251_v23 = vld [vmem:[%s8542_s4 + $0x170] sm:$0xff]   ;;  %v6255_v27 = vld [vmem:[%s8542_s4 + $0x178] sm:$0xff]  }
  0x1d   : > { %5804 = vmatprep.subr.bf16.mxu0 %v6200_v26  ;;  %5791 = vmatpush3.bf16.msra.mxu1 %v6217_v39  ;;  %v6252_v24 = vld [vmem:[%s8542_s4 + $0x1f0] sm:$0xff]   ;;  %v6257_v29 = vld [vmem:[%s8542_s4 + $0x138] sm:$0xff]   ;;  %v6259_v31 = vld [vmem:[%s8542_s4 + $0x200] sm:$0xff]  }
  0x1e   : > { %5792 = vmatprep.subr.bf16.mxu1 %v6219_v43  ;;  %v6253_v25 = vld [vmem:[%s8542_s4 + $0x130] sm:$0xff]   ;;  %v6262_v35 = vld [vmem:[%s8542_s4 + $0x228] sm:$0xff]   ;;  %v6266_v39 = vld [vmem:[%s8542_s4 + $0x238] sm:$0xff]  }
  0x1f   : > { %v6254_v26 = vld [vmem:[%s8542_s4 + $0x1b0] sm:$0xff]  }
  0x20   : > { %5805 = vmatpush3.bf16.msra.mxu0 %v6202_v28  ;;  %v6256_v28 = vld [vmem:[%s8542_s4 + $0x1f8] sm:$0xff]   ;;  %v6264_v37 = vld [vmem:[%s8542_s4 + $0x230] sm:$0xff]  }
  0x21   : > { %5806 = vmatprep.subr.bf16.mxu0 %v6204_v30  ;;  %5793 = vmatpush3.bf16.msra.mxu1 %v6221_v45  ;;  %v6258_v30 = vld [vmem:[%s8542_s4 + $0x1b8] sm:$0xff]  }
  0x22   : > { %5794 = vmatprep.subr.bf16.mxu1 %v6223_v47 }
  0x24   : > { %5807 = vmatpush3.bf16.msra.mxu0 %v6206_v32  ;;  %v6260_v32 = vld [vmem:[%s8542_s4 + $0x220] sm:$0xff]  }
  0x25   : > { %5808 = vmatprep.subr.bf16.mxu0 %v6208_v34  ;;  %5795 = vmatpush3.bf16.msra.mxu1 %v6225_v49  ;;  %v6261_v34 = vld [vmem:[%s8542_s4 + $0x208] sm:$0xff]  }
  0x26   : > { %5824 = vmatprep.subr.bf16.mxu1 %v6227_v51 }
  0x28   : > { %5809 = vmatpush3.bf16.msra.mxu0 %v6210_v36  ;;  %v6263_v36 = vld [vmem:[%s8542_s4 + $0x210] sm:$0xff]  }
  0x29   : > { %5810 = vmatprep.subr.bf16.mxu0 %v6212_v38  ;;  %v6265_v38 = vld [vmem:[%s8542_s4 + $0x218] sm:$0xff]  }
  0x2c   : > { %5811 = vmatpush3.bf16.msra.mxu0 %v6214_v40 }
  0x2d   : > { %5812 = vmatprep.subr.bf16.mxu0 %v6216_v41 }
  0x30   : > { %5813 = vmatpush3.bf16.msra.mxu0 %v6218_v42 }
  0x31   : > { %5814 = vmatprep.subr.bf16.mxu0 %v6220_v44 }
  0x34   : > { %5815 = vmatpush3.bf16.msra.mxu0 %v6222_v46 }
  0x35   : > { %5816 = vmatprep.subr.bf16.mxu0 %v6224_v48 }
  0x38   : > { %5817 = vmatpush3.bf16.msra.mxu0 %v6226_v50 }
  0x39   : > { %5846 = vmatprep.subr.bf16.mxu0 %v6228_v52 }
  0x86   : > { %v356_v53 = vpop.permute.xlu0 %355 }
  0xee   : > { %v396_v54 = vpop.f32.mrb[0].mxu0 }
  0xef   : > { %v397_v55 = vadd.f32 %v396_v54, %v356_v53  ;;  %v398_v56 = vpop.f32.mrb[1].mxu0 }
  0xf0   : > { %v399_v57 = vadd.f32 %v398_v56, %v356_v53  ;;  %v400_v58 = vpop.f32.mrb[2].mxu0 }
  0xf1   : > { %v6971_v59 = vmax.f32 %v397_v55, 0.0  ;;  %v401_v60 = vpop.f32.mrb[3].mxu0 }
  0xf2   : > { %v6973_v61 = vmax.f32 %v399_v57, 0.0 }
  0xf3   : > { %v6985_v2 = vpack.c.bf16 %v6971_v59, %v6971_v59 }
  0xf4   : > { %v438_v62 = vpack.c.bf16 %v6973_v61, %v6973_v61 }
  0xf6   : > { %567 = vmatprep.mubr.bf16.mxu1 %v438_v62  ;;  %735 = vmatprep.mubr.bf16.mxu0 %v438_v62 }
  0xf7   : > { %568 = vmatmul.mubr.bf16.vlgmr.msra.gmra.mrb[0].mxu1 %v6985_v2  ;;  %736 = vmatmul.mubr.bf16.vlgmr.msra.gmra.mrb[4].mxu0 %v6985_v2 }
  0xf8   : > { %5825 = vmatpush3.bf16.msra.mxu1 %v6229_v63  ;;  %5847 = vmatpush3.bf16.msra.mxu0 %v6230_v0 }
  0xf9   : > { %903 = vmatprep.mubr.bf16.mxu1 %v438_v62  ;;  %1071 = vmatprep.mubr.bf16.mxu0 %v438_v62 }
  0xfa   : > { %5826 = vmatprep.subr.bf16.mxu1 %v6231_v3  ;;  %5848 = vmatprep.subr.bf16.mxu0 %v6232_v4  ;;  %v6268_v3 = vld [vmem:[%s8542_s4 + $0x260] sm:$0xff]  }
  0xfc   : > { %5827 = vmatpush3.bf16.msra.mxu1 %v6233_v5  ;;  %5849 = vmatpush3.bf16.msra.mxu0 %v6234_v6  ;;  %v6269_v5 = vld [vmem:[%s8542_s4 + $0x248] sm:$0xff]  }
  0xfd   : > { %5828 = vmatprep.subr.bf16.mxu1 %v6235_v7  ;;  %5850 = vmatprep.subr.bf16.mxu0 %v6236_v8  ;;  %v6270_v6 = vld [vmem:[%s8542_s4 + $0x268] sm:$0xff]   ;;  %v6271_v7 = vld [vmem:[%s8542_s4 + $0x250] sm:$0xff]  }
  0xfe   : > { %v6272_v8 = vld [vmem:[%s8542_s4 + $0x270] sm:$0xff]  }
 0x100   : > { %5829 = vmatpush3.bf16.msra.mxu1 %v6237_v9  ;;  %5851 = vmatpush3.bf16.msra.mxu0 %v6238_v10  ;;  %v6273_v9 = vld [vmem:[%s8542_s4 + $0x258] sm:$0xff]  }
 0x101   : > { %5830 = vmatprep.subr.bf16.mxu1 %v6239_v11  ;;  %5852 = vmatprep.subr.bf16.mxu0 %v6240_v12  ;;  %v6274_v10 = vld [vmem:[%s8542_s4 + $0x278] sm:$0xff]   ;;  %v6275_v11 = vld [vmem:[%s8542_s4 + $0x280] sm:$0xff]  }
 0x102   : > { %v6276_v12 = vld [vmem:[%s8542_s4 + $0x2a0] sm:$0xff]  }
 0x104   : > { %5831 = vmatpush3.bf16.msra.mxu1 %v6241_v13  ;;  %5853 = vmatpush3.bf16.msra.mxu0 %v6242_v14  ;;  %v6277_v13 = vld [vmem:[%s8542_s4 + $0x288] sm:$0xff]  }
 0x105   : > { %5832 = vmatprep.subr.bf16.mxu1 %v6243_v15  ;;  %5854 = vmatprep.subr.bf16.mxu0 %v6244_v16  ;;  %v6278_v14 = vld [vmem:[%s8542_s4 + $0x2a8] sm:$0xff]   ;;  %v6279_v15 = vld [vmem:[%s8542_s4 + $0x290] sm:$0xff]  }
 0x106   : > { %v6280_v16 = vld [vmem:[%s8542_s4 + $0x2b0] sm:$0xff]  }
 0x108   : > { %5833 = vmatpush3.bf16.msra.mxu1 %v6245_v17  ;;  %5855 = vmatpush3.bf16.msra.mxu0 %v6246_v18  ;;  %v6281_v17 = vld [vmem:[%s8542_s4 + $0x298] sm:$0xff]  }
 0x109   : > { %5834 = vmatprep.subr.bf16.mxu1 %v6247_v19  ;;  %5856 = vmatprep.subr.bf16.mxu0 %v6248_v20  ;;  %v6282_v18 = vld [vmem:[%s8542_s4 + $0x2b8] sm:$0xff]   ;;  %v6283_v19 = vld [vmem:[%s8542_s4 + $0x2c0] sm:$0xff]  }
 0x10a   : > { %v6284_v20 = vld [vmem:[%s8542_s4 + $0x2e0] sm:$0xff]  }
 0x10c   : > { %5835 = vmatpush3.bf16.msra.mxu1 %v6249_v21  ;;  %5857 = vmatpush3.bf16.msra.mxu0 %v6250_v22  ;;  %v6285_v21 = vld [vmem:[%s8542_s4 + $0x2c8] sm:$0xff]  }
 0x10d   : > { %5836 = vmatprep.subr.bf16.mxu1 %v6251_v23  ;;  %5858 = vmatprep.subr.bf16.mxu0 %v6252_v24  ;;  %v6286_v22 = vld [vmem:[%s8542_s4 + $0x2e8] sm:$0xff]   ;;  %v6287_v23 = vld [vmem:[%s8542_s4 + $0x2d0] sm:$0xff]  }
 0x10e   : > { %v6288_v24 = vld [vmem:[%s8542_s4 + $0x2f0] sm:$0xff]  }
 0x110   : > { %5837 = vmatpush3.bf16.msra.mxu1 %v6253_v25  ;;  %5859 = vmatpush3.bf16.msra.mxu0 %v6254_v26  ;;  %v6289_v25 = vld [vmem:[%s8542_s4 + $0x2d8] sm:$0xff]  }
 0x111   : > { %5838 = vmatprep.subr.bf16.mxu1 %v6255_v27  ;;  %5860 = vmatprep.subr.bf16.mxu0 %v6256_v28  ;;  %v6290_v26 = vld [vmem:[%s8542_s4 + $0x2f8] sm:$0xff]   ;;  %v6291_v27 = vld [vmem:[%s8542_s4 + $0x300] sm:$0xff]   ;;  %v6292_v28 = vld [vmem:[%s8542_s4 + $0x308] sm:$0xff]  }
 0x114   : > { %5839 = vmatpush3.bf16.msra.mxu1 %v6257_v29  ;;  %5861 = vmatpush3.bf16.msra.mxu0 %v6258_v30  ;;  %v6293_v29 = vld [vmem:[%s8542_s4 + $0x310] sm:$0xff]   ;;  %v6294_v30 = vld [vmem:[%s8542_s4 + $0x318] sm:$0xff]  }
 0x115   : > { %5957 = vmatprep.subr.bf16.mxu1 %v6785_v33  ;;  %5969 = vmatprep.subr.bf16.mxu0 %v6785_v33 }
 0x117   : > { %904 = vmatmul.mubr.bf16.vlgmr.msra.gmra.mrb[4].mxu1 %v6985_v2  ;;  %1072 = vmatmul.mubr.bf16.vlgmr.msra.gmra.mrb[8].mxu0 %v6985_v2  ;;  %v6267_v2 = vld [vmem:[%s8542_s4 + $0x240] sm:$0xff]  }
 0x118   : > { %5958 = vmatpush3.bf16.msra.mxu1 %v6259_v31  ;;  %5970 = vmatpush3.bf16.msra.mxu0 %v6260_v32  ;;  %v1743_v31 = vld [vmem:[%s8545_s7 + $0x10] sm:$0xff]  ;;  %v2571_v32 = vld [vmem:[%s8545_s7 + $0x18] sm:$0xff] }
 0x119   : > { %5959 = vmatprep.subr.bf16.mxu1 %v6785_v33  ;;  %5971 = vmatprep.subr.bf16.mxu0 %v6785_v33 }
 0x11a   : > { %5965 = vmatprep.mubr.msk.bf16.mxu1 %vm6786_vm1, %v6785_v33  ;;  %5977 = vmatprep.mubr.msk.bf16.mxu0 %vm6786_vm1, %v6785_v33 }
 0x11b   : > { %1751 = vperm.xlu1 %6194, %v1743_v31  }
 0x11c   : > { %5960 = vmatpush3.bf16.msra.mxu1 %v6261_v34  ;;  %5972 = vmatpush3.bf16.msra.mxu0 %v6262_v35  ;;  %v6296_v34 = vld [vmem:[%s8543_s5] sm:$0xff]   ;;  %v2573_v35 = vld [vmem:[%s8545_s7 + $0x28] sm:$0xff] }
 0x11d   : > { %5961 = vmatprep.subr.bf16.mxu1 %v6785_v33  ;;  %5973 = vmatprep.subr.bf16.mxu0 %v6785_v33 }
 0x11f   : > { %2577 = vperm.xlu1 %6194, %v2571_v32  }
 0x120   : > { %5962 = vmatpush3.bf16.msra.mxu1 %v6263_v36  ;;  %5974 = vmatpush3.bf16.msra.mxu0 %v6264_v37  ;;  %v6298_v36 = vld [vmem:[%s8543_s5 + $0x8] sm:$0xff]   ;;  %v4974_v37 = vld [vmem:[%s8545_s7 + $0x38] sm:$0xff] }
 0x121   : > { %5963 = vmatprep.subr.bf16.mxu1 %v6785_v33  ;;  %5975 = vmatprep.subr.bf16.mxu0 %v6785_v33 }
 0x123   : > { %2587 = vperm.xlu1 %6194, %v2573_v35  }
 0x124   : > { %5964 = vmatpush3.bf16.msra.mxu1 %v6265_v38  ;;  %5976 = vmatpush3.bf16.msra.mxu0 %v6266_v39  ;;  %v5140_v38 = vld [vmem:[%s8545_s7 + $0x48] sm:$0xff] }
 0x125   : > { %5981 = vmatprep.subr.bf16.mxu1 %v6785_v33  ;;  %5993 = vmatprep.subr.bf16.mxu0 %v6785_v33 }
 0x127   : > { %4977 = vperm.xlu1 %6194, %v4974_v37  }
 0x12b   : > { %5143 = vperm.xlu1 %6194, %v5140_v38   ;;  %v6304_v38 = vld [vmem:[%s8543_s5 + $0x40] sm:$0xff]  }
 0x19a   : > { %v1752_v31 = vpop.permute.xlu1 %1751 }
 0x1ca   : > { %v5796_v40 = vpop.f32.mrb[0].mxu1  ;;  %v5818_v41 = vpop.f32.mrb[4].mxu0 }
 0x1cb   : > { %v5797_v42 = vpop.f32.mrb[1].mxu1  ;;  %v5819_v43 = vpop.f32.mrb[5].mxu0 }
 0x1cc   : > { %v5798_v44 = vadd.f32 %v5797_v42, %v5796_v40  ;;  %v5820_v45 = vadd.f32 %v5819_v43, %v5818_v41  ;;  %v5799_v46 = vpop.f32.mrb[2].mxu1  ;;  %v5821_v47 = vpop.f32.mrb[6].mxu0 }
 0x1cd   : > { %v5800_v48 = vpop.f32.mrb[3].mxu1  ;;  %v5822_v49 = vpop.f32.mrb[7].mxu0 }
 0x1ce   : > { %v1079_v50 = vmax.f32 %v5798_v44, %v5820_v45 }
 0x1ea   : > { %v5840_v51 = vpop.f32.mrb[4].mxu1  ;;  %v5862_v52 = vpop.f32.mrb[8].mxu0 }
 0x1eb   : > { %v5841_v53 = vpop.f32.mrb[5].mxu1  ;;  %v5863_v54 = vpop.f32.mrb[9].mxu0 }
 0x1ec   : > { %v5842_v55 = vadd.f32 %v5841_v53, %v5840_v51  ;;  %v5864_v56 = vadd.f32 %v5863_v54, %v5862_v52  ;;  %v5843_v57 = vpop.f32.mrb[6].mxu1  ;;  %v5865_v58 = vpop.f32.mrb[10].mxu0 }
 0x1ed   : > { %v5844_v60 = vpop.f32.mrb[7].mxu1  ;;  %v5866_v62 = vpop.f32.mrb[11].mxu0 }
 0x1ee   : > { %v1080_v63 = vmax.f32 %v1079_v50, %v5842_v55 }
 0x1f0   : > { %v1081_v0 = vmax.f32 %v1080_v63, %v5864_v56 }
 0x1f2   : > { %v7119_v4 = vpack.c.bf16 %v1081_v0, %v1081_v0 }
 0x1f4   : > { %5966 = vmatmul.mubr.msk.bf16.vlgmr.msra.gmra.mrb[8].mxu1 %vm1115_vm2, %v7119_v4  ;;  %5978 = vmatmul.mubr.msk.bf16.vlgmr.msra.gmra.mrb[12].mxu0 %vm1115_vm2, %v7119_v4 }
 0x1f5   : > { %5982 = vmatpush3.bf16.msra.mxu1 %v6267_v2  ;;  %5994 = vmatpush3.bf16.msra.mxu0 %v6268_v3 }
 0x1f6   : > { %5983 = vmatprep.subr.bf16.mxu1 %v6785_v33  ;;  %5995 = vmatprep.subr.bf16.mxu0 %v6785_v33 }
 0x1f7   : > { %5989 = vmatprep.mubr.msk.bf16.mxu1 %vm6786_vm1, %v6785_v33  ;;  %6001 = vmatprep.mubr.msk.bf16.mxu0 %vm6786_vm1, %v6785_v33 }
 0x1f9   : > { %5984 = vmatpush3.bf16.msra.mxu1 %v6269_v5  ;;  %5996 = vmatpush3.bf16.msra.mxu0 %v6270_v6 }
 0x1fa   : > { %5985 = vmatprep.subr.bf16.mxu1 %v6785_v33  ;;  %5997 = vmatprep.subr.bf16.mxu0 %v6785_v33 }
 0x1fd   : > { %5986 = vmatpush3.bf16.msra.mxu1 %v6271_v7  ;;  %5998 = vmatpush3.bf16.msra.mxu0 %v6272_v8 }
 0x1fe   : > { %5987 = vmatprep.subr.bf16.mxu1 %v6785_v33  ;;  %5999 = vmatprep.subr.bf16.mxu0 %v6785_v33 }
 0x201   : > { %5988 = vmatpush3.bf16.msra.mxu1 %v6273_v9  ;;  %6000 = vmatpush3.bf16.msra.mxu0 %v6274_v10 }
 0x202   : > { %6005 = vmatprep.subr.bf16.mxu1 %v6785_v33  ;;  %6017 = vmatprep.subr.bf16.mxu0 %v6785_v33 }
 0x204   : > { %5990 = vmatmul.mubr.msk.bf16.vlgmr.msra.gmra.mrb[12].mxu1 %vm1115_vm2, %v7119_v4  ;;  %6002 = vmatmul.mubr.msk.bf16.vlgmr.msra.gmra.mrb[16].mxu0 %vm1115_vm2, %v7119_v4 }
 0x205   : > { %6006 = vmatpush3.bf16.msra.mxu1 %v6275_v11  ;;  %6018 = vmatpush3.bf16.msra.mxu0 %v6276_v12 }
 0x206   : > { %6007 = vmatprep.subr.bf16.mxu1 %v6785_v33  ;;  %6019 = vmatprep.subr.bf16.mxu0 %v6785_v33 }
 0x207   : > { %6013 = vmatprep.mubr.msk.bf16.mxu1 %vm6786_vm1, %v6785_v33  ;;  %6025 = vmatprep.mubr.msk.bf16.mxu0 %vm6786_vm1, %v6785_v33 }
 0x209   : > { %6008 = vmatpush3.bf16.msra.mxu1 %v6277_v13  ;;  %6020 = vmatpush3.bf16.msra.mxu0 %v6278_v14 }
 0x20a   : > { %6009 = vmatprep.subr.bf16.mxu1 %v6785_v33  ;;  %6021 = vmatprep.subr.bf16.mxu0 %v6785_v33 }
 0x20d   : > { %6010 = vmatpush3.bf16.msra.mxu1 %v6279_v15  ;;  %6022 = vmatpush3.bf16.msra.mxu0 %v6280_v16 }
 0x20e   : > { %6011 = vmatprep.subr.bf16.mxu1 %v6785_v33  ;;  %6023 = vmatprep.subr.bf16.mxu0 %v6785_v33 }
 0x211   : > { %6012 = vmatpush3.bf16.msra.mxu1 %v6281_v17  ;;  %6024 = vmatpush3.bf16.msra.mxu0 %v6282_v18 }
 0x212   : > { %6029 = vmatprep.subr.bf16.mxu1 %v6785_v33  ;;  %6041 = vmatprep.subr.bf16.mxu0 %v6785_v33 }
 0x214   : > { %6014 = vmatmul.mubr.msk.bf16.vlgmr.msra.gmra.mrb[16].mxu1 %vm1115_vm2, %v7119_v4  ;;  %6026 = vmatmul.mubr.msk.bf16.vlgmr.msra.gmra.mrb[20].mxu0 %vm1115_vm2, %v7119_v4 }
 0x215   : > { %6030 = vmatpush3.bf16.msra.mxu1 %v6283_v19  ;;  %6042 = vmatpush3.bf16.msra.mxu0 %v6284_v20  ;;  %v6295_v20 = vld [vmem:[%s8544_s6 + $0x10] ss:$8 sps:$4 sm:$0xff]  }
 0x216   : > { %6031 = vmatprep.subr.bf16.mxu1 %v6785_v33  ;;  %6043 = vmatprep.subr.bf16.mxu0 %v6785_v33 }
 0x217   : > { %6037 = vmatprep.mubr.msk.bf16.mxu1 %vm6786_vm1, %v6785_v33  ;;  %6049 = vmatprep.mubr.msk.bf16.mxu0 %vm6786_vm1, %v6785_v33 }
 0x219   : > { %6032 = vmatpush3.bf16.msra.mxu1 %v6285_v21  ;;  %6044 = vmatpush3.bf16.msra.mxu0 %v6286_v22  ;;  %v6297_v21 = vld [vmem:[%s8543_s5 + $0x20] sm:$0xff]   ;;  %v6299_v22 = vld [vmem:[%s8543_s5 + $0x28] sm:$0xff]  }
 0x21a   : > { %6033 = vmatprep.subr.bf16.mxu1 %v6785_v33  ;;  %6045 = vmatprep.subr.bf16.mxu0 %v6785_v33 }
 0x21d   : > { %6034 = vmatpush3.bf16.msra.mxu1 %v6287_v23  ;;  %6046 = vmatpush3.bf16.msra.mxu0 %v6288_v24  ;;  %v6300_v23 = vld [vmem:[%s8543_s5 + $0x10] sm:$0xff]  }
 0x21e   : > { %6035 = vmatprep.subr.bf16.mxu1 %v6785_v33  ;;  %6047 = vmatprep.subr.bf16.mxu0 %v6785_v33  ;;  %v6301_v24 = vld [vmem:[%s8543_s5 + $0x30] sm:$0xff]  }
 0x221   : > { %6036 = vmatpush3.bf16.msra.mxu1 %v6289_v25  ;;  %6048 = vmatpush3.bf16.msra.mxu0 %v6290_v26  ;;  %v6302_v25 = vld [vmem:[%s8543_s5 + $0x18] sm:$0xff]  }
 0x222   : > { %6053 = vmatprep.subr.bf16.mxu1 %v6785_v33  ;;  %6065 = vmatprep.subr.bf16.mxu0 %v6785_v33  ;;  %v6303_v26 = vld [vmem:[%s8543_s5 + $0x38] sm:$0xff]  }
 0x224   : > { %6038 = vmatmul.mubr.msk.bf16.vlgmr.msra.gmra.mrb[20].mxu1 %vm1115_vm2, %v7119_v4  ;;  %6050 = vmatmul.mubr.msk.bf16.vlgmr.msra.gmra.mrb[24].mxu0 %vm1115_vm2, %v7119_v4 }
 0x225   : > { %6054 = vmatpush3.bf16.msra.mxu1 %v6291_v27  ;;  %6061 = vmatprep.mubr.msk.bf16.mxu1 %vm6786_vm1, %v6785_v33  ;;  %v1747_v27 = vpop.permute.xlu0 %1746 }
 0x226   : > { %6055 = vmatprep.subr.bf16.mxu1 %v6785_v33  ;;  %6075 = vmatprep.mubr.msk.bf16.mxu0 %vm6786_vm1, %v6785_v33 }
 0x229   : > { %6056 = vmatpush3.bf16.msra.mxu1 %v6292_v28 }
 0x22a   : > { %6057 = vmatprep.subr.bf16.mxu1 %v6785_v33 }
 0x22d   : > { %6058 = vmatpush3.bf16.msra.mxu1 %v6293_v29 }
 0x22e   : > { %6059 = vmatprep.subr.bf16.mxu1 %v6785_v33 }
 0x231   : > { %6060 = vmatpush3.bf16.msra.mxu1 %v6294_v30 }
 0x232   : > { %6079 = vmatprep.subr.bf16.mxu1 %v6785_v33 }
 0x234   : > { %6062 = vmatmul.mubr.msk.bf16.vlgmr.msra.gmra.mrb[24].mxu1 %vm1115_vm2, %v7119_v4 }
 0x235   : > { %6087 = vmatprep.mubr.msk.bf16.mxu1 %vm6786_vm1, %v6785_v33  ;;  %6080 = vmatpush3.bf16.msra.mxu1 %v6296_v34 }
 0x236   : > { %6081 = vmatprep.subr.bf16.mxu1 %v6785_v33 }
 0x239   : > { %6082 = vmatpush3.bf16.msra.mxu1 %v6298_v36 }
 0x23a   : > { %6083 = vmatprep.subr.bf16.mxu1 %v6785_v33 }
 0x23d   : > { %6084 = vmatpush3.bf16.msra.mxu1 %v6300_v23  ;;  %v6327_v23 = vld [vmem:[%s8541_s3 + $0x920] ss:$8 sps:$4 sm:$0xff]  }
 0x23e   : > { %6085 = vmatprep.subr.bf16.mxu1 %v6785_v33 }
 0x241   : > { %6086 = vmatpush3.bf16.msra.mxu1 %v6302_v25  ;;  %v6333_v25 = vld [vmem:[%s8544_s6 + $0x24] ss:$8 sps:$4 sm:$0xff]  }
 0x242   : > { %6103 = vmatprep.subr.bf16.mxu1 %v6785_v33 }
 0x2c7   : > { %v1153_v39 = vpop.f32.mrb[8].mxu1  ;;  %v1225_v40 = vpop.f32.mrb[12].mxu0 }
 0x2c8   : > { %v1737_v41 = vpack.c.bf16 %v1225_v40, %v1153_v39  ;;  %v5967_v42 = vpop.f32.mrb[9].mxu1  ;;  %v5979_v43 = vpop.f32.mrb[13].mxu0  ;;  %v6305_v39 = vld [vmem:[%s8543_s5 + $0x60] sm:$0xff]  }
 0x2c9   : > { %v1156_v44 = vpop.f32.mrb[10].mxu1  ;;  %v1228_v45 = vpop.f32.mrb[14].mxu0  ;;  %v6307_v42 = vld [vmem:[%s8543_s5 + $0x68] sm:$0xff]   ;;  %v6308_v43 = vld [vmem:[%s8543_s5 + $0x50] sm:$0xff]  }
 0x2ca   : > { %v5968_v46 = vpop.f32.mrb[11].mxu1  ;;  %v5980_v47 = vpop.f32.mrb[15].mxu0  ;;  %6066 = vmatpush3.bf16.msra.mxu0 %v1737_v41  ;;  %v6306_v41 = vld [vmem:[%s8543_s5 + $0x48] sm:$0xff]   ;;  %v6309_v44 = vld [vmem:[%s8543_s5 + $0x70] sm:$0xff]   ;;  %v6310_v45 = vld [vmem:[%s8543_s5 + $0x58] sm:$0xff]  }
 0x2cb   : > { %6067 = vmatprep.subr.bf16.mxu0 %v6785_v33  ;;  %v6311_v46 = vld [vmem:[%s8543_s5 + $0x78] sm:$0xff]   ;;  %v6312_v47 = vld [vmem:[%s8543_s5 + $0x80] sm:$0xff]  }
 0x2d7   : > { %v1297_v48 = vpop.f32.mrb[12].mxu1  ;;  %v1369_v49 = vpop.f32.mrb[16].mxu0 }
 0x2d8   : > { %v1738_v50 = vpack.c.bf16 %v1369_v49, %v1297_v48  ;;  %v5991_v51 = vpop.f32.mrb[13].mxu1  ;;  %v6003_v52 = vpop.f32.mrb[17].mxu0  ;;  %v6313_v48 = vld [vmem:[%s8543_s5 + $0x90] sm:$0xff]  }
 0x2d9   : > { %v1300_v53 = vpop.f32.mrb[14].mxu1  ;;  %v1372_v54 = vpop.f32.mrb[18].mxu0 }
 0x2da   : > { %v5992_v55 = vpop.f32.mrb[15].mxu1  ;;  %v6004_v56 = vpop.f32.mrb[19].mxu0  ;;  %6068 = vmatpush3.bf16.msra.mxu0 %v1738_v50 }
 0x2db   : > { %6069 = vmatprep.subr.bf16.mxu0 %v6785_v33 }
 0x2e7   : > { %v1441_v57 = vpop.f32.mrb[16].mxu1  ;;  %v1513_v58 = vpop.f32.mrb[20].mxu0 }
 0x2e8   : > { %v1739_v60 = vpack.c.bf16 %v1513_v58, %v1441_v57  ;;  %v6015_v62 = vpop.f32.mrb[17].mxu1  ;;  %v6027_v63 = vpop.f32.mrb[21].mxu0 }
 0x2e9   : > { %v1444_v0 = vpop.f32.mrb[18].mxu1  ;;  %v1516_v2 = vpop.f32.mrb[22].mxu0 }
 0x2ea   : > { %v6016_v3 = vpop.f32.mrb[19].mxu1  ;;  %v6028_v4 = vpop.f32.mrb[23].mxu0  ;;  %6070 = vmatpush3.bf16.msra.mxu0 %v1739_v60 }
 0x2eb   : > { %6071 = vmatprep.subr.bf16.mxu0 %v6785_v33 }
 0x2f7   : > { %v1585_v5 = vpop.f32.mrb[20].mxu1  ;;  %v1657_v6 = vpop.f32.mrb[24].mxu0 }
 0x2f8   : > { %v1740_v7 = vpack.c.bf16 %v1657_v6, %v1585_v5  ;;  %v6039_v8 = vpop.f32.mrb[21].mxu1  ;;  %v6051_v9 = vpop.f32.mrb[25].mxu0 }
 0x2f9   : > { %v1588_v10 = vpop.f32.mrb[22].mxu1  ;;  %v1660_v11 = vpop.f32.mrb[26].mxu0 }
 0x2fa   : > { %v6040_v12 = vpop.f32.mrb[23].mxu1  ;;  %v6052_v13 = vpop.f32.mrb[27].mxu0  ;;  %6072 = vmatpush3.bf16.msra.mxu0 %v1740_v7  ;;  %v6314_v10 = vld [vmem:[%s8543_s5 + $0x88] sm:$0xff]   ;;  %v6315_v11 = vld [vmem:[%s8543_s5 + $0xa0] sm:$0xff]  }
 0x2fb   : > { %6073 = vmatprep.subr.bf16.mxu0 %v6785_v33  ;;  %v6316_v13 = vld [vmem:[%s8543_s5 + $0x98] sm:$0xff]  }
 0x307   : > { %v1729_v14 = vpop.f32.mrb[24].mxu1 }
 0x308   : > { %v1741_v15 = vpack.c.bf16 %v1729_v14, %v1729_v14  ;;  %v6063_v16 = vpop.f32.mrb[25].mxu1  ;;  %v6317_v14 = vld [vmem:[%s8543_s5 + $0xb0] sm:$0xff]  }
 0x309   : > { %v1732_v17 = vpop.f32.mrb[26].mxu1  ;;  %v6319_v16 = vld [vmem:[%s8543_s5 + $0xa8] sm:$0xff]  }
 0x30a   : > { %v1765_v18 = vsel %vm1763_vm3, %v1741_v15, 0  ;;  %v6064_v19 = vpop.f32.mrb[27].mxu1  ;;  %v6318_v15 = vld [vmem:[%s8543_s5 + $0xc0] sm:$0xff]  }
 0x30b   : > { %6074 = vmatpush3.bf16.msra.mxu0 %v1765_v18  ;;  %v6322_v17 = vld [vmem:[%s8541_s3 + $0x904] ss:$8 sps:$4 sm:$0xff]   ;;  %v6320_v18 = vld [vmem:[%s8541_s3 + $0x900] ss:$8 sps:$4 sm:$0xff]   ;;  %v6326_v19 = vld [vmem:[%s8543_s5 + $0xb8] sm:$0xff]  }
 0x30c   : > { %6091 = vmatprep.subr.bf16.mxu0 %v6785_v33 }
 0x30e   : > { %6076 = vmatmul.mubr.msk.bf16.vlgmr.msra.gmra.mrb[28].mxu0 %vm1759_vm4, %v6295_v20  ;;  %v6325_v20 = vld [vmem:[%s8541_s3 + $0x914] ss:$8 sps:$4 sm:$0xff]  }
 0x30f   : > { %6092 = vmatpush3.bf16.msra.mxu0 %v6297_v21  ;;  %6099 = vmatprep.mubr.msk.bf16.mxu0 %vm6786_vm1, %v6785_v33  ;;  %v6323_v21 = vld [vmem:[%s8541_s3 + $0x910] ss:$8 sps:$4 sm:$0xff]  }
 0x310   : > { %6093 = vmatprep.subr.bf16.mxu0 %v6785_v33 }
 0x313   : > { %6094 = vmatpush3.bf16.msra.mxu0 %v6299_v22  ;;  %v6329_v22 = vld [vmem:[%s8541_s3 + $0x924] ss:$8 sps:$4 sm:$0xff]  }
 0x314   : > { %6095 = vmatprep.subr.bf16.mxu0 %v6785_v33 }
 0x317   : > { %6096 = vmatpush3.bf16.msra.mxu0 %v6301_v24  ;;  %v6332_v24 = vld [vmem:[%s8541_s3 + $0x934] ss:$8 sps:$4 sm:$0xff]  }
 0x318   : > { %6097 = vmatprep.subr.bf16.mxu0 %v6785_v33 }
 0x31b   : > { %6098 = vmatpush3.bf16.msra.mxu0 %v6303_v26 }
 0x31c   : > { %6115 = vmatprep.subr.bf16.mxu0 %v6785_v33 }
 0x3e1   : > { %v1801_v28 = vpop.f32.mrb[28].mxu0 }
 0x3e2   : > { %v1802_v29 = vadd.f32 %v1801_v28, %v1747_v27  ;;  %v6077_v30 = vpop.f32.mrb[29].mxu0 }
 0x3e3   : > { %v1804_v32 = vpop.f32.mrb[30].mxu0 }
 0x3e4   : > { %v1805_v34 = vadd.f32 %v1804_v32, %v1752_v31  ;;  %v6078_v35 = vpop.f32.mrb[31].mxu0  ;;  %v1808_v36 = vmax.f32 %v1802_v29, 0.0 }
 0x3e6   : > { %v1809_v37 = vmax.f32 %v1805_v34, 0.0 }
 0x3e8   : > { %v7327_v40 = vpack.c.bf16 %v1809_v37, %v1808_v36 }
 0x3ea   : > { %6088 = vmatmul.mubr.msk.bf16.vlgmr.msra.gmra.mrb[28].mxu1 %vm1115_vm2, %v7327_v40  ;;  %6100 = vmatmul.mubr.msk.bf16.vlgmr.msra.gmra.mrb[32].mxu0 %vm1115_vm2, %v7327_v40 }
 0x3eb   : > { %6104 = vmatpush3.bf16.msra.mxu1 %v6304_v38  ;;  %6116 = vmatpush3.bf16.msra.mxu0 %v6305_v39 }
 0x3ec   : > { %6105 = vmatprep.subr.bf16.mxu1 %v6785_v33  ;;  %6117 = vmatprep.subr.bf16.mxu0 %v6785_v33 }
 0x3ed   : > { %6111 = vmatprep.mubr.msk.bf16.mxu1 %vm6786_vm1, %v6785_v33  ;;  %6123 = vmatprep.mubr.msk.bf16.mxu0 %vm6786_vm1, %v6785_v33 }
 0x3ef   : > { %6106 = vmatpush3.bf16.msra.mxu1 %v6306_v41  ;;  %6118 = vmatpush3.bf16.msra.mxu0 %v6307_v42 }
 0x3f0   : > { %6107 = vmatprep.subr.bf16.mxu1 %v6785_v33  ;;  %6119 = vmatprep.subr.bf16.mxu0 %v6785_v33 }
 0x3f3   : > { %6108 = vmatpush3.bf16.msra.mxu1 %v6308_v43  ;;  %6120 = vmatpush3.bf16.msra.mxu0 %v6309_v44 }
 0x3f4   : > { %6109 = vmatprep.subr.bf16.mxu1 %v6785_v33  ;;  %6121 = vmatprep.subr.bf16.mxu0 %v6785_v33 }
 0x3f7   : > { %6110 = vmatpush3.bf16.msra.mxu1 %v6310_v45  ;;  %6122 = vmatpush3.bf16.msra.mxu0 %v6311_v46 }
 0x3f8   : > { %6127 = vmatprep.subr.bf16.mxu1 %v6785_v33  ;;  %6139 = vmatprep.subr.bf16.mxu0 %v6785_v33 }
 0x3fa   : > { %6112 = vmatmul.mubr.msk.bf16.vlgmr.msra.gmra.mrb[32].mxu1 %vm1115_vm2, %v7327_v40  ;;  %6124 = vmatmul.mubr.msk.bf16.vlgmr.msra.gmra.mrb[36].mxu0 %vm1115_vm2, %v7327_v40 }
 0x3fb   : > { %6129 = vmatprep.mubr.msk.bf16.mxu1 %vm6786_vm1, %v6785_v33  ;;  %6141 = vmatprep.mubr.msk.bf16.mxu0 %vm6786_vm1, %v6785_v33 }
 0x3fc   : > { %6128 = vmatpush3.bf16.msra.mxu1 %v6312_v47  ;;  %6140 = vmatpush3.bf16.msra.mxu0 %v6313_v48 }
 0x3fd   : > { %6133 = vmatprep.subr.bf16.mxu1 %v6785_v33  ;;  %6151 = vmatprep.subr.bf16.mxu0 %v6785_v33 }
 0x4bd   : > { %v1880_v49 = vpop.f32.mrb[28].mxu1  ;;  %v1953_v50 = vpop.f32.mrb[32].mxu0 }
 0x4be   : > { %v2106_v51 = vmax.f32 %v1880_v49, %v1953_v50  ;;  %v6089_v52 = vpop.f32.mrb[29].mxu1  ;;  %v6101_v53 = vpop.f32.mrb[33].mxu0 }
 0x4bf   : > { %v1883_v54 = vpop.f32.mrb[30].mxu1  ;;  %v1956_v55 = vpop.f32.mrb[34].mxu0 }
 0x4c0   : > { %v2107_v56 = vmax.f32 %v1883_v54, %v1956_v55  ;;  %v6090_v57 = vpop.f32.mrb[31].mxu1  ;;  %v6102_v58 = vpop.f32.mrb[35].mxu0 }
 0x4cd   : > { %v2026_v60 = vpop.f32.mrb[32].mxu1  ;;  %v2099_v62 = vpop.f32.mrb[36].mxu0 }
 0x4ce   : > { %v2108_v63 = vmax.f32 %v2106_v51, %v2026_v60  ;;  %v6113_v0 = vpop.f32.mrb[33].mxu1  ;;  %v6125_v2 = vpop.f32.mrb[37].mxu0 }
 0x4cf   : > { %v2029_v3 = vpop.f32.mrb[34].mxu1  ;;  %v2102_v4 = vpop.f32.mrb[38].mxu0 }
 0x4d0   : > { %v2110_v5 = vmax.f32 %v2108_v63, %v2099_v62  ;;  %v2109_v6 = vmax.f32 %v2107_v56, %v2029_v3  ;;  %v6114_v7 = vpop.f32.mrb[35].mxu1  ;;  %v6126_v8 = vpop.f32.mrb[39].mxu0 }
 0x4d2   : > { %v2111_v9 = vmax.f32 %v2109_v6, %v2102_v4 }
 0x4d4   : > { %v2114_v12 = vpack.c.bf16 %v2111_v9, %v2110_v5 }
 0x4d6   : > { %6130 = vmatmul.mubr.msk.bf16.vlgmr.msra.gmra.mrb[36].mxu1 %vm2121_vm5, %v2114_v12  ;;  %6142 = vmatmul.mubr.msk.bf16.vlgmr.msra.gmra.mrb[40].mxu0 %vm2121_vm5, %v2114_v12 }
 0x4d7   : > { %6134 = vmatpush3.bf16.msra.mxu1 %v6314_v10  ;;  %6152 = vmatpush3.bf16.msra.mxu0 %v6315_v11  ;;  %v6338_v11 = vld [vmem:[%s8541_s3 + $0x104] ss:$8 sps:$4 sm:$0xff]  }
 0x4d8   : > { %6135 = vmatprep.mubr.msk.bf16.mxu1 %vm6786_vm1, %v6785_v33  ;;  %6153 = vmatprep.mubr.msk.bf16.mxu0 %vm6786_vm1, %v6785_v33 }
 0x4d9   : > { %6145 = vmatprep.subr.bf16.mxu1 %v6785_v33  ;;  %6163 = vmatprep.subr.bf16.mxu0 %v6785_v33 }
 0x4de   : > { %6136 = vmatmul.mubr.msk.bf16.vlgmr.msra.gmra.mrb[40].mxu1 %vm2121_vm5, %v2114_v12  ;;  %6154 = vmatmul.mubr.msk.bf16.vlgmr.msra.gmra.mrb[44].mxu0 %vm2121_vm5, %v2114_v12 }
 0x4df   : > { %6146 = vmatpush3.bf16.msra.mxu1 %v6316_v13  ;;  %6164 = vmatpush3.bf16.msra.mxu0 %v6317_v14  ;;  %v6335_v13 = vld [vmem:[%s8544_s6 + $0x20] ss:$8 sps:$4 sm:$0xff]  }
 0x4e0   : > { %6147 = vmatprep.mubr.msk.bf16.mxu1 %vm6786_vm1, %v6785_v33  ;;  %6165 = vmatprep.mubr.msk.bf16.mxu0 %vm6786_vm1, %v6785_v33 }
 0x4e1   : > { %6175 = vmatprep.subr.bf16.mxu0 %v6785_v33  ;;  %6157 = vmatprep.subr.bf16.mxu1 %v6785_v33 }
 0x4e6   : > { %6148 = vmatmul.mubr.msk.bf16.vlgmr.msra.gmra.mrb[44].mxu1 %vm2121_vm5, %v2114_v12  ;;  %6166 = vmatmul.mubr.msk.bf16.vlgmr.msra.gmra.mrb[48].mxu0 %vm2121_vm5, %v2114_v12 }
 0x4e7   : > { %6176 = vmatpush3.bf16.msra.mxu0 %v6318_v15  ;;  %6158 = vmatpush3.bf16.msra.mxu1 %v6319_v16  ;;  %v6336_v15 = vld [vmem:[%s8541_s3 + $0x100] ss:$8 sps:$4 sm:$0xff]   ;;  %v6342_v16 = vld [vmem:[%s8544_s6 + $0x34] ss:$8 sps:$4 sm:$0xff]  }
 0x4e8   : > { %6159 = vmatprep.mubr.msk.bf16.mxu1 %vm6786_vm1, %v6785_v33  ;;  %6177 = vmatprep.mubr.msk.bf16.mxu0 %vm6786_vm1, %v6785_v33 }
 0x4e9   : > { %2720 = vmatprep.subr.bf16.mxu0 %v6322_v17  ;;  %6169 = vmatprep.subr.bf16.mxu1 %v6785_v33 }
 0x4ee   : > { %6160 = vmatmul.mubr.msk.bf16.vlgmr.msra.gmra.mrb[48].mxu1 %vm2121_vm5, %v2114_v12  ;;  %6178 = vmatmul.mubr.msk.bf16.vlgmr.msra.gmra.mrb[52].mxu0 %vm2121_vm5, %v2114_v12 }
 0x4ef   : > { %2721 = vmatpush1.bf16.msra.mxu0 %v6320_v18  ;;  %6170 = vmatpush3.bf16.msra.mxu1 %v6326_v19  ;;  %v6341_v18 = vld [vmem:[%s8541_s3 + $0x114] ss:$8 sps:$4 sm:$0xff]  }
 0x4f0   : > { %2722 = vmatprep.subr.bf16.mxu0 %v6325_v20  ;;  %6171 = vmatprep.mubr.msk.bf16.mxu1 %vm6786_vm1, %v6785_v33  ;;  %v6330_v33 = vld [vmem:[%s8541_s3 + $0x930] ss:$8 sps:$4 sm:$0xff]  }
 0x4f1   : > { %2752 = vmatprep.mubr.bf16.mxu0 %v6784_v1  ;;  %2619 = vmatprep.subr.bf16.mxu1 %v6784_v1 }
 0x4f3   : > { %2723 = vmatpush1.bf16.msra.mxu0 %v6323_v21 }
 0x4f4   : > { %2724 = vmatprep.subr.bf16.mxu0 %v6329_v22  ;;  %v6339_v22 = vld [vmem:[%s8541_s3 + $0x110] ss:$8 sps:$4 sm:$0xff]  }
 0x4f6   : > { %6172 = vmatmul.mubr.msk.bf16.vlgmr.msra.gmra.mrb[52].mxu1 %vm2121_vm5, %v2114_v12 }
 0x4f7   : > { %2725 = vmatpush1.bf16.msra.mxu0 %v6327_v23  ;;  %5466 = vmatprep.mubr.msk.bf16.mxu1 %vm2121_vm5, %v6333_v25  ;;  %v6347_v23 = vld [vmem:[%s8541_s3 + $0x124] ss:$8 sps:$4 sm:$0xff]   ;;  %v6345_v25 = vld [vmem:[%s8541_s3 + $0x120] ss:$8 sps:$4 sm:$0xff]  }
 0x4f8   : > { %2726 = vmatprep.subr.bf16.mxu0 %v6332_v24  ;;  %v2837_v24 = vld [vmem:[%s7500_s16 + $0x8] sm:$0xff] }
 0x4fb   : > { %2727 = vmatpush1.bf16.msra.mxu0 %v6330_v33  ;;  %v6344_v33 = vld [vmem:[%s8544_s6 + $0x30] ss:$8 sps:$4 sm:$0xff]  }
 0x4fe   : > { %5476 = vmatmul.mubr.msk.bf16.vlgmr.msra.gmra.mrb[56].mxu0 %vm1115_vm2, %v7327_v40 }
 0x4ff   : > { %2815 = vmatprep.mubr.bf16.mxu0 %v6784_v1 }
 0x5a9   : > { %v2159_v26 = vpop.f32.mrb[36].mxu1  ;;  %v2257_v27 = vpop.f32.mrb[40].mxu0 }
 0x5aa   : > { %v6131_v28 = vpop.f32.mrb[37].mxu1  ;;  %v6143_v29 = vpop.f32.mrb[41].mxu0 }
 0x5ab   : > { %v2162_v30 = vpop.f32.mrb[38].mxu1  ;;  %v2260_v31 = vpop.f32.mrb[42].mxu0  ;;  %v6348_v28 = vld [vmem:[%s8541_s3 + $0x130] ss:$8 sps:$4 sm:$0xff]   ;;  %v6353_v29 = vld [vmem:[%s8541_s3 + $0x144] ss:$8 sps:$4 sm:$0xff]  }
 0x5ac   : > { %v2562_v32 = vpack.c.bf16 %v2162_v30, %v2159_v26  ;;  %v2564_v34 = vpack.c.bf16 %v2260_v31, %v2257_v27  ;;  %v6132_v35 = vpop.f32.mrb[39].mxu1  ;;  %v6144_v36 = vpop.f32.mrb[43].mxu0  ;;  %v6350_v26 = vld [vmem:[%s8541_s3 + $0x134] ss:$8 sps:$4 sm:$0xff]   ;;  %v7520_v27 = vpack.c.bf16 %v6973_v61, %v2837_v24  ;;  %v6351_v30 = vld [vmem:[%s8541_s3 + $0x140] ss:$8 sps:$4 sm:$0xff]  }
 0x5ad   : > { %v6356_v61 = vld [vmem:[%s8541_s3 + $0x154] ss:$8 sps:$4 sm:$0xff]   ;;  %v6354_v31 = vld [vmem:[%s8541_s3 + $0x150] ss:$8 sps:$4 sm:$0xff]  }
 0x5ae   : > { %2620 = vmatpush1.bf16.msra.mxu1 %v2562_v32  ;;  %v6359_v32 = vld [vmem:[%s8541_s3 + $0x164] ss:$8 sps:$4 sm:$0xff]   ;;  %v6362_v35 = vld [vmem:[%s8541_s3 + $0x174] ss:$8 sps:$4 sm:$0xff]   ;;  %v6360_v36 = vld [vmem:[%s8541_s3 + $0x170] ss:$8 sps:$4 sm:$0xff]  }
 0x5af   : > { %2621 = vmatprep.subr.bf16.mxu1 %v6784_v1  ;;  %v6422_v24 = vld [vmem:[%s8541_s3 + $0x3b4] ss:$8 sps:$4 sm:$0xff]  }
 0x5b1   : > { %v2208_v37 = vpop.f32.mrb[40].mxu1  ;;  %v2355_v38 = vpop.f32.mrb[44].mxu0 }
 0x5b2   : > { %v6137_v39 = vpop.f32.mrb[41].mxu1  ;;  %v6155_v40 = vpop.f32.mrb[45].mxu0 }
 0x5b3   : > { %v2211_v41 = vpop.f32.mrb[42].mxu1  ;;  %v2358_v42 = vpop.f32.mrb[46].mxu0  ;;  %v6368_v39 = vld [vmem:[%s8541_s3 + $0x194] ss:$8 sps:$4 sm:$0xff]   ;;  %v6366_v40 = vld [vmem:[%s8541_s3 + $0x190] ss:$8 sps:$4 sm:$0xff]  }
 0x5b4   : > { %v2563_v43 = vpack.c.bf16 %v2211_v41, %v2208_v37  ;;  %v2566_v44 = vpack.c.bf16 %v2358_v42, %v2355_v38  ;;  %v6138_v45 = vpop.f32.mrb[43].mxu1  ;;  %v6156_v46 = vpop.f32.mrb[47].mxu0  ;;  %v6365_v37 = vld [vmem:[%s8541_s3 + $0x184] ss:$8 sps:$4 sm:$0xff]   ;;  %v6363_v38 = vld [vmem:[%s8541_s3 + $0x180] ss:$8 sps:$4 sm:$0xff]  }
 0x5b5   : > { %v6371_v41 = vld [vmem:[%s8541_s3 + $0x1a4] ss:$8 sps:$4 sm:$0xff]   ;;  %v6369_v42 = vld [vmem:[%s8541_s3 + $0x1a0] ss:$8 sps:$4 sm:$0xff]  }
 0x5b6   : > { %2622 = vmatpush1.bf16.msra.mxu1 %v2563_v43  ;;  %v6374_v43 = vld [vmem:[%s8541_s3 + $0x1b4] ss:$8 sps:$4 sm:$0xff]   ;;  %v6377_v45 = vld [vmem:[%s8541_s3 + $0x1c4] ss:$8 sps:$4 sm:$0xff]   ;;  %v6375_v46 = vld [vmem:[%s8541_s3 + $0x1c0] ss:$8 sps:$4 sm:$0xff]  }
 0x5b7   : > { %2623 = vmatprep.subr.bf16.mxu1 %v6784_v1 }
 0x5b9   : > { %v2306_v47 = vpop.f32.mrb[44].mxu1  ;;  %v2453_v48 = vpop.f32.mrb[48].mxu0 }
 0x5ba   : > { %v6149_v49 = vpop.f32.mrb[45].mxu1  ;;  %v6167_v50 = vpop.f32.mrb[49].mxu0  ;;  %2624 = vmatpush1.bf16.msra.mxu1 %v2564_v34  ;;  %v6357_v34 = vld [vmem:[%s8541_s3 + $0x160] ss:$8 sps:$4 sm:$0xff]  }
 0x5bb   : > { %v2309_v51 = vpop.f32.mrb[46].mxu1  ;;  %v2456_v52 = vpop.f32.mrb[50].mxu0  ;;  %2625 = vmatprep.subr.bf16.mxu1 %v6784_v1  ;;  %v6383_v49 = vld [vmem:[%s8541_s3 + $0x1e4] ss:$8 sps:$4 sm:$0xff]   ;;  %v6381_v50 = vld [vmem:[%s8541_s3 + $0x1e0] ss:$8 sps:$4 sm:$0xff]  }
 0x5bc   : > { %v2565_v53 = vpack.c.bf16 %v2309_v51, %v2306_v47  ;;  %v2568_v54 = vpack.c.bf16 %v2456_v52, %v2453_v48  ;;  %v6150_v55 = vpop.f32.mrb[47].mxu1  ;;  %v6168_v56 = vpop.f32.mrb[51].mxu0  ;;  %v6380_v47 = vld [vmem:[%s8541_s3 + $0x1d4] ss:$8 sps:$4 sm:$0xff]   ;;  %v6378_v48 = vld [vmem:[%s8541_s3 + $0x1d0] ss:$8 sps:$4 sm:$0xff]  }
 0x5bd   : > { %v6386_v51 = vld [vmem:[%s8541_s3 + $0x1f4] ss:$8 sps:$4 sm:$0xff]   ;;  %v6384_v52 = vld [vmem:[%s8541_s3 + $0x1f0] ss:$8 sps:$4 sm:$0xff]   ;;  %v6387_v55 = vld [vmem:[%s8541_s3 + $0x300] ss:$8 sps:$4 sm:$0xff]  }
 0x5be   : > { %2626 = vmatpush1.bf16.msra.mxu1 %v2565_v53  ;;  %v6389_v53 = vld [vmem:[%s8541_s3 + $0x304] ss:$8 sps:$4 sm:$0xff]  }
 0x5bf   : > { %2627 = vmatprep.subr.bf16.mxu1 %v6784_v1 }
 0x5c1   : > { %v2404_v57 = vpop.f32.mrb[48].mxu1  ;;  %v2551_v58 = vpop.f32.mrb[52].mxu0 }
 0x5c2   : > { %v6161_v60 = vpop.f32.mrb[49].mxu1  ;;  %v6179_v62 = vpop.f32.mrb[53].mxu0  ;;  %2628 = vmatpush1.bf16.msra.mxu1 %v2566_v44  ;;  %v6372_v44 = vld [vmem:[%s8541_s3 + $0x1b0] ss:$8 sps:$4 sm:$0xff]  }
 0x5c3   : > { %v2407_v63 = vpop.f32.mrb[50].mxu1  ;;  %v2554_v0 = vpop.f32.mrb[54].mxu0  ;;  %2629 = vmatprep.subr.bf16.mxu1 %v6784_v1  ;;  %v6393_v60 = vld [vmem:[%s8541_s3 + $0x320] ss:$8 sps:$4 sm:$0xff]   ;;  %v6398_v62 = vld [vmem:[%s8541_s3 + $0x334] ss:$8 sps:$4 sm:$0xff]  }
 0x5c4   : > { %v2567_v2 = vpack.c.bf16 %v2407_v63, %v2404_v57  ;;  %v2570_v3 = vpack.c.bf16 %v2554_v0, %v2551_v58  ;;  %v6162_v4 = vpop.f32.mrb[51].mxu1  ;;  %v6180_v5 = vpop.f32.mrb[55].mxu0  ;;  %v6392_v57 = vld [vmem:[%s8541_s3 + $0x314] ss:$8 sps:$4 sm:$0xff]   ;;  %v6390_v58 = vld [vmem:[%s8541_s3 + $0x310] ss:$8 sps:$4 sm:$0xff]  }
 0x5c5   : > { %v6396_v63 = vld [vmem:[%s8541_s3 + $0x330] ss:$8 sps:$4 sm:$0xff]   ;;  %v6401_v0 = vld [vmem:[%s8541_s3 + $0x344] ss:$8 sps:$4 sm:$0xff]  }
 0x5c6   : > { %2630 = vmatpush1.bf16.msra.mxu1 %v2567_v2  ;;  %v6399_v2 = vld [vmem:[%s8541_s3 + $0x340] ss:$8 sps:$4 sm:$0xff]   ;;  %v6402_v4 = vld [vmem:[%s8541_s3 + $0x350] ss:$8 sps:$4 sm:$0xff]   ;;  %v6407_v5 = vld [vmem:[%s8541_s3 + $0x364] ss:$8 sps:$4 sm:$0xff]  }
 0x5c7   : > { %2631 = vmatprep.subr.bf16.mxu1 %v6784_v1 }
 0x5c9   : > { %v2502_v6 = vpop.f32.mrb[52].mxu1 }
 0x5ca   : > { %v6173_v7 = vpop.f32.mrb[53].mxu1  ;;  %2632 = vmatpush1.bf16.msra.mxu1 %v2568_v54  ;;  %v2836_v54 = vld [vmem:[%s7500_s16] sm:$0xff] }
 0x5cb   : > { %v2505_v8 = vpop.f32.mrb[54].mxu1  ;;  %2633 = vmatprep.subr.bf16.mxu1 %v6784_v1  ;;  %v7606_v56 = vpack.c.bf16 %v6971_v59, %v2836_v54  ;;  %v6395_v59 = vld [vmem:[%s8541_s3 + $0x324] ss:$8 sps:$4 sm:$0xff]   ;;  %v6410_v7 = vld [vmem:[%s8541_s3 + $0x374] ss:$8 sps:$4 sm:$0xff]  }
 0x5cc   : > { %v2569_v9 = vpack.c.bf16 %v2505_v8, %v2502_v6  ;;  %v6174_v10 = vpop.f32.mrb[55].mxu1  ;;  %v6405_v6 = vld [vmem:[%s8541_s3 + $0x360] ss:$8 sps:$4 sm:$0xff]   ;;  %v6503_v8 = vld [vmem:[%s8541_s3 + $0x944] ss:$8 sps:$4 sm:$0xff]  }
 0x5cd   : > { %2783 = vmatprep.subr.bf16.mxu0 %v6503_v8  ;;  %v6408_v10 = vld [vmem:[%s8541_s3 + $0x370] ss:$8 sps:$4 sm:$0xff]   ;;  %v6467_v54 = vld [vmem:[%s8541_s3 + $0x5a4] ss:$8 sps:$4 sm:$0xff]  }
 0x5ce   : > { %2634 = vmatpush1.bf16.msra.mxu1 %v2569_v9  ;;  %v6501_v9 = vld [vmem:[%s8541_s3 + $0x940] ss:$8 sps:$4 sm:$0xff]   ;;  %v6486_v8 = vld [vmem:[%s8541_s3 + $0x710] ss:$8 sps:$4 sm:$0xff]  }
 0x5cf   : > { %2635 = vmatprep.subr.bf16.mxu1 %v6784_v1  ;;  %2784 = vmatpush1.bf16.msra.mxu0 %v6501_v9  ;;  %v6491_v9 = vld [vmem:[%s8541_s3 + $0x724] ss:$8 sps:$4 sm:$0xff]  }
 0x5d1   : > { %v7472_v12 = vpop.f32.mrb[56].mxu0 }
 0x5d2   : > { %v7477_v14 = vpop.f32.mrb[57].mxu0  ;;  %2636 = vmatpush1.bf16.msra.mxu1 %v2570_v3  ;;  %v6404_v3 = vld [vmem:[%s8541_s3 + $0x354] ss:$8 sps:$4 sm:$0xff]  }
 0x5d3   : > { %v7486_v17 = vpop.f32.mrb[58].mxu0  ;;  %3267 = vmatprep.subr.bf16.mxu1 %v6338_v11  ;;  %v6413_v11 = vld [vmem:[%s8541_s3 + $0x384] ss:$8 sps:$4 sm:$0xff]  }
 0x5d4   : > { %v5033_v19 = vpack.c.bf16 %v7486_v17, %v7472_v12  ;;  %v7493_v20 = vpop.f32.mrb[59].mxu0  ;;  %v5089_v12 = vld [vmem:[%s8544_s6 + $0x60] sm:$0xf] }
 0x5d5   : > { %v5034_v21 = vpack.c.bf16 %v7493_v20, %v7477_v14  ;;  %2652 = vmatmul.mubr.bf16.vlgmr.msra.gmra.mrb[56].mxu1 %v6335_v13  ;;  %v6509_v13 = vld [vmem:[%s8541_s3 + $0x4] ss:$8 sps:$4 sm:$0xff]  }
 0x5d6   : > { %3268 = vmatpush1.bf16.msra.mxu1 %v6336_v15  ;;  %5467 = vmatprep.mubr.msk.bf16.mxu1 %vm2121_vm5, %v6342_v16  ;;  %v6411_v15 = vld [vmem:[%s8541_s3 + $0x380] ss:$8 sps:$4 sm:$0xff]   ;;  %v6416_v16 = vld [vmem:[%s8541_s3 + $0x394] ss:$8 sps:$4 sm:$0xff]  }
 0x5d7   : > { %3269 = vmatprep.subr.bf16.mxu1 %v6341_v18  ;;  %3032 = vmatprep.subr.bf16.mxu0 %v6509_v13  ;;  %v6414_v18 = vld [vmem:[%s8541_s3 + $0x390] ss:$8 sps:$4 sm:$0xff]  }
 0x5d8   : > { %v6492_v13 = vld [vmem:[%s8541_s3 + $0x730] ss:$8 sps:$4 sm:$0xff]  }
 0x5da   : > { %3270 = vmatpush1.bf16.msra.mxu1 %v6339_v22  ;;  %v6419_v22 = vld [vmem:[%s8541_s3 + $0x3a4] ss:$8 sps:$4 sm:$0xff]  }
 0x5db   : > { %3271 = vmatprep.subr.bf16.mxu1 %v6347_v23  ;;  %v6417_v23 = vld [vmem:[%s8541_s3 + $0x3a0] ss:$8 sps:$4 sm:$0xff]  }
 0x5dd   : > { %2660 = vmatmul.mubr.bf16.gmra.mrb[60].mxu1 %v6344_v33  ;;  %v6420_v33 = vld [vmem:[%s8541_s3 + $0x3b0] ss:$8 sps:$4 sm:$0xff]  }
 0x5de   : > { %3272 = vmatpush1.bf16.msra.mxu1 %v6345_v25  ;;  %3299 = vmatprep.mubr.bf16.mxu1 %v7520_v27  ;;  %v6425_v25 = vld [vmem:[%s8541_s3 + $0x3c4] ss:$8 sps:$4 sm:$0xff]  }
 0x5df   : > { %3273 = vmatprep.subr.bf16.mxu1 %v6350_v26  ;;  %v6423_v26 = vld [vmem:[%s8541_s3 + $0x3c0] ss:$8 sps:$4 sm:$0xff]  }
 0x5e2   : > { %3274 = vmatpush1.bf16.msra.mxu1 %v6348_v28  ;;  %v6428_v28 = vld [vmem:[%s8541_s3 + $0x3d4] ss:$8 sps:$4 sm:$0xff]  }
 0x5e3   : > { %3275 = vmatprep.subr.bf16.mxu1 %v6353_v29  ;;  %v6426_v29 = vld [vmem:[%s8541_s3 + $0x3d0] ss:$8 sps:$4 sm:$0xff]  }
 0x5e6   : > { %3276 = vmatpush1.bf16.msra.mxu1 %v6351_v30  ;;  %v6431_v30 = vld [vmem:[%s8541_s3 + $0x3e4] ss:$8 sps:$4 sm:$0xff]  }
 0x5e7   : > { %3277 = vmatprep.subr.bf16.mxu1 %v6356_v61  ;;  %v6429_v61 = vld [vmem:[%s8541_s3 + $0x3e0] ss:$8 sps:$4 sm:$0xff]  }
 0x5ea   : > { %3278 = vmatpush1.bf16.msra.mxu1 %v6354_v31  ;;  %v6434_v31 = vld [vmem:[%s8541_s3 + $0x3f4] ss:$8 sps:$4 sm:$0xff]  }
 0x5eb   : > { %3279 = vmatprep.subr.bf16.mxu1 %v6359_v32  ;;  %v6432_v32 = vld [vmem:[%s8541_s3 + $0x3f0] ss:$8 sps:$4 sm:$0xff]  }
 0x5ee   : > { %3280 = vmatpush1.bf16.msra.mxu1 %v6357_v34  ;;  %v6437_v34 = vld [vmem:[%s8541_s3 + $0x504] ss:$8 sps:$4 sm:$0xff]  }
 0x5ef   : > { %3281 = vmatprep.subr.bf16.mxu1 %v6362_v35  ;;  %v6435_v35 = vld [vmem:[%s8541_s3 + $0x500] ss:$8 sps:$4 sm:$0xff]  }
 0x5f2   : > { %3282 = vmatpush1.bf16.msra.mxu1 %v6360_v36  ;;  %v6440_v36 = vld [vmem:[%s8541_s3 + $0x514] ss:$8 sps:$4 sm:$0xff]  }
 0x5f3   : > { %3283 = vmatprep.subr.bf16.mxu1 %v6365_v37  ;;  %v6438_v37 = vld [vmem:[%s8541_s3 + $0x510] ss:$8 sps:$4 sm:$0xff]  }
 0x5f6   : > { %3284 = vmatpush1.bf16.msra.mxu1 %v6363_v38  ;;  %v6443_v38 = vld [vmem:[%s8541_s3 + $0x524] ss:$8 sps:$4 sm:$0xff]  }
 0x5f7   : > { %3285 = vmatprep.subr.bf16.mxu1 %v6368_v39  ;;  %v6441_v39 = vld [vmem:[%s8541_s3 + $0x520] ss:$8 sps:$4 sm:$0xff]  }
 0x5fa   : > { %3286 = vmatpush1.bf16.msra.mxu1 %v6366_v40  ;;  %v6446_v40 = vld [vmem:[%s8541_s3 + $0x534] ss:$8 sps:$4 sm:$0xff]  }
 0x5fb   : > { %3287 = vmatprep.subr.bf16.mxu1 %v6371_v41  ;;  %v6444_v41 = vld [vmem:[%s8541_s3 + $0x530] ss:$8 sps:$4 sm:$0xff]  }
 0x5fe   : > { %3288 = vmatpush1.bf16.msra.mxu1 %v6369_v42  ;;  %v6449_v42 = vld [vmem:[%s8541_s3 + $0x544] ss:$8 sps:$4 sm:$0xff]  }
 0x5ff   : > { %3289 = vmatprep.subr.bf16.mxu1 %v6374_v43  ;;  %v6447_v43 = vld [vmem:[%s8541_s3 + $0x540] ss:$8 sps:$4 sm:$0xff]  }
 0x602   : > { %3290 = vmatpush1.bf16.msra.mxu1 %v6372_v44  ;;  %v6452_v44 = vld [vmem:[%s8541_s3 + $0x554] ss:$8 sps:$4 sm:$0xff]  }
 0x603   : > { %3291 = vmatprep.subr.bf16.mxu1 %v6377_v45  ;;  %v6450_v45 = vld [vmem:[%s8541_s3 + $0x550] ss:$8 sps:$4 sm:$0xff]  }
 0x606   : > { %3292 = vmatpush1.bf16.msra.mxu1 %v6375_v46  ;;  %v6455_v46 = vld [vmem:[%s8541_s3 + $0x564] ss:$8 sps:$4 sm:$0xff]  }
 0x607   : > { %3293 = vmatprep.subr.bf16.mxu1 %v6380_v47  ;;  %v6453_v47 = vld [vmem:[%s8541_s3 + $0x560] ss:$8 sps:$4 sm:$0xff]  }
 0x60a   : > { %3294 = vmatpush1.bf16.msra.mxu1 %v6378_v48  ;;  %v6458_v48 = vld [vmem:[%s8541_s3 + $0x574] ss:$8 sps:$4 sm:$0xff]  }
 0x60b   : > { %3295 = vmatprep.subr.bf16.mxu1 %v6383_v49  ;;  %v6456_v49 = vld [vmem:[%s8541_s3 + $0x570] ss:$8 sps:$4 sm:$0xff]  }
 0x60e   : > { %3296 = vmatpush1.bf16.msra.mxu1 %v6381_v50  ;;  %v6461_v50 = vld [vmem:[%s8541_s3 + $0x584] ss:$8 sps:$4 sm:$0xff]  }
 0x60f   : > { %3297 = vmatprep.subr.bf16.mxu1 %v6386_v51  ;;  %v6459_v51 = vld [vmem:[%s8541_s3 + $0x580] ss:$8 sps:$4 sm:$0xff]  }
 0x612   : > { %3298 = vmatpush1.bf16.msra.mxu1 %v6384_v52  ;;  %v6464_v52 = vld [vmem:[%s8541_s3 + $0x594] ss:$8 sps:$4 sm:$0xff]  }
 0x613   : > { %3737 = vmatprep.subr.bf16.mxu1 %v6389_v53  ;;  %v6462_v53 = vld [vmem:[%s8541_s3 + $0x590] ss:$8 sps:$4 sm:$0xff]  }
 0x615   : > { %3300 = vmatmul.mubr.bf16.vlgmr.msra.gmra.mrb[64].mxu1 %v7606_v56 }
 0x616   : > { %3738 = vmatpush1.bf16.msra.mxu1 %v6387_v55  ;;  %3769 = vmatprep.mubr.bf16.mxu1 %v7520_v27  ;;  %v6465_v55 = vld [vmem:[%s8541_s3 + $0x5a0] ss:$8 sps:$4 sm:$0xff]  }
 0x617   : > { %3739 = vmatprep.subr.bf16.mxu1 %v6392_v57  ;;  %v6470_v57 = vld [vmem:[%s8541_s3 + $0x5b4] ss:$8 sps:$4 sm:$0xff]  }
 0x61a   : > { %3740 = vmatpush1.bf16.msra.mxu1 %v6390_v58  ;;  %v6468_v58 = vld [vmem:[%s8541_s3 + $0x5b0] ss:$8 sps:$4 sm:$0xff]  }
 0x61b   : > { %3741 = vmatprep.subr.bf16.mxu1 %v6395_v59  ;;  %v6473_v59 = vld [vmem:[%s8541_s3 + $0x5c4] ss:$8 sps:$4 sm:$0xff]  }
 0x61e   : > { %3742 = vmatpush1.bf16.msra.mxu1 %v6393_v60  ;;  %v6471_v60 = vld [vmem:[%s8541_s3 + $0x5c0] ss:$8 sps:$4 sm:$0xff]  }
 0x61f   : > { %3743 = vmatprep.subr.bf16.mxu1 %v6398_v62  ;;  %v6476_v62 = vld [vmem:[%s8541_s3 + $0x5d4] ss:$8 sps:$4 sm:$0xff]  }
 0x622   : > { %3744 = vmatpush1.bf16.msra.mxu1 %v6396_v63  ;;  %v6474_v63 = vld [vmem:[%s8541_s3 + $0x5d0] ss:$8 sps:$4 sm:$0xff]  }
 0x623   : > { %3745 = vmatprep.subr.bf16.mxu1 %v6401_v0  ;;  %v6479_v0 = vld [vmem:[%s8541_s3 + $0x5e4] ss:$8 sps:$4 sm:$0xff]  }
 0x626   : > { %3746 = vmatpush1.bf16.msra.mxu1 %v6399_v2  ;;  %v6477_v2 = vld [vmem:[%s8541_s3 + $0x5e0] ss:$8 sps:$4 sm:$0xff]  }
 0x627   : > { %3747 = vmatprep.subr.bf16.mxu1 %v6404_v3  ;;  %v6482_v3 = vld [vmem:[%s8541_s3 + $0x5f4] ss:$8 sps:$4 sm:$0xff]  }
 0x62a   : > { %3748 = vmatpush1.bf16.msra.mxu1 %v6402_v4  ;;  %v6480_v4 = vld [vmem:[%s8541_s3 + $0x5f0] ss:$8 sps:$4 sm:$0xff]  }
 0x62b   : > { %3749 = vmatprep.subr.bf16.mxu1 %v6407_v5  ;;  %v6485_v5 = vld [vmem:[%s8541_s3 + $0x704] ss:$8 sps:$4 sm:$0xff]  }
 0x62e   : > { %3750 = vmatpush1.bf16.msra.mxu1 %v6405_v6  ;;  %v6483_v6 = vld [vmem:[%s8541_s3 + $0x700] ss:$8 sps:$4 sm:$0xff]  }
 0x62f   : > { %3751 = vmatprep.subr.bf16.mxu1 %v6410_v7  ;;  %v6488_v7 = vld [vmem:[%s8541_s3 + $0x714] ss:$8 sps:$4 sm:$0xff]  }
 0x632   : > { %3752 = vmatpush1.bf16.msra.mxu1 %v6408_v10  ;;  %v6489_v10 = vld [vmem:[%s8541_s3 + $0x720] ss:$8 sps:$4 sm:$0xff]  }
 0x633   : > { %3753 = vmatprep.subr.bf16.mxu1 %v6413_v11  ;;  %v6494_v11 = vld [vmem:[%s8541_s3 + $0x734] ss:$8 sps:$4 sm:$0xff]  }
 0x636   : > { %3754 = vmatpush1.bf16.msra.mxu1 %v6411_v15  ;;  %v6497_v15 = vld [vmem:[%s8541_s3 + $0x744] ss:$8 sps:$4 sm:$0xff]  }
 0x637   : > { %3755 = vmatprep.subr.bf16.mxu1 %v6416_v16  ;;  %v6495_v16 = vld [vmem:[%s8541_s3 + $0x740] ss:$8 sps:$4 sm:$0xff]  }
 0x63a   : > { %3756 = vmatpush1.bf16.msra.mxu1 %v6414_v18  ;;  %v6500_v18 = vld [vmem:[%s8541_s3 + $0x754] ss:$8 sps:$4 sm:$0xff]  }
 0x63b   : > { %3757 = vmatprep.subr.bf16.mxu1 %v6419_v22  ;;  %v6498_v22 = vld [vmem:[%s8541_s3 + $0x750] ss:$8 sps:$4 sm:$0xff]  }
 0x63e   : > { %3758 = vmatpush1.bf16.msra.mxu1 %v6417_v23  ;;  %v6506_v23 = vld [vmem:[%s8541_s3 + $0x764] ss:$8 sps:$4 sm:$0xff]  }
 0x63f   : > { %3759 = vmatprep.subr.bf16.mxu1 %v6422_v24  ;;  %v2578_v24 = vpop.permute.xlu1 %2577 }
 0x642   : > { %3760 = vmatpush1.bf16.msra.mxu1 %v6420_v33 }
 0x643   : > { %3761 = vmatprep.subr.bf16.mxu1 %v6425_v25 }
 0x646   : > { %3762 = vmatpush1.bf16.msra.mxu1 %v6423_v26 }
 0x647   : > { %3763 = vmatprep.subr.bf16.mxu1 %v6428_v28  ;;  %v2583_v28 = vpop.permute.xlu0 %2582 }
 0x64a   : > { %3764 = vmatpush1.bf16.msra.mxu1 %v6426_v29 }
 0x64b   : > { %3765 = vmatprep.subr.bf16.mxu1 %v6431_v30  ;;  %v6504_v30 = vld [vmem:[%s8541_s3 + $0x760] ss:$8 sps:$4 sm:$0xff]  }
 0x64e   : > { %3766 = vmatpush1.bf16.msra.mxu1 %v6429_v61 }
 0x64f   : > { %3767 = vmatprep.subr.bf16.mxu1 %v6434_v31 }
 0x652   : > { %3768 = vmatpush1.bf16.msra.mxu1 %v6432_v32  ;;  %v6512_v32 = vld [vmem:[%s8541_s3 + $0x774] ss:$8 sps:$4 sm:$0xff]  }
 0x653   : > { %4207 = vmatprep.subr.bf16.mxu1 %v6437_v34 }
 0x655   : > { %3770 = vmatmul.mubr.bf16.vlgmr.msra.gmra.mrb[68].mxu1 %v7606_v56 }
 0x656   : > { %4208 = vmatpush1.bf16.msra.mxu1 %v6435_v35  ;;  %4239 = vmatprep.mubr.bf16.mxu1 %v7520_v27 }
 0x657   : > { %4209 = vmatprep.subr.bf16.mxu1 %v6440_v36  ;;  %v6507_v36 = vld [vmem:[%s8541_s3] ss:$8 sps:$4 sm:$0xff]  }
 0x65a   : > { %4210 = vmatpush1.bf16.msra.mxu1 %v6438_v37  ;;  %v6510_v37 = vld [vmem:[%s8541_s3 + $0x770] ss:$8 sps:$4 sm:$0xff]  }
 0x65b   : > { %4211 = vmatprep.subr.bf16.mxu1 %v6443_v38 }
 0x65e   : > { %4212 = vmatpush1.bf16.msra.mxu1 %v6441_v39  ;;  %v6515_v39 = vld [vmem:[%s8541_s3 + $0x14] ss:$8 sps:$4 sm:$0xff]  }
 0x65f   : > { %4213 = vmatprep.subr.bf16.mxu1 %v6446_v40  ;;  %v6518_v40 = vld [vmem:[%s8541_s3 + $0x784] ss:$8 sps:$4 sm:$0xff]  }
 0x662   : > { %4214 = vmatpush1.bf16.msra.mxu1 %v6444_v41  ;;  %v2588_v41 = vpop.permute.xlu1 %2587 }
 0x663   : > { %4215 = vmatprep.subr.bf16.mxu1 %v6449_v42 }
 0x666   : > { %4216 = vmatpush1.bf16.msra.mxu1 %v6447_v43 }
 0x667   : > { %4217 = vmatprep.subr.bf16.mxu1 %v6452_v44 }
 0x66a   : > { %4218 = vmatpush1.bf16.msra.mxu1 %v6450_v45  ;;  %v2593_v45 = vpop.permute.xlu0 %2592 }
 0x66b   : > { %4219 = vmatprep.subr.bf16.mxu1 %v6455_v46 }
 0x66e   : > { %4220 = vmatpush1.bf16.msra.mxu1 %v6453_v47  ;;  %v6513_v47 = vld [vmem:[%s8541_s3 + $0x10] ss:$8 sps:$4 sm:$0xff]  }
 0x66f   : > { %4221 = vmatprep.subr.bf16.mxu1 %v6458_v48  ;;  %v6516_v48 = vld [vmem:[%s8541_s3 + $0x780] ss:$8 sps:$4 sm:$0xff]  }
 0x672   : > { %4222 = vmatpush1.bf16.msra.mxu1 %v6456_v49 }
 0x673   : > { %4223 = vmatprep.subr.bf16.mxu1 %v6461_v50  ;;  %v6521_v50 = vld [vmem:[%s8541_s3 + $0x24] ss:$8 sps:$4 sm:$0xff]  }
 0x676   : > { %4224 = vmatpush1.bf16.msra.mxu1 %v6459_v51  ;;  %v6524_v51 = vld [vmem:[%s8541_s3 + $0x794] ss:$8 sps:$4 sm:$0xff]  }
 0x677   : > { %4225 = vmatprep.subr.bf16.mxu1 %v6464_v52 }
 0x67a   : > { %4226 = vmatpush1.bf16.msra.mxu1 %v6462_v53 }
 0x67b   : > { %4227 = vmatprep.subr.bf16.mxu1 %v6467_v54 }
 0x67e   : > { %4228 = vmatpush1.bf16.msra.mxu1 %v6465_v55  ;;  %v6519_v55 = vld [vmem:[%s8541_s3 + $0x20] ss:$8 sps:$4 sm:$0xff]  }
 0x67f   : > { %4229 = vmatprep.subr.bf16.mxu1 %v6470_v57 }
 0x682   : > { %4230 = vmatpush1.bf16.msra.mxu1 %v6468_v58  ;;  %v6522_v58 = vld [vmem:[%s8541_s3 + $0x790] ss:$8 sps:$4 sm:$0xff]  }
 0x683   : > { %4231 = vmatprep.subr.bf16.mxu1 %v6473_v59  ;;  %v6527_v59 = vld [vmem:[%s8541_s3 + $0x34] ss:$8 sps:$4 sm:$0xff]  }
 0x686   : > { %4232 = vmatpush1.bf16.msra.mxu1 %v6471_v60  ;;  %v6530_v60 = vld [vmem:[%s8541_s3 + $0x7a4] ss:$8 sps:$4 sm:$0xff]  }
 0x687   : > { %4233 = vmatprep.subr.bf16.mxu1 %v6476_v62  ;;  %v6525_v62 = vld [vmem:[%s8541_s3 + $0x30] ss:$8 sps:$4 sm:$0xff]  }
 0x68a   : > { %4234 = vmatpush1.bf16.msra.mxu1 %v6474_v63  ;;  %v6528_v63 = vld [vmem:[%s8541_s3 + $0x7a0] ss:$8 sps:$4 sm:$0xff]  }
 0x68b   : > { %4235 = vmatprep.subr.bf16.mxu1 %v6479_v0  ;;  %v6533_v0 = vld [vmem:[%s8541_s3 + $0x44] ss:$8 sps:$4 sm:$0xff]  }
 0x68e   : > { %4236 = vmatpush1.bf16.msra.mxu1 %v6477_v2  ;;  %v6536_v2 = vld [vmem:[%s8541_s3 + $0x7b4] ss:$8 sps:$4 sm:$0xff]  }
 0x68f   : > { %4237 = vmatprep.subr.bf16.mxu1 %v6482_v3  ;;  %v6531_v3 = vld [vmem:[%s8541_s3 + $0x40] ss:$8 sps:$4 sm:$0xff]  }
 0x692   : > { %4238 = vmatpush1.bf16.msra.mxu1 %v6480_v4  ;;  %v6534_v4 = vld [vmem:[%s8541_s3 + $0x7b0] ss:$8 sps:$4 sm:$0xff]  }
 0x693   : > { %4677 = vmatprep.subr.bf16.mxu1 %v6485_v5  ;;  %v6539_v5 = vld [vmem:[%s8541_s3 + $0x54] ss:$8 sps:$4 sm:$0xff]  }
 0x695   : > { %4240 = vmatmul.mubr.bf16.vlgmr.msra.gmra.mrb[72].mxu1 %v7606_v56 }
 0x696   : > { %4678 = vmatpush1.bf16.msra.mxu1 %v6483_v6  ;;  %4709 = vmatprep.mubr.bf16.mxu1 %v7520_v27  ;;  %v6542_v6 = vld [vmem:[%s8541_s3 + $0x7c4] ss:$8 sps:$4 sm:$0xff]  }
 0x697   : > { %4679 = vmatprep.subr.bf16.mxu1 %v6488_v7  ;;  %v6537_v7 = vld [vmem:[%s8541_s3 + $0x50] ss:$8 sps:$4 sm:$0xff]  }
 0x69a   : > { %4680 = vmatpush1.bf16.msra.mxu1 %v6486_v8  ;;  %v6540_v8 = vld [vmem:[%s8541_s3 + $0x7c0] ss:$8 sps:$4 sm:$0xff]  }
 0x69b   : > { %4681 = vmatprep.subr.bf16.mxu1 %v6491_v9  ;;  %v6545_v9 = vld [vmem:[%s8541_s3 + $0x64] ss:$8 sps:$4 sm:$0xff]  }
 0x69e   : > { %4682 = vmatpush1.bf16.msra.mxu1 %v6489_v10  ;;  %v6548_v10 = vld [vmem:[%s8541_s3 + $0x7d4] ss:$8 sps:$4 sm:$0xff]  }
 0x69f   : > { %4683 = vmatprep.subr.bf16.mxu1 %v6494_v11  ;;  %v6543_v11 = vld [vmem:[%s8541_s3 + $0x60] ss:$8 sps:$4 sm:$0xff]  }
 0x6a2   : > { %4684 = vmatpush1.bf16.msra.mxu1 %v6492_v13  ;;  %v6546_v13 = vld [vmem:[%s8541_s3 + $0x7d0] ss:$8 sps:$4 sm:$0xff]  }
 0x6a3   : > { %4685 = vmatprep.subr.bf16.mxu1 %v6497_v15  ;;  %v6551_v15 = vld [vmem:[%s8541_s3 + $0x74] ss:$8 sps:$4 sm:$0xff]  }
 0x6a6   : > { %4686 = vmatpush1.bf16.msra.mxu1 %v6495_v16  ;;  %v6554_v16 = vld [vmem:[%s8541_s3 + $0x7e4] ss:$8 sps:$4 sm:$0xff]  }
 0x6a7   : > { %4687 = vmatprep.subr.bf16.mxu1 %v6500_v18  ;;  %v6549_v18 = vld [vmem:[%s8541_s3 + $0x70] ss:$8 sps:$4 sm:$0xff]  }
 0x6a8   : > { %v2653_v33 = vpop.f32.mrb[56].mxu1 }
 0x6a9   : > { %v2654_v25 = vadd.f32 %v2653_v33, %v2578_v24  ;;  %v2655_v26 = vpop.f32.mrb[57].mxu1  ;;  %v6560_v24 = vld [vmem:[%s8541_s3 + $0x7f4] ss:$8 sps:$4 sm:$0xff]   ;;  %v6555_v33 = vld [vmem:[%s8541_s3 + $0x80] ss:$8 sps:$4 sm:$0xff]  }
 0x6aa   : > { %v2656_v29 = vpop.f32.mrb[58].mxu1  ;;  %4688 = vmatpush1.bf16.msra.mxu1 %v6498_v22  ;;  %v6552_v22 = vld [vmem:[%s8541_s3 + $0x7e0] ss:$8 sps:$4 sm:$0xff]   ;;  %v6563_v26 = vld [vmem:[%s8541_s3 + $0x94] ss:$8 sps:$4 sm:$0xff]  }
 0x6ab   : > { %v2657_v61 = vadd.f32 %v2656_v29, %v2583_v28  ;;  %v2658_v31 = vpop.f32.mrb[59].mxu1  ;;  %4689 = vmatprep.subr.bf16.mxu1 %v6506_v23  ;;  %v2668_v34 = vmax.f32 %v2654_v25, 0.0  ;;  %v6557_v23 = vld [vmem:[%s8541_s3 + $0x84] ss:$8 sps:$4 sm:$0xff]   ;;  %v6558_v25 = vld [vmem:[%s8541_s3 + $0x7f0] ss:$8 sps:$4 sm:$0xff]  }
 0x6ac   : > { %v6561_v28 = vld [vmem:[%s8541_s3 + $0x90] ss:$8 sps:$4 sm:$0xff]   ;;  %v6566_v29 = vld [vmem:[%s8541_s3 + $0xa4] ss:$8 sps:$4 sm:$0xff]  }
 0x6ad   : > { %v2669_v35 = vmax.f32 %v2657_v61, 0.0  ;;  %v6569_v61 = vld [vmem:[%s8541_s3 + $0xb4] ss:$8 sps:$4 sm:$0xff]   ;;  %v6567_v31 = vld [vmem:[%s8541_s3 + $0xb0] ss:$8 sps:$4 sm:$0xff]  }
 0x6ae   : > { %4690 = vmatpush1.bf16.msra.mxu1 %v6504_v30  ;;  %v6564_v30 = vld [vmem:[%s8541_s3 + $0xa0] ss:$8 sps:$4 sm:$0xff]  }
 0x6af   : > { %v2765_v38 = vpack.c.bf16 %v2669_v35, %v2668_v34  ;;  %4691 = vmatprep.subr.bf16.mxu1 %v6512_v32  ;;  %v6572_v32 = vld [vmem:[%s8541_s3 + $0xc4] ss:$8 sps:$4 sm:$0xff]   ;;  %v6570_v34 = vld [vmem:[%s8541_s3 + $0xc0] ss:$8 sps:$4 sm:$0xff]   ;;  %v6575_v35 = vld [vmem:[%s8541_s3 + $0xd4] ss:$8 sps:$4 sm:$0xff]  }
 0x6b0   : > { %v2661_v42 = vpop.f32.mrb[60].mxu1 }
 0x6b1   : > { %v2662_v43 = vadd.f32 %v2661_v42, %v2588_v41  ;;  %v2663_v44 = vpop.f32.mrb[61].mxu1  ;;  %5479 = vmatmul.mubr.msk.bf16.vlgmr.msra.gmra.mrb[60].mxu0 %vm2121_vm5, %v2765_v38  ;;  %v6576_v38 = vld [vmem:[%s8541_s3 + $0xe0] ss:$8 sps:$4 sm:$0xff]  }
 0x6b2   : > { %3033 = vmatpush1.bf16.msra.mxu0 %v6507_v36  ;;  %v2664_v46 = vpop.f32.mrb[62].mxu1  ;;  %4692 = vmatpush1.bf16.msra.mxu1 %v6510_v37  ;;  %v6573_v36 = vld [vmem:[%s8541_s3 + $0xd0] ss:$8 sps:$4 sm:$0xff]   ;;  %v6578_v37 = vld [vmem:[%s8541_s3 + $0xe4] ss:$8 sps:$4 sm:$0xff]  }
 0x6b3   : > { %v2665_v49 = vadd.f32 %v2664_v46, %v2593_v45  ;;  %3034 = vmatprep.subr.bf16.mxu0 %v6515_v39  ;;  %4693 = vmatprep.subr.bf16.mxu1 %v6518_v40  ;;  %v2666_v52 = vpop.f32.mrb[63].mxu1  ;;  %v2670_v53 = vmax.f32 %v2662_v43, 0.0  ;;  %v6581_v39 = vld [vmem:[%s8541_s3 + $0xf4] ss:$8 sps:$4 sm:$0xff]   ;;  %v6579_v43 = vld [vmem:[%s8541_s3 + $0xf0] ss:$8 sps:$4 sm:$0xff]  }
 0x6b4   : > { %2825 = vmatprep.mubr.bf16.mxu0 %v6784_v1  ;;  %v6584_v46 = vld [vmem:[%s8541_s3 + $0x204] ss:$8 sps:$4 sm:$0xff]   ;;  %v6588_v52 = vld [vmem:[%s8541_s3 + $0x220] ss:$8 sps:$4 sm:$0xff]  }
 0x6b5   : > { %v2671_v54 = vmax.f32 %v2665_v49, 0.0  ;;  %v6587_v49 = vld [vmem:[%s8541_s3 + $0x214] ss:$8 sps:$4 sm:$0xff]  }
 0x6b6   : > { %3035 = vmatpush1.bf16.msra.mxu0 %v6513_v47  ;;  %4694 = vmatpush1.bf16.msra.mxu1 %v6516_v48  ;;  %v6582_v48 = vld [vmem:[%s8541_s3 + $0x200] ss:$8 sps:$4 sm:$0xff]  }
 0x6b7   : > { %v2766_v57 = vpack.c.bf16 %v2671_v54, %v2670_v53  ;;  %3036 = vmatprep.subr.bf16.mxu0 %v6521_v50  ;;  %4695 = vmatprep.subr.bf16.mxu1 %v6524_v51  ;;  %v6585_v50 = vld [vmem:[%s8541_s3 + $0x210] ss:$8 sps:$4 sm:$0xff]   ;;  %v6590_v51 = vld [vmem:[%s8541_s3 + $0x224] ss:$8 sps:$4 sm:$0xff]   ;;  %v6593_v53 = vld [vmem:[%s8541_s3 + $0x234] ss:$8 sps:$4 sm:$0xff]  }
 0x6b8   : > { %v6591_v54 = vld [vmem:[%s8541_s3 + $0x230] ss:$8 sps:$4 sm:$0xff]  }
 0x6b9   : > { %5480 = vmatmul.mubr.msk.bf16.gmra.mrb[64].mxu0 %vm2121_vm5, %v2766_v57  ;;  %v6594_v57 = vld [vmem:[%s8541_s3 + $0x240] ss:$8 sps:$4 sm:$0xff]  }
 0x6ba   : > { %3037 = vmatpush1.bf16.msra.mxu0 %v6519_v55  ;;  %3064 = vmatprep.mubr.bf16.mxu0 %v7520_v27  ;;  %v6596_v55 = vld [vmem:[%s8541_s3 + $0x244] ss:$8 sps:$4 sm:$0xff]  }
 0x6bb   : > { %4696 = vmatpush1.bf16.msra.mxu1 %v6522_v58  ;;  %3038 = vmatprep.subr.bf16.mxu0 %v6527_v59  ;;  %v6599_v58 = vld [vmem:[%s8541_s3 + $0x254] ss:$8 sps:$4 sm:$0xff]   ;;  %v6597_v59 = vld [vmem:[%s8541_s3 + $0x250] ss:$8 sps:$4 sm:$0xff]  }
 0x6bc   : > { %4697 = vmatprep.subr.bf16.mxu1 %v6530_v60  ;;  %v6602_v60 = vld [vmem:[%s8541_s3 + $0x264] ss:$8 sps:$4 sm:$0xff]  }
 0x6be   : > { %3039 = vmatpush1.bf16.msra.mxu0 %v6525_v62  ;;  %v6600_v62 = vld [vmem:[%s8541_s3 + $0x260] ss:$8 sps:$4 sm:$0xff]  }
 0x6bf   : > { %4698 = vmatpush1.bf16.msra.mxu1 %v6528_v63  ;;  %3040 = vmatprep.subr.bf16.mxu0 %v6533_v0  ;;  %v6605_v63 = vld [vmem:[%s8541_s3 + $0x274] ss:$8 sps:$4 sm:$0xff]   ;;  %v6603_v0 = vld [vmem:[%s8541_s3 + $0x270] ss:$8 sps:$4 sm:$0xff]  }
 0x6c0   : > { %4699 = vmatprep.subr.bf16.mxu1 %v6536_v2  ;;  %v6608_v2 = vld [vmem:[%s8541_s3 + $0x284] ss:$8 sps:$4 sm:$0xff]  }
 0x6c2   : > { %3041 = vmatpush1.bf16.msra.mxu0 %v6531_v3  ;;  %v6606_v3 = vld [vmem:[%s8541_s3 + $0x280] ss:$8 sps:$4 sm:$0xff]  }
 0x6c3   : > { %4700 = vmatpush1.bf16.msra.mxu1 %v6534_v4  ;;  %3042 = vmatprep.subr.bf16.mxu0 %v6539_v5  ;;  %v6611_v4 = vld [vmem:[%s8541_s3 + $0x294] ss:$8 sps:$4 sm:$0xff]   ;;  %v6609_v5 = vld [vmem:[%s8541_s3 + $0x290] ss:$8 sps:$4 sm:$0xff]  }
 0x6c4   : > { %4701 = vmatprep.subr.bf16.mxu1 %v6542_v6  ;;  %v6614_v6 = vld [vmem:[%s8541_s3 + $0x2a4] ss:$8 sps:$4 sm:$0xff]  }
 0x6c6   : > { %3043 = vmatpush1.bf16.msra.mxu0 %v6537_v7  ;;  %v6612_v7 = vld [vmem:[%s8541_s3 + $0x2a0] ss:$8 sps:$4 sm:$0xff]  }
 0x6c7   : > { %4702 = vmatpush1.bf16.msra.mxu1 %v6540_v8  ;;  %3044 = vmatprep.subr.bf16.mxu0 %v6545_v9  ;;  %v6617_v8 = vld [vmem:[%s8541_s3 + $0x2b4] ss:$8 sps:$4 sm:$0xff]   ;;  %v6615_v9 = vld [vmem:[%s8541_s3 + $0x2b0] ss:$8 sps:$4 sm:$0xff]  }
 0x6c8   : > { %4703 = vmatprep.subr.bf16.mxu1 %v6548_v10  ;;  %v6620_v10 = vld [vmem:[%s8541_s3 + $0x2c4] ss:$8 sps:$4 sm:$0xff]  }
 0x6ca   : > { %3045 = vmatpush1.bf16.msra.mxu0 %v6543_v11  ;;  %v6618_v11 = vld [vmem:[%s8541_s3 + $0x2c0] ss:$8 sps:$4 sm:$0xff]  }
 0x6cb   : > { %4704 = vmatpush1.bf16.msra.mxu1 %v6546_v13  ;;  %3046 = vmatprep.subr.bf16.mxu0 %v6551_v15  ;;  %v6623_v13 = vld [vmem:[%s8541_s3 + $0x2d4] ss:$8 sps:$4 sm:$0xff]   ;;  %v6621_v15 = vld [vmem:[%s8541_s3 + $0x2d0] ss:$8 sps:$4 sm:$0xff]  }
 0x6cc   : > { %4705 = vmatprep.subr.bf16.mxu1 %v6554_v16  ;;  %v6626_v16 = vld [vmem:[%s8541_s3 + $0x2e4] ss:$8 sps:$4 sm:$0xff]  }
 0x6ce   : > { %3047 = vmatpush1.bf16.msra.mxu0 %v6549_v18  ;;  %v6624_v18 = vld [vmem:[%s8541_s3 + $0x2e0] ss:$8 sps:$4 sm:$0xff]  }
 0x6cf   : > { %4706 = vmatpush1.bf16.msra.mxu1 %v6552_v22  ;;  %3048 = vmatprep.subr.bf16.mxu0 %v6557_v23  ;;  %v6629_v22 = vld [vmem:[%s8541_s3 + $0x2f4] ss:$8 sps:$4 sm:$0xff]  }
 0x6d0   : > { %4707 = vmatprep.subr.bf16.mxu1 %v6560_v24 }
 0x6d2   : > { %3049 = vmatpush1.bf16.msra.mxu0 %v6555_v33 }
 0x6d3   : > { %4708 = vmatpush1.bf16.msra.mxu1 %v6558_v25  ;;  %3050 = vmatprep.subr.bf16.mxu0 %v6563_v26  ;;  %v6627_v25 = vld [vmem:[%s8541_s3 + $0x2f0] ss:$8 sps:$4 sm:$0xff]  }
 0x6d6   : > { %3051 = vmatpush1.bf16.msra.mxu0 %v6561_v28  ;;  %4710 = vmatmul.mubr.bf16.vlgmr.msra.gmra.mrb[76].mxu1 %v7606_v56 }
 0x6d7   : > { %3052 = vmatprep.subr.bf16.mxu0 %v6566_v29  ;;  %v6632_v29 = vld [vmem:[%s8541_s3 + $0x404] ss:$8 sps:$4 sm:$0xff]  }
 0x6da   : > { %3053 = vmatpush1.bf16.msra.mxu0 %v6564_v30 }
 0x6db   : > { %3054 = vmatprep.subr.bf16.mxu0 %v6569_v61  ;;  %v6630_v61 = vld [vmem:[%s8541_s3 + $0x400] ss:$8 sps:$4 sm:$0xff]  }
 0x6de   : > { %3055 = vmatpush1.bf16.msra.mxu0 %v6567_v31  ;;  %v6635_v31 = vld [vmem:[%s8541_s3 + $0x414] ss:$8 sps:$4 sm:$0xff]  }
 0x6df   : > { %3056 = vmatprep.subr.bf16.mxu0 %v6572_v32  ;;  %v6633_v32 = vld [vmem:[%s8541_s3 + $0x410] ss:$8 sps:$4 sm:$0xff]  }
 0x6e2   : > { %3057 = vmatpush1.bf16.msra.mxu0 %v6570_v34  ;;  %v6638_v34 = vld [vmem:[%s8541_s3 + $0x424] ss:$8 sps:$4 sm:$0xff]  }
 0x6e3   : > { %3058 = vmatprep.subr.bf16.mxu0 %v6575_v35  ;;  %v6636_v35 = vld [vmem:[%s8541_s3 + $0x420] ss:$8 sps:$4 sm:$0xff]  }
 0x6e6   : > { %3059 = vmatpush1.bf16.msra.mxu0 %v6573_v36  ;;  %v6641_v36 = vld [vmem:[%s8541_s3 + $0x434] ss:$8 sps:$4 sm:$0xff]  }
 0x6e7   : > { %3060 = vmatprep.subr.bf16.mxu0 %v6578_v37  ;;  %v6639_v37 = vld [vmem:[%s8541_s3 + $0x430] ss:$8 sps:$4 sm:$0xff]  }
 0x6e8   : > { %v8000_v40 = vpop.f32.mrb[64].mxu1 }
 0x6e9   : > { %v8002_v41 = vpop.f32.mrb[65].mxu1 }
 0x6ea   : > { %3061 = vmatpush1.bf16.msra.mxu0 %v6576_v38  ;;  %v8004_v42 = vpop.f32.mrb[66].mxu1  ;;  %v6644_v38 = vld [vmem:[%s8541_s3 + $0x444] ss:$8 sps:$4 sm:$0xff]  }
 0x6eb   : > { %v4958_v44 = vpack.c.bf16 %v8004_v42, %v8000_v40  ;;  %v8011_v45 = vpop.f32.mrb[67].mxu1  ;;  %3062 = vmatprep.subr.bf16.mxu0 %v6581_v39  ;;  %v6642_v39 = vld [vmem:[%s8541_s3 + $0x440] ss:$8 sps:$4 sm:$0xff]   ;;  %v6761_v42 = vld [vmem:[%s8541_s3 + $0x8b4] ss:$8 sps:$4 sm:$0xff]  }
 0x6ec   : > { %v4959_v47 = vpack.c.bf16 %v8011_v45, %v8002_v41  ;;  %v6753_v41 = vld [vmem:[%s8541_s3 + $0x890] ss:$8 sps:$4 sm:$0xff]   ;;  %v6758_v45 = vld [vmem:[%s8541_s3 + $0x8a4] ss:$8 sps:$4 sm:$0xff]   ;;  %v6756_v40 = vld [vmem:[%s8541_s3 + $0x8a0] ss:$8 sps:$4 sm:$0xff]  }
 0x6ee   : > { %3063 = vmatpush1.bf16.msra.mxu0 %v6579_v43  ;;  %v6647_v43 = vld [vmem:[%s8541_s3 + $0x454] ss:$8 sps:$4 sm:$0xff]  }
 0x6ef   : > { %3502 = vmatprep.subr.bf16.mxu0 %v6584_v46  ;;  %v6645_v46 = vld [vmem:[%s8541_s3 + $0x450] ss:$8 sps:$4 sm:$0xff]  }
 0x6f1   : > { %3065 = vmatmul.mubr.bf16.vlgmr.msra.gmra.mrb[68].mxu0 %v7606_v56 }
 0x6f2   : > { %3503 = vmatpush1.bf16.msra.mxu0 %v6582_v48  ;;  %3534 = vmatprep.mubr.bf16.mxu0 %v7520_v27  ;;  %v6650_v48 = vld [vmem:[%s8541_s3 + $0x464] ss:$8 sps:$4 sm:$0xff]  }
 0x6f3   : > { %3504 = vmatprep.subr.bf16.mxu0 %v6587_v49  ;;  %v6648_v49 = vld [vmem:[%s8541_s3 + $0x460] ss:$8 sps:$4 sm:$0xff]  }
 0x6f6   : > { %3505 = vmatpush1.bf16.msra.mxu0 %v6585_v50  ;;  %v6653_v50 = vld [vmem:[%s8541_s3 + $0x474] ss:$8 sps:$4 sm:$0xff]  }
 0x6f7   : > { %3506 = vmatprep.subr.bf16.mxu0 %v6590_v51  ;;  %v6651_v51 = vld [vmem:[%s8541_s3 + $0x470] ss:$8 sps:$4 sm:$0xff]  }
 0x6fa   : > { %3507 = vmatpush1.bf16.msra.mxu0 %v6588_v52  ;;  %v6656_v52 = vld [vmem:[%s8541_s3 + $0x484] ss:$8 sps:$4 sm:$0xff]  }
 0x6fb   : > { %3508 = vmatprep.subr.bf16.mxu0 %v6593_v53  ;;  %v6654_v53 = vld [vmem:[%s8541_s3 + $0x480] ss:$8 sps:$4 sm:$0xff]  }
 0x6fe   : > { %3509 = vmatpush1.bf16.msra.mxu0 %v6591_v54  ;;  %v6659_v54 = vld [vmem:[%s8541_s3 + $0x494] ss:$8 sps:$4 sm:$0xff]  }
 0x6ff   : > { %3510 = vmatprep.subr.bf16.mxu0 %v6596_v55  ;;  %v6657_v55 = vld [vmem:[%s8541_s3 + $0x490] ss:$8 sps:$4 sm:$0xff]  }
 0x702   : > { %3511 = vmatpush1.bf16.msra.mxu0 %v6594_v57  ;;  %v6662_v57 = vld [vmem:[%s8541_s3 + $0x4a4] ss:$8 sps:$4 sm:$0xff]  }
 0x703   : > { %3512 = vmatprep.subr.bf16.mxu0 %v6599_v58  ;;  %v6660_v58 = vld [vmem:[%s8541_s3 + $0x4a0] ss:$8 sps:$4 sm:$0xff]  }
 0x706   : > { %3513 = vmatpush1.bf16.msra.mxu0 %v6597_v59  ;;  %v6665_v59 = vld [vmem:[%s8541_s3 + $0x4b4] ss:$8 sps:$4 sm:$0xff]  }
 0x707   : > { %3514 = vmatprep.subr.bf16.mxu0 %v6602_v60  ;;  %v6663_v60 = vld [vmem:[%s8541_s3 + $0x4b0] ss:$8 sps:$4 sm:$0xff]  }
 0x70a   : > { %3515 = vmatpush1.bf16.msra.mxu0 %v6600_v62  ;;  %v6668_v62 = vld [vmem:[%s8541_s3 + $0x4c4] ss:$8 sps:$4 sm:$0xff]  }
 0x70b   : > { %3516 = vmatprep.subr.bf16.mxu0 %v6605_v63  ;;  %v6666_v63 = vld [vmem:[%s8541_s3 + $0x4c0] ss:$8 sps:$4 sm:$0xff]  }
 0x70e   : > { %3517 = vmatpush1.bf16.msra.mxu0 %v6603_v0  ;;  %v6671_v0 = vld [vmem:[%s8541_s3 + $0x4d4] ss:$8 sps:$4 sm:$0xff]  }
 0x70f   : > { %3518 = vmatprep.subr.bf16.mxu0 %v6608_v2  ;;  %v6669_v2 = vld [vmem:[%s8541_s3 + $0x4d0] ss:$8 sps:$4 sm:$0xff]  }
 0x712   : > { %3519 = vmatpush1.bf16.msra.mxu0 %v6606_v3  ;;  %v6674_v3 = vld [vmem:[%s8541_s3 + $0x4e4] ss:$8 sps:$4 sm:$0xff]  }
 0x713   : > { %3520 = vmatprep.subr.bf16.mxu0 %v6611_v4  ;;  %v6672_v4 = vld [vmem:[%s8541_s3 + $0x4e0] ss:$8 sps:$4 sm:$0xff]  }
 0x716   : > { %3521 = vmatpush1.bf16.msra.mxu0 %v6609_v5  ;;  %v6677_v5 = vld [vmem:[%s8541_s3 + $0x4f4] ss:$8 sps:$4 sm:$0xff]  }
 0x717   : > { %3522 = vmatprep.subr.bf16.mxu0 %v6614_v6 }
 0x71a   : > { %3523 = vmatpush1.bf16.msra.mxu0 %v6612_v7 }
 0x71b   : > { %3524 = vmatprep.subr.bf16.mxu0 %v6617_v8 }
 0x71e   : > { %3525 = vmatpush1.bf16.msra.mxu0 %v6615_v9  ;;  %v6675_v9 = vld [vmem:[%s8541_s3 + $0x4f0] ss:$8 sps:$4 sm:$0xff]  }
 0x71f   : > { %3526 = vmatprep.subr.bf16.mxu0 %v6620_v10 }
 0x722   : > { %3527 = vmatpush1.bf16.msra.mxu0 %v6618_v11 }
 0x723   : > { %3528 = vmatprep.subr.bf16.mxu0 %v6623_v13  ;;  %v6680_v13 = vld [vmem:[%s8541_s3 + $0x604] ss:$8 sps:$4 sm:$0xff]  }
 0x726   : > { %3529 = vmatpush1.bf16.msra.mxu0 %v6621_v15 }
 0x727   : > { %3530 = vmatprep.subr.bf16.mxu0 %v6626_v16  ;;  %v6678_v16 = vld [vmem:[%s8541_s3 + $0x600] ss:$8 sps:$4 sm:$0xff]  }
 0x728   : > { %v8110_v23 = vpop.f32.mrb[68].mxu1 }
 0x729   : > { %v8112_v24 = vpop.f32.mrb[69].mxu1 }
 0x72a   : > { %3531 = vmatpush1.bf16.msra.mxu0 %v6624_v18  ;;  %v8114_v33 = vpop.f32.mrb[70].mxu1  ;;  %v6683_v18 = vld [vmem:[%s8541_s3 + $0x614] ss:$8 sps:$4 sm:$0xff]  }
 0x72b   : > { %v4962_v26 = vpack.c.bf16 %v8114_v33, %v8110_v23  ;;  %v8121_v28 = vpop.f32.mrb[71].mxu1  ;;  %3532 = vmatprep.subr.bf16.mxu0 %v6629_v22  ;;  %v6681_v22 = vld [vmem:[%s8541_s3 + $0x610] ss:$8 sps:$4 sm:$0xff]  }
 0x72c   : > { %v4963_v30 = vpack.c.bf16 %v8121_v28, %v8112_v24 }
 0x72e   : > { %3533 = vmatpush1.bf16.msra.mxu0 %v6627_v25  ;;  %v6686_v25 = vld [vmem:[%s8541_s3 + $0x624] ss:$8 sps:$4 sm:$0xff]  }
 0x72f   : > { %3972 = vmatprep.subr.bf16.mxu0 %v6632_v29  ;;  %v6684_v29 = vld [vmem:[%s8541_s3 + $0x620] ss:$8 sps:$4 sm:$0xff]  }
 0x731   : > { %3535 = vmatmul.mubr.bf16.vlgmr.msra.gmra.mrb[72].mxu0 %v7606_v56 }
 0x732   : > { %3973 = vmatpush1.bf16.msra.mxu0 %v6630_v61  ;;  %4004 = vmatprep.mubr.bf16.mxu0 %v7520_v27  ;;  %v6689_v61 = vld [vmem:[%s8541_s3 + $0x634] ss:$8 sps:$4 sm:$0xff]  }
 0x733   : > { %3974 = vmatprep.subr.bf16.mxu0 %v6635_v31  ;;  %v6687_v31 = vld [vmem:[%s8541_s3 + $0x630] ss:$8 sps:$4 sm:$0xff]  }
 0x736   : > { %3975 = vmatpush1.bf16.msra.mxu0 %v6633_v32  ;;  %v6692_v32 = vld [vmem:[%s8541_s3 + $0x644] ss:$8 sps:$4 sm:$0xff]  }
 0x737   : > { %3976 = vmatprep.subr.bf16.mxu0 %v6638_v34  ;;  %v6690_v34 = vld [vmem:[%s8541_s3 + $0x640] ss:$8 sps:$4 sm:$0xff]  }
 0x73a   : > { %3977 = vmatpush1.bf16.msra.mxu0 %v6636_v35  ;;  %v6695_v35 = vld [vmem:[%s8541_s3 + $0x654] ss:$8 sps:$4 sm:$0xff]  }
 0x73b   : > { %3978 = vmatprep.subr.bf16.mxu0 %v6641_v36  ;;  %v6693_v36 = vld [vmem:[%s8541_s3 + $0x650] ss:$8 sps:$4 sm:$0xff]  }
 0x73e   : > { %3979 = vmatpush1.bf16.msra.mxu0 %v6639_v37  ;;  %v6698_v37 = vld [vmem:[%s8541_s3 + $0x664] ss:$8 sps:$4 sm:$0xff]  }
 0x73f   : > { %3980 = vmatprep.subr.bf16.mxu0 %v6644_v38 }
 0x742   : > { %3981 = vmatpush1.bf16.msra.mxu0 %v6642_v39 }
 0x743   : > { %3982 = vmatprep.subr.bf16.mxu0 %v6647_v43 }
 0x746   : > { %3983 = vmatpush1.bf16.msra.mxu0 %v6645_v46  ;;  %v6696_v46 = vld [vmem:[%s8541_s3 + $0x660] ss:$8 sps:$4 sm:$0xff]  }
 0x747   : > { %3984 = vmatprep.subr.bf16.mxu0 %v6650_v48 }
 0x74a   : > { %3985 = vmatpush1.bf16.msra.mxu0 %v6648_v49 }
 0x74b   : > { %3986 = vmatprep.subr.bf16.mxu0 %v6653_v50  ;;  %v6701_v50 = vld [vmem:[%s8541_s3 + $0x674] ss:$8 sps:$4 sm:$0xff]  }
 0x74e   : > { %3987 = vmatpush1.bf16.msra.mxu0 %v6651_v51 }
 0x74f   : > { %3988 = vmatprep.subr.bf16.mxu0 %v6656_v52  ;;  %v6699_v52 = vld [vmem:[%s8541_s3 + $0x670] ss:$8 sps:$4 sm:$0xff]  }
 0x752   : > { %3989 = vmatpush1.bf16.msra.mxu0 %v6654_v53  ;;  %v6704_v53 = vld [vmem:[%s8541_s3 + $0x684] ss:$8 sps:$4 sm:$0xff]  }
 0x753   : > { %3990 = vmatprep.subr.bf16.mxu0 %v6659_v54 }
 0x756   : > { %3991 = vmatpush1.bf16.msra.mxu0 %v6657_v55 }
 0x757   : > { %3992 = vmatprep.subr.bf16.mxu0 %v6662_v57 }
 0x75a   : > { %3993 = vmatpush1.bf16.msra.mxu0 %v6660_v58  ;;  %v6702_v58 = vld [vmem:[%s8541_s3 + $0x680] ss:$8 sps:$4 sm:$0xff]  }
 0x75b   : > { %3994 = vmatprep.subr.bf16.mxu0 %v6665_v59 }
 0x75e   : > { %3995 = vmatpush1.bf16.msra.mxu0 %v6663_v60 }
 0x75f   : > { %3996 = vmatprep.subr.bf16.mxu0 %v6668_v62  ;;  %v6707_v62 = vld [vmem:[%s8541_s3 + $0x694] ss:$8 sps:$4 sm:$0xff]  }
 0x762   : > { %3997 = vmatpush1.bf16.msra.mxu0 %v6666_v63 }
 0x763   : > { %3998 = vmatprep.subr.bf16.mxu0 %v6671_v0  ;;  %v6705_v0 = vld [vmem:[%s8541_s3 + $0x690] ss:$8 sps:$4 sm:$0xff]  }
 0x766   : > { %3999 = vmatpush1.bf16.msra.mxu0 %v6669_v2  ;;  %v6710_v2 = vld [vmem:[%s8541_s3 + $0x6a4] ss:$8 sps:$4 sm:$0xff]  }
 0x767   : > { %4000 = vmatprep.subr.bf16.mxu0 %v6674_v3  ;;  %v6708_v3 = vld [vmem:[%s8541_s3 + $0x6a0] ss:$8 sps:$4 sm:$0xff]  }
 0x768   : > { %v8220_v6 = vpop.f32.mrb[72].mxu1 }
 0x769   : > { %v8222_v7 = vpop.f32.mrb[73].mxu1 }
 0x76a   : > { %4001 = vmatpush1.bf16.msra.mxu0 %v6672_v4  ;;  %v8224_v8 = vpop.f32.mrb[74].mxu1  ;;  %v6713_v4 = vld [vmem:[%s8541_s3 + $0x6b4] ss:$8 sps:$4 sm:$0xff]  }
 0x76b   : > { %v4966_v10 = vpack.c.bf16 %v8224_v8, %v8220_v6  ;;  %v8231_v11 = vpop.f32.mrb[75].mxu1  ;;  %4002 = vmatprep.subr.bf16.mxu0 %v6677_v5  ;;  %v6711_v5 = vld [vmem:[%s8541_s3 + $0x6b0] ss:$8 sps:$4 sm:$0xff]  }
 0x76c   : > { %v4967_v15 = vpack.c.bf16 %v8231_v11, %v8222_v7 }
 0x76e   : > { %4003 = vmatpush1.bf16.msra.mxu0 %v6675_v9  ;;  %v6716_v9 = vld [vmem:[%s8541_s3 + $0x6c4] ss:$8 sps:$4 sm:$0xff]  }
 0x76f   : > { %4442 = vmatprep.subr.bf16.mxu0 %v6680_v13  ;;  %v6714_v13 = vld [vmem:[%s8541_s3 + $0x6c0] ss:$8 sps:$4 sm:$0xff]  }
 0x771   : > { %4005 = vmatmul.mubr.bf16.vlgmr.msra.gmra.mrb[76].mxu0 %v7606_v56 }
 0x772   : > { %4443 = vmatpush1.bf16.msra.mxu0 %v6678_v16  ;;  %4474 = vmatprep.mubr.bf16.mxu0 %v7520_v27  ;;  %v6719_v16 = vld [vmem:[%s8541_s3 + $0x6d4] ss:$8 sps:$4 sm:$0xff]  }
 0x773   : > { %4444 = vmatprep.subr.bf16.mxu0 %v6683_v18  ;;  %v6717_v18 = vld [vmem:[%s8541_s3 + $0x6d0] ss:$8 sps:$4 sm:$0xff]  }
 0x776   : > { %4445 = vmatpush1.bf16.msra.mxu0 %v6681_v22  ;;  %v6722_v22 = vld [vmem:[%s8541_s3 + $0x6e4] ss:$8 sps:$4 sm:$0xff]  }
 0x777   : > { %4446 = vmatprep.subr.bf16.mxu0 %v6686_v25  ;;  %v6720_v25 = vld [vmem:[%s8541_s3 + $0x6e0] ss:$8 sps:$4 sm:$0xff]  }
 0x77a   : > { %4447 = vmatpush1.bf16.msra.mxu0 %v6684_v29  ;;  %v6725_v29 = vld [vmem:[%s8541_s3 + $0x6f4] ss:$8 sps:$4 sm:$0xff]  }
 0x77b   : > { %4448 = vmatprep.subr.bf16.mxu0 %v6689_v61 }
 0x77e   : > { %4449 = vmatpush1.bf16.msra.mxu0 %v6687_v31 }
 0x77f   : > { %4450 = vmatprep.subr.bf16.mxu0 %v6692_v32  ;;  %v6723_v32 = vld [vmem:[%s8541_s3 + $0x6f0] ss:$8 sps:$4 sm:$0xff]  }
 0x782   : > { %4451 = vmatpush1.bf16.msra.mxu0 %v6690_v34 }
 0x783   : > { %4452 = vmatprep.subr.bf16.mxu0 %v6695_v35  ;;  %v6728_v35 = vld [vmem:[%s8541_s3 + $0x804] ss:$8 sps:$4 sm:$0xff]  }
 0x784   : > { %v8276_v38 = vpop.f32.mrb[60].mxu0 }
 0x785   : > { %v8278_v39 = vpop.f32.mrb[61].mxu0 }
 0x786   : > { %4453 = vmatpush1.bf16.msra.mxu0 %v6693_v36  ;;  %v8280_v43 = vpop.f32.mrb[62].mxu0 }
 0x787   : > { %v5090_v48 = vpack.c.bf16 %v8280_v43, %v8276_v38  ;;  %v8287_v49 = vpop.f32.mrb[63].mxu0  ;;  %4454 = vmatprep.subr.bf16.mxu0 %v6698_v37 }
 0x788   : > { %v5091_v51 = vpack.c.bf16 %v8287_v49, %v8278_v39 }
 0x78a   : > { %4455 = vmatpush1.bf16.msra.mxu0 %v6696_v46 }
 0x78b   : > { %4456 = vmatprep.subr.bf16.mxu0 %v6701_v50  ;;  %v6726_v50 = vld [vmem:[%s8541_s3 + $0x800] ss:$8 sps:$4 sm:$0xff]  }
 0x78c   : > { %v8300_v54 = vpop.f32.mrb[64].mxu0 }
 0x78d   : > { %v8302_v55 = vpop.f32.mrb[65].mxu0 }
 0x78e   : > { %4457 = vmatpush1.bf16.msra.mxu0 %v6699_v52  ;;  %v8304_v57 = vpop.f32.mrb[66].mxu0  ;;  %v6731_v52 = vld [vmem:[%s8541_s3 + $0x814] ss:$8 sps:$4 sm:$0xff]  }
 0x78f   : > { %v5092_v59 = vpack.c.bf16 %v8304_v57, %v8300_v54  ;;  %v8311_v60 = vpop.f32.mrb[67].mxu0  ;;  %4458 = vmatprep.subr.bf16.mxu0 %v6704_v53  ;;  %v6729_v53 = vld [vmem:[%s8541_s3 + $0x810] ss:$8 sps:$4 sm:$0xff]  }
 0x790   : > { %v5093_v63 = vpack.c.bf16 %v8311_v60, %v8302_v55  ;;  %v5085_v60 = vpop.permute.xlu0 %5084 }
 0x792   : > { %4459 = vmatpush1.bf16.msra.mxu0 %v6702_v58  ;;  %v6734_v58 = vld [vmem:[%s8541_s3 + $0x824] ss:$8 sps:$4 sm:$0xff]  }
 0x793   : > { %4460 = vmatprep.subr.bf16.mxu0 %v6707_v62  ;;  %v6732_v62 = vld [vmem:[%s8541_s3 + $0x820] ss:$8 sps:$4 sm:$0xff]  }
 0x796   : > { %4461 = vmatpush1.bf16.msra.mxu0 %v6705_v0  ;;  %v6737_v0 = vld [vmem:[%s8541_s3 + $0x834] ss:$8 sps:$4 sm:$0xff]  }
 0x797   : > { %4462 = vmatprep.subr.bf16.mxu0 %v6710_v2  ;;  %v6740_v2 = vld [vmem:[%s8541_s3 + $0x844] ss:$8 sps:$4 sm:$0xff]  }
 0x79a   : > { %4463 = vmatpush1.bf16.msra.mxu0 %v6708_v3  ;;  %v6738_v3 = vld [vmem:[%s8541_s3 + $0x840] ss:$8 sps:$4 sm:$0xff]  }
 0x79b   : > { %4464 = vmatprep.subr.bf16.mxu0 %v6713_v4  ;;  %v6743_v4 = vld [vmem:[%s8541_s3 + $0x854] ss:$8 sps:$4 sm:$0xff]  }
 0x79e   : > { %4465 = vmatpush1.bf16.msra.mxu0 %v6711_v5  ;;  %v6741_v5 = vld [vmem:[%s8541_s3 + $0x850] ss:$8 sps:$4 sm:$0xff]  }
 0x79f   : > { %4466 = vmatprep.subr.bf16.mxu0 %v6716_v9  ;;  %v6746_v9 = vld [vmem:[%s8541_s3 + $0x864] ss:$8 sps:$4 sm:$0xff]  }
 0x7a2   : > { %4467 = vmatpush1.bf16.msra.mxu0 %v6714_v13 }
 0x7a3   : > { %4468 = vmatprep.subr.bf16.mxu0 %v6719_v16 }
 0x7a6   : > { %4469 = vmatpush1.bf16.msra.mxu0 %v6717_v18 }
 0x7a7   : > { %4470 = vmatprep.subr.bf16.mxu0 %v6722_v22  ;;  %v6744_v22 = vld [vmem:[%s8541_s3 + $0x860] ss:$8 sps:$4 sm:$0xff]  }
 0x7a9   : > { %v8354_v61 = vpop.f32.mrb[76].mxu1 }
 0x7aa   : > { %4471 = vmatpush1.bf16.msra.mxu0 %v6720_v25  ;;  %v8356_v31 = vpop.f32.mrb[77].mxu1 }
 0x7ab   : > { %v8361_v34 = vpop.f32.mrb[78].mxu1  ;;  %4472 = vmatprep.subr.bf16.mxu0 %v6725_v29 }
 0x7ac   : > { %v4970_v36 = vpack.c.bf16 %v8361_v34, %v8354_v61  ;;  %v8368_v37 = vpop.f32.mrb[79].mxu1  ;;  %v5032_v61 = vld [vmem:[%s8544_s6 + $0x50] sm:$0xf] }
 0x7ad   : > { %v4971_v46 = vpack.c.bf16 %v8368_v37, %v8356_v31 }
 0x7ae   : > { %4473 = vmatpush1.bf16.msra.mxu0 %v6723_v32  ;;  %v6749_v32 = vld [vmem:[%s8541_s3 + $0x874] ss:$8 sps:$4 sm:$0xff]  }
 0x7af   : > { %4912 = vmatprep.subr.bf16.mxu0 %v6728_v35 }
 0x7b1   : > { %4475 = vmatmul.mubr.bf16.vlgmr.msra.gmra.mrb[80].mxu0 %v7606_v56 }
 0x7b2   : > { %4913 = vmatpush1.bf16.msra.mxu0 %v6726_v50  ;;  %4944 = vmatprep.mubr.bf16.mxu0 %v7520_v27  ;;  %v6735_v27 = vld [vmem:[%s8541_s3 + $0x830] ss:$8 sps:$4 sm:$0xff]  }
 0x7b3   : > { %4914 = vmatprep.subr.bf16.mxu0 %v6731_v52  ;;  %v6747_v50 = vld [vmem:[%s8541_s3 + $0x870] ss:$8 sps:$4 sm:$0xff]   ;;  %v6752_v52 = vld [vmem:[%s8541_s3 + $0x884] ss:$8 sps:$4 sm:$0xff]  }
 0x7b6   : > { %4915 = vmatpush1.bf16.msra.mxu0 %v6729_v53  ;;  %v6750_v53 = vld [vmem:[%s8541_s3 + $0x880] ss:$8 sps:$4 sm:$0xff]  }
 0x7b7   : > { %4916 = vmatprep.subr.bf16.mxu0 %v6734_v58  ;;  %v6755_v58 = vld [vmem:[%s8541_s3 + $0x894] ss:$8 sps:$4 sm:$0xff]  }
 0x7ba   : > { %4917 = vmatpush1.bf16.msra.mxu0 %v6732_v62  ;;  %v6762_v62 = vld [vmem:[%s8541_s3 + $0x8c0] ss:$8 sps:$4 sm:$0xff]  }
 0x7bb   : > { %4918 = vmatprep.subr.bf16.mxu0 %v6737_v0  ;;  %v6767_v0 = vld [vmem:[%s8541_s3 + $0x8d4] ss:$8 sps:$4 sm:$0xff]  }
 0x7be   : > { %4919 = vmatpush1.bf16.msra.mxu0 %v6735_v27  ;;  %v6765_v27 = vld [vmem:[%s8541_s3 + $0x8d0] ss:$8 sps:$4 sm:$0xff]  }
 0x7bf   : > { %4920 = vmatprep.subr.bf16.mxu0 %v6740_v2  ;;  %v6770_v2 = vld [vmem:[%s8541_s3 + $0x8e4] ss:$8 sps:$4 sm:$0xff]  }
 0x7c2   : > { %4921 = vmatpush1.bf16.msra.mxu0 %v6738_v3  ;;  %v6768_v3 = vld [vmem:[%s8541_s3 + $0x8e0] ss:$8 sps:$4 sm:$0xff]  }
 0x7c3   : > { %4922 = vmatprep.subr.bf16.mxu0 %v6743_v4  ;;  %v6773_v4 = vld [vmem:[%s8541_s3 + $0x8f4] ss:$8 sps:$4 sm:$0xff]  }
 0x7c4   : > { %v3066_v13 = vpop.f32.mrb[68].mxu0 }
 0x7c5   : > { %v3068_v16 = vpop.f32.mrb[69].mxu0 }
 0x7c6   : > { %v3070_v18 = vpop.f32.mrb[70].mxu0  ;;  %4923 = vmatpush1.bf16.msra.mxu0 %v6741_v5  ;;  %v6771_v5 = vld [vmem:[%s8541_s3 + $0x8f0] ss:$8 sps:$4 sm:$0xff]  }
 0x7c7   : > { %v4956_v25 = vpack.c.bf16 %v3070_v18, %v3066_v13  ;;  %v3072_v29 = vpop.f32.mrb[71].mxu0  ;;  %4924 = vmatprep.subr.bf16.mxu0 %v6746_v9 }
 0x7c8   : > { %v4957_v35 = vpack.c.bf16 %v3072_v29, %v3068_v16 }
 0x7ca   : > { %4925 = vmatpush1.bf16.msra.mxu0 %v6744_v22  ;;  %4989 = vmatprep.subr.bf16.mxu1 %v4957_v35 }
 0x7cb   : > { %4990 = vmatpush1.bf16.msra.mxu1 %v4956_v25  ;;  %4926 = vmatprep.subr.bf16.mxu0 %v6749_v32 }
 0x7cc   : > { %4991 = vmatprep.subr.bf16.mxu1 %v4959_v47  ;;  %v6764_v47 = vld [vmem:[%s8541_s3 + $0x8c4] ss:$8 sps:$4 sm:$0xff]  }
 0x7ce   : > { %4927 = vmatpush1.bf16.msra.mxu0 %v6747_v50 }
 0x7cf   : > { %4992 = vmatpush1.bf16.msra.mxu1 %v4958_v44  ;;  %4928 = vmatprep.subr.bf16.mxu0 %v6752_v52  ;;  %v6759_v44 = vld [vmem:[%s8541_s3 + $0x8b0] ss:$8 sps:$4 sm:$0xff]  }
 0x7d2   : > { %4929 = vmatpush1.bf16.msra.mxu0 %v6750_v53  ;;  %v4955_v53 = vld [vmem:[%s8544_s6 + $0x40] sm:$0xff] }
 0x7d3   : > { %4930 = vmatprep.subr.bf16.mxu0 %v6755_v58  ;;  %v5770_v58 = vcombine.high %v4955_v53, %v4955_v53 }
 0x7d5   : > { %5771 = vmatprep.mubr.msk.bf16.mxu1 %vm2121_vm5, %v5770_v58 }
 0x7d6   : > { %4931 = vmatpush1.bf16.msra.mxu0 %v6753_v41  ;;  %v5769_v41 = vcombine.low %v4955_v53, %v4955_v53 }
 0x7d7   : > { %4932 = vmatprep.subr.bf16.mxu0 %v6758_v45 }
 0x7da   : > { %4933 = vmatpush1.bf16.msra.mxu0 %v6756_v40 }
 0x7db   : > { %4934 = vmatprep.subr.bf16.mxu0 %v6761_v42 }
 0x7de   : > { %4935 = vmatpush1.bf16.msra.mxu0 %v6759_v44 }
 0x7df   : > { %4936 = vmatprep.subr.bf16.mxu0 %v6764_v47 }
 0x7e2   : > { %4937 = vmatpush1.bf16.msra.mxu0 %v6762_v62 }
 0x7e3   : > { %4938 = vmatprep.subr.bf16.mxu0 %v6767_v0 }
 0x7e6   : > { %4939 = vmatpush1.bf16.msra.mxu0 %v6765_v27  ;;  %v5150_v27 = vld [vmem:[%s333_s24] sm:$0x1] }
 0x7e7   : > { %4940 = vmatprep.subr.bf16.mxu0 %v6770_v2 }
 0x7ea   : > { %4941 = vmatpush1.bf16.msra.mxu0 %v6768_v3 }
 0x7eb   : > { %4942 = vmatprep.subr.bf16.mxu0 %v6773_v4  ;;  %v5151_v4 = vpack.c.bf16 %v5150_v27, %v5150_v27 }
 0x7ee   : > { %4943 = vmatpush1.bf16.msra.mxu0 %v6771_v5  ;;  %v6787_v5 = vmov 1966171168  }
 0x7f1   : > { %4945 = vmatmul.mubr.bf16.vlgmr.msra.gmra.mrb[84].mxu0 %v7606_v56 }
 0x804   : > { %v3536_v9 = vpop.f32.mrb[72].mxu0 }
 0x805   : > { %v3538_v13 = vpop.f32.mrb[73].mxu0 }
 0x806   : > { %v3540_v16 = vpop.f32.mrb[74].mxu0 }
 0x807   : > { %v4960_v18 = vpack.c.bf16 %v3540_v16, %v3536_v9  ;;  %v3542_v22 = vpop.f32.mrb[75].mxu0  ;;  %v5209_v9 = vunpack.c.l.s4 %v6787_v5 }
 0x808   : > { %v4961_v25 = vpack.c.bf16 %v3542_v22, %v3538_v13  ;;  %v5211_v13 = vlaneseq }
 0x809   : > { %v5210_v16 = vunpack.c.0.s8 %v5209_v9 }
 0x80a   : > { %4993 = vmatprep.subr.bf16.mxu1 %v4961_v25  ;;  %vm5225_vm7 = vcmp.lt.s32.totalorder %v5211_v13, 256 }
 0x80b   : > { %4994 = vmatpush1.bf16.msra.mxu1 %v4960_v18  ;;  %v5212_v18 = vshrl.u32 %v5211_v13, 7 }
 0x80c   : > { %4995 = vmatprep.subr.bf16.mxu1 %v4963_v30 }
 0x80d   : > { %v5213_v25 = vsub.s32 %v5210_v16, %v5212_v18 }
 0x80f   : > { %4996 = vmatpush1.bf16.msra.mxu1 %v4962_v26 }
 0x844   : > { %v4006_v29 = vpop.f32.mrb[76].mxu0 }
 0x845   : > { %v4008_v32 = vpop.f32.mrb[77].mxu0 }
 0x846   : > { %v4010_v35 = vpop.f32.mrb[78].mxu0 }
 0x847   : > { %v4964_v56 = vpack.c.bf16 %v4010_v35, %v4006_v29  ;;  %v4012_v50 = vpop.f32.mrb[79].mxu0 }
 0x848   : > { %v4965_v52 = vpack.c.bf16 %v4012_v50, %v4008_v32 }
 0x84a   : > { %4997 = vmatprep.subr.bf16.mxu1 %v4965_v52 }
 0x84b   : > { %4998 = vmatpush1.bf16.msra.mxu1 %v4964_v56 }
 0x84c   : > { %4999 = vmatprep.subr.bf16.mxu1 %v4967_v15 }
 0x84f   : > { %5000 = vmatpush1.bf16.msra.mxu1 %v4966_v10 }
 0x884   : > { %v4476_v23 = vpop.f32.mrb[80].mxu0 }
 0x885   : > { %v4478_v24 = vpop.f32.mrb[81].mxu0 }
 0x886   : > { %v4480_v33 = vpop.f32.mrb[82].mxu0 }
 0x887   : > { %v4968_v26 = vpack.c.bf16 %v4480_v33, %v4476_v23  ;;  %v4482_v28 = vpop.f32.mrb[83].mxu0 }
 0x888   : > { %v4969_v30 = vpack.c.bf16 %v4482_v28, %v4478_v24 }
 0x88a   : > { %5001 = vmatprep.subr.bf16.mxu1 %v4969_v30 }
 0x88b   : > { %5002 = vmatpush1.bf16.msra.mxu1 %v4968_v26 }
 0x88c   : > { %5003 = vmatprep.subr.bf16.mxu1 %v4971_v46 }
 0x88f   : > { %5004 = vmatpush1.bf16.msra.mxu1 %v4970_v36 }
 0x8c4   : > { %v4946_v7 = vpop.f32.mrb[84].mxu0 }
 0x8c5   : > { %v4948_v11 = vpop.f32.mrb[85].mxu0 }
 0x8c6   : > { %v4950_v6 = vpop.f32.mrb[86].mxu0 }
 0x8c7   : > { %v4972_v8 = vpack.c.bf16 %v4950_v6, %v4946_v7  ;;  %v4952_v10 = vpop.f32.mrb[87].mxu0 }
 0x8c8   : > { %v4973_v15 = vpack.c.bf16 %v4952_v10, %v4948_v11 }
 0x8ca   : > { %5005 = vmatprep.subr.bf16.mxu1 %v4973_v15 }
 0x8cb   : > { %5006 = vmatpush1.bf16.msra.mxu1 %v4972_v8 }
 0x8cc   : > { %5038 = vmatprep.subr.bf16.mxu1 %v5034_v21 }
 0x8ce   : > { %5022 = vmatmul.mubr.bf16.vlgmr.msra.gmra.mrb[80].mxu1 %v5769_v41 }
 0x8cf   : > { %5039 = vmatpush1.bf16.msra.mxu1 %v5033_v19  ;;  %5070 = vmatprep.mubr.bf16.mxu1 %v6784_v1  ;;  %v4978_v19 = vpop.permute.xlu1 %4977 }
 0x8d0   : > { %5097 = vmatprep.subr.bf16.mxu1 %v5091_v51 }
 0x8d3   : > { %v5144_v37 = vpop.permute.xlu1 %5143 }
 0x8d6   : > { %5772 = vmatmul.mubr.msk.bf16.vlgmr.msra.gmra.mrb[84].mxu1 %vm2121_vm5, %v5032_v61 }
 0x8d7   : > { %5098 = vmatpush1.bf16.msra.mxu1 %v5090_v48  ;;  %5129 = vmatprep.mubr.bf16.mxu1 %v6784_v1 }
 0x8d8   : > { %5099 = vmatprep.subr.bf16.mxu1 %v5093_v63 }
 0x8db   : > { %5100 = vmatpush1.bf16.msra.mxu1 %v5092_v59 }
 0x8de   : > { %5773 = vmatmul.mubr.msk.bf16.vlgmr.msra.gmra.mrb[88].mxu1 %vm358_vm0, %v5089_v12 }
 0x8df   : > { %5196 = vmatprep.mubr.bf16.mxu1 %v6784_v1 }
 0x9a1   : > { %v5023_v14 = vpop.f32.mrb[80].mxu1 }
 0x9a2   : > { %v5025_v17 = vpop.f32.mrb[81].mxu1  ;;  %v5024_v21 = vadd.f32 %v5023_v14, %v4978_v19 }
 0x9a3   : > { %v5027_v20 = vpop.f32.mrb[82].mxu1  ;;  %v5026_v39 = vadd.f32 %v5025_v17, %v4978_v19 }
 0x9a4   : > { %v5028_v38 = vpop.f32.mrb[83].mxu1  ;;  %v5030_v43 = vmax.f32 %v5024_v21, 0.0 }
 0x9a5   : > { %v5031_v48 = vmax.f32 %v5026_v39, 0.0 }
 0x9a9   : > { %v5072_v49 = vpop.f32.mrb[84].mxu1 }
 0x9aa   : > { %v5079_v51 = vadd.f32 %v5072_v49, %v5030_v43  ;;  %v5074_v54 = vpop.f32.mrb[85].mxu1 }
 0x9ab   : > { %v5080_v55 = vadd.f32 %v5074_v54, %v5031_v48  ;;  %v5076_v57 = vpop.f32.mrb[86].mxu1 }
 0x9ac   : > { %v5077_v59 = vpop.f32.mrb[87].mxu1  ;;  %v5087_v63 = vadd.f32 %v5085_v60, %v5079_v51 }
 0x9ad   : > { %v5088_v1 = vadd.f32 %v5085_v60, %v5080_v55 }
 0x9b1   : > { %v5131_v31 = vpop.f32.mrb[88].mxu1 }
 0x9b2   : > { %v5138_v34 = vadd.f32 %v5131_v31, %v5087_v63  ;;  %v5133_v36 = vpop.f32.mrb[89].mxu1 }
 0x9b3   : > { %v5139_v46 = vadd.f32 %v5133_v36, %v5088_v1  ;;  %v5135_v45 = vpop.f32.mrb[90].mxu1 }
 0x9b4   : > { %v5146_v40 = vadd.f32 %v5144_v37, %v5138_v34  ;;  %v5136_v42 = vpop.f32.mrb[91].mxu1 }
 0x9b5   : > { %v5147_v44 = vadd.f32 %v5144_v37, %v5139_v46 }
 0x9b6   : > { %v5148_v47 = vmax.f32 %v5146_v40, 0.0 }
 0x9b7   : > { %v5149_v62 = vmax.f32 %v5147_v44, 0.0 }
 0x9b8   : > { %v5152_v0 = vpack.c.bf16 %v5148_v47, %v5148_v47 }
 0x9b9   : > { %v5153_v2 = vpack.c.bf16 %v5149_v62, %v5149_v62 }
 0x9ba   : > { %v5159_v3 = vsel %vm1763_vm3, %v5152_v0, 0 }
 0x9bb   : > { %5774 = vmatprep.subr.msk.bf16.mxu1 %vm1763_vm3, %v5153_v2 }
 0x9bc   : > { %5165 = vmatpush1.bf16.msra.mxu1 %v5159_v3 }
 0x9bf   : > { %5775 = vmatmul.mubr.msk.bf16.vlgmr.msra.gmra.mrb[92].mxu1 %vm5154_vm6, %v5151_v4 }
 0xa92   : > { %v5198_v22 = vpop.f32.mrb[92].mxu1 }
 0xa93   : > { %v5200_v29 = vpop.f32.mrb[93].mxu1 }
 0xa94   : > { %v5207_v32 = vcombine.low %v5198_v22, %v5200_v29  ;;  %v5202_v35 = vpop.f32.mrb[94].mxu1 }
 0xa95   : > { %v5203_v56 = vpop.f32.mrb[95].mxu1 }
 0xa96   : > { %v5214_v50 = vrot.slane %v5207_v32, %v5213_v25 }
 0xa98   : > { %v5221_v52 = vrot.slane %v5214_v50, %v5213_v25 }
 0xa9a   : > { %5227 = vst.msk [vmem:[%s337_s29] sm:$0x3] %vm5225_vm7, %v5221_v52 }
 0xa9b PF: > { %s18_s27 = sadd.s32 1, %s6782_s27  }
 0xa9c   : > { %p15_p4 = scmp.ge.s32.totalorder %s18_s27, 4  }
 0xa9e   :  { %17 = sbr.rel (!%p15_p4) target bundleno = 1 (0x1), region = 88 }

</bundles_post_ra>
